<compile_context>
chip_gen: v7x
topology: tpu7x:2x2x1
jax: 0.10.0
libtpu: 0.0.40
codegen_flags: <defaults>
</compile_context>

<pallas_src>
import math

import jax
import jax.numpy as jnp
from jax.experimental import pallas as pl
from jax.experimental.pallas import tpu as pltpu


OUT_PAD = 128   # lane-dense width of the fc-head output slab
DT_PAD = 16     # dt_rank padded so dt|B|C sit at lane offsets 0/16/32


# ----------------------------------------------------------------------------- helpers
def _silu(v):
    return v * (1.0 / (1.0 + jnp.exp(-v)))


def _softplus(v):
    return jnp.maximum(v, 0.0) + jnp.log1p(jnp.exp(-jnp.abs(v)))


def _const_spec(shape):
    nd = len(shape)
    return pl.BlockSpec(tuple(shape), lambda b, _n=nd: (0,) * _n)


# ----------------------------------------------------------------------------- fused kernel
def fused_forward_kernel(
        x_ref,                                   # (Bt, L, F) f32
        emb_w_ref, pe_b_ref,                     # (F, D) f32, (L, D) f32 (pe + emb bias)
        cnn_w_ref, cnn_b_ref,                    # merged im2col conv (7*D, CPAD) bf16, (1, CPAD) f32
        fcnn_w_ref, fcnn_b_ref,                  # 1x1 fuse conv (CPAD, D) bf16, (1, D) f32
        ln_g_ref, ln_b_ref,                      # (NB, 1, D) LayerNorm
        w_in_ref,                                # (NB, D, 2*d_inner) bf16, in_proj (x | z)
        w_conv_ref, b_conv_ref,                  # (NB, d_conv, d_inner) f32 depthwise conv
        w_x_ref,                                 # (NB, d_inner, DT_PAD+2*d_state) bf16 (dt|B|C)
        w_dt_ref, b_dt_ref,                      # (NB, DT_PAD, d_inner) bf16, (NB, 1, d_inner) f32
        a_t_ref, dpar_ref,                       # (NB, d_state, d_inner) f32, (NB, 1, d_inner) f32
        w_out_ref,                               # (NB, d_inner, D) bf16
        fuse_w_ref, fuse_b_ref,                  # (2D, D) bf16, (1, D) f32
        fc_w_ref, fc_b_ref,                      # (D, OUT_PAD) bf16, (1, OUT_PAD) f32
        out_ref,                                 # (Bt, 1, OUT_PAD) f32
        xpad_s,                                  # (Bt, L+2*max_pad, D) bf16  CNN zero-halo scratch
        xmpad_s,                                 # (Bt, L+d_conv-1, d_inner) f32 causal-conv scratch
        h_all_s):                                # (L, Bt, d_state, d_inner) f32 scan states
    f32, bf16 = jnp.float32, jnp.bfloat16

    Bt, L, F = x_ref.shape
    D = emb_w_ref.shape[1]
    NB = ln_g_ref.shape[0]
    d_conv = w_conv_ref.shape[1]
    d_inner = w_conv_ref.shape[2]
    d_state = a_t_ref.shape[1]
    dt_pad = w_dt_ref.shape[1]
    max_pad = (xpad_s.shape[1] - L) // 2
    n_shift = 2 * max_pad + 1
    BL = Bt * L

    def mm(a_bf16, w_bf16):
        # bf16 MXU matmul with f32 accumulation (operands pre-cast once per reuse)
        return jnp.dot(a_bf16, w_bf16, preferred_element_type=f32)

    # --- 1) embedding (VPU: K = in_features is tiny) + (pos-enc + bias) table ---
    x = x_ref[...]                                           # (Bt, L, F) f32
    emb_w = emb_w_ref[...]                                   # (F, D) f32
    x_embed = pe_b_ref[...][None] + x[:, :, 0:1] * emb_w[0:1]
    for f in range(1, F):
        x_embed = x_embed + x[:, :, f:f + 1] * emb_w[f:f + 1]
    # x_embed: (Bt, L, D) f32

    # --- 2) multi-scale CNN branch: zero-halo scratch + ONE im2col matmul -------
    xe_bf = x_embed.astype(bf16)
    xpad_s[:, 0:max_pad, :] = jnp.zeros((Bt, max_pad, D), bf16)
    xpad_s[:, max_pad + L:, :] = jnp.zeros((Bt, max_pad, D), bf16)
    xpad_s[:, max_pad:max_pad + L, :] = xe_bf
    cols = [xpad_s[:, j:j + L, :] for j in range(n_shift)]   # static halo slices
    x7 = jnp.concatenate(cols, axis=-1).reshape(BL, n_shift * D)   # (BL, 7*D) bf16
    y_cat = jnp.maximum(mm(x7, cnn_w_ref[...]) + cnn_b_ref[...], 0.0)        # (BL, CPAD)
    cnn_feat = jnp.maximum(mm(y_cat.astype(bf16), fcnn_w_ref[...]) + fcnn_b_ref[...], 0.0)  # (BL, D)

    # --- 3) Mamba global branch --------------------------------------------------
    feats = x_embed.reshape(BL, D)                           # f32
    for blk in range(NB):
        # LayerNorm(d_model)
        mu = jnp.mean(feats, axis=1, keepdims=True)
        var = jnp.mean(jnp.square(feats - mu), axis=1, keepdims=True)
        xn = (feats - mu) * jax.lax.rsqrt(var + 1e-5)
        xn = xn * ln_g_ref[blk] + ln_b_ref[blk]

        # in_proj (bias-free): x branch and gate z in one 2*d_inner wide matmul
        xz = mm(xn.astype(bf16), w_in_ref[blk])              # (BL, 2*d_inner) f32
        xm = xz[:, :d_inner]
        z = xz[:, d_inner:]

        # causal depthwise conv (kernel d_conv, left pad d_conv-1) via halo scratch
        xmpad_s[:, 0:d_conv - 1, :] = jnp.zeros((Bt, d_conv - 1, d_inner), f32)
        xmpad_s[:, d_conv - 1:, :] = xm.reshape(Bt, L, d_inner)
        wconv = w_conv_ref[blk]                              # (d_conv, d_inner)
        conv = xmpad_s[:, 0:L, :] * wconv[0:1, :]
        for k in range(1, d_conv):
            conv = conv + xmpad_s[:, k:k + L, :] * wconv[k:k + 1, :]
        u = _silu(conv + b_conv_ref[blk])                    # (Bt, L, d_inner) f32

        # x_proj (dt | B | C) in one matmul (dt padded to lane 16), then dt_proj
        u_flat = u.reshape(BL, d_inner)
        xw = mm(u_flat.astype(bf16), w_x_ref[blk])           # (BL, dt_pad + 2*d_state)
        dt_lo = xw[:, :dt_pad]
        Bm = xw[:, dt_pad:dt_pad + d_state].reshape(Bt, L, d_state)
        Cm = xw[:, dt_pad + d_state:].reshape(Bt, L, d_state)
        delta = _softplus(mm(dt_lo.astype(bf16), w_dt_ref[blk]) + b_dt_ref[blk])
        delta = delta.reshape(Bt, L, d_inner)                # f32

        # selective scan: exp / outer products hoisted OUT of the recurrence
        A_T = a_t_ref[blk]                                   # (d_state, d_inner) f32
        du = delta * u                                       # (Bt, L, d_inner)
        dA_all = jnp.exp(delta[:, :, None, :] * A_T[None, None, :, :])   # (Bt,L,S,di)
        dBu_all = Bm[:, :, :, None] * du[:, :, None, :]                  # (Bt,L,S,di)

        h = jnp.zeros((Bt, d_state, d_inner), f32)
        # TODO(synk): switch to lax.fori_loop(..., unroll=4) if L grows beyond ~64.
        for l in range(L):
            h = dA_all[:, l] * h + dBu_all[:, l]             # two vreg FMAs / step
            h_all_s[l] = h                                   # store off the critical path

        # deferred C-readout: batched multiply + sublane reduction (no per-step MXU)
        h_all = h_all_s[...]                                 # (L, Bt, d_state, d_inner)
        y = u * dpar_ref[blk]                                # + u * D
        y_rd = []
        for b in range(Bt):
            y_rd.append(jnp.sum(Cm[b][:, :, None] * h_all[:, b], axis=1))   # (L, d_inner)
        y = y + jnp.stack(y_rd, axis=0)                      # (Bt, L, d_inner)

        # gate + out_proj (Dropout -> identity at inference)
        y_flat = y.reshape(BL, d_inner) * _silu(z)
        feats = mm(y_flat.astype(bf16), w_out_ref[blk])      # (BL, D)

    # --- 4) fuse(concat) + ReLU + mean pool + fc head ---------------------------
    fused = jnp.concatenate([cnn_feat, feats], axis=1).astype(bf16)   # (BL, 2D)
    fv = jnp.maximum(mm(fused, fuse_w_ref[...]) + fuse_b_ref[...], 0.0)
    pooled = jnp.mean(fv.reshape(Bt, L, D), axis=1)          # AdaptiveAvgPool1d(1) -> (Bt, D)
    out = mm(pooled.astype(bf16), fc_w_ref[...]) + fc_b_ref[...]      # (Bt, OUT_PAD)
    out_ref[...] = out[:, None, :]                           # lane-dense store


# ----------------------------------------------------------------------------- params
def init_params(key, input_size, output_size, in_features=2, d_model=64,
                num_cnn_channels=32, num_mamba_blocks=3,
                d_state=16, d_conv=4, expand=2):
    f32, bf16 = jnp.float32, jnp.bfloat16
    d_inner = expand * d_model
    dt_rank = int(math.ceil(d_model / 16))
    dt_pad = max(DT_PAD, ((dt_rank + 15) // 16) * 16)
    keys = iter(jax.random.split(key, 256))

    def nrm(shape, scale):
        return (scale * jax.random.normal(next(keys), shape)).astype(f32)

    p = {}
    # embedding: Linear(in_features -> d_model); bias folded into the pe table
    emb_w = nrm((in_features, d_model), 1.0 / math.sqrt(in_features))
    emb_b = nrm((1, d_model), 0.01)
    p['emb_w'] = emb_w

    # sin/cos positional encoding (max_len = input_size) + embedding bias
    # TODO(synk): odd d_model positional-encoding branch not implemented (d_model must be even).
    pos = jnp.arange(input_size, dtype=f32)[:, None]
    div = jnp.exp(jnp.arange(0, d_model, 2, dtype=f32) * (-math.log(10000.0) / d_model))
    pe = jnp.zeros((input_size, d_model), f32)
    pe = pe.at[:, 0::2].set(jnp.sin(pos * div))
    pe = pe.at[:, 1::2].set(jnp.cos(pos * div))
    p['pe_b'] = pe + emb_b

    # multi-scale CNN branch: Conv1d(k=3/5/7, "same") + BN(eval) + ReLU, merged
    # into one im2col weight (7*d_model, CPAD); channel width padded to 128.
    bn_scale = 1.0 / math.sqrt(1.0 + 1e-5)     # eval BN: mean=0, var=1, gamma=1, beta=0
    max_pad = 3
    n_shift = 2 * max_pad + 1
    ncc = num_cnn_channels
    cpad = ((3 * ncc + 127) // 128) * 128
    cnn_w = jnp.zeros((n_shift * d_model, cpad), f32)
    cnn_b = jnp.zeros((1, cpad), f32)
    for bi, ks in enumerate((3, 5, 7)):
        w = nrm((ks, d_model, ncc), 1.0 / math.sqrt(ks * d_model)) * bn_scale
        b = nrm((1, ncc), 0.01) * bn_scale
        pad = ks // 2
        for k in range(ks):
            j = (k - pad) + max_pad
            cnn_w = cnn_w.at[j * d_model:(j + 1) * d_model,
                             bi * ncc:(bi + 1) * ncc].set(w[k])
        cnn_b = cnn_b.at[:, bi * ncc:(bi + 1) * ncc].set(b)
    p['cnn_w'] = cnn_w.astype(bf16)
    p['cnn_b'] = cnn_b
    fcnn_w = jnp.zeros((cpad, d_model), f32)
    fcnn_w = fcnn_w.at[:3 * ncc, :].set(
        nrm((3 * ncc, d_model), 1.0 / math.sqrt(3 * ncc)) * bn_scale)
    p['fcnn_w'] = fcnn_w.astype(bf16)
    p['fcnn_b'] = nrm((1, d_model), 0.01) * bn_scale

    # Mamba blocks, stacked along a leading block axis
    ln_g, ln_b, w_in, w_conv, b_conv, w_x, w_dt, b_dt, a_t, dpar, w_out = ([] for _ in range(11))
    for _ in range(num_mamba_blocks):
        ln_g.append(jnp.ones((1, d_model), f32))
        ln_b.append(jnp.zeros((1, d_model), f32))
        w_in.append(jnp.concatenate(
            [nrm((d_model, d_inner), 1.0 / math.sqrt(d_model)),     # x branch
             nrm((d_model, d_inner), 1.0 / math.sqrt(d_model))],    # gate z
            axis=1))
        w_conv.append(nrm((d_conv, d_inner), 1.0 / math.sqrt(d_conv)))
        b_conv.append(nrm((1, d_inner), 0.01))
        wx = jnp.zeros((d_inner, dt_pad + 2 * d_state), f32)        # dt padded to lane 16
        wx = wx.at[:, :dt_rank].set(nrm((d_inner, dt_rank), 1.0 / math.sqrt(d_inner)))
        wx = wx.at[:, dt_pad:dt_pad + d_state].set(nrm((d_inner, d_state), 1.0 / math.sqrt(d_inner)))
        wx = wx.at[:, dt_pad + d_state:].set(nrm((d_inner, d_state), 1.0 / math.sqrt(d_inner)))
        w_x.append(wx)
        wdt = jnp.zeros((dt_pad, d_inner), f32)
        wdt = wdt.at[:dt_rank, :].set(nrm((dt_rank, d_inner), 1.0 / math.sqrt(dt_rank)))
        w_dt.append(wdt)
        b_dt.append(jnp.log(jnp.expm1(jax.random.uniform(
            next(keys), (1, d_inner), f32, minval=1e-3, maxval=1e-1))))
        # A = -exp(A_log), A_log[d, s] = log(s + 1); stored transposed (d_state, d_inner)
        a_t.append(-jnp.broadcast_to(
            jnp.arange(1, d_state + 1, dtype=f32)[:, None], (d_state, d_inner)))
        dpar.append(jnp.ones((1, d_inner), f32))
        w_out.append(nrm((d_inner, d_model), 1.0 / math.sqrt(d_inner)))
    p['mb_ln_g'] = jnp.stack(ln_g)
    p['mb_ln_b'] = jnp.stack(ln_b)
    p['mb_w_in'] = jnp.stack(w_in).astype(bf16)
    p['mb_w_conv'] = jnp.stack(w_conv)
    p['mb_b_conv'] = jnp.stack(b_conv)
    p['mb_w_x'] = jnp.stack(w_x).astype(bf16)
    p['mb_w_dt'] = jnp.stack(w_dt).astype(bf16)
    p['mb_b_dt'] = jnp.stack(b_dt)
    p['mb_a_t'] = jnp.stack(a_t)
    p['mb_dpar'] = jnp.stack(dpar)
    p['mb_w_out'] = jnp.stack(w_out).astype(bf16)

    # fuse Linear(2*d_model -> d_model) + fc head (padded lane-dense to OUT_PAD)
    p['fuse_w'] = nrm((2 * d_model, d_model), 1.0 / math.sqrt(2 * d_model)).astype(bf16)
    p['fuse_b'] = nrm((1, d_model), 0.01)
    out_pad = ((max(output_size, OUT_PAD) + 127) // 128) * 128
    fc_w = nrm((d_model, output_size), 1.0 / math.sqrt(d_model))
    fc_b = nrm((1, output_size), 0.01)
    p['fc_w'] = jnp.zeros((d_model, out_pad), f32).at[:, :output_size].set(fc_w).astype(bf16)
    p['fc_b'] = jnp.zeros((1, out_pad), f32).at[:, :output_size].set(fc_b)
    return p


# ----------------------------------------------------------------------------- forward
def mamba_model_forward(x, params, output_size, block_batch=None):
    if x.ndim == 2:                          # (B, L) -> (B, L, 2), like the torch module
        x = jnp.repeat(x[:, :, None], 2, axis=-1)
    x = x.astype(jnp.float32)
    B, L, F = x.shape

    d_model = params['emb_w'].shape[1]
    d_conv = params['mb_w_conv'].shape[1]
    d_inner = params['mb_w_conv'].shape[2]
    d_state = params['mb_a_t'].shape[1]
    out_pad = params['fc_w'].shape[1]
    max_pad = (params['cnn_w'].shape[0] // d_model - 1) // 2

    assert L == params['pe_b'].shape[0], "runtime seq-len must match input_size at init"
    assert F == params['emb_w'].shape[0], "runtime feature count must match in_features"

    # batch block: bigger block -> better MXU row fill; keep >= 2 grid steps so
    # both v7x TensorCores stay busy whenever B >= 2.
    if block_batch is None:
        block_batch = 8 if B >= 16 else max(1, B // 2)
    Bt = max(1, min(block_batch, B))
    B_pad = ((B + Bt - 1) // Bt) * Bt
    if B_pad != B:
        x = jnp.concatenate([x, jnp.zeros((B_pad - B, L, F), x.dtype)], axis=0)

    weight_names = ('emb_w', 'pe_b',
                    'cnn_w', 'cnn_b', 'fcnn_w', 'fcnn_b',
                    'mb_ln_g', 'mb_ln_b', 'mb_w_in', 'mb_w_conv', 'mb_b_conv',
                    'mb_w_x', 'mb_w_dt', 'mb_b_dt', 'mb_a_t', 'mb_dpar', 'mb_w_out',
                    'fuse_w', 'fuse_b', 'fc_w', 'fc_b')
    w_args = tuple(params[n] for n in weight_names)

    out = pl.pallas_call(
        fused_forward_kernel,
        grid=(B_pad // Bt,),
        in_specs=[pl.BlockSpec((Bt, L, F), lambda b: (b, 0, 0))]
                 + [_const_spec(a.shape) for a in w_args],
        out_specs=pl.BlockSpec((Bt, 1, out_pad), lambda b: (b, 0, 0)),
        out_shape=jax.ShapeDtypeStruct((B_pad, 1, out_pad), jnp.float32),
        scratch_shapes=[
            pltpu.VMEM((Bt, L + 2 * max_pad, d_model), jnp.bfloat16),   # CNN zero-halo
            pltpu.VMEM((Bt, L + d_conv - 1, d_inner), jnp.float32),     # causal-conv halo
            pltpu.VMEM((L, Bt, d_state, d_inner), jnp.float32),         # scan states
        ],
        compiler_params=pltpu.CompilerParams(
            dimension_semantics=("parallel",),       # v7x: grid steps across both TCs
            vmem_limit_bytes=32 * 1024 * 1024),
    )(x, *w_args)
    return out[:B, 0, :output_size]


# ----------------------------------------------------------------------------- main
if __name__ == "__main__":
    B, L, F = 2, 16, 2           # batch, number of LiDAR beams (input_size), features/beam
    D_MODEL, N_CNN, N_BLOCKS, OUT = 64, 32, 3, 3

    key = jax.random.PRNGKey(0)
    kx, kp = jax.random.split(key)
    x = jax.random.normal(kx, (B, L, F), dtype=jnp.float32)
    params = init_params(kp, input_size=L, output_size=OUT, in_features=F,
                         d_model=D_MODEL, num_cnn_channels=N_CNN,
                         num_mamba_blocks=N_BLOCKS)

    fwd = jax.jit(mamba_model_forward, static_argnames=("output_size", "block_batch"))
    out = jax.block_until_ready(fwd(x, params, output_size=OUT))

    assert out.shape == (B, OUT), out.shape
    assert bool(jnp.all(jnp.isfinite(out)))
    print("KERNEL_OK")
</pallas_src>

<mosaic_0001>
module attributes {stable_mosaic.version = 11 : i64} {
  func.func @fused_forward_kernel(%arg0: i32, %arg1: memref<1x16x2xf32, #tpu.memory_space<vmem>>, %arg2: memref<2x64xf32, #tpu.memory_space<vmem>>, %arg3: memref<16x64xf32, #tpu.memory_space<vmem>>, %arg4: memref<448x128xbf16, #tpu.memory_space<vmem>>, %arg5: memref<1x128xf32, #tpu.memory_space<vmem>>, %arg6: memref<128x64xbf16, #tpu.memory_space<vmem>>, %arg7: memref<1x64xf32, #tpu.memory_space<vmem>>, %arg8: memref<3x1x64xf32, #tpu.memory_space<vmem>>, %arg9: memref<3x1x64xf32, #tpu.memory_space<vmem>>, %arg10: memref<3x64x256xbf16, #tpu.memory_space<vmem>>, %arg11: memref<3x4x128xf32, #tpu.memory_space<vmem>>, %arg12: memref<3x1x128xf32, #tpu.memory_space<vmem>>, %arg13: memref<3x128x48xbf16, #tpu.memory_space<vmem>>, %arg14: memref<3x16x128xbf16, #tpu.memory_space<vmem>>, %arg15: memref<3x1x128xf32, #tpu.memory_space<vmem>>, %arg16: memref<3x16x128xf32, #tpu.memory_space<vmem>>, %arg17: memref<3x1x128xf32, #tpu.memory_space<vmem>>, %arg18: memref<3x128x64xbf16, #tpu.memory_space<vmem>>, %arg19: memref<128x64xbf16, #tpu.memory_space<vmem>>, %arg20: memref<1x64xf32, #tpu.memory_space<vmem>>, %arg21: memref<64x128xbf16, #tpu.memory_space<vmem>>, %arg22: memref<1x128xf32, #tpu.memory_space<vmem>>, %arg23: memref<1x1x128xf32, #tpu.memory_space<vmem>>, %arg24: memref<1x22x64xbf16, #tpu.memory_space<vmem>>, %arg25: memref<1x19x128xf32, #tpu.memory_space<vmem>>, %arg26: memref<16x1x16x128xf32, #tpu.memory_space<vmem>>) attributes {dimension_semantics = [#tpu.dimension_semantics<parallel>], iteration_bounds = array<i64: 2>, scalar_prefetch = 0 : i64, scratch_operands = 3 : i64, tpu.core_type = #tpu.core_type<tc>, window_params = [{transform_indices = @transform_0, window_bounds = array<i64: 1, 16, 2>}, {pipeline_mode = #tpu.pipeline_mode<synchronous>, transform_indices = @transform_1, window_bounds = array<i64: 2, 64>}, {pipeline_mode = #tpu.pipeline_mode<synchronous>, transform_indices = @transform_2, window_bounds = array<i64: 16, 64>}, {pipeline_mode = #tpu.pipeline_mode<synchronous>, transform_indices = @transform_3, window_bounds = array<i64: 448, 128>}, {pipeline_mode = #tpu.pipeline_mode<synchronous>, transform_indices = @transform_4, window_bounds = array<i64: 1, 128>}, {pipeline_mode = #tpu.pipeline_mode<synchronous>, transform_indices = @transform_5, window_bounds = array<i64: 128, 64>}, {pipeline_mode = #tpu.pipeline_mode<synchronous>, transform_indices = @transform_6, window_bounds = array<i64: 1, 64>}, {pipeline_mode = #tpu.pipeline_mode<synchronous>, transform_indices = @transform_7, window_bounds = array<i64: 3, 1, 64>}, {pipeline_mode = #tpu.pipeline_mode<synchronous>, transform_indices = @transform_8, window_bounds = array<i64: 3, 1, 64>}, {pipeline_mode = #tpu.pipeline_mode<synchronous>, transform_indices = @transform_9, window_bounds = array<i64: 3, 64, 256>}, {pipeline_mode = #tpu.pipeline_mode<synchronous>, transform_indices = @transform_10, window_bounds = array<i64: 3, 4, 128>}, {pipeline_mode = #tpu.pipeline_mode<synchronous>, transform_indices = @transform_11, window_bounds = array<i64: 3, 1, 128>}, {pipeline_mode = #tpu.pipeline_mode<synchronous>, transform_indices = @transform_12, window_bounds = array<i64: 3, 128, 48>}, {pipeline_mode = #tpu.pipeline_mode<synchronous>, transform_indices = @transform_13, window_bounds = array<i64: 3, 16, 128>}, {pipeline_mode = #tpu.pipeline_mode<synchronous>, transform_indices = @transform_14, window_bounds = array<i64: 3, 1, 128>}, {pipeline_mode = #tpu.pipeline_mode<synchronous>, transform_indices = @transform_15, window_bounds = array<i64: 3, 16, 128>}, {pipeline_mode = #tpu.pipeline_mode<synchronous>, transform_indices = @transform_16, window_bounds = array<i64: 3, 1, 128>}, {pipeline_mode = #tpu.pipeline_mode<synchronous>, transform_indices = @transform_17, window_bounds = array<i64: 3, 128, 64>}, {pipeline_mode = #tpu.pipeline_mode<synchronous>, transform_indices = @transform_18, window_bounds = array<i64: 128, 64>}, {pipeline_mode = #tpu.pipeline_mode<synchronous>, transform_indices = @transform_19, window_bounds = array<i64: 1, 64>}, {pipeline_mode = #tpu.pipeline_mode<synchronous>, transform_indices = @transform_20, window_bounds = array<i64: 64, 128>}, {pipeline_mode = #tpu.pipeline_mode<synchronous>, transform_indices = @transform_21, window_bounds = array<i64: 1, 128>}, {transform_indices = @transform_22, window_bounds = array<i64: 1, 1, 128>}]} {
    %c0 = arith.constant 0 : index
    %c0_0 = arith.constant 0 : index
    %c0_1 = arith.constant 0 : index
    %0 = vector.load %arg1[%c0, %c0_0, %c0_1] : memref<1x16x2xf32, #tpu.memory_space<vmem>>, vector<1x16x2xf32>
    %c0_2 = arith.constant 0 : index
    %c0_3 = arith.constant 0 : index
    %1 = vector.load %arg2[%c0_2, %c0_3] : memref<2x64xf32, #tpu.memory_space<vmem>>, vector<2x64xf32>
    %c0_4 = arith.constant 0 : index
    %c0_5 = arith.constant 0 : index
    %2 = vector.load %arg3[%c0_4, %c0_5] : memref<16x64xf32, #tpu.memory_space<vmem>>, vector<16x64xf32>
    %3 = vector.shape_cast %2 : vector<16x64xf32> to vector<1x16x64xf32>
    %4 = vector.extract_strided_slice %0 {offsets = [0, 0, 0], sizes = [1, 16, 1], strides = [1, 1, 1]} : vector<1x16x2xf32> to vector<1x16x1xf32>
    %5 = vector.extract_strided_slice %1 {offsets = [0, 0], sizes = [1, 64], strides = [1, 1]} : vector<2x64xf32> to vector<1x64xf32>
    %6 = vector.shape_cast %5 : vector<1x64xf32> to vector<1x1x64xf32>
    %7 = vector.broadcast %4 : vector<1x16x1xf32> to vector<1x16x64xf32>
    %8 = vector.broadcast %6 : vector<1x1x64xf32> to vector<1x16x64xf32>
    %9 = arith.mulf %7, %8 : vector<1x16x64xf32>
    %10 = arith.addf %3, %9 : vector<1x16x64xf32>
    %11 = vector.extract_strided_slice %0 {offsets = [0, 0, 1], sizes = [1, 16, 1], strides = [1, 1, 1]} : vector<1x16x2xf32> to vector<1x16x1xf32>
    %12 = vector.extract_strided_slice %1 {offsets = [1, 0], sizes = [1, 64], strides = [1, 1]} : vector<2x64xf32> to vector<1x64xf32>
    %13 = vector.shape_cast %12 : vector<1x64xf32> to vector<1x1x64xf32>
    %14 = vector.broadcast %11 : vector<1x16x1xf32> to vector<1x16x64xf32>
    %15 = vector.broadcast %13 : vector<1x1x64xf32> to vector<1x16x64xf32>
    %16 = arith.mulf %14, %15 : vector<1x16x64xf32>
    %17 = arith.addf %10, %16 : vector<1x16x64xf32>
    %18 = arith.truncf %17 : vector<1x16x64xf32> to vector<1x16x64xbf16>
    %cst = arith.constant 0.000000e+00 : bf16
    %19 = vector.broadcast %cst : bf16 to vector<1x3x64xbf16>
    %c0_6 = arith.constant 0 : index
    %c0_7 = arith.constant 0 : index
    %c0_8 = arith.constant 0 : index
    %20 = vector.load %arg24[%c0_6, %c0_7, %c0_8] : memref<1x22x64xbf16, #tpu.memory_space<vmem>>, vector<1x3x64xbf16>
    tpu.vector_store %arg24[%c0_6, %c0_7, %c0_8], %19 {strides = array<i32>} : memref<1x22x64xbf16, #tpu.memory_space<vmem>>, vector<1x3x64xbf16>,
    %cst_9 = arith.constant 0.000000e+00 : bf16
    %21 = vector.broadcast %cst_9 : bf16 to vector<1x3x64xbf16>
    %c0_10 = arith.constant 0 : index
    %c19 = arith.constant 19 : index
    %c0_11 = arith.constant 0 : index
    %22 = vector.load %arg24[%c0_10, %c19, %c0_11] : memref<1x22x64xbf16, #tpu.memory_space<vmem>>, vector<1x3x64xbf16>
    tpu.vector_store %arg24[%c0_10, %c19, %c0_11], %21 {strides = array<i32>} : memref<1x22x64xbf16, #tpu.memory_space<vmem>>, vector<1x3x64xbf16>,
    %c0_12 = arith.constant 0 : index
    %c3 = arith.constant 3 : index
    %c0_13 = arith.constant 0 : index
    %23 = vector.load %arg24[%c0_12, %c3, %c0_13] : memref<1x22x64xbf16, #tpu.memory_space<vmem>>, vector<1x16x64xbf16>
    tpu.vector_store %arg24[%c0_12, %c3, %c0_13], %18 {strides = array<i32>} : memref<1x22x64xbf16, #tpu.memory_space<vmem>>, vector<1x16x64xbf16>,
    %c0_14 = arith.constant 0 : index
    %c0_15 = arith.constant 0 : index
    %c0_16 = arith.constant 0 : index
    %24 = vector.load %arg24[%c0_14, %c0_15, %c0_16] : memref<1x22x64xbf16, #tpu.memory_space<vmem>>, vector<1x16x64xbf16>
    %c0_17 = arith.constant 0 : index
    %c1 = arith.constant 1 : index
    %c0_18 = arith.constant 0 : index
    %25 = vector.load %arg24[%c0_17, %c1, %c0_18] : memref<1x22x64xbf16, #tpu.memory_space<vmem>>, vector<1x16x64xbf16>
    %c0_19 = arith.constant 0 : index
    %c2 = arith.constant 2 : index
    %c0_20 = arith.constant 0 : index
    %26 = vector.load %arg24[%c0_19, %c2, %c0_20] : memref<1x22x64xbf16, #tpu.memory_space<vmem>>, vector<1x16x64xbf16>
    %c0_21 = arith.constant 0 : index
    %c3_22 = arith.constant 3 : index
    %c0_23 = arith.constant 0 : index
    %27 = vector.load %arg24[%c0_21, %c3_22, %c0_23] : memref<1x22x64xbf16, #tpu.memory_space<vmem>>, vector<1x16x64xbf16>
    %c0_24 = arith.constant 0 : index
    %c4 = arith.constant 4 : index
    %c0_25 = arith.constant 0 : index
    %28 = vector.load %arg24[%c0_24, %c4, %c0_25] : memref<1x22x64xbf16, #tpu.memory_space<vmem>>, vector<1x16x64xbf16>
    %c0_26 = arith.constant 0 : index
    %c5 = arith.constant 5 : index
    %c0_27 = arith.constant 0 : index
    %29 = vector.load %arg24[%c0_26, %c5, %c0_27] : memref<1x22x64xbf16, #tpu.memory_space<vmem>>, vector<1x16x64xbf16>
    %c0_28 = arith.constant 0 : index
    %c6 = arith.constant 6 : index
    %c0_29 = arith.constant 0 : index
    %30 = vector.load %arg24[%c0_28, %c6, %c0_29] : memref<1x22x64xbf16, #tpu.memory_space<vmem>>, vector<1x16x64xbf16>
    %31 = tpu.concatenate %24, %25, %26, %27, %28, %29, %30 in 2 : vector<1x16x64xbf16>, vector<1x16x64xbf16>, vector<1x16x64xbf16>, vector<1x16x64xbf16>, vector<1x16x64xbf16>, vector<1x16x64xbf16>, vector<1x16x64xbf16> -> vector<1x16x448xbf16>
    %32 = vector.shape_cast %31 : vector<1x16x448xbf16> to vector<16x448xbf16>
    %c0_30 = arith.constant 0 : index
    %c0_31 = arith.constant 0 : index
    %33 = vector.load %arg4[%c0_30, %c0_31] : memref<448x128xbf16, #tpu.memory_space<vmem>>, vector<448x128xbf16>
    %cst_32 = arith.constant dense<0.000000e+00> : vector<16x128xf32>
    %34 = tpu.matmul %32, %33, %cst_32 {dimension_numbers = #tpu.dot_dimension_numbers<[1], [0], [0], [1], [0, 0, 1, 1], [], []>} : vector<16x448xbf16>, vector<448x128xbf16>, vector<16x128xf32> -> vector<16x128xf32>
    %c0_33 = arith.constant 0 : index
    %c0_34 = arith.constant 0 : index
    %35 = vector.load %arg5[%c0_33, %c0_34] : memref<1x128xf32, #tpu.memory_space<vmem>>, vector<1x128xf32>
    %36 = vector.broadcast %35 : vector<1x128xf32> to vector<16x128xf32>
    %37 = arith.addf %34, %36 : vector<16x128xf32>
    %cst_35 = arith.constant 0.000000e+00 : f32
    %38 = vector.broadcast %cst_35 : f32 to vector<16x128xf32>
    %39 = arith.maximumf %37, %38 : vector<16x128xf32>
    %40 = arith.truncf %39 : vector<16x128xf32> to vector<16x128xbf16>
    %c0_36 = arith.constant 0 : index
    %c0_37 = arith.constant 0 : index
    %41 = vector.load %arg6[%c0_36, %c0_37] : memref<128x64xbf16, #tpu.memory_space<vmem>>, vector<128x64xbf16>
    %cst_38 = arith.constant dense<0.000000e+00> : vector<16x64xf32>
    %42 = tpu.matmul %40, %41, %cst_38 {dimension_numbers = #tpu.dot_dimension_numbers<[1], [0], [0], [1], [0, 0, 1, 1], [], []>} : vector<16x128xbf16>, vector<128x64xbf16>, vector<16x64xf32> -> vector<16x64xf32>
    %c0_39 = arith.constant 0 : index
    %c0_40 = arith.constant 0 : index
    %43 = vector.load %arg7[%c0_39, %c0_40] : memref<1x64xf32, #tpu.memory_space<vmem>>, vector<1x64xf32>
    %44 = vector.broadcast %43 : vector<1x64xf32> to vector<16x64xf32>
    %45 = arith.addf %42, %44 : vector<16x64xf32>
    %cst_41 = arith.constant 0.000000e+00 : f32
    %46 = vector.broadcast %cst_41 : f32 to vector<16x64xf32>
    %47 = arith.maximumf %45, %46 : vector<16x64xf32>
    %48 = vector.shape_cast %17 : vector<1x16x64xf32> to vector<16x64xf32>
    %cst_42 = arith.constant dense<0.000000e+00> : vector<16xf32>
    %49 = vector.multi_reduction <add>, %48, %cst_42 [1] : vector<16x64xf32> to vector<16xf32>
    %50 = vector.shape_cast %49 : vector<16xf32> to vector<16x1xf32>
    %cst_43 = arith.constant 6.400000e+01 : f32
    %51 = vector.broadcast %cst_43 : f32 to vector<16x1xf32>
    %52 = arith.divf %50, %51 : vector<16x1xf32>
    %53 = vector.broadcast %52 : vector<16x1xf32> to vector<16x64xf32>
    %54 = arith.subf %48, %53 : vector<16x64xf32>
    %55 = arith.mulf %54, %54 : vector<16x64xf32>
    %cst_44 = arith.constant dense<0.000000e+00> : vector<16xf32>
    %56 = vector.multi_reduction <add>, %55, %cst_44 [1] : vector<16x64xf32> to vector<16xf32>
    %57 = vector.shape_cast %56 : vector<16xf32> to vector<16x1xf32>
    %cst_45 = arith.constant 6.400000e+01 : f32
    %58 = vector.broadcast %cst_45 : f32 to vector<16x1xf32>
    %59 = arith.divf %57, %58 : vector<16x1xf32>
    %60 = vector.broadcast %52 : vector<16x1xf32> to vector<16x64xf32>
    %61 = arith.subf %48, %60 : vector<16x64xf32>
    %cst_46 = arith.constant 9.99999974E-6 : f32
    %62 = vector.broadcast %cst_46 : f32 to vector<16x1xf32>
    %63 = arith.addf %59, %62 : vector<16x1xf32>
    %64 = math.rsqrt %63 : vector<16x1xf32>
    %65 = vector.broadcast %64 : vector<16x1xf32> to vector<16x64xf32>
    %66 = arith.mulf %61, %65 : vector<16x64xf32>
    %c0_47 = arith.constant 0 : index
    %c0_48 = arith.constant 0 : index
    %c0_49 = arith.constant 0 : index
    %67 = vector.load %arg8[%c0_47, %c0_48, %c0_49] : memref<3x1x64xf32, #tpu.memory_space<vmem>>, vector<1x1x64xf32>
    %68 = vector.shape_cast %67 : vector<1x1x64xf32> to vector<1x64xf32>
    %69 = vector.broadcast %68 : vector<1x64xf32> to vector<16x64xf32>
    %70 = arith.mulf %66, %69 : vector<16x64xf32>
    %c0_50 = arith.constant 0 : index
    %c0_51 = arith.constant 0 : index
    %c0_52 = arith.constant 0 : index
    %71 = vector.load %arg9[%c0_50, %c0_51, %c0_52] : memref<3x1x64xf32, #tpu.memory_space<vmem>>, vector<1x1x64xf32>
    %72 = vector.shape_cast %71 : vector<1x1x64xf32> to vector<1x64xf32>
    %73 = vector.broadcast %72 : vector<1x64xf32> to vector<16x64xf32>
    %74 = arith.addf %70, %73 : vector<16x64xf32>
    %75 = arith.truncf %74 : vector<16x64xf32> to vector<16x64xbf16>
    %c0_53 = arith.constant 0 : index
    %c0_54 = arith.constant 0 : index
    %c0_55 = arith.constant 0 : index
    %76 = vector.load %arg10[%c0_53, %c0_54, %c0_55] : memref<3x64x256xbf16, #tpu.memory_space<vmem>>, vector<1x64x256xbf16>
    %77 = vector.shape_cast %76 : vector<1x64x256xbf16> to vector<64x256xbf16>
    %cst_56 = arith.constant dense<0.000000e+00> : vector<16x256xf32>
    %78 = tpu.matmul %75, %77, %cst_56 {dimension_numbers = #tpu.dot_dimension_numbers<[1], [0], [0], [1], [0, 0, 1, 1], [], []>} : vector<16x64xbf16>, vector<64x256xbf16>, vector<16x256xf32> -> vector<16x256xf32>
    %79 = vector.extract_strided_slice %78 {offsets = [0, 0], sizes = [16, 128], strides = [1, 1]} : vector<16x256xf32> to vector<16x128xf32>
    %80 = vector.extract_strided_slice %78 {offsets = [0, 128], sizes = [16, 128], strides = [1, 1]} : vector<16x256xf32> to vector<16x128xf32>
    %cst_57 = arith.constant 0.000000e+00 : f32
    %81 = vector.broadcast %cst_57 : f32 to vector<1x3x128xf32>
    %c0_58 = arith.constant 0 : index
    %c0_59 = arith.constant 0 : index
    %c0_60 = arith.constant 0 : index
    %82 = vector.load %arg25[%c0_58, %c0_59, %c0_60] : memref<1x19x128xf32, #tpu.memory_space<vmem>>, vector<1x3x128xf32>
    tpu.vector_store %arg25[%c0_58, %c0_59, %c0_60], %81 {strides = array<i32>} : memref<1x19x128xf32, #tpu.memory_space<vmem>>, vector<1x3x128xf32>,
    %83 = vector.shape_cast %79 : vector<16x128xf32> to vector<1x16x128xf32>
    %c0_61 = arith.constant 0 : index
    %c3_62 = arith.constant 3 : index
    %c0_63 = arith.constant 0 : index
    %84 = vector.load %arg25[%c0_61, %c3_62, %c0_63] : memref<1x19x128xf32, #tpu.memory_space<vmem>>, vector<1x16x128xf32>
    tpu.vector_store %arg25[%c0_61, %c3_62, %c0_63], %83 {strides = array<i32>} : memref<1x19x128xf32, #tpu.memory_space<vmem>>, vector<1x16x128xf32>,
    %c0_64 = arith.constant 0 : index
    %c0_65 = arith.constant 0 : index
    %c0_66 = arith.constant 0 : index
    %85 = vector.load %arg11[%c0_64, %c0_65, %c0_66] : memref<3x4x128xf32, #tpu.memory_space<vmem>>, vector<1x4x128xf32>
    %86 = vector.shape_cast %85 : vector<1x4x128xf32> to vector<4x128xf32>
    %c0_67 = arith.constant 0 : index
    %c0_68 = arith.constant 0 : index
    %c0_69 = arith.constant 0 : index
    %87 = vector.load %arg25[%c0_67, %c0_68, %c0_69] : memref<1x19x128xf32, #tpu.memory_space<vmem>>, vector<1x16x128xf32>
    %88 = vector.extract_strided_slice %86 {offsets = [0, 0], sizes = [1, 128], strides = [1, 1]} : vector<4x128xf32> to vector<1x128xf32>
    %89 = vector.shape_cast %88 : vector<1x128xf32> to vector<1x1x128xf32>
    %90 = vector.broadcast %89 : vector<1x1x128xf32> to vector<1x16x128xf32>
    %91 = arith.mulf %87, %90 : vector<1x16x128xf32>
    %c0_70 = arith.constant 0 : index
    %c1_71 = arith.constant 1 : index
    %c0_72 = arith.constant 0 : index
    %92 = vector.load %arg25[%c0_70, %c1_71, %c0_72] : memref<1x19x128xf32, #tpu.memory_space<vmem>>, vector<1x16x128xf32>
    %93 = vector.extract_strided_slice %86 {offsets = [1, 0], sizes = [1, 128], strides = [1, 1]} : vector<4x128xf32> to vector<1x128xf32>
    %94 = vector.shape_cast %93 : vector<1x128xf32> to vector<1x1x128xf32>
    %95 = vector.broadcast %94 : vector<1x1x128xf32> to vector<1x16x128xf32>
    %96 = arith.mulf %92, %95 : vector<1x16x128xf32>
    %97 = arith.addf %91, %96 : vector<1x16x128xf32>
    %c0_73 = arith.constant 0 : index
    %c2_74 = arith.constant 2 : index
    %c0_75 = arith.constant 0 : index
    %98 = vector.load %arg25[%c0_73, %c2_74, %c0_75] : memref<1x19x128xf32, #tpu.memory_space<vmem>>, vector<1x16x128xf32>
    %99 = vector.extract_strided_slice %86 {offsets = [2, 0], sizes = [1, 128], strides = [1, 1]} : vector<4x128xf32> to vector<1x128xf32>
    %100 = vector.shape_cast %99 : vector<1x128xf32> to vector<1x1x128xf32>
    %101 = vector.broadcast %100 : vector<1x1x128xf32> to vector<1x16x128xf32>
    %102 = arith.mulf %98, %101 : vector<1x16x128xf32>
    %103 = arith.addf %97, %102 : vector<1x16x128xf32>
    %c0_76 = arith.constant 0 : index
    %c3_77 = arith.constant 3 : index
    %c0_78 = arith.constant 0 : index
    %104 = vector.load %arg25[%c0_76, %c3_77, %c0_78] : memref<1x19x128xf32, #tpu.memory_space<vmem>>, vector<1x16x128xf32>
    %105 = vector.extract_strided_slice %86 {offsets = [3, 0], sizes = [1, 128], strides = [1, 1]} : vector<4x128xf32> to vector<1x128xf32>
    %106 = vector.shape_cast %105 : vector<1x128xf32> to vector<1x1x128xf32>
    %107 = vector.broadcast %106 : vector<1x1x128xf32> to vector<1x16x128xf32>
    %108 = arith.mulf %104, %107 : vector<1x16x128xf32>
    %109 = arith.addf %103, %108 : vector<1x16x128xf32>
    %c0_79 = arith.constant 0 : index
    %c0_80 = arith.constant 0 : index
    %c0_81 = arith.constant 0 : index
    %110 = vector.load %arg12[%c0_79, %c0_80, %c0_81] : memref<3x1x128xf32, #tpu.memory_space<vmem>>, vector<1x1x128xf32>
    %111 = vector.shape_cast %110 : vector<1x1x128xf32> to vector<1x128xf32>
    %112 = vector.shape_cast %111 : vector<1x128xf32> to vector<1x1x128xf32>
    %113 = vector.broadcast %112 : vector<1x1x128xf32> to vector<1x16x128xf32>
    %114 = arith.addf %109, %113 : vector<1x16x128xf32>
    %cst_82 = arith.constant 0.000000e+00 : f32
    %115 = vector.broadcast %cst_82 : f32 to vector<1x16x128xf32>
    %116 = arith.subf %115, %114 : vector<1x16x128xf32>
    %117 = math.exp %116 : vector<1x16x128xf32>
    %cst_83 = arith.constant 1.000000e+00 : f32
    %118 = vector.broadcast %cst_83 : f32 to vector<1x16x128xf32>
    %119 = arith.addf %118, %117 : vector<1x16x128xf32>
    %cst_84 = arith.constant 1.000000e+00 : f32
    %120 = vector.broadcast %cst_84 : f32 to vector<1x16x128xf32>
    %121 = arith.divf %120, %119 : vector<1x16x128xf32>
    %122 = arith.mulf %114, %121 : vector<1x16x128xf32>
    %123 = vector.shape_cast %122 : vector<1x16x128xf32> to vector<16x128xf32>
    %124 = arith.truncf %123 : vector<16x128xf32> to vector<16x128xbf16>
    %c0_85 = arith.constant 0 : index
    %c0_86 = arith.constant 0 : index
    %c0_87 = arith.constant 0 : index
    %125 = vector.load %arg13[%c0_85, %c0_86, %c0_87] : memref<3x128x48xbf16, #tpu.memory_space<vmem>>, vector<1x128x48xbf16>
    %126 = vector.shape_cast %125 : vector<1x128x48xbf16> to vector<128x48xbf16>
    %cst_88 = arith.constant dense<0.000000e+00> : vector<16x48xf32>
    %127 = tpu.matmul %124, %126, %cst_88 {dimension_numbers = #tpu.dot_dimension_numbers<[1], [0], [0], [1], [0, 0, 1, 1], [], []>} : vector<16x128xbf16>, vector<128x48xbf16>, vector<16x48xf32> -> vector<16x48xf32>
    %128 = vector.extract_strided_slice %127 {offsets = [0, 0], sizes = [16, 16], strides = [1, 1]} : vector<16x48xf32> to vector<16x16xf32>
    %129 = vector.extract_strided_slice %127 {offsets = [0, 16], sizes = [16, 16], strides = [1, 1]} : vector<16x48xf32> to vector<16x16xf32>
    %130 = vector.shape_cast %129 : vector<16x16xf32> to vector<1x16x16xf32>
    %131 = vector.extract_strided_slice %127 {offsets = [0, 32], sizes = [16, 16], strides = [1, 1]} : vector<16x48xf32> to vector<16x16xf32>
    %132 = vector.shape_cast %131 : vector<16x16xf32> to vector<1x16x16xf32>
    %133 = arith.truncf %128 : vector<16x16xf32> to vector<16x16xbf16>
    %c0_89 = arith.constant 0 : index
    %c0_90 = arith.constant 0 : index
    %c0_91 = arith.constant 0 : index
    %134 = vector.load %arg14[%c0_89, %c0_90, %c0_91] : memref<3x16x128xbf16, #tpu.memory_space<vmem>>, vector<1x16x128xbf16>
    %135 = vector.shape_cast %134 : vector<1x16x128xbf16> to vector<16x128xbf16>
    %cst_92 = arith.constant dense<0.000000e+00> : vector<16x128xf32>
    %136 = tpu.matmul %133, %135, %cst_92 {dimension_numbers = #tpu.dot_dimension_numbers<[1], [0], [0], [1], [0, 0, 1, 1], [], []>} : vector<16x16xbf16>, vector<16x128xbf16>, vector<16x128xf32> -> vector<16x128xf32>
    %c0_93 = arith.constant 0 : index
    %c0_94 = arith.constant 0 : index
    %c0_95 = arith.constant 0 : index
    %137 = vector.load %arg15[%c0_93, %c0_94, %c0_95] : memref<3x1x128xf32, #tpu.memory_space<vmem>>, vector<1x1x128xf32>
    %138 = vector.shape_cast %137 : vector<1x1x128xf32> to vector<1x128xf32>
    %139 = vector.broadcast %138 : vector<1x128xf32> to vector<16x128xf32>
    %140 = arith.addf %136, %139 : vector<16x128xf32>
    %cst_96 = arith.constant 0.000000e+00 : f32
    %141 = vector.broadcast %cst_96 : f32 to vector<16x128xf32>
    %142 = arith.maximumf %140, %141 : vector<16x128xf32>
    %143 = math.absf %140 : vector<16x128xf32>
    %cst_97 = arith.constant 0.000000e+00 : f32
    %144 = vector.broadcast %cst_97 : f32 to vector<16x128xf32>
    %145 = arith.subf %144, %143 : vector<16x128xf32>
    %146 = math.exp %145 : vector<16x128xf32>
    %147 = math.log1p %146 : vector<16x128xf32>
    %148 = arith.addf %142, %147 : vector<16x128xf32>
    %149 = vector.shape_cast %148 : vector<16x128xf32> to vector<1x16x128xf32>
    %c0_98 = arith.constant 0 : index
    %c0_99 = arith.constant 0 : index
    %c0_100 = arith.constant 0 : index
    %150 = vector.load %arg16[%c0_98, %c0_99, %c0_100] : memref<3x16x128xf32, #tpu.memory_space<vmem>>, vector<1x16x128xf32>
    %151 = vector.shape_cast %150 : vector<1x16x128xf32> to vector<16x128xf32>
    %152 = arith.mulf %149, %122 : vector<1x16x128xf32>
    %153 = vector.shape_cast %149 : vector<1x16x128xf32> to vector<1x16x1x128xf32>
    %154 = vector.shape_cast %151 : vector<16x128xf32> to vector<1x1x16x128xf32>
    %155 = vector.broadcast %153 : vector<1x16x1x128xf32> to vector<1x16x16x128xf32>
    %156 = vector.broadcast %154 : vector<1x1x16x128xf32> to vector<1x16x16x128xf32>
    %157 = arith.mulf %155, %156 : vector<1x16x16x128xf32>
    %158 = math.exp %157 : vector<1x16x16x128xf32>
    %159 = vector.shape_cast %130 : vector<1x16x16xf32> to vector<1x16x16x1xf32>
    %160 = vector.shape_cast %152 : vector<1x16x128xf32> to vector<1x16x1x128xf32>
    %161 = vector.broadcast %159 : vector<1x16x16x1xf32> to vector<1x16x16x128xf32>
    %162 = vector.broadcast %160 : vector<1x16x1x128xf32> to vector<1x16x16x128xf32>
    %163 = arith.mulf %161, %162 : vector<1x16x16x128xf32>
    %cst_101 = arith.constant 0.000000e+00 : f32
    %164 = vector.broadcast %cst_101 : f32 to vector<1x16x128xf32>
    %165 = vector.extract_strided_slice %158 {offsets = [0, 0, 0, 0], sizes = [1, 1, 16, 128], strides = [1, 1, 1, 1]} : vector<1x16x16x128xf32> to vector<1x1x16x128xf32>
    %166 = vector.shape_cast %165 : vector<1x1x16x128xf32> to vector<1x16x128xf32>
    %167 = arith.mulf %166, %164 : vector<1x16x128xf32>
    %168 = vector.extract_strided_slice %163 {offsets = [0, 0, 0, 0], sizes = [1, 1, 16, 128], strides = [1, 1, 1, 1]} : vector<1x16x16x128xf32> to vector<1x1x16x128xf32>
    %169 = vector.shape_cast %168 : vector<1x1x16x128xf32> to vector<1x16x128xf32>
    %170 = arith.addf %167, %169 : vector<1x16x128xf32>
    %c0_102 = arith.constant 0 : index
    %c0_103 = arith.constant 0 : index
    %c0_104 = arith.constant 0 : index
    %c0_105 = arith.constant 0 : index
    %171 = vector.load %arg26[%c0_102, %c0_103, %c0_104, %c0_105] : memref<16x1x16x128xf32, #tpu.memory_space<vmem>>, vector<1x1x16x128xf32>
    %172 = vector.shape_cast %171 : vector<1x1x16x128xf32> to vector<1x16x128xf32>
    %173 = vector.shape_cast %170 : vector<1x16x128xf32> to vector<1x1x16x128xf32>
    tpu.vector_store %arg26[%c0_102, %c0_103, %c0_104, %c0_105], %173 {strides = array<i32>} : memref<16x1x16x128xf32, #tpu.memory_space<vmem>>, vector<1x1x16x128xf32>,
    %174 = vector.extract_strided_slice %158 {offsets = [0, 1, 0, 0], sizes = [1, 1, 16, 128], strides = [1, 1, 1, 1]} : vector<1x16x16x128xf32> to vector<1x1x16x128xf32>
    %175 = vector.shape_cast %174 : vector<1x1x16x128xf32> to vector<1x16x128xf32>
    %176 = arith.mulf %175, %170 : vector<1x16x128xf32>
    %177 = vector.extract_strided_slice %163 {offsets = [0, 1, 0, 0], sizes = [1, 1, 16, 128], strides = [1, 1, 1, 1]} : vector<1x16x16x128xf32> to vector<1x1x16x128xf32>
    %178 = vector.shape_cast %177 : vector<1x1x16x128xf32> to vector<1x16x128xf32>
    %179 = arith.addf %176, %178 : vector<1x16x128xf32>
    %c1_106 = arith.constant 1 : index
    %c0_107 = arith.constant 0 : index
    %c0_108 = arith.constant 0 : index
    %c0_109 = arith.constant 0 : index
    %180 = vector.load %arg26[%c1_106, %c0_107, %c0_108, %c0_109] : memref<16x1x16x128xf32, #tpu.memory_space<vmem>>, vector<1x1x16x128xf32>
    %181 = vector.shape_cast %180 : vector<1x1x16x128xf32> to vector<1x16x128xf32>
    %182 = vector.shape_cast %179 : vector<1x16x128xf32> to vector<1x1x16x128xf32>
    tpu.vector_store %arg26[%c1_106, %c0_107, %c0_108, %c0_109], %182 {strides = array<i32>} : memref<16x1x16x128xf32, #tpu.memory_space<vmem>>, vector<1x1x16x128xf32>,
    %183 = vector.extract_strided_slice %158 {offsets = [0, 2, 0, 0], sizes = [1, 1, 16, 128], strides = [1, 1, 1, 1]} : vector<1x16x16x128xf32> to vector<1x1x16x128xf32>
    %184 = vector.shape_cast %183 : vector<1x1x16x128xf32> to vector<1x16x128xf32>
    %185 = arith.mulf %184, %179 : vector<1x16x128xf32>
    %186 = vector.extract_strided_slice %163 {offsets = [0, 2, 0, 0], sizes = [1, 1, 16, 128], strides = [1, 1, 1, 1]} : vector<1x16x16x128xf32> to vector<1x1x16x128xf32>
    %187 = vector.shape_cast %186 : vector<1x1x16x128xf32> to vector<1x16x128xf32>
    %188 = arith.addf %185, %187 : vector<1x16x128xf32>
    %c2_110 = arith.constant 2 : index
    %c0_111 = arith.constant 0 : index
    %c0_112 = arith.constant 0 : index
    %c0_113 = arith.constant 0 : index
    %189 = vector.load %arg26[%c2_110, %c0_111, %c0_112, %c0_113] : memref<16x1x16x128xf32, #tpu.memory_space<vmem>>, vector<1x1x16x128xf32>
    %190 = vector.shape_cast %189 : vector<1x1x16x128xf32> to vector<1x16x128xf32>
    %191 = vector.shape_cast %188 : vector<1x16x128xf32> to vector<1x1x16x128xf32>
    tpu.vector_store %arg26[%c2_110, %c0_111, %c0_112, %c0_113], %191 {strides = array<i32>} : memref<16x1x16x128xf32, #tpu.memory_space<vmem>>, vector<1x1x16x128xf32>,
    %192 = vector.extract_strided_slice %158 {offsets = [0, 3, 0, 0], sizes = [1, 1, 16, 128], strides = [1, 1, 1, 1]} : vector<1x16x16x128xf32> to vector<1x1x16x128xf32>
    %193 = vector.shape_cast %192 : vector<1x1x16x128xf32> to vector<1x16x128xf32>
    %194 = arith.mulf %193, %188 : vector<1x16x128xf32>
    %195 = vector.extract_strided_slice %163 {offsets = [0, 3, 0, 0], sizes = [1, 1, 16, 128], strides = [1, 1, 1, 1]} : vector<1x16x16x128xf32> to vector<1x1x16x128xf32>
    %196 = vector.shape_cast %195 : vector<1x1x16x128xf32> to vector<1x16x128xf32>
    %197 = arith.addf %194, %196 : vector<1x16x128xf32>
    %c3_114 = arith.constant 3 : index
    %c0_115 = arith.constant 0 : index
    %c0_116 = arith.constant 0 : index
    %c0_117 = arith.constant 0 : index
    %198 = vector.load %arg26[%c3_114, %c0_115, %c0_116, %c0_117] : memref<16x1x16x128xf32, #tpu.memory_space<vmem>>, vector<1x1x16x128xf32>
    %199 = vector.shape_cast %198 : vector<1x1x16x128xf32> to vector<1x16x128xf32>
    %200 = vector.shape_cast %197 : vector<1x16x128xf32> to vector<1x1x16x128xf32>
    tpu.vector_store %arg26[%c3_114, %c0_115, %c0_116, %c0_117], %200 {strides = array<i32>} : memref<16x1x16x128xf32, #tpu.memory_space<vmem>>, vector<1x1x16x128xf32>,
    %201 = vector.extract_strided_slice %158 {offsets = [0, 4, 0, 0], sizes = [1, 1, 16, 128], strides = [1, 1, 1, 1]} : vector<1x16x16x128xf32> to vector<1x1x16x128xf32>
    %202 = vector.shape_cast %201 : vector<1x1x16x128xf32> to vector<1x16x128xf32>
    %203 = arith.mulf %202, %197 : vector<1x16x128xf32>
    %204 = vector.extract_strided_slice %163 {offsets = [0, 4, 0, 0], sizes = [1, 1, 16, 128], strides = [1, 1, 1, 1]} : vector<1x16x16x128xf32> to vector<1x1x16x128xf32>
    %205 = vector.shape_cast %204 : vector<1x1x16x128xf32> to vector<1x16x128xf32>
    %206 = arith.addf %203, %205 : vector<1x16x128xf32>
    %c4_118 = arith.constant 4 : index
    %c0_119 = arith.constant 0 : index
    %c0_120 = arith.constant 0 : index
    %c0_121 = arith.constant 0 : index
    %207 = vector.load %arg26[%c4_118, %c0_119, %c0_120, %c0_121] : memref<16x1x16x128xf32, #tpu.memory_space<vmem>>, vector<1x1x16x128xf32>
    %208 = vector.shape_cast %207 : vector<1x1x16x128xf32> to vector<1x16x128xf32>
    %209 = vector.shape_cast %206 : vector<1x16x128xf32> to vector<1x1x16x128xf32>
    tpu.vector_store %arg26[%c4_118, %c0_119, %c0_120, %c0_121], %209 {strides = array<i32>} : memref<16x1x16x128xf32, #tpu.memory_space<vmem>>, vector<1x1x16x128xf32>,
    %210 = vector.extract_strided_slice %158 {offsets = [0, 5, 0, 0], sizes = [1, 1, 16, 128], strides = [1, 1, 1, 1]} : vector<1x16x16x128xf32> to vector<1x1x16x128xf32>
    %211 = vector.shape_cast %210 : vector<1x1x16x128xf32> to vector<1x16x128xf32>
    %212 = arith.mulf %211, %206 : vector<1x16x128xf32>
    %213 = vector.extract_strided_slice %163 {offsets = [0, 5, 0, 0], sizes = [1, 1, 16, 128], strides = [1, 1, 1, 1]} : vector<1x16x16x128xf32> to vector<1x1x16x128xf32>
    %214 = vector.shape_cast %213 : vector<1x1x16x128xf32> to vector<1x16x128xf32>
    %215 = arith.addf %212, %214 : vector<1x16x128xf32>
    %c5_122 = arith.constant 5 : index
    %c0_123 = arith.constant 0 : index
    %c0_124 = arith.constant 0 : index
    %c0_125 = arith.constant 0 : index
    %216 = vector.load %arg26[%c5_122, %c0_123, %c0_124, %c0_125] : memref<16x1x16x128xf32, #tpu.memory_space<vmem>>, vector<1x1x16x128xf32>
    %217 = vector.shape_cast %216 : vector<1x1x16x128xf32> to vector<1x16x128xf32>
    %218 = vector.shape_cast %215 : vector<1x16x128xf32> to vector<1x1x16x128xf32>
    tpu.vector_store %arg26[%c5_122, %c0_123, %c0_124, %c0_125], %218 {strides = array<i32>} : memref<16x1x16x128xf32, #tpu.memory_space<vmem>>, vector<1x1x16x128xf32>,
    %219 = vector.extract_strided_slice %158 {offsets = [0, 6, 0, 0], sizes = [1, 1, 16, 128], strides = [1, 1, 1, 1]} : vector<1x16x16x128xf32> to vector<1x1x16x128xf32>
    %220 = vector.shape_cast %219 : vector<1x1x16x128xf32> to vector<1x16x128xf32>
    %221 = arith.mulf %220, %215 : vector<1x16x128xf32>
    %222 = vector.extract_strided_slice %163 {offsets = [0, 6, 0, 0], sizes = [1, 1, 16, 128], strides = [1, 1, 1, 1]} : vector<1x16x16x128xf32> to vector<1x1x16x128xf32>
    %223 = vector.shape_cast %222 : vector<1x1x16x128xf32> to vector<1x16x128xf32>
    %224 = arith.addf %221, %223 : vector<1x16x128xf32>
    %c6_126 = arith.constant 6 : index
    %c0_127 = arith.constant 0 : index
    %c0_128 = arith.constant 0 : index
    %c0_129 = arith.constant 0 : index
    %225 = vector.load %arg26[%c6_126, %c0_127, %c0_128, %c0_129] : memref<16x1x16x128xf32, #tpu.memory_space<vmem>>, vector<1x1x16x128xf32>
    %226 = vector.shape_cast %225 : vector<1x1x16x128xf32> to vector<1x16x128xf32>
    %227 = vector.shape_cast %224 : vector<1x16x128xf32> to vector<1x1x16x128xf32>
    tpu.vector_store %arg26[%c6_126, %c0_127, %c0_128, %c0_129], %227 {strides = array<i32>} : memref<16x1x16x128xf32, #tpu.memory_space<vmem>>, vector<1x1x16x128xf32>,
    %228 = vector.extract_strided_slice %158 {offsets = [0, 7, 0, 0], sizes = [1, 1, 16, 128], strides = [1, 1, 1, 1]} : vector<1x16x16x128xf32> to vector<1x1x16x128xf32>
    %229 = vector.shape_cast %228 : vector<1x1x16x128xf32> to vector<1x16x128xf32>
    %230 = arith.mulf %229, %224 : vector<1x16x128xf32>
    %231 = vector.extract_strided_slice %163 {offsets = [0, 7, 0, 0], sizes = [1, 1, 16, 128], strides = [1, 1, 1, 1]} : vector<1x16x16x128xf32> to vector<1x1x16x128xf32>
    %232 = vector.shape_cast %231 : vector<1x1x16x128xf32> to vector<1x16x128xf32>
    %233 = arith.addf %230, %232 : vector<1x16x128xf32>
    %c7 = arith.constant 7 : index
    %c0_130 = arith.constant 0 : index
    %c0_131 = arith.constant 0 : index
    %c0_132 = arith.constant 0 : index
    %234 = vector.load %arg26[%c7, %c0_130, %c0_131, %c0_132] : memref<16x1x16x128xf32, #tpu.memory_space<vmem>>, vector<1x1x16x128xf32>
    %235 = vector.shape_cast %234 : vector<1x1x16x128xf32> to vector<1x16x128xf32>
    %236 = vector.shape_cast %233 : vector<1x16x128xf32> to vector<1x1x16x128xf32>
    tpu.vector_store %arg26[%c7, %c0_130, %c0_131, %c0_132], %236 {strides = array<i32>} : memref<16x1x16x128xf32, #tpu.memory_space<vmem>>, vector<1x1x16x128xf32>,
    %237 = vector.extract_strided_slice %158 {offsets = [0, 8, 0, 0], sizes = [1, 1, 16, 128], strides = [1, 1, 1, 1]} : vector<1x16x16x128xf32> to vector<1x1x16x128xf32>
    %238 = vector.shape_cast %237 : vector<1x1x16x128xf32> to vector<1x16x128xf32>
    %239 = arith.mulf %238, %233 : vector<1x16x128xf32>
    %240 = vector.extract_strided_slice %163 {offsets = [0, 8, 0, 0], sizes = [1, 1, 16, 128], strides = [1, 1, 1, 1]} : vector<1x16x16x128xf32> to vector<1x1x16x128xf32>
    %241 = vector.shape_cast %240 : vector<1x1x16x128xf32> to vector<1x16x128xf32>
    %242 = arith.addf %239, %241 : vector<1x16x128xf32>
    %c8 = arith.constant 8 : index
    %c0_133 = arith.constant 0 : index
    %c0_134 = arith.constant 0 : index
    %c0_135 = arith.constant 0 : index
    %243 = vector.load %arg26[%c8, %c0_133, %c0_134, %c0_135] : memref<16x1x16x128xf32, #tpu.memory_space<vmem>>, vector<1x1x16x128xf32>
    %244 = vector.shape_cast %243 : vector<1x1x16x128xf32> to vector<1x16x128xf32>
    %245 = vector.shape_cast %242 : vector<1x16x128xf32> to vector<1x1x16x128xf32>
    tpu.vector_store %arg26[%c8, %c0_133, %c0_134, %c0_135], %245 {strides = array<i32>} : memref<16x1x16x128xf32, #tpu.memory_space<vmem>>, vector<1x1x16x128xf32>,
    %246 = vector.extract_strided_slice %158 {offsets = [0, 9, 0, 0], sizes = [1, 1, 16, 128], strides = [1, 1, 1, 1]} : vector<1x16x16x128xf32> to vector<1x1x16x128xf32>
    %247 = vector.shape_cast %246 : vector<1x1x16x128xf32> to vector<1x16x128xf32>
    %248 = arith.mulf %247, %242 : vector<1x16x128xf32>
    %249 = vector.extract_strided_slice %163 {offsets = [0, 9, 0, 0], sizes = [1, 1, 16, 128], strides = [1, 1, 1, 1]} : vector<1x16x16x128xf32> to vector<1x1x16x128xf32>
    %250 = vector.shape_cast %249 : vector<1x1x16x128xf32> to vector<1x16x128xf32>
    %251 = arith.addf %248, %250 : vector<1x16x128xf32>
    %c9 = arith.constant 9 : index
    %c0_136 = arith.constant 0 : index
    %c0_137 = arith.constant 0 : index
    %c0_138 = arith.constant 0 : index
    %252 = vector.load %arg26[%c9, %c0_136, %c0_137, %c0_138] : memref<16x1x16x128xf32, #tpu.memory_space<vmem>>, vector<1x1x16x128xf32>
    %253 = vector.shape_cast %252 : vector<1x1x16x128xf32> to vector<1x16x128xf32>
    %254 = vector.shape_cast %251 : vector<1x16x128xf32> to vector<1x1x16x128xf32>
    tpu.vector_store %arg26[%c9, %c0_136, %c0_137, %c0_138], %254 {strides = array<i32>} : memref<16x1x16x128xf32, #tpu.memory_space<vmem>>, vector<1x1x16x128xf32>,
    %255 = vector.extract_strided_slice %158 {offsets = [0, 10, 0, 0], sizes = [1, 1, 16, 128], strides = [1, 1, 1, 1]} : vector<1x16x16x128xf32> to vector<1x1x16x128xf32>
    %256 = vector.shape_cast %255 : vector<1x1x16x128xf32> to vector<1x16x128xf32>
    %257 = arith.mulf %256, %251 : vector<1x16x128xf32>
    %258 = vector.extract_strided_slice %163 {offsets = [0, 10, 0, 0], sizes = [1, 1, 16, 128], strides = [1, 1, 1, 1]} : vector<1x16x16x128xf32> to vector<1x1x16x128xf32>
    %259 = vector.shape_cast %258 : vector<1x1x16x128xf32> to vector<1x16x128xf32>
    %260 = arith.addf %257, %259 : vector<1x16x128xf32>
    %c10 = arith.constant 10 : index
    %c0_139 = arith.constant 0 : index
    %c0_140 = arith.constant 0 : index
    %c0_141 = arith.constant 0 : index
    %261 = vector.load %arg26[%c10, %c0_139, %c0_140, %c0_141] : memref<16x1x16x128xf32, #tpu.memory_space<vmem>>, vector<1x1x16x128xf32>
    %262 = vector.shape_cast %261 : vector<1x1x16x128xf32> to vector<1x16x128xf32>
    %263 = vector.shape_cast %260 : vector<1x16x128xf32> to vector<1x1x16x128xf32>
    tpu.vector_store %arg26[%c10, %c0_139, %c0_140, %c0_141], %263 {strides = array<i32>} : memref<16x1x16x128xf32, #tpu.memory_space<vmem>>, vector<1x1x16x128xf32>,
    %264 = vector.extract_strided_slice %158 {offsets = [0, 11, 0, 0], sizes = [1, 1, 16, 128], strides = [1, 1, 1, 1]} : vector<1x16x16x128xf32> to vector<1x1x16x128xf32>
    %265 = vector.shape_cast %264 : vector<1x1x16x128xf32> to vector<1x16x128xf32>
    %266 = arith.mulf %265, %260 : vector<1x16x128xf32>
    %267 = vector.extract_strided_slice %163 {offsets = [0, 11, 0, 0], sizes = [1, 1, 16, 128], strides = [1, 1, 1, 1]} : vector<1x16x16x128xf32> to vector<1x1x16x128xf32>
    %268 = vector.shape_cast %267 : vector<1x1x16x128xf32> to vector<1x16x128xf32>
    %269 = arith.addf %266, %268 : vector<1x16x128xf32>
    %c11 = arith.constant 11 : index
    %c0_142 = arith.constant 0 : index
    %c0_143 = arith.constant 0 : index
    %c0_144 = arith.constant 0 : index
    %270 = vector.load %arg26[%c11, %c0_142, %c0_143, %c0_144] : memref<16x1x16x128xf32, #tpu.memory_space<vmem>>, vector<1x1x16x128xf32>
    %271 = vector.shape_cast %270 : vector<1x1x16x128xf32> to vector<1x16x128xf32>
    %272 = vector.shape_cast %269 : vector<1x16x128xf32> to vector<1x1x16x128xf32>
    tpu.vector_store %arg26[%c11, %c0_142, %c0_143, %c0_144], %272 {strides = array<i32>} : memref<16x1x16x128xf32, #tpu.memory_space<vmem>>, vector<1x1x16x128xf32>,
    %273 = vector.extract_strided_slice %158 {offsets = [0, 12, 0, 0], sizes = [1, 1, 16, 128], strides = [1, 1, 1, 1]} : vector<1x16x16x128xf32> to vector<1x1x16x128xf32>
    %274 = vector.shape_cast %273 : vector<1x1x16x128xf32> to vector<1x16x128xf32>
    %275 = arith.mulf %274, %269 : vector<1x16x128xf32>
    %276 = vector.extract_strided_slice %163 {offsets = [0, 12, 0, 0], sizes = [1, 1, 16, 128], strides = [1, 1, 1, 1]} : vector<1x16x16x128xf32> to vector<1x1x16x128xf32>
    %277 = vector.shape_cast %276 : vector<1x1x16x128xf32> to vector<1x16x128xf32>
    %278 = arith.addf %275, %277 : vector<1x16x128xf32>
    %c12 = arith.constant 12 : index
    %c0_145 = arith.constant 0 : index
    %c0_146 = arith.constant 0 : index
    %c0_147 = arith.constant 0 : index
    %279 = vector.load %arg26[%c12, %c0_145, %c0_146, %c0_147] : memref<16x1x16x128xf32, #tpu.memory_space<vmem>>, vector<1x1x16x128xf32>
    %280 = vector.shape_cast %279 : vector<1x1x16x128xf32> to vector<1x16x128xf32>
    %281 = vector.shape_cast %278 : vector<1x16x128xf32> to vector<1x1x16x128xf32>
    tpu.vector_store %arg26[%c12, %c0_145, %c0_146, %c0_147], %281 {strides = array<i32>} : memref<16x1x16x128xf32, #tpu.memory_space<vmem>>, vector<1x1x16x128xf32>,
    %282 = vector.extract_strided_slice %158 {offsets = [0, 13, 0, 0], sizes = [1, 1, 16, 128], strides = [1, 1, 1, 1]} : vector<1x16x16x128xf32> to vector<1x1x16x128xf32>
    %283 = vector.shape_cast %282 : vector<1x1x16x128xf32> to vector<1x16x128xf32>
    %284 = arith.mulf %283, %278 : vector<1x16x128xf32>
    %285 = vector.extract_strided_slice %163 {offsets = [0, 13, 0, 0], sizes = [1, 1, 16, 128], strides = [1, 1, 1, 1]} : vector<1x16x16x128xf32> to vector<1x1x16x128xf32>
    %286 = vector.shape_cast %285 : vector<1x1x16x128xf32> to vector<1x16x128xf32>
    %287 = arith.addf %284, %286 : vector<1x16x128xf32>
    %c13 = arith.constant 13 : index
    %c0_148 = arith.constant 0 : index
    %c0_149 = arith.constant 0 : index
    %c0_150 = arith.constant 0 : index
    %288 = vector.load %arg26[%c13, %c0_148, %c0_149, %c0_150] : memref<16x1x16x128xf32, #tpu.memory_space<vmem>>, vector<1x1x16x128xf32>
    %289 = vector.shape_cast %288 : vector<1x1x16x128xf32> to vector<1x16x128xf32>
    %290 = vector.shape_cast %287 : vector<1x16x128xf32> to vector<1x1x16x128xf32>
    tpu.vector_store %arg26[%c13, %c0_148, %c0_149, %c0_150], %290 {strides = array<i32>} : memref<16x1x16x128xf32, #tpu.memory_space<vmem>>, vector<1x1x16x128xf32>,
    %291 = vector.extract_strided_slice %158 {offsets = [0, 14, 0, 0], sizes = [1, 1, 16, 128], strides = [1, 1, 1, 1]} : vector<1x16x16x128xf32> to vector<1x1x16x128xf32>
    %292 = vector.shape_cast %291 : vector<1x1x16x128xf32> to vector<1x16x128xf32>
    %293 = arith.mulf %292, %287 : vector<1x16x128xf32>
    %294 = vector.extract_strided_slice %163 {offsets = [0, 14, 0, 0], sizes = [1, 1, 16, 128], strides = [1, 1, 1, 1]} : vector<1x16x16x128xf32> to vector<1x1x16x128xf32>
    %295 = vector.shape_cast %294 : vector<1x1x16x128xf32> to vector<1x16x128xf32>
    %296 = arith.addf %293, %295 : vector<1x16x128xf32>
    %c14 = arith.constant 14 : index
    %c0_151 = arith.constant 0 : index
    %c0_152 = arith.constant 0 : index
    %c0_153 = arith.constant 0 : index
    %297 = vector.load %arg26[%c14, %c0_151, %c0_152, %c0_153] : memref<16x1x16x128xf32, #tpu.memory_space<vmem>>, vector<1x1x16x128xf32>
    %298 = vector.shape_cast %297 : vector<1x1x16x128xf32> to vector<1x16x128xf32>
    %299 = vector.shape_cast %296 : vector<1x16x128xf32> to vector<1x1x16x128xf32>
    tpu.vector_store %arg26[%c14, %c0_151, %c0_152, %c0_153], %299 {strides = array<i32>} : memref<16x1x16x128xf32, #tpu.memory_space<vmem>>, vector<1x1x16x128xf32>,
    %300 = vector.extract_strided_slice %158 {offsets = [0, 15, 0, 0], sizes = [1, 1, 16, 128], strides = [1, 1, 1, 1]} : vector<1x16x16x128xf32> to vector<1x1x16x128xf32>
    %301 = vector.shape_cast %300 : vector<1x1x16x128xf32> to vector<1x16x128xf32>
    %302 = arith.mulf %301, %296 : vector<1x16x128xf32>
    %303 = vector.extract_strided_slice %163 {offsets = [0, 15, 0, 0], sizes = [1, 1, 16, 128], strides = [1, 1, 1, 1]} : vector<1x16x16x128xf32> to vector<1x1x16x128xf32>
    %304 = vector.shape_cast %303 : vector<1x1x16x128xf32> to vector<1x16x128xf32>
    %305 = arith.addf %302, %304 : vector<1x16x128xf32>
    %c15 = arith.constant 15 : index
    %c0_154 = arith.constant 0 : index
    %c0_155 = arith.constant 0 : index
    %c0_156 = arith.constant 0 : index
    %306 = vector.load %arg26[%c15, %c0_154, %c0_155, %c0_156] : memref<16x1x16x128xf32, #tpu.memory_space<vmem>>, vector<1x1x16x128xf32>
    %307 = vector.shape_cast %306 : vector<1x1x16x128xf32> to vector<1x16x128xf32>
    %308 = vector.shape_cast %305 : vector<1x16x128xf32> to vector<1x1x16x128xf32>
    tpu.vector_store %arg26[%c15, %c0_154, %c0_155, %c0_156], %308 {strides = array<i32>} : memref<16x1x16x128xf32, #tpu.memory_space<vmem>>, vector<1x1x16x128xf32>,
    %c0_157 = arith.constant 0 : index
    %c0_158 = arith.constant 0 : index
    %c0_159 = arith.constant 0 : index
    %c0_160 = arith.constant 0 : index
    %309 = vector.load %arg26[%c0_157, %c0_158, %c0_159, %c0_160] : memref<16x1x16x128xf32, #tpu.memory_space<vmem>>, vector<16x1x16x128xf32>
    %c0_161 = arith.constant 0 : index
    %c0_162 = arith.constant 0 : index
    %c0_163 = arith.constant 0 : index
    %310 = vector.load %arg17[%c0_161, %c0_162, %c0_163] : memref<3x1x128xf32, #tpu.memory_space<vmem>>, vector<1x1x128xf32>
    %311 = vector.shape_cast %310 : vector<1x1x128xf32> to vector<1x128xf32>
    %312 = vector.shape_cast %311 : vector<1x128xf32> to vector<1x1x128xf32>
    %313 = vector.broadcast %312 : vector<1x1x128xf32> to vector<1x16x128xf32>
    %314 = arith.mulf %122, %313 : vector<1x16x128xf32>
    %315 = vector.shape_cast %132 : vector<1x16x16xf32> to vector<16x16xf32>
    %316 = vector.shape_cast %315 : vector<16x16xf32> to vector<16x16x1xf32>
    %317 = vector.shape_cast %309 : vector<16x1x16x128xf32> to vector<16x16x128xf32>
    %318 = vector.broadcast %316 : vector<16x16x1xf32> to vector<16x16x128xf32>
    %319 = arith.mulf %318, %317 : vector<16x16x128xf32>
    %cst_164 = arith.constant dense<0.000000e+00> : vector<16x128xf32>
    %320 = vector.multi_reduction <add>, %319, %cst_164 [1] : vector<16x16x128xf32> to vector<16x128xf32>
    %321 = vector.shape_cast %320 : vector<16x128xf32> to vector<1x16x128xf32>
    %322 = arith.addf %314, %321 : vector<1x16x128xf32>
    %323 = vector.shape_cast %322 : vector<1x16x128xf32> to vector<16x128xf32>
    %cst_165 = arith.constant 0.000000e+00 : f32
    %324 = vector.broadcast %cst_165 : f32 to vector<16x128xf32>
    %325 = arith.subf %324, %80 : vector<16x128xf32>
    %326 = math.exp %325 : vector<16x128xf32>
    %cst_166 = arith.constant 1.000000e+00 : f32
    %327 = vector.broadcast %cst_166 : f32 to vector<16x128xf32>
    %328 = arith.addf %327, %326 : vector<16x128xf32>
    %cst_167 = arith.constant 1.000000e+00 : f32
    %329 = vector.broadcast %cst_167 : f32 to vector<16x128xf32>
    %330 = arith.divf %329, %328 : vector<16x128xf32>
    %331 = arith.mulf %80, %330 : vector<16x128xf32>
    %332 = arith.mulf %323, %331 : vector<16x128xf32>
    %333 = arith.truncf %332 : vector<16x128xf32> to vector<16x128xbf16>
    %c0_168 = arith.constant 0 : index
    %c0_169 = arith.constant 0 : index
    %c0_170 = arith.constant 0 : index
    %334 = vector.load %arg18[%c0_168, %c0_169, %c0_170] : memref<3x128x64xbf16, #tpu.memory_space<vmem>>, vector<1x128x64xbf16>
    %335 = vector.shape_cast %334 : vector<1x128x64xbf16> to vector<128x64xbf16>
    %cst_171 = arith.constant dense<0.000000e+00> : vector<16x64xf32>
    %336 = tpu.matmul %333, %335, %cst_171 {dimension_numbers = #tpu.dot_dimension_numbers<[1], [0], [0], [1], [0, 0, 1, 1], [], []>} : vector<16x128xbf16>, vector<128x64xbf16>, vector<16x64xf32> -> vector<16x64xf32>
    %cst_172 = arith.constant dense<0.000000e+00> : vector<16xf32>
    %337 = vector.multi_reduction <add>, %336, %cst_172 [1] : vector<16x64xf32> to vector<16xf32>
    %338 = vector.shape_cast %337 : vector<16xf32> to vector<16x1xf32>
    %cst_173 = arith.constant 6.400000e+01 : f32
    %339 = vector.broadcast %cst_173 : f32 to vector<16x1xf32>
    %340 = arith.divf %338, %339 : vector<16x1xf32>
    %341 = vector.broadcast %340 : vector<16x1xf32> to vector<16x64xf32>
    %342 = arith.subf %336, %341 : vector<16x64xf32>
    %343 = arith.mulf %342, %342 : vector<16x64xf32>
    %cst_174 = arith.constant dense<0.000000e+00> : vector<16xf32>
    %344 = vector.multi_reduction <add>, %343, %cst_174 [1] : vector<16x64xf32> to vector<16xf32>
    %345 = vector.shape_cast %344 : vector<16xf32> to vector<16x1xf32>
    %cst_175 = arith.constant 6.400000e+01 : f32
    %346 = vector.broadcast %cst_175 : f32 to vector<16x1xf32>
    %347 = arith.divf %345, %346 : vector<16x1xf32>
    %348 = vector.broadcast %340 : vector<16x1xf32> to vector<16x64xf32>
    %349 = arith.subf %336, %348 : vector<16x64xf32>
    %cst_176 = arith.constant 9.99999974E-6 : f32
    %350 = vector.broadcast %cst_176 : f32 to vector<16x1xf32>
    %351 = arith.addf %347, %350 : vector<16x1xf32>
    %352 = math.rsqrt %351 : vector<16x1xf32>
    %353 = vector.broadcast %352 : vector<16x1xf32> to vector<16x64xf32>
    %354 = arith.mulf %349, %353 : vector<16x64xf32>
    %c1_177 = arith.constant 1 : index
    %c0_178 = arith.constant 0 : index
    %c0_179 = arith.constant 0 : index
    %355 = vector.load %arg8[%c1_177, %c0_178, %c0_179] : memref<3x1x64xf32, #tpu.memory_space<vmem>>, vector<1x1x64xf32>
    %356 = vector.shape_cast %355 : vector<1x1x64xf32> to vector<1x64xf32>
    %357 = vector.broadcast %356 : vector<1x64xf32> to vector<16x64xf32>
    %358 = arith.mulf %354, %357 : vector<16x64xf32>
    %c1_180 = arith.constant 1 : index
    %c0_181 = arith.constant 0 : index
    %c0_182 = arith.constant 0 : index
    %359 = vector.load %arg9[%c1_180, %c0_181, %c0_182] : memref<3x1x64xf32, #tpu.memory_space<vmem>>, vector<1x1x64xf32>
    %360 = vector.shape_cast %359 : vector<1x1x64xf32> to vector<1x64xf32>
    %361 = vector.broadcast %360 : vector<1x64xf32> to vector<16x64xf32>
    %362 = arith.addf %358, %361 : vector<16x64xf32>
    %363 = arith.truncf %362 : vector<16x64xf32> to vector<16x64xbf16>
    %c1_183 = arith.constant 1 : index
    %c0_184 = arith.constant 0 : index
    %c0_185 = arith.constant 0 : index
    %364 = vector.load %arg10[%c1_183, %c0_184, %c0_185] : memref<3x64x256xbf16, #tpu.memory_space<vmem>>, vector<1x64x256xbf16>
    %365 = vector.shape_cast %364 : vector<1x64x256xbf16> to vector<64x256xbf16>
    %cst_186 = arith.constant dense<0.000000e+00> : vector<16x256xf32>
    %366 = tpu.matmul %363, %365, %cst_186 {dimension_numbers = #tpu.dot_dimension_numbers<[1], [0], [0], [1], [0, 0, 1, 1], [], []>} : vector<16x64xbf16>, vector<64x256xbf16>, vector<16x256xf32> -> vector<16x256xf32>
    %367 = vector.extract_strided_slice %366 {offsets = [0, 0], sizes = [16, 128], strides = [1, 1]} : vector<16x256xf32> to vector<16x128xf32>
    %368 = vector.extract_strided_slice %366 {offsets = [0, 128], sizes = [16, 128], strides = [1, 1]} : vector<16x256xf32> to vector<16x128xf32>
    %cst_187 = arith.constant 0.000000e+00 : f32
    %369 = vector.broadcast %cst_187 : f32 to vector<1x3x128xf32>
    %c0_188 = arith.constant 0 : index
    %c0_189 = arith.constant 0 : index
    %c0_190 = arith.constant 0 : index
    %370 = vector.load %arg25[%c0_188, %c0_189, %c0_190] : memref<1x19x128xf32, #tpu.memory_space<vmem>>, vector<1x3x128xf32>
    tpu.vector_store %arg25[%c0_188, %c0_189, %c0_190], %369 {strides = array<i32>} : memref<1x19x128xf32, #tpu.memory_space<vmem>>, vector<1x3x128xf32>,
    %371 = vector.shape_cast %367 : vector<16x128xf32> to vector<1x16x128xf32>
    %c0_191 = arith.constant 0 : index
    %c3_192 = arith.constant 3 : index
    %c0_193 = arith.constant 0 : index
    %372 = vector.load %arg25[%c0_191, %c3_192, %c0_193] : memref<1x19x128xf32, #tpu.memory_space<vmem>>, vector<1x16x128xf32>
    tpu.vector_store %arg25[%c0_191, %c3_192, %c0_193], %371 {strides = array<i32>} : memref<1x19x128xf32, #tpu.memory_space<vmem>>, vector<1x16x128xf32>,
    %c1_194 = arith.constant 1 : index
    %c0_195 = arith.constant 0 : index
    %c0_196 = arith.constant 0 : index
    %373 = vector.load %arg11[%c1_194, %c0_195, %c0_196] : memref<3x4x128xf32, #tpu.memory_space<vmem>>, vector<1x4x128xf32>
    %374 = vector.shape_cast %373 : vector<1x4x128xf32> to vector<4x128xf32>
    %c0_197 = arith.constant 0 : index
    %c0_198 = arith.constant 0 : index
    %c0_199 = arith.constant 0 : index
    %375 = vector.load %arg25[%c0_197, %c0_198, %c0_199] : memref<1x19x128xf32, #tpu.memory_space<vmem>>, vector<1x16x128xf32>
    %376 = vector.extract_strided_slice %374 {offsets = [0, 0], sizes = [1, 128], strides = [1, 1]} : vector<4x128xf32> to vector<1x128xf32>
    %377 = vector.shape_cast %376 : vector<1x128xf32> to vector<1x1x128xf32>
    %378 = vector.broadcast %377 : vector<1x1x128xf32> to vector<1x16x128xf32>
    %379 = arith.mulf %375, %378 : vector<1x16x128xf32>
    %c0_200 = arith.constant 0 : index
    %c1_201 = arith.constant 1 : index
    %c0_202 = arith.constant 0 : index
    %380 = vector.load %arg25[%c0_200, %c1_201, %c0_202] : memref<1x19x128xf32, #tpu.memory_space<vmem>>, vector<1x16x128xf32>
    %381 = vector.extract_strided_slice %374 {offsets = [1, 0], sizes = [1, 128], strides = [1, 1]} : vector<4x128xf32> to vector<1x128xf32>
    %382 = vector.shape_cast %381 : vector<1x128xf32> to vector<1x1x128xf32>
    %383 = vector.broadcast %382 : vector<1x1x128xf32> to vector<1x16x128xf32>
    %384 = arith.mulf %380, %383 : vector<1x16x128xf32>
    %385 = arith.addf %379, %384 : vector<1x16x128xf32>
    %c0_203 = arith.constant 0 : index
    %c2_204 = arith.constant 2 : index
    %c0_205 = arith.constant 0 : index
    %386 = vector.load %arg25[%c0_203, %c2_204, %c0_205] : memref<1x19x128xf32, #tpu.memory_space<vmem>>, vector<1x16x128xf32>
    %387 = vector.extract_strided_slice %374 {offsets = [2, 0], sizes = [1, 128], strides = [1, 1]} : vector<4x128xf32> to vector<1x128xf32>
    %388 = vector.shape_cast %387 : vector<1x128xf32> to vector<1x1x128xf32>
    %389 = vector.broadcast %388 : vector<1x1x128xf32> to vector<1x16x128xf32>
    %390 = arith.mulf %386, %389 : vector<1x16x128xf32>
    %391 = arith.addf %385, %390 : vector<1x16x128xf32>
    %c0_206 = arith.constant 0 : index
    %c3_207 = arith.constant 3 : index
    %c0_208 = arith.constant 0 : index
    %392 = vector.load %arg25[%c0_206, %c3_207, %c0_208] : memref<1x19x128xf32, #tpu.memory_space<vmem>>, vector<1x16x128xf32>
    %393 = vector.extract_strided_slice %374 {offsets = [3, 0], sizes = [1, 128], strides = [1, 1]} : vector<4x128xf32> to vector<1x128xf32>
    %394 = vector.shape_cast %393 : vector<1x128xf32> to vector<1x1x128xf32>
    %395 = vector.broadcast %394 : vector<1x1x128xf32> to vector<1x16x128xf32>
    %396 = arith.mulf %392, %395 : vector<1x16x128xf32>
    %397 = arith.addf %391, %396 : vector<1x16x128xf32>
    %c1_209 = arith.constant 1 : index
    %c0_210 = arith.constant 0 : index
    %c0_211 = arith.constant 0 : index
    %398 = vector.load %arg12[%c1_209, %c0_210, %c0_211] : memref<3x1x128xf32, #tpu.memory_space<vmem>>, vector<1x1x128xf32>
    %399 = vector.shape_cast %398 : vector<1x1x128xf32> to vector<1x128xf32>
    %400 = vector.shape_cast %399 : vector<1x128xf32> to vector<1x1x128xf32>
    %401 = vector.broadcast %400 : vector<1x1x128xf32> to vector<1x16x128xf32>
    %402 = arith.addf %397, %401 : vector<1x16x128xf32>
    %cst_212 = arith.constant 0.000000e+00 : f32
    %403 = vector.broadcast %cst_212 : f32 to vector<1x16x128xf32>
    %404 = arith.subf %403, %402 : vector<1x16x128xf32>
    %405 = math.exp %404 : vector<1x16x128xf32>
    %cst_213 = arith.constant 1.000000e+00 : f32
    %406 = vector.broadcast %cst_213 : f32 to vector<1x16x128xf32>
    %407 = arith.addf %406, %405 : vector<1x16x128xf32>
    %cst_214 = arith.constant 1.000000e+00 : f32
    %408 = vector.broadcast %cst_214 : f32 to vector<1x16x128xf32>
    %409 = arith.divf %408, %407 : vector<1x16x128xf32>
    %410 = arith.mulf %402, %409 : vector<1x16x128xf32>
    %411 = vector.shape_cast %410 : vector<1x16x128xf32> to vector<16x128xf32>
    %412 = arith.truncf %411 : vector<16x128xf32> to vector<16x128xbf16>
    %c1_215 = arith.constant 1 : index
    %c0_216 = arith.constant 0 : index
    %c0_217 = arith.constant 0 : index
    %413 = vector.load %arg13[%c1_215, %c0_216, %c0_217] : memref<3x128x48xbf16, #tpu.memory_space<vmem>>, vector<1x128x48xbf16>
    %414 = vector.shape_cast %413 : vector<1x128x48xbf16> to vector<128x48xbf16>
    %cst_218 = arith.constant dense<0.000000e+00> : vector<16x48xf32>
    %415 = tpu.matmul %412, %414, %cst_218 {dimension_numbers = #tpu.dot_dimension_numbers<[1], [0], [0], [1], [0, 0, 1, 1], [], []>} : vector<16x128xbf16>, vector<128x48xbf16>, vector<16x48xf32> -> vector<16x48xf32>
    %416 = vector.extract_strided_slice %415 {offsets = [0, 0], sizes = [16, 16], strides = [1, 1]} : vector<16x48xf32> to vector<16x16xf32>
    %417 = vector.extract_strided_slice %415 {offsets = [0, 16], sizes = [16, 16], strides = [1, 1]} : vector<16x48xf32> to vector<16x16xf32>
    %418 = vector.shape_cast %417 : vector<16x16xf32> to vector<1x16x16xf32>
    %419 = vector.extract_strided_slice %415 {offsets = [0, 32], sizes = [16, 16], strides = [1, 1]} : vector<16x48xf32> to vector<16x16xf32>
    %420 = vector.shape_cast %419 : vector<16x16xf32> to vector<1x16x16xf32>
    %421 = arith.truncf %416 : vector<16x16xf32> to vector<16x16xbf16>
    %c1_219 = arith.constant 1 : index
    %c0_220 = arith.constant 0 : index
    %c0_221 = arith.constant 0 : index
    %422 = vector.load %arg14[%c1_219, %c0_220, %c0_221] : memref<3x16x128xbf16, #tpu.memory_space<vmem>>, vector<1x16x128xbf16>
    %423 = vector.shape_cast %422 : vector<1x16x128xbf16> to vector<16x128xbf16>
    %cst_222 = arith.constant dense<0.000000e+00> : vector<16x128xf32>
    %424 = tpu.matmul %421, %423, %cst_222 {dimension_numbers = #tpu.dot_dimension_numbers<[1], [0], [0], [1], [0, 0, 1, 1], [], []>} : vector<16x16xbf16>, vector<16x128xbf16>, vector<16x128xf32> -> vector<16x128xf32>
    %c1_223 = arith.constant 1 : index
    %c0_224 = arith.constant 0 : index
    %c0_225 = arith.constant 0 : index
    %425 = vector.load %arg15[%c1_223, %c0_224, %c0_225] : memref<3x1x128xf32, #tpu.memory_space<vmem>>, vector<1x1x128xf32>
    %426 = vector.shape_cast %425 : vector<1x1x128xf32> to vector<1x128xf32>
    %427 = vector.broadcast %426 : vector<1x128xf32> to vector<16x128xf32>
    %428 = arith.addf %424, %427 : vector<16x128xf32>
    %cst_226 = arith.constant 0.000000e+00 : f32
    %429 = vector.broadcast %cst_226 : f32 to vector<16x128xf32>
    %430 = arith.maximumf %428, %429 : vector<16x128xf32>
    %431 = math.absf %428 : vector<16x128xf32>
    %cst_227 = arith.constant 0.000000e+00 : f32
    %432 = vector.broadcast %cst_227 : f32 to vector<16x128xf32>
    %433 = arith.subf %432, %431 : vector<16x128xf32>
    %434 = math.exp %433 : vector<16x128xf32>
    %435 = math.log1p %434 : vector<16x128xf32>
    %436 = arith.addf %430, %435 : vector<16x128xf32>
    %437 = vector.shape_cast %436 : vector<16x128xf32> to vector<1x16x128xf32>
    %c1_228 = arith.constant 1 : index
    %c0_229 = arith.constant 0 : index
    %c0_230 = arith.constant 0 : index
    %438 = vector.load %arg16[%c1_228, %c0_229, %c0_230] : memref<3x16x128xf32, #tpu.memory_space<vmem>>, vector<1x16x128xf32>
    %439 = vector.shape_cast %438 : vector<1x16x128xf32> to vector<16x128xf32>
    %440 = arith.mulf %437, %410 : vector<1x16x128xf32>
    %441 = vector.shape_cast %437 : vector<1x16x128xf32> to vector<1x16x1x128xf32>
    %442 = vector.shape_cast %439 : vector<16x128xf32> to vector<1x1x16x128xf32>
    %443 = vector.broadcast %441 : vector<1x16x1x128xf32> to vector<1x16x16x128xf32>
    %444 = vector.broadcast %442 : vector<1x1x16x128xf32> to vector<1x16x16x128xf32>
    %445 = arith.mulf %443, %444 : vector<1x16x16x128xf32>
    %446 = math.exp %445 : vector<1x16x16x128xf32>
    %447 = vector.shape_cast %418 : vector<1x16x16xf32> to vector<1x16x16x1xf32>
    %448 = vector.shape_cast %440 : vector<1x16x128xf32> to vector<1x16x1x128xf32>
    %449 = vector.broadcast %447 : vector<1x16x16x1xf32> to vector<1x16x16x128xf32>
    %450 = vector.broadcast %448 : vector<1x16x1x128xf32> to vector<1x16x16x128xf32>
    %451 = arith.mulf %449, %450 : vector<1x16x16x128xf32>
    %cst_231 = arith.constant 0.000000e+00 : f32
    %452 = vector.broadcast %cst_231 : f32 to vector<1x16x128xf32>
    %453 = vector.extract_strided_slice %446 {offsets = [0, 0, 0, 0], sizes = [1, 1, 16, 128], strides = [1, 1, 1, 1]} : vector<1x16x16x128xf32> to vector<1x1x16x128xf32>
    %454 = vector.shape_cast %453 : vector<1x1x16x128xf32> to vector<1x16x128xf32>
    %455 = arith.mulf %454, %452 : vector<1x16x128xf32>
    %456 = vector.extract_strided_slice %451 {offsets = [0, 0, 0, 0], sizes = [1, 1, 16, 128], strides = [1, 1, 1, 1]} : vector<1x16x16x128xf32> to vector<1x1x16x128xf32>
    %457 = vector.shape_cast %456 : vector<1x1x16x128xf32> to vector<1x16x128xf32>
    %458 = arith.addf %455, %457 : vector<1x16x128xf32>
    %c0_232 = arith.constant 0 : index
    %c0_233 = arith.constant 0 : index
    %c0_234 = arith.constant 0 : index
    %c0_235 = arith.constant 0 : index
    %459 = vector.load %arg26[%c0_232, %c0_233, %c0_234, %c0_235] : memref<16x1x16x128xf32, #tpu.memory_space<vmem>>, vector<1x1x16x128xf32>
    %460 = vector.shape_cast %459 : vector<1x1x16x128xf32> to vector<1x16x128xf32>
    %461 = vector.shape_cast %458 : vector<1x16x128xf32> to vector<1x1x16x128xf32>
    tpu.vector_store %arg26[%c0_232, %c0_233, %c0_234, %c0_235], %461 {strides = array<i32>} : memref<16x1x16x128xf32, #tpu.memory_space<vmem>>, vector<1x1x16x128xf32>,
    %462 = vector.extract_strided_slice %446 {offsets = [0, 1, 0, 0], sizes = [1, 1, 16, 128], strides = [1, 1, 1, 1]} : vector<1x16x16x128xf32> to vector<1x1x16x128xf32>
    %463 = vector.shape_cast %462 : vector<1x1x16x128xf32> to vector<1x16x128xf32>
    %464 = arith.mulf %463, %458 : vector<1x16x128xf32>
    %465 = vector.extract_strided_slice %451 {offsets = [0, 1, 0, 0], sizes = [1, 1, 16, 128], strides = [1, 1, 1, 1]} : vector<1x16x16x128xf32> to vector<1x1x16x128xf32>
    %466 = vector.shape_cast %465 : vector<1x1x16x128xf32> to vector<1x16x128xf32>
    %467 = arith.addf %464, %466 : vector<1x16x128xf32>
    %c1_236 = arith.constant 1 : index
    %c0_237 = arith.constant 0 : index
    %c0_238 = arith.constant 0 : index
    %c0_239 = arith.constant 0 : index
    %468 = vector.load %arg26[%c1_236, %c0_237, %c0_238, %c0_239] : memref<16x1x16x128xf32, #tpu.memory_space<vmem>>, vector<1x1x16x128xf32>
    %469 = vector.shape_cast %468 : vector<1x1x16x128xf32> to vector<1x16x128xf32>
    %470 = vector.shape_cast %467 : vector<1x16x128xf32> to vector<1x1x16x128xf32>
    tpu.vector_store %arg26[%c1_236, %c0_237, %c0_238, %c0_239], %470 {strides = array<i32>} : memref<16x1x16x128xf32, #tpu.memory_space<vmem>>, vector<1x1x16x128xf32>,
    %471 = vector.extract_strided_slice %446 {offsets = [0, 2, 0, 0], sizes = [1, 1, 16, 128], strides = [1, 1, 1, 1]} : vector<1x16x16x128xf32> to vector<1x1x16x128xf32>
    %472 = vector.shape_cast %471 : vector<1x1x16x128xf32> to vector<1x16x128xf32>
    %473 = arith.mulf %472, %467 : vector<1x16x128xf32>
    %474 = vector.extract_strided_slice %451 {offsets = [0, 2, 0, 0], sizes = [1, 1, 16, 128], strides = [1, 1, 1, 1]} : vector<1x16x16x128xf32> to vector<1x1x16x128xf32>
    %475 = vector.shape_cast %474 : vector<1x1x16x128xf32> to vector<1x16x128xf32>
    %476 = arith.addf %473, %475 : vector<1x16x128xf32>
    %c2_240 = arith.constant 2 : index
    %c0_241 = arith.constant 0 : index
    %c0_242 = arith.constant 0 : index
    %c0_243 = arith.constant 0 : index
    %477 = vector.load %arg26[%c2_240, %c0_241, %c0_242, %c0_243] : memref<16x1x16x128xf32, #tpu.memory_space<vmem>>, vector<1x1x16x128xf32>
    %478 = vector.shape_cast %477 : vector<1x1x16x128xf32> to vector<1x16x128xf32>
    %479 = vector.shape_cast %476 : vector<1x16x128xf32> to vector<1x1x16x128xf32>
    tpu.vector_store %arg26[%c2_240, %c0_241, %c0_242, %c0_243], %479 {strides = array<i32>} : memref<16x1x16x128xf32, #tpu.memory_space<vmem>>, vector<1x1x16x128xf32>,
    %480 = vector.extract_strided_slice %446 {offsets = [0, 3, 0, 0], sizes = [1, 1, 16, 128], strides = [1, 1, 1, 1]} : vector<1x16x16x128xf32> to vector<1x1x16x128xf32>
    %481 = vector.shape_cast %480 : vector<1x1x16x128xf32> to vector<1x16x128xf32>
    %482 = arith.mulf %481, %476 : vector<1x16x128xf32>
    %483 = vector.extract_strided_slice %451 {offsets = [0, 3, 0, 0], sizes = [1, 1, 16, 128], strides = [1, 1, 1, 1]} : vector<1x16x16x128xf32> to vector<1x1x16x128xf32>
    %484 = vector.shape_cast %483 : vector<1x1x16x128xf32> to vector<1x16x128xf32>
    %485 = arith.addf %482, %484 : vector<1x16x128xf32>
    %c3_244 = arith.constant 3 : index
    %c0_245 = arith.constant 0 : index
    %c0_246 = arith.constant 0 : index
    %c0_247 = arith.constant 0 : index
    %486 = vector.load %arg26[%c3_244, %c0_245, %c0_246, %c0_247] : memref<16x1x16x128xf32, #tpu.memory_space<vmem>>, vector<1x1x16x128xf32>
    %487 = vector.shape_cast %486 : vector<1x1x16x128xf32> to vector<1x16x128xf32>
    %488 = vector.shape_cast %485 : vector<1x16x128xf32> to vector<1x1x16x128xf32>
    tpu.vector_store %arg26[%c3_244, %c0_245, %c0_246, %c0_247], %488 {strides = array<i32>} : memref<16x1x16x128xf32, #tpu.memory_space<vmem>>, vector<1x1x16x128xf32>,
    %489 = vector.extract_strided_slice %446 {offsets = [0, 4, 0, 0], sizes = [1, 1, 16, 128], strides = [1, 1, 1, 1]} : vector<1x16x16x128xf32> to vector<1x1x16x128xf32>
    %490 = vector.shape_cast %489 : vector<1x1x16x128xf32> to vector<1x16x128xf32>
    %491 = arith.mulf %490, %485 : vector<1x16x128xf32>
    %492 = vector.extract_strided_slice %451 {offsets = [0, 4, 0, 0], sizes = [1, 1, 16, 128], strides = [1, 1, 1, 1]} : vector<1x16x16x128xf32> to vector<1x1x16x128xf32>
    %493 = vector.shape_cast %492 : vector<1x1x16x128xf32> to vector<1x16x128xf32>
    %494 = arith.addf %491, %493 : vector<1x16x128xf32>
    %c4_248 = arith.constant 4 : index
    %c0_249 = arith.constant 0 : index
    %c0_250 = arith.constant 0 : index
    %c0_251 = arith.constant 0 : index
    %495 = vector.load %arg26[%c4_248, %c0_249, %c0_250, %c0_251] : memref<16x1x16x128xf32, #tpu.memory_space<vmem>>, vector<1x1x16x128xf32>
    %496 = vector.shape_cast %495 : vector<1x1x16x128xf32> to vector<1x16x128xf32>
    %497 = vector.shape_cast %494 : vector<1x16x128xf32> to vector<1x1x16x128xf32>
    tpu.vector_store %arg26[%c4_248, %c0_249, %c0_250, %c0_251], %497 {strides = array<i32>} : memref<16x1x16x128xf32, #tpu.memory_space<vmem>>, vector<1x1x16x128xf32>,
    %498 = vector.extract_strided_slice %446 {offsets = [0, 5, 0, 0], sizes = [1, 1, 16, 128], strides = [1, 1, 1, 1]} : vector<1x16x16x128xf32> to vector<1x1x16x128xf32>
    %499 = vector.shape_cast %498 : vector<1x1x16x128xf32> to vector<1x16x128xf32>
    %500 = arith.mulf %499, %494 : vector<1x16x128xf32>
    %501 = vector.extract_strided_slice %451 {offsets = [0, 5, 0, 0], sizes = [1, 1, 16, 128], strides = [1, 1, 1, 1]} : vector<1x16x16x128xf32> to vector<1x1x16x128xf32>
    %502 = vector.shape_cast %501 : vector<1x1x16x128xf32> to vector<1x16x128xf32>
    %503 = arith.addf %500, %502 : vector<1x16x128xf32>
    %c5_252 = arith.constant 5 : index
    %c0_253 = arith.constant 0 : index
    %c0_254 = arith.constant 0 : index
    %c0_255 = arith.constant 0 : index
    %504 = vector.load %arg26[%c5_252, %c0_253, %c0_254, %c0_255] : memref<16x1x16x128xf32, #tpu.memory_space<vmem>>, vector<1x1x16x128xf32>
    %505 = vector.shape_cast %504 : vector<1x1x16x128xf32> to vector<1x16x128xf32>
    %506 = vector.shape_cast %503 : vector<1x16x128xf32> to vector<1x1x16x128xf32>
    tpu.vector_store %arg26[%c5_252, %c0_253, %c0_254, %c0_255], %506 {strides = array<i32>} : memref<16x1x16x128xf32, #tpu.memory_space<vmem>>, vector<1x1x16x128xf32>,
    %507 = vector.extract_strided_slice %446 {offsets = [0, 6, 0, 0], sizes = [1, 1, 16, 128], strides = [1, 1, 1, 1]} : vector<1x16x16x128xf32> to vector<1x1x16x128xf32>
    %508 = vector.shape_cast %507 : vector<1x1x16x128xf32> to vector<1x16x128xf32>
    %509 = arith.mulf %508, %503 : vector<1x16x128xf32>
    %510 = vector.extract_strided_slice %451 {offsets = [0, 6, 0, 0], sizes = [1, 1, 16, 128], strides = [1, 1, 1, 1]} : vector<1x16x16x128xf32> to vector<1x1x16x128xf32>
    %511 = vector.shape_cast %510 : vector<1x1x16x128xf32> to vector<1x16x128xf32>
    %512 = arith.addf %509, %511 : vector<1x16x128xf32>
    %c6_256 = arith.constant 6 : index
    %c0_257 = arith.constant 0 : index
    %c0_258 = arith.constant 0 : index
    %c0_259 = arith.constant 0 : index
    %513 = vector.load %arg26[%c6_256, %c0_257, %c0_258, %c0_259] : memref<16x1x16x128xf32, #tpu.memory_space<vmem>>, vector<1x1x16x128xf32>
    %514 = vector.shape_cast %513 : vector<1x1x16x128xf32> to vector<1x16x128xf32>
    %515 = vector.shape_cast %512 : vector<1x16x128xf32> to vector<1x1x16x128xf32>
    tpu.vector_store %arg26[%c6_256, %c0_257, %c0_258, %c0_259], %515 {strides = array<i32>} : memref<16x1x16x128xf32, #tpu.memory_space<vmem>>, vector<1x1x16x128xf32>,
    %516 = vector.extract_strided_slice %446 {offsets = [0, 7, 0, 0], sizes = [1, 1, 16, 128], strides = [1, 1, 1, 1]} : vector<1x16x16x128xf32> to vector<1x1x16x128xf32>
    %517 = vector.shape_cast %516 : vector<1x1x16x128xf32> to vector<1x16x128xf32>
    %518 = arith.mulf %517, %512 : vector<1x16x128xf32>
    %519 = vector.extract_strided_slice %451 {offsets = [0, 7, 0, 0], sizes = [1, 1, 16, 128], strides = [1, 1, 1, 1]} : vector<1x16x16x128xf32> to vector<1x1x16x128xf32>
    %520 = vector.shape_cast %519 : vector<1x1x16x128xf32> to vector<1x16x128xf32>
    %521 = arith.addf %518, %520 : vector<1x16x128xf32>
    %c7_260 = arith.constant 7 : index
    %c0_261 = arith.constant 0 : index
    %c0_262 = arith.constant 0 : index
    %c0_263 = arith.constant 0 : index
    %522 = vector.load %arg26[%c7_260, %c0_261, %c0_262, %c0_263] : memref<16x1x16x128xf32, #tpu.memory_space<vmem>>, vector<1x1x16x128xf32>
    %523 = vector.shape_cast %522 : vector<1x1x16x128xf32> to vector<1x16x128xf32>
    %524 = vector.shape_cast %521 : vector<1x16x128xf32> to vector<1x1x16x128xf32>
    tpu.vector_store %arg26[%c7_260, %c0_261, %c0_262, %c0_263], %524 {strides = array<i32>} : memref<16x1x16x128xf32, #tpu.memory_space<vmem>>, vector<1x1x16x128xf32>,
    %525 = vector.extract_strided_slice %446 {offsets = [0, 8, 0, 0], sizes = [1, 1, 16, 128], strides = [1, 1, 1, 1]} : vector<1x16x16x128xf32> to vector<1x1x16x128xf32>
    %526 = vector.shape_cast %525 : vector<1x1x16x128xf32> to vector<1x16x128xf32>
    %527 = arith.mulf %526, %521 : vector<1x16x128xf32>
    %528 = vector.extract_strided_slice %451 {offsets = [0, 8, 0, 0], sizes = [1, 1, 16, 128], strides = [1, 1, 1, 1]} : vector<1x16x16x128xf32> to vector<1x1x16x128xf32>
    %529 = vector.shape_cast %528 : vector<1x1x16x128xf32> to vector<1x16x128xf32>
    %530 = arith.addf %527, %529 : vector<1x16x128xf32>
    %c8_264 = arith.constant 8 : index
    %c0_265 = arith.constant 0 : index
    %c0_266 = arith.constant 0 : index
    %c0_267 = arith.constant 0 : index
    %531 = vector.load %arg26[%c8_264, %c0_265, %c0_266, %c0_267] : memref<16x1x16x128xf32, #tpu.memory_space<vmem>>, vector<1x1x16x128xf32>
    %532 = vector.shape_cast %531 : vector<1x1x16x128xf32> to vector<1x16x128xf32>
    %533 = vector.shape_cast %530 : vector<1x16x128xf32> to vector<1x1x16x128xf32>
    tpu.vector_store %arg26[%c8_264, %c0_265, %c0_266, %c0_267], %533 {strides = array<i32>} : memref<16x1x16x128xf32, #tpu.memory_space<vmem>>, vector<1x1x16x128xf32>,
    %534 = vector.extract_strided_slice %446 {offsets = [0, 9, 0, 0], sizes = [1, 1, 16, 128], strides = [1, 1, 1, 1]} : vector<1x16x16x128xf32> to vector<1x1x16x128xf32>
    %535 = vector.shape_cast %534 : vector<1x1x16x128xf32> to vector<1x16x128xf32>
    %536 = arith.mulf %535, %530 : vector<1x16x128xf32>
    %537 = vector.extract_strided_slice %451 {offsets = [0, 9, 0, 0], sizes = [1, 1, 16, 128], strides = [1, 1, 1, 1]} : vector<1x16x16x128xf32> to vector<1x1x16x128xf32>
    %538 = vector.shape_cast %537 : vector<1x1x16x128xf32> to vector<1x16x128xf32>
    %539 = arith.addf %536, %538 : vector<1x16x128xf32>
    %c9_268 = arith.constant 9 : index
    %c0_269 = arith.constant 0 : index
    %c0_270 = arith.constant 0 : index
    %c0_271 = arith.constant 0 : index
    %540 = vector.load %arg26[%c9_268, %c0_269, %c0_270, %c0_271] : memref<16x1x16x128xf32, #tpu.memory_space<vmem>>, vector<1x1x16x128xf32>
    %541 = vector.shape_cast %540 : vector<1x1x16x128xf32> to vector<1x16x128xf32>
    %542 = vector.shape_cast %539 : vector<1x16x128xf32> to vector<1x1x16x128xf32>
    tpu.vector_store %arg26[%c9_268, %c0_269, %c0_270, %c0_271], %542 {strides = array<i32>} : memref<16x1x16x128xf32, #tpu.memory_space<vmem>>, vector<1x1x16x128xf32>,
    %543 = vector.extract_strided_slice %446 {offsets = [0, 10, 0, 0], sizes = [1, 1, 16, 128], strides = [1, 1, 1, 1]} : vector<1x16x16x128xf32> to vector<1x1x16x128xf32>
    %544 = vector.shape_cast %543 : vector<1x1x16x128xf32> to vector<1x16x128xf32>
    %545 = arith.mulf %544, %539 : vector<1x16x128xf32>
    %546 = vector.extract_strided_slice %451 {offsets = [0, 10, 0, 0], sizes = [1, 1, 16, 128], strides = [1, 1, 1, 1]} : vector<1x16x16x128xf32> to vector<1x1x16x128xf32>
    %547 = vector.shape_cast %546 : vector<1x1x16x128xf32> to vector<1x16x128xf32>
    %548 = arith.addf %545, %547 : vector<1x16x128xf32>
    %c10_272 = arith.constant 10 : index
    %c0_273 = arith.constant 0 : index
    %c0_274 = arith.constant 0 : index
    %c0_275 = arith.constant 0 : index
    %549 = vector.load %arg26[%c10_272, %c0_273, %c0_274, %c0_275] : memref<16x1x16x128xf32, #tpu.memory_space<vmem>>, vector<1x1x16x128xf32>
    %550 = vector.shape_cast %549 : vector<1x1x16x128xf32> to vector<1x16x128xf32>
    %551 = vector.shape_cast %548 : vector<1x16x128xf32> to vector<1x1x16x128xf32>
    tpu.vector_store %arg26[%c10_272, %c0_273, %c0_274, %c0_275], %551 {strides = array<i32>} : memref<16x1x16x128xf32, #tpu.memory_space<vmem>>, vector<1x1x16x128xf32>,
    %552 = vector.extract_strided_slice %446 {offsets = [0, 11, 0, 0], sizes = [1, 1, 16, 128], strides = [1, 1, 1, 1]} : vector<1x16x16x128xf32> to vector<1x1x16x128xf32>
    %553 = vector.shape_cast %552 : vector<1x1x16x128xf32> to vector<1x16x128xf32>
    %554 = arith.mulf %553, %548 : vector<1x16x128xf32>
    %555 = vector.extract_strided_slice %451 {offsets = [0, 11, 0, 0], sizes = [1, 1, 16, 128], strides = [1, 1, 1, 1]} : vector<1x16x16x128xf32> to vector<1x1x16x128xf32>
    %556 = vector.shape_cast %555 : vector<1x1x16x128xf32> to vector<1x16x128xf32>
    %557 = arith.addf %554, %556 : vector<1x16x128xf32>
    %c11_276 = arith.constant 11 : index
    %c0_277 = arith.constant 0 : index
    %c0_278 = arith.constant 0 : index
    %c0_279 = arith.constant 0 : index
    %558 = vector.load %arg26[%c11_276, %c0_277, %c0_278, %c0_279] : memref<16x1x16x128xf32, #tpu.memory_space<vmem>>, vector<1x1x16x128xf32>
    %559 = vector.shape_cast %558 : vector<1x1x16x128xf32> to vector<1x16x128xf32>
    %560 = vector.shape_cast %557 : vector<1x16x128xf32> to vector<1x1x16x128xf32>
    tpu.vector_store %arg26[%c11_276, %c0_277, %c0_278, %c0_279], %560 {strides = array<i32>} : memref<16x1x16x128xf32, #tpu.memory_space<vmem>>, vector<1x1x16x128xf32>,
    %561 = vector.extract_strided_slice %446 {offsets = [0, 12, 0, 0], sizes = [1, 1, 16, 128], strides = [1, 1, 1, 1]} : vector<1x16x16x128xf32> to vector<1x1x16x128xf32>
    %562 = vector.shape_cast %561 : vector<1x1x16x128xf32> to vector<1x16x128xf32>
    %563 = arith.mulf %562, %557 : vector<1x16x128xf32>
    %564 = vector.extract_strided_slice %451 {offsets = [0, 12, 0, 0], sizes = [1, 1, 16, 128], strides = [1, 1, 1, 1]} : vector<1x16x16x128xf32> to vector<1x1x16x128xf32>
    %565 = vector.shape_cast %564 : vector<1x1x16x128xf32> to vector<1x16x128xf32>
    %566 = arith.addf %563, %565 : vector<1x16x128xf32>
    %c12_280 = arith.constant 12 : index
    %c0_281 = arith.constant 0 : index
    %c0_282 = arith.constant 0 : index
    %c0_283 = arith.constant 0 : index
    %567 = vector.load %arg26[%c12_280, %c0_281, %c0_282, %c0_283] : memref<16x1x16x128xf32, #tpu.memory_space<vmem>>, vector<1x1x16x128xf32>
    %568 = vector.shape_cast %567 : vector<1x1x16x128xf32> to vector<1x16x128xf32>
    %569 = vector.shape_cast %566 : vector<1x16x128xf32> to vector<1x1x16x128xf32>
    tpu.vector_store %arg26[%c12_280, %c0_281, %c0_282, %c0_283], %569 {strides = array<i32>} : memref<16x1x16x128xf32, #tpu.memory_space<vmem>>, vector<1x1x16x128xf32>,
    %570 = vector.extract_strided_slice %446 {offsets = [0, 13, 0, 0], sizes = [1, 1, 16, 128], strides = [1, 1, 1, 1]} : vector<1x16x16x128xf32> to vector<1x1x16x128xf32>
    %571 = vector.shape_cast %570 : vector<1x1x16x128xf32> to vector<1x16x128xf32>
    %572 = arith.mulf %571, %566 : vector<1x16x128xf32>
    %573 = vector.extract_strided_slice %451 {offsets = [0, 13, 0, 0], sizes = [1, 1, 16, 128], strides = [1, 1, 1, 1]} : vector<1x16x16x128xf32> to vector<1x1x16x128xf32>
    %574 = vector.shape_cast %573 : vector<1x1x16x128xf32> to vector<1x16x128xf32>
    %575 = arith.addf %572, %574 : vector<1x16x128xf32>
    %c13_284 = arith.constant 13 : index
    %c0_285 = arith.constant 0 : index
    %c0_286 = arith.constant 0 : index
    %c0_287 = arith.constant 0 : index
    %576 = vector.load %arg26[%c13_284, %c0_285, %c0_286, %c0_287] : memref<16x1x16x128xf32, #tpu.memory_space<vmem>>, vector<1x1x16x128xf32>
    %577 = vector.shape_cast %576 : vector<1x1x16x128xf32> to vector<1x16x128xf32>
    %578 = vector.shape_cast %575 : vector<1x16x128xf32> to vector<1x1x16x128xf32>
    tpu.vector_store %arg26[%c13_284, %c0_285, %c0_286, %c0_287], %578 {strides = array<i32>} : memref<16x1x16x128xf32, #tpu.memory_space<vmem>>, vector<1x1x16x128xf32>,
    %579 = vector.extract_strided_slice %446 {offsets = [0, 14, 0, 0], sizes = [1, 1, 16, 128], strides = [1, 1, 1, 1]} : vector<1x16x16x128xf32> to vector<1x1x16x128xf32>
    %580 = vector.shape_cast %579 : vector<1x1x16x128xf32> to vector<1x16x128xf32>
    %581 = arith.mulf %580, %575 : vector<1x16x128xf32>
    %582 = vector.extract_strided_slice %451 {offsets = [0, 14, 0, 0], sizes = [1, 1, 16, 128], strides = [1, 1, 1, 1]} : vector<1x16x16x128xf32> to vector<1x1x16x128xf32>
    %583 = vector.shape_cast %582 : vector<1x1x16x128xf32> to vector<1x16x128xf32>
    %584 = arith.addf %581, %583 : vector<1x16x128xf32>
    %c14_288 = arith.constant 14 : index
    %c0_289 = arith.constant 0 : index
    %c0_290 = arith.constant 0 : index
    %c0_291 = arith.constant 0 : index
    %585 = vector.load %arg26[%c14_288, %c0_289, %c0_290, %c0_291] : memref<16x1x16x128xf32, #tpu.memory_space<vmem>>, vector<1x1x16x128xf32>
    %586 = vector.shape_cast %585 : vector<1x1x16x128xf32> to vector<1x16x128xf32>
    %587 = vector.shape_cast %584 : vector<1x16x128xf32> to vector<1x1x16x128xf32>
    tpu.vector_store %arg26[%c14_288, %c0_289, %c0_290, %c0_291], %587 {strides = array<i32>} : memref<16x1x16x128xf32, #tpu.memory_space<vmem>>, vector<1x1x16x128xf32>,
    %588 = vector.extract_strided_slice %446 {offsets = [0, 15, 0, 0], sizes = [1, 1, 16, 128], strides = [1, 1, 1, 1]} : vector<1x16x16x128xf32> to vector<1x1x16x128xf32>
    %589 = vector.shape_cast %588 : vector<1x1x16x128xf32> to vector<1x16x128xf32>
    %590 = arith.mulf %589, %584 : vector<1x16x128xf32>
    %591 = vector.extract_strided_slice %451 {offsets = [0, 15, 0, 0], sizes = [1, 1, 16, 128], strides = [1, 1, 1, 1]} : vector<1x16x16x128xf32> to vector<1x1x16x128xf32>
    %592 = vector.shape_cast %591 : vector<1x1x16x128xf32> to vector<1x16x128xf32>
    %593 = arith.addf %590, %592 : vector<1x16x128xf32>
    %c15_292 = arith.constant 15 : index
    %c0_293 = arith.constant 0 : index
    %c0_294 = arith.constant 0 : index
    %c0_295 = arith.constant 0 : index
    %594 = vector.load %arg26[%c15_292, %c0_293, %c0_294, %c0_295] : memref<16x1x16x128xf32, #tpu.memory_space<vmem>>, vector<1x1x16x128xf32>
    %595 = vector.shape_cast %594 : vector<1x1x16x128xf32> to vector<1x16x128xf32>
    %596 = vector.shape_cast %593 : vector<1x16x128xf32> to vector<1x1x16x128xf32>
    tpu.vector_store %arg26[%c15_292, %c0_293, %c0_294, %c0_295], %596 {strides = array<i32>} : memref<16x1x16x128xf32, #tpu.memory_space<vmem>>, vector<1x1x16x128xf32>,
    %c0_296 = arith.constant 0 : index
    %c0_297 = arith.constant 0 : index
    %c0_298 = arith.constant 0 : index
    %c0_299 = arith.constant 0 : index
    %597 = vector.load %arg26[%c0_296, %c0_297, %c0_298, %c0_299] : memref<16x1x16x128xf32, #tpu.memory_space<vmem>>, vector<16x1x16x128xf32>
    %c1_300 = arith.constant 1 : index
    %c0_301 = arith.constant 0 : index
    %c0_302 = arith.constant 0 : index
    %598 = vector.load %arg17[%c1_300, %c0_301, %c0_302] : memref<3x1x128xf32, #tpu.memory_space<vmem>>, vector<1x1x128xf32>
    %599 = vector.shape_cast %598 : vector<1x1x128xf32> to vector<1x128xf32>
    %600 = vector.shape_cast %599 : vector<1x128xf32> to vector<1x1x128xf32>
    %601 = vector.broadcast %600 : vector<1x1x128xf32> to vector<1x16x128xf32>
    %602 = arith.mulf %410, %601 : vector<1x16x128xf32>
    %603 = vector.shape_cast %420 : vector<1x16x16xf32> to vector<16x16xf32>
    %604 = vector.shape_cast %603 : vector<16x16xf32> to vector<16x16x1xf32>
    %605 = vector.shape_cast %597 : vector<16x1x16x128xf32> to vector<16x16x128xf32>
    %606 = vector.broadcast %604 : vector<16x16x1xf32> to vector<16x16x128xf32>
    %607 = arith.mulf %606, %605 : vector<16x16x128xf32>
    %cst_303 = arith.constant dense<0.000000e+00> : vector<16x128xf32>
    %608 = vector.multi_reduction <add>, %607, %cst_303 [1] : vector<16x16x128xf32> to vector<16x128xf32>
    %609 = vector.shape_cast %608 : vector<16x128xf32> to vector<1x16x128xf32>
    %610 = arith.addf %602, %609 : vector<1x16x128xf32>
    %611 = vector.shape_cast %610 : vector<1x16x128xf32> to vector<16x128xf32>
    %cst_304 = arith.constant 0.000000e+00 : f32
    %612 = vector.broadcast %cst_304 : f32 to vector<16x128xf32>
    %613 = arith.subf %612, %368 : vector<16x128xf32>
    %614 = math.exp %613 : vector<16x128xf32>
    %cst_305 = arith.constant 1.000000e+00 : f32
    %615 = vector.broadcast %cst_305 : f32 to vector<16x128xf32>
    %616 = arith.addf %615, %614 : vector<16x128xf32>
    %cst_306 = arith.constant 1.000000e+00 : f32
    %617 = vector.broadcast %cst_306 : f32 to vector<16x128xf32>
    %618 = arith.divf %617, %616 : vector<16x128xf32>
    %619 = arith.mulf %368, %618 : vector<16x128xf32>
    %620 = arith.mulf %611, %619 : vector<16x128xf32>
    %621 = arith.truncf %620 : vector<16x128xf32> to vector<16x128xbf16>
    %c1_307 = arith.constant 1 : index
    %c0_308 = arith.constant 0 : index
    %c0_309 = arith.constant 0 : index
    %622 = vector.load %arg18[%c1_307, %c0_308, %c0_309] : memref<3x128x64xbf16, #tpu.memory_space<vmem>>, vector<1x128x64xbf16>
    %623 = vector.shape_cast %622 : vector<1x128x64xbf16> to vector<128x64xbf16>
    %cst_310 = arith.constant dense<0.000000e+00> : vector<16x64xf32>
    %624 = tpu.matmul %621, %623, %cst_310 {dimension_numbers = #tpu.dot_dimension_numbers<[1], [0], [0], [1], [0, 0, 1, 1], [], []>} : vector<16x128xbf16>, vector<128x64xbf16>, vector<16x64xf32> -> vector<16x64xf32>
    %cst_311 = arith.constant dense<0.000000e+00> : vector<16xf32>
    %625 = vector.multi_reduction <add>, %624, %cst_311 [1] : vector<16x64xf32> to vector<16xf32>
    %626 = vector.shape_cast %625 : vector<16xf32> to vector<16x1xf32>
    %cst_312 = arith.constant 6.400000e+01 : f32
    %627 = vector.broadcast %cst_312 : f32 to vector<16x1xf32>
    %628 = arith.divf %626, %627 : vector<16x1xf32>
    %629 = vector.broadcast %628 : vector<16x1xf32> to vector<16x64xf32>
    %630 = arith.subf %624, %629 : vector<16x64xf32>
    %631 = arith.mulf %630, %630 : vector<16x64xf32>
    %cst_313 = arith.constant dense<0.000000e+00> : vector<16xf32>
    %632 = vector.multi_reduction <add>, %631, %cst_313 [1] : vector<16x64xf32> to vector<16xf32>
    %633 = vector.shape_cast %632 : vector<16xf32> to vector<16x1xf32>
    %cst_314 = arith.constant 6.400000e+01 : f32
    %634 = vector.broadcast %cst_314 : f32 to vector<16x1xf32>
    %635 = arith.divf %633, %634 : vector<16x1xf32>
    %636 = vector.broadcast %628 : vector<16x1xf32> to vector<16x64xf32>
    %637 = arith.subf %624, %636 : vector<16x64xf32>
    %cst_315 = arith.constant 9.99999974E-6 : f32
    %638 = vector.broadcast %cst_315 : f32 to vector<16x1xf32>
    %639 = arith.addf %635, %638 : vector<16x1xf32>
    %640 = math.rsqrt %639 : vector<16x1xf32>
    %641 = vector.broadcast %640 : vector<16x1xf32> to vector<16x64xf32>
    %642 = arith.mulf %637, %641 : vector<16x64xf32>
    %c2_316 = arith.constant 2 : index
    %c0_317 = arith.constant 0 : index
    %c0_318 = arith.constant 0 : index
    %643 = vector.load %arg8[%c2_316, %c0_317, %c0_318] : memref<3x1x64xf32, #tpu.memory_space<vmem>>, vector<1x1x64xf32>
    %644 = vector.shape_cast %643 : vector<1x1x64xf32> to vector<1x64xf32>
    %645 = vector.broadcast %644 : vector<1x64xf32> to vector<16x64xf32>
    %646 = arith.mulf %642, %645 : vector<16x64xf32>
    %c2_319 = arith.constant 2 : index
    %c0_320 = arith.constant 0 : index
    %c0_321 = arith.constant 0 : index
    %647 = vector.load %arg9[%c2_319, %c0_320, %c0_321] : memref<3x1x64xf32, #tpu.memory_space<vmem>>, vector<1x1x64xf32>
    %648 = vector.shape_cast %647 : vector<1x1x64xf32> to vector<1x64xf32>
    %649 = vector.broadcast %648 : vector<1x64xf32> to vector<16x64xf32>
    %650 = arith.addf %646, %649 : vector<16x64xf32>
    %651 = arith.truncf %650 : vector<16x64xf32> to vector<16x64xbf16>
    %c2_322 = arith.constant 2 : index
    %c0_323 = arith.constant 0 : index
    %c0_324 = arith.constant 0 : index
    %652 = vector.load %arg10[%c2_322, %c0_323, %c0_324] : memref<3x64x256xbf16, #tpu.memory_space<vmem>>, vector<1x64x256xbf16>
    %653 = vector.shape_cast %652 : vector<1x64x256xbf16> to vector<64x256xbf16>
    %cst_325 = arith.constant dense<0.000000e+00> : vector<16x256xf32>
    %654 = tpu.matmul %651, %653, %cst_325 {dimension_numbers = #tpu.dot_dimension_numbers<[1], [0], [0], [1], [0, 0, 1, 1], [], []>} : vector<16x64xbf16>, vector<64x256xbf16>, vector<16x256xf32> -> vector<16x256xf32>
    %655 = vector.extract_strided_slice %654 {offsets = [0, 0], sizes = [16, 128], strides = [1, 1]} : vector<16x256xf32> to vector<16x128xf32>
    %656 = vector.extract_strided_slice %654 {offsets = [0, 128], sizes = [16, 128], strides = [1, 1]} : vector<16x256xf32> to vector<16x128xf32>
    %cst_326 = arith.constant 0.000000e+00 : f32
    %657 = vector.broadcast %cst_326 : f32 to vector<1x3x128xf32>
    %c0_327 = arith.constant 0 : index
    %c0_328 = arith.constant 0 : index
    %c0_329 = arith.constant 0 : index
    %658 = vector.load %arg25[%c0_327, %c0_328, %c0_329] : memref<1x19x128xf32, #tpu.memory_space<vmem>>, vector<1x3x128xf32>
    tpu.vector_store %arg25[%c0_327, %c0_328, %c0_329], %657 {strides = array<i32>} : memref<1x19x128xf32, #tpu.memory_space<vmem>>, vector<1x3x128xf32>,
    %659 = vector.shape_cast %655 : vector<16x128xf32> to vector<1x16x128xf32>
    %c0_330 = arith.constant 0 : index
    %c3_331 = arith.constant 3 : index
    %c0_332 = arith.constant 0 : index
    %660 = vector.load %arg25[%c0_330, %c3_331, %c0_332] : memref<1x19x128xf32, #tpu.memory_space<vmem>>, vector<1x16x128xf32>
    tpu.vector_store %arg25[%c0_330, %c3_331, %c0_332], %659 {strides = array<i32>} : memref<1x19x128xf32, #tpu.memory_space<vmem>>, vector<1x16x128xf32>,
    %c2_333 = arith.constant 2 : index
    %c0_334 = arith.constant 0 : index
    %c0_335 = arith.constant 0 : index
    %661 = vector.load %arg11[%c2_333, %c0_334, %c0_335] : memref<3x4x128xf32, #tpu.memory_space<vmem>>, vector<1x4x128xf32>
    %662 = vector.shape_cast %661 : vector<1x4x128xf32> to vector<4x128xf32>
    %c0_336 = arith.constant 0 : index
    %c0_337 = arith.constant 0 : index
    %c0_338 = arith.constant 0 : index
    %663 = vector.load %arg25[%c0_336, %c0_337, %c0_338] : memref<1x19x128xf32, #tpu.memory_space<vmem>>, vector<1x16x128xf32>
    %664 = vector.extract_strided_slice %662 {offsets = [0, 0], sizes = [1, 128], strides = [1, 1]} : vector<4x128xf32> to vector<1x128xf32>
    %665 = vector.shape_cast %664 : vector<1x128xf32> to vector<1x1x128xf32>
    %666 = vector.broadcast %665 : vector<1x1x128xf32> to vector<1x16x128xf32>
    %667 = arith.mulf %663, %666 : vector<1x16x128xf32>
    %c0_339 = arith.constant 0 : index
    %c1_340 = arith.constant 1 : index
    %c0_341 = arith.constant 0 : index
    %668 = vector.load %arg25[%c0_339, %c1_340, %c0_341] : memref<1x19x128xf32, #tpu.memory_space<vmem>>, vector<1x16x128xf32>
    %669 = vector.extract_strided_slice %662 {offsets = [1, 0], sizes = [1, 128], strides = [1, 1]} : vector<4x128xf32> to vector<1x128xf32>
    %670 = vector.shape_cast %669 : vector<1x128xf32> to vector<1x1x128xf32>
    %671 = vector.broadcast %670 : vector<1x1x128xf32> to vector<1x16x128xf32>
    %672 = arith.mulf %668, %671 : vector<1x16x128xf32>
    %673 = arith.addf %667, %672 : vector<1x16x128xf32>
    %c0_342 = arith.constant 0 : index
    %c2_343 = arith.constant 2 : index
    %c0_344 = arith.constant 0 : index
    %674 = vector.load %arg25[%c0_342, %c2_343, %c0_344] : memref<1x19x128xf32, #tpu.memory_space<vmem>>, vector<1x16x128xf32>
    %675 = vector.extract_strided_slice %662 {offsets = [2, 0], sizes = [1, 128], strides = [1, 1]} : vector<4x128xf32> to vector<1x128xf32>
    %676 = vector.shape_cast %675 : vector<1x128xf32> to vector<1x1x128xf32>
    %677 = vector.broadcast %676 : vector<1x1x128xf32> to vector<1x16x128xf32>
    %678 = arith.mulf %674, %677 : vector<1x16x128xf32>
    %679 = arith.addf %673, %678 : vector<1x16x128xf32>
    %c0_345 = arith.constant 0 : index
    %c3_346 = arith.constant 3 : index
    %c0_347 = arith.constant 0 : index
    %680 = vector.load %arg25[%c0_345, %c3_346, %c0_347] : memref<1x19x128xf32, #tpu.memory_space<vmem>>, vector<1x16x128xf32>
    %681 = vector.extract_strided_slice %662 {offsets = [3, 0], sizes = [1, 128], strides = [1, 1]} : vector<4x128xf32> to vector<1x128xf32>
    %682 = vector.shape_cast %681 : vector<1x128xf32> to vector<1x1x128xf32>
    %683 = vector.broadcast %682 : vector<1x1x128xf32> to vector<1x16x128xf32>
    %684 = arith.mulf %680, %683 : vector<1x16x128xf32>
    %685 = arith.addf %679, %684 : vector<1x16x128xf32>
    %c2_348 = arith.constant 2 : index
    %c0_349 = arith.constant 0 : index
    %c0_350 = arith.constant 0 : index
    %686 = vector.load %arg12[%c2_348, %c0_349, %c0_350] : memref<3x1x128xf32, #tpu.memory_space<vmem>>, vector<1x1x128xf32>
    %687 = vector.shape_cast %686 : vector<1x1x128xf32> to vector<1x128xf32>
    %688 = vector.shape_cast %687 : vector<1x128xf32> to vector<1x1x128xf32>
    %689 = vector.broadcast %688 : vector<1x1x128xf32> to vector<1x16x128xf32>
    %690 = arith.addf %685, %689 : vector<1x16x128xf32>
    %cst_351 = arith.constant 0.000000e+00 : f32
    %691 = vector.broadcast %cst_351 : f32 to vector<1x16x128xf32>
    %692 = arith.subf %691, %690 : vector<1x16x128xf32>
    %693 = math.exp %692 : vector<1x16x128xf32>
    %cst_352 = arith.constant 1.000000e+00 : f32
    %694 = vector.broadcast %cst_352 : f32 to vector<1x16x128xf32>
    %695 = arith.addf %694, %693 : vector<1x16x128xf32>
    %cst_353 = arith.constant 1.000000e+00 : f32
    %696 = vector.broadcast %cst_353 : f32 to vector<1x16x128xf32>
    %697 = arith.divf %696, %695 : vector<1x16x128xf32>
    %698 = arith.mulf %690, %697 : vector<1x16x128xf32>
    %699 = vector.shape_cast %698 : vector<1x16x128xf32> to vector<16x128xf32>
    %700 = arith.truncf %699 : vector<16x128xf32> to vector<16x128xbf16>
    %c2_354 = arith.constant 2 : index
    %c0_355 = arith.constant 0 : index
    %c0_356 = arith.constant 0 : index
    %701 = vector.load %arg13[%c2_354, %c0_355, %c0_356] : memref<3x128x48xbf16, #tpu.memory_space<vmem>>, vector<1x128x48xbf16>
    %702 = vector.shape_cast %701 : vector<1x128x48xbf16> to vector<128x48xbf16>
    %cst_357 = arith.constant dense<0.000000e+00> : vector<16x48xf32>
    %703 = tpu.matmul %700, %702, %cst_357 {dimension_numbers = #tpu.dot_dimension_numbers<[1], [0], [0], [1], [0, 0, 1, 1], [], []>} : vector<16x128xbf16>, vector<128x48xbf16>, vector<16x48xf32> -> vector<16x48xf32>
    %704 = vector.extract_strided_slice %703 {offsets = [0, 0], sizes = [16, 16], strides = [1, 1]} : vector<16x48xf32> to vector<16x16xf32>
    %705 = vector.extract_strided_slice %703 {offsets = [0, 16], sizes = [16, 16], strides = [1, 1]} : vector<16x48xf32> to vector<16x16xf32>
    %706 = vector.shape_cast %705 : vector<16x16xf32> to vector<1x16x16xf32>
    %707 = vector.extract_strided_slice %703 {offsets = [0, 32], sizes = [16, 16], strides = [1, 1]} : vector<16x48xf32> to vector<16x16xf32>
    %708 = vector.shape_cast %707 : vector<16x16xf32> to vector<1x16x16xf32>
    %709 = arith.truncf %704 : vector<16x16xf32> to vector<16x16xbf16>
    %c2_358 = arith.constant 2 : index
    %c0_359 = arith.constant 0 : index
    %c0_360 = arith.constant 0 : index
    %710 = vector.load %arg14[%c2_358, %c0_359, %c0_360] : memref<3x16x128xbf16, #tpu.memory_space<vmem>>, vector<1x16x128xbf16>
    %711 = vector.shape_cast %710 : vector<1x16x128xbf16> to vector<16x128xbf16>
    %cst_361 = arith.constant dense<0.000000e+00> : vector<16x128xf32>
    %712 = tpu.matmul %709, %711, %cst_361 {dimension_numbers = #tpu.dot_dimension_numbers<[1], [0], [0], [1], [0, 0, 1, 1], [], []>} : vector<16x16xbf16>, vector<16x128xbf16>, vector<16x128xf32> -> vector<16x128xf32>
    %c2_362 = arith.constant 2 : index
    %c0_363 = arith.constant 0 : index
    %c0_364 = arith.constant 0 : index
    %713 = vector.load %arg15[%c2_362, %c0_363, %c0_364] : memref<3x1x128xf32, #tpu.memory_space<vmem>>, vector<1x1x128xf32>
    %714 = vector.shape_cast %713 : vector<1x1x128xf32> to vector<1x128xf32>
    %715 = vector.broadcast %714 : vector<1x128xf32> to vector<16x128xf32>
    %716 = arith.addf %712, %715 : vector<16x128xf32>
    %cst_365 = arith.constant 0.000000e+00 : f32
    %717 = vector.broadcast %cst_365 : f32 to vector<16x128xf32>
    %718 = arith.maximumf %716, %717 : vector<16x128xf32>
    %719 = math.absf %716 : vector<16x128xf32>
    %cst_366 = arith.constant 0.000000e+00 : f32
    %720 = vector.broadcast %cst_366 : f32 to vector<16x128xf32>
    %721 = arith.subf %720, %719 : vector<16x128xf32>
    %722 = math.exp %721 : vector<16x128xf32>
    %723 = math.log1p %722 : vector<16x128xf32>
    %724 = arith.addf %718, %723 : vector<16x128xf32>
    %725 = vector.shape_cast %724 : vector<16x128xf32> to vector<1x16x128xf32>
    %c2_367 = arith.constant 2 : index
    %c0_368 = arith.constant 0 : index
    %c0_369 = arith.constant 0 : index
    %726 = vector.load %arg16[%c2_367, %c0_368, %c0_369] : memref<3x16x128xf32, #tpu.memory_space<vmem>>, vector<1x16x128xf32>
    %727 = vector.shape_cast %726 : vector<1x16x128xf32> to vector<16x128xf32>
    %728 = arith.mulf %725, %698 : vector<1x16x128xf32>
    %729 = vector.shape_cast %725 : vector<1x16x128xf32> to vector<1x16x1x128xf32>
    %730 = vector.shape_cast %727 : vector<16x128xf32> to vector<1x1x16x128xf32>
    %731 = vector.broadcast %729 : vector<1x16x1x128xf32> to vector<1x16x16x128xf32>
    %732 = vector.broadcast %730 : vector<1x1x16x128xf32> to vector<1x16x16x128xf32>
    %733 = arith.mulf %731, %732 : vector<1x16x16x128xf32>
    %734 = math.exp %733 : vector<1x16x16x128xf32>
    %735 = vector.shape_cast %706 : vector<1x16x16xf32> to vector<1x16x16x1xf32>
    %736 = vector.shape_cast %728 : vector<1x16x128xf32> to vector<1x16x1x128xf32>
    %737 = vector.broadcast %735 : vector<1x16x16x1xf32> to vector<1x16x16x128xf32>
    %738 = vector.broadcast %736 : vector<1x16x1x128xf32> to vector<1x16x16x128xf32>
    %739 = arith.mulf %737, %738 : vector<1x16x16x128xf32>
    %cst_370 = arith.constant 0.000000e+00 : f32
    %740 = vector.broadcast %cst_370 : f32 to vector<1x16x128xf32>
    %741 = vector.extract_strided_slice %734 {offsets = [0, 0, 0, 0], sizes = [1, 1, 16, 128], strides = [1, 1, 1, 1]} : vector<1x16x16x128xf32> to vector<1x1x16x128xf32>
    %742 = vector.shape_cast %741 : vector<1x1x16x128xf32> to vector<1x16x128xf32>
    %743 = arith.mulf %742, %740 : vector<1x16x128xf32>
    %744 = vector.extract_strided_slice %739 {offsets = [0, 0, 0, 0], sizes = [1, 1, 16, 128], strides = [1, 1, 1, 1]} : vector<1x16x16x128xf32> to vector<1x1x16x128xf32>
    %745 = vector.shape_cast %744 : vector<1x1x16x128xf32> to vector<1x16x128xf32>
    %746 = arith.addf %743, %745 : vector<1x16x128xf32>
    %c0_371 = arith.constant 0 : index
    %c0_372 = arith.constant 0 : index
    %c0_373 = arith.constant 0 : index
    %c0_374 = arith.constant 0 : index
    %747 = vector.load %arg26[%c0_371, %c0_372, %c0_373, %c0_374] : memref<16x1x16x128xf32, #tpu.memory_space<vmem>>, vector<1x1x16x128xf32>
    %748 = vector.shape_cast %747 : vector<1x1x16x128xf32> to vector<1x16x128xf32>
    %749 = vector.shape_cast %746 : vector<1x16x128xf32> to vector<1x1x16x128xf32>
    tpu.vector_store %arg26[%c0_371, %c0_372, %c0_373, %c0_374], %749 {strides = array<i32>} : memref<16x1x16x128xf32, #tpu.memory_space<vmem>>, vector<1x1x16x128xf32>,
    %750 = vector.extract_strided_slice %734 {offsets = [0, 1, 0, 0], sizes = [1, 1, 16, 128], strides = [1, 1, 1, 1]} : vector<1x16x16x128xf32> to vector<1x1x16x128xf32>
    %751 = vector.shape_cast %750 : vector<1x1x16x128xf32> to vector<1x16x128xf32>
    %752 = arith.mulf %751, %746 : vector<1x16x128xf32>
    %753 = vector.extract_strided_slice %739 {offsets = [0, 1, 0, 0], sizes = [1, 1, 16, 128], strides = [1, 1, 1, 1]} : vector<1x16x16x128xf32> to vector<1x1x16x128xf32>
    %754 = vector.shape_cast %753 : vector<1x1x16x128xf32> to vector<1x16x128xf32>
    %755 = arith.addf %752, %754 : vector<1x16x128xf32>
    %c1_375 = arith.constant 1 : index
    %c0_376 = arith.constant 0 : index
    %c0_377 = arith.constant 0 : index
    %c0_378 = arith.constant 0 : index
    %756 = vector.load %arg26[%c1_375, %c0_376, %c0_377, %c0_378] : memref<16x1x16x128xf32, #tpu.memory_space<vmem>>, vector<1x1x16x128xf32>
    %757 = vector.shape_cast %756 : vector<1x1x16x128xf32> to vector<1x16x128xf32>
    %758 = vector.shape_cast %755 : vector<1x16x128xf32> to vector<1x1x16x128xf32>
    tpu.vector_store %arg26[%c1_375, %c0_376, %c0_377, %c0_378], %758 {strides = array<i32>} : memref<16x1x16x128xf32, #tpu.memory_space<vmem>>, vector<1x1x16x128xf32>,
    %759 = vector.extract_strided_slice %734 {offsets = [0, 2, 0, 0], sizes = [1, 1, 16, 128], strides = [1, 1, 1, 1]} : vector<1x16x16x128xf32> to vector<1x1x16x128xf32>
    %760 = vector.shape_cast %759 : vector<1x1x16x128xf32> to vector<1x16x128xf32>
    %761 = arith.mulf %760, %755 : vector<1x16x128xf32>
    %762 = vector.extract_strided_slice %739 {offsets = [0, 2, 0, 0], sizes = [1, 1, 16, 128], strides = [1, 1, 1, 1]} : vector<1x16x16x128xf32> to vector<1x1x16x128xf32>
    %763 = vector.shape_cast %762 : vector<1x1x16x128xf32> to vector<1x16x128xf32>
    %764 = arith.addf %761, %763 : vector<1x16x128xf32>
    %c2_379 = arith.constant 2 : index
    %c0_380 = arith.constant 0 : index
    %c0_381 = arith.constant 0 : index
    %c0_382 = arith.constant 0 : index
    %765 = vector.load %arg26[%c2_379, %c0_380, %c0_381, %c0_382] : memref<16x1x16x128xf32, #tpu.memory_space<vmem>>, vector<1x1x16x128xf32>
    %766 = vector.shape_cast %765 : vector<1x1x16x128xf32> to vector<1x16x128xf32>
    %767 = vector.shape_cast %764 : vector<1x16x128xf32> to vector<1x1x16x128xf32>
    tpu.vector_store %arg26[%c2_379, %c0_380, %c0_381, %c0_382], %767 {strides = array<i32>} : memref<16x1x16x128xf32, #tpu.memory_space<vmem>>, vector<1x1x16x128xf32>,
    %768 = vector.extract_strided_slice %734 {offsets = [0, 3, 0, 0], sizes = [1, 1, 16, 128], strides = [1, 1, 1, 1]} : vector<1x16x16x128xf32> to vector<1x1x16x128xf32>
    %769 = vector.shape_cast %768 : vector<1x1x16x128xf32> to vector<1x16x128xf32>
    %770 = arith.mulf %769, %764 : vector<1x16x128xf32>
    %771 = vector.extract_strided_slice %739 {offsets = [0, 3, 0, 0], sizes = [1, 1, 16, 128], strides = [1, 1, 1, 1]} : vector<1x16x16x128xf32> to vector<1x1x16x128xf32>
    %772 = vector.shape_cast %771 : vector<1x1x16x128xf32> to vector<1x16x128xf32>
    %773 = arith.addf %770, %772 : vector<1x16x128xf32>
    %c3_383 = arith.constant 3 : index
    %c0_384 = arith.constant 0 : index
    %c0_385 = arith.constant 0 : index
    %c0_386 = arith.constant 0 : index
    %774 = vector.load %arg26[%c3_383, %c0_384, %c0_385, %c0_386] : memref<16x1x16x128xf32, #tpu.memory_space<vmem>>, vector<1x1x16x128xf32>
    %775 = vector.shape_cast %774 : vector<1x1x16x128xf32> to vector<1x16x128xf32>
    %776 = vector.shape_cast %773 : vector<1x16x128xf32> to vector<1x1x16x128xf32>
    tpu.vector_store %arg26[%c3_383, %c0_384, %c0_385, %c0_386], %776 {strides = array<i32>} : memref<16x1x16x128xf32, #tpu.memory_space<vmem>>, vector<1x1x16x128xf32>,
    %777 = vector.extract_strided_slice %734 {offsets = [0, 4, 0, 0], sizes = [1, 1, 16, 128], strides = [1, 1, 1, 1]} : vector<1x16x16x128xf32> to vector<1x1x16x128xf32>
    %778 = vector.shape_cast %777 : vector<1x1x16x128xf32> to vector<1x16x128xf32>
    %779 = arith.mulf %778, %773 : vector<1x16x128xf32>
    %780 = vector.extract_strided_slice %739 {offsets = [0, 4, 0, 0], sizes = [1, 1, 16, 128], strides = [1, 1, 1, 1]} : vector<1x16x16x128xf32> to vector<1x1x16x128xf32>
    %781 = vector.shape_cast %780 : vector<1x1x16x128xf32> to vector<1x16x128xf32>
    %782 = arith.addf %779, %781 : vector<1x16x128xf32>
    %c4_387 = arith.constant 4 : index
    %c0_388 = arith.constant 0 : index
    %c0_389 = arith.constant 0 : index
    %c0_390 = arith.constant 0 : index
    %783 = vector.load %arg26[%c4_387, %c0_388, %c0_389, %c0_390] : memref<16x1x16x128xf32, #tpu.memory_space<vmem>>, vector<1x1x16x128xf32>
    %784 = vector.shape_cast %783 : vector<1x1x16x128xf32> to vector<1x16x128xf32>
    %785 = vector.shape_cast %782 : vector<1x16x128xf32> to vector<1x1x16x128xf32>
    tpu.vector_store %arg26[%c4_387, %c0_388, %c0_389, %c0_390], %785 {strides = array<i32>} : memref<16x1x16x128xf32, #tpu.memory_space<vmem>>, vector<1x1x16x128xf32>,
    %786 = vector.extract_strided_slice %734 {offsets = [0, 5, 0, 0], sizes = [1, 1, 16, 128], strides = [1, 1, 1, 1]} : vector<1x16x16x128xf32> to vector<1x1x16x128xf32>
    %787 = vector.shape_cast %786 : vector<1x1x16x128xf32> to vector<1x16x128xf32>
    %788 = arith.mulf %787, %782 : vector<1x16x128xf32>
    %789 = vector.extract_strided_slice %739 {offsets = [0, 5, 0, 0], sizes = [1, 1, 16, 128], strides = [1, 1, 1, 1]} : vector<1x16x16x128xf32> to vector<1x1x16x128xf32>
    %790 = vector.shape_cast %789 : vector<1x1x16x128xf32> to vector<1x16x128xf32>
    %791 = arith.addf %788, %790 : vector<1x16x128xf32>
    %c5_391 = arith.constant 5 : index
    %c0_392 = arith.constant 0 : index
    %c0_393 = arith.constant 0 : index
    %c0_394 = arith.constant 0 : index
    %792 = vector.load %arg26[%c5_391, %c0_392, %c0_393, %c0_394] : memref<16x1x16x128xf32, #tpu.memory_space<vmem>>, vector<1x1x16x128xf32>
    %793 = vector.shape_cast %792 : vector<1x1x16x128xf32> to vector<1x16x128xf32>
    %794 = vector.shape_cast %791 : vector<1x16x128xf32> to vector<1x1x16x128xf32>
    tpu.vector_store %arg26[%c5_391, %c0_392, %c0_393, %c0_394], %794 {strides = array<i32>} : memref<16x1x16x128xf32, #tpu.memory_space<vmem>>, vector<1x1x16x128xf32>,
    %795 = vector.extract_strided_slice %734 {offsets = [0, 6, 0, 0], sizes = [1, 1, 16, 128], strides = [1, 1, 1, 1]} : vector<1x16x16x128xf32> to vector<1x1x16x128xf32>
    %796 = vector.shape_cast %795 : vector<1x1x16x128xf32> to vector<1x16x128xf32>
    %797 = arith.mulf %796, %791 : vector<1x16x128xf32>
    %798 = vector.extract_strided_slice %739 {offsets = [0, 6, 0, 0], sizes = [1, 1, 16, 128], strides = [1, 1, 1, 1]} : vector<1x16x16x128xf32> to vector<1x1x16x128xf32>
    %799 = vector.shape_cast %798 : vector<1x1x16x128xf32> to vector<1x16x128xf32>
    %800 = arith.addf %797, %799 : vector<1x16x128xf32>
    %c6_395 = arith.constant 6 : index
    %c0_396 = arith.constant 0 : index
    %c0_397 = arith.constant 0 : index
    %c0_398 = arith.constant 0 : index
    %801 = vector.load %arg26[%c6_395, %c0_396, %c0_397, %c0_398] : memref<16x1x16x128xf32, #tpu.memory_space<vmem>>, vector<1x1x16x128xf32>
    %802 = vector.shape_cast %801 : vector<1x1x16x128xf32> to vector<1x16x128xf32>
    %803 = vector.shape_cast %800 : vector<1x16x128xf32> to vector<1x1x16x128xf32>
    tpu.vector_store %arg26[%c6_395, %c0_396, %c0_397, %c0_398], %803 {strides = array<i32>} : memref<16x1x16x128xf32, #tpu.memory_space<vmem>>, vector<1x1x16x128xf32>,
    %804 = vector.extract_strided_slice %734 {offsets = [0, 7, 0, 0], sizes = [1, 1, 16, 128], strides = [1, 1, 1, 1]} : vector<1x16x16x128xf32> to vector<1x1x16x128xf32>
    %805 = vector.shape_cast %804 : vector<1x1x16x128xf32> to vector<1x16x128xf32>
    %806 = arith.mulf %805, %800 : vector<1x16x128xf32>
    %807 = vector.extract_strided_slice %739 {offsets = [0, 7, 0, 0], sizes = [1, 1, 16, 128], strides = [1, 1, 1, 1]} : vector<1x16x16x128xf32> to vector<1x1x16x128xf32>
    %808 = vector.shape_cast %807 : vector<1x1x16x128xf32> to vector<1x16x128xf32>
    %809 = arith.addf %806, %808 : vector<1x16x128xf32>
    %c7_399 = arith.constant 7 : index
    %c0_400 = arith.constant 0 : index
    %c0_401 = arith.constant 0 : index
    %c0_402 = arith.constant 0 : index
    %810 = vector.load %arg26[%c7_399, %c0_400, %c0_401, %c0_402] : memref<16x1x16x128xf32, #tpu.memory_space<vmem>>, vector<1x1x16x128xf32>
    %811 = vector.shape_cast %810 : vector<1x1x16x128xf32> to vector<1x16x128xf32>
    %812 = vector.shape_cast %809 : vector<1x16x128xf32> to vector<1x1x16x128xf32>
    tpu.vector_store %arg26[%c7_399, %c0_400, %c0_401, %c0_402], %812 {strides = array<i32>} : memref<16x1x16x128xf32, #tpu.memory_space<vmem>>, vector<1x1x16x128xf32>,
    %813 = vector.extract_strided_slice %734 {offsets = [0, 8, 0, 0], sizes = [1, 1, 16, 128], strides = [1, 1, 1, 1]} : vector<1x16x16x128xf32> to vector<1x1x16x128xf32>
    %814 = vector.shape_cast %813 : vector<1x1x16x128xf32> to vector<1x16x128xf32>
    %815 = arith.mulf %814, %809 : vector<1x16x128xf32>
    %816 = vector.extract_strided_slice %739 {offsets = [0, 8, 0, 0], sizes = [1, 1, 16, 128], strides = [1, 1, 1, 1]} : vector<1x16x16x128xf32> to vector<1x1x16x128xf32>
    %817 = vector.shape_cast %816 : vector<1x1x16x128xf32> to vector<1x16x128xf32>
    %818 = arith.addf %815, %817 : vector<1x16x128xf32>
    %c8_403 = arith.constant 8 : index
    %c0_404 = arith.constant 0 : index
    %c0_405 = arith.constant 0 : index
    %c0_406 = arith.constant 0 : index
    %819 = vector.load %arg26[%c8_403, %c0_404, %c0_405, %c0_406] : memref<16x1x16x128xf32, #tpu.memory_space<vmem>>, vector<1x1x16x128xf32>
    %820 = vector.shape_cast %819 : vector<1x1x16x128xf32> to vector<1x16x128xf32>
    %821 = vector.shape_cast %818 : vector<1x16x128xf32> to vector<1x1x16x128xf32>
    tpu.vector_store %arg26[%c8_403, %c0_404, %c0_405, %c0_406], %821 {strides = array<i32>} : memref<16x1x16x128xf32, #tpu.memory_space<vmem>>, vector<1x1x16x128xf32>,
    %822 = vector.extract_strided_slice %734 {offsets = [0, 9, 0, 0], sizes = [1, 1, 16, 128], strides = [1, 1, 1, 1]} : vector<1x16x16x128xf32> to vector<1x1x16x128xf32>
    %823 = vector.shape_cast %822 : vector<1x1x16x128xf32> to vector<1x16x128xf32>
    %824 = arith.mulf %823, %818 : vector<1x16x128xf32>
    %825 = vector.extract_strided_slice %739 {offsets = [0, 9, 0, 0], sizes = [1, 1, 16, 128], strides = [1, 1, 1, 1]} : vector<1x16x16x128xf32> to vector<1x1x16x128xf32>
    %826 = vector.shape_cast %825 : vector<1x1x16x128xf32> to vector<1x16x128xf32>
    %827 = arith.addf %824, %826 : vector<1x16x128xf32>
    %c9_407 = arith.constant 9 : index
    %c0_408 = arith.constant 0 : index
    %c0_409 = arith.constant 0 : index
    %c0_410 = arith.constant 0 : index
    %828 = vector.load %arg26[%c9_407, %c0_408, %c0_409, %c0_410] : memref<16x1x16x128xf32, #tpu.memory_space<vmem>>, vector<1x1x16x128xf32>
    %829 = vector.shape_cast %828 : vector<1x1x16x128xf32> to vector<1x16x128xf32>
    %830 = vector.shape_cast %827 : vector<1x16x128xf32> to vector<1x1x16x128xf32>
    tpu.vector_store %arg26[%c9_407, %c0_408, %c0_409, %c0_410], %830 {strides = array<i32>} : memref<16x1x16x128xf32, #tpu.memory_space<vmem>>, vector<1x1x16x128xf32>,
    %831 = vector.extract_strided_slice %734 {offsets = [0, 10, 0, 0], sizes = [1, 1, 16, 128], strides = [1, 1, 1, 1]} : vector<1x16x16x128xf32> to vector<1x1x16x128xf32>
    %832 = vector.shape_cast %831 : vector<1x1x16x128xf32> to vector<1x16x128xf32>
    %833 = arith.mulf %832, %827 : vector<1x16x128xf32>
    %834 = vector.extract_strided_slice %739 {offsets = [0, 10, 0, 0], sizes = [1, 1, 16, 128], strides = [1, 1, 1, 1]} : vector<1x16x16x128xf32> to vector<1x1x16x128xf32>
    %835 = vector.shape_cast %834 : vector<1x1x16x128xf32> to vector<1x16x128xf32>
    %836 = arith.addf %833, %835 : vector<1x16x128xf32>
    %c10_411 = arith.constant 10 : index
    %c0_412 = arith.constant 0 : index
    %c0_413 = arith.constant 0 : index
    %c0_414 = arith.constant 0 : index
    %837 = vector.load %arg26[%c10_411, %c0_412, %c0_413, %c0_414] : memref<16x1x16x128xf32, #tpu.memory_space<vmem>>, vector<1x1x16x128xf32>
    %838 = vector.shape_cast %837 : vector<1x1x16x128xf32> to vector<1x16x128xf32>
    %839 = vector.shape_cast %836 : vector<1x16x128xf32> to vector<1x1x16x128xf32>
    tpu.vector_store %arg26[%c10_411, %c0_412, %c0_413, %c0_414], %839 {strides = array<i32>} : memref<16x1x16x128xf32, #tpu.memory_space<vmem>>, vector<1x1x16x128xf32>,
    %840 = vector.extract_strided_slice %734 {offsets = [0, 11, 0, 0], sizes = [1, 1, 16, 128], strides = [1, 1, 1, 1]} : vector<1x16x16x128xf32> to vector<1x1x16x128xf32>
    %841 = vector.shape_cast %840 : vector<1x1x16x128xf32> to vector<1x16x128xf32>
    %842 = arith.mulf %841, %836 : vector<1x16x128xf32>
    %843 = vector.extract_strided_slice %739 {offsets = [0, 11, 0, 0], sizes = [1, 1, 16, 128], strides = [1, 1, 1, 1]} : vector<1x16x16x128xf32> to vector<1x1x16x128xf32>
    %844 = vector.shape_cast %843 : vector<1x1x16x128xf32> to vector<1x16x128xf32>
    %845 = arith.addf %842, %844 : vector<1x16x128xf32>
    %c11_415 = arith.constant 11 : index
    %c0_416 = arith.constant 0 : index
    %c0_417 = arith.constant 0 : index
    %c0_418 = arith.constant 0 : index
    %846 = vector.load %arg26[%c11_415, %c0_416, %c0_417, %c0_418] : memref<16x1x16x128xf32, #tpu.memory_space<vmem>>, vector<1x1x16x128xf32>
    %847 = vector.shape_cast %846 : vector<1x1x16x128xf32> to vector<1x16x128xf32>
    %848 = vector.shape_cast %845 : vector<1x16x128xf32> to vector<1x1x16x128xf32>
    tpu.vector_store %arg26[%c11_415, %c0_416, %c0_417, %c0_418], %848 {strides = array<i32>} : memref<16x1x16x128xf32, #tpu.memory_space<vmem>>, vector<1x1x16x128xf32>,
    %849 = vector.extract_strided_slice %734 {offsets = [0, 12, 0, 0], sizes = [1, 1, 16, 128], strides = [1, 1, 1, 1]} : vector<1x16x16x128xf32> to vector<1x1x16x128xf32>
    %850 = vector.shape_cast %849 : vector<1x1x16x128xf32> to vector<1x16x128xf32>
    %851 = arith.mulf %850, %845 : vector<1x16x128xf32>
    %852 = vector.extract_strided_slice %739 {offsets = [0, 12, 0, 0], sizes = [1, 1, 16, 128], strides = [1, 1, 1, 1]} : vector<1x16x16x128xf32> to vector<1x1x16x128xf32>
    %853 = vector.shape_cast %852 : vector<1x1x16x128xf32> to vector<1x16x128xf32>
    %854 = arith.addf %851, %853 : vector<1x16x128xf32>
    %c12_419 = arith.constant 12 : index
    %c0_420 = arith.constant 0 : index
    %c0_421 = arith.constant 0 : index
    %c0_422 = arith.constant 0 : index
    %855 = vector.load %arg26[%c12_419, %c0_420, %c0_421, %c0_422] : memref<16x1x16x128xf32, #tpu.memory_space<vmem>>, vector<1x1x16x128xf32>
    %856 = vector.shape_cast %855 : vector<1x1x16x128xf32> to vector<1x16x128xf32>
    %857 = vector.shape_cast %854 : vector<1x16x128xf32> to vector<1x1x16x128xf32>
    tpu.vector_store %arg26[%c12_419, %c0_420, %c0_421, %c0_422], %857 {strides = array<i32>} : memref<16x1x16x128xf32, #tpu.memory_space<vmem>>, vector<1x1x16x128xf32>,
    %858 = vector.extract_strided_slice %734 {offsets = [0, 13, 0, 0], sizes = [1, 1, 16, 128], strides = [1, 1, 1, 1]} : vector<1x16x16x128xf32> to vector<1x1x16x128xf32>
    %859 = vector.shape_cast %858 : vector<1x1x16x128xf32> to vector<1x16x128xf32>
    %860 = arith.mulf %859, %854 : vector<1x16x128xf32>
    %861 = vector.extract_strided_slice %739 {offsets = [0, 13, 0, 0], sizes = [1, 1, 16, 128], strides = [1, 1, 1, 1]} : vector<1x16x16x128xf32> to vector<1x1x16x128xf32>
    %862 = vector.shape_cast %861 : vector<1x1x16x128xf32> to vector<1x16x128xf32>
    %863 = arith.addf %860, %862 : vector<1x16x128xf32>
    %c13_423 = arith.constant 13 : index
    %c0_424 = arith.constant 0 : index
    %c0_425 = arith.constant 0 : index
    %c0_426 = arith.constant 0 : index
    %864 = vector.load %arg26[%c13_423, %c0_424, %c0_425, %c0_426] : memref<16x1x16x128xf32, #tpu.memory_space<vmem>>, vector<1x1x16x128xf32>
    %865 = vector.shape_cast %864 : vector<1x1x16x128xf32> to vector<1x16x128xf32>
    %866 = vector.shape_cast %863 : vector<1x16x128xf32> to vector<1x1x16x128xf32>
    tpu.vector_store %arg26[%c13_423, %c0_424, %c0_425, %c0_426], %866 {strides = array<i32>} : memref<16x1x16x128xf32, #tpu.memory_space<vmem>>, vector<1x1x16x128xf32>,
    %867 = vector.extract_strided_slice %734 {offsets = [0, 14, 0, 0], sizes = [1, 1, 16, 128], strides = [1, 1, 1, 1]} : vector<1x16x16x128xf32> to vector<1x1x16x128xf32>
    %868 = vector.shape_cast %867 : vector<1x1x16x128xf32> to vector<1x16x128xf32>
    %869 = arith.mulf %868, %863 : vector<1x16x128xf32>
    %870 = vector.extract_strided_slice %739 {offsets = [0, 14, 0, 0], sizes = [1, 1, 16, 128], strides = [1, 1, 1, 1]} : vector<1x16x16x128xf32> to vector<1x1x16x128xf32>
    %871 = vector.shape_cast %870 : vector<1x1x16x128xf32> to vector<1x16x128xf32>
    %872 = arith.addf %869, %871 : vector<1x16x128xf32>
    %c14_427 = arith.constant 14 : index
    %c0_428 = arith.constant 0 : index
    %c0_429 = arith.constant 0 : index
    %c0_430 = arith.constant 0 : index
    %873 = vector.load %arg26[%c14_427, %c0_428, %c0_429, %c0_430] : memref<16x1x16x128xf32, #tpu.memory_space<vmem>>, vector<1x1x16x128xf32>
    %874 = vector.shape_cast %873 : vector<1x1x16x128xf32> to vector<1x16x128xf32>
    %875 = vector.shape_cast %872 : vector<1x16x128xf32> to vector<1x1x16x128xf32>
    tpu.vector_store %arg26[%c14_427, %c0_428, %c0_429, %c0_430], %875 {strides = array<i32>} : memref<16x1x16x128xf32, #tpu.memory_space<vmem>>, vector<1x1x16x128xf32>,
    %876 = vector.extract_strided_slice %734 {offsets = [0, 15, 0, 0], sizes = [1, 1, 16, 128], strides = [1, 1, 1, 1]} : vector<1x16x16x128xf32> to vector<1x1x16x128xf32>
    %877 = vector.shape_cast %876 : vector<1x1x16x128xf32> to vector<1x16x128xf32>
    %878 = arith.mulf %877, %872 : vector<1x16x128xf32>
    %879 = vector.extract_strided_slice %739 {offsets = [0, 15, 0, 0], sizes = [1, 1, 16, 128], strides = [1, 1, 1, 1]} : vector<1x16x16x128xf32> to vector<1x1x16x128xf32>
    %880 = vector.shape_cast %879 : vector<1x1x16x128xf32> to vector<1x16x128xf32>
    %881 = arith.addf %878, %880 : vector<1x16x128xf32>
    %c15_431 = arith.constant 15 : index
    %c0_432 = arith.constant 0 : index
    %c0_433 = arith.constant 0 : index
    %c0_434 = arith.constant 0 : index
    %882 = vector.load %arg26[%c15_431, %c0_432, %c0_433, %c0_434] : memref<16x1x16x128xf32, #tpu.memory_space<vmem>>, vector<1x1x16x128xf32>
    %883 = vector.shape_cast %882 : vector<1x1x16x128xf32> to vector<1x16x128xf32>
    %884 = vector.shape_cast %881 : vector<1x16x128xf32> to vector<1x1x16x128xf32>
    tpu.vector_store %arg26[%c15_431, %c0_432, %c0_433, %c0_434], %884 {strides = array<i32>} : memref<16x1x16x128xf32, #tpu.memory_space<vmem>>, vector<1x1x16x128xf32>,
    %c0_435 = arith.constant 0 : index
    %c0_436 = arith.constant 0 : index
    %c0_437 = arith.constant 0 : index
    %c0_438 = arith.constant 0 : index
    %885 = vector.load %arg26[%c0_435, %c0_436, %c0_437, %c0_438] : memref<16x1x16x128xf32, #tpu.memory_space<vmem>>, vector<16x1x16x128xf32>
    %c2_439 = arith.constant 2 : index
    %c0_440 = arith.constant 0 : index
    %c0_441 = arith.constant 0 : index
    %886 = vector.load %arg17[%c2_439, %c0_440, %c0_441] : memref<3x1x128xf32, #tpu.memory_space<vmem>>, vector<1x1x128xf32>
    %887 = vector.shape_cast %886 : vector<1x1x128xf32> to vector<1x128xf32>
    %888 = vector.shape_cast %887 : vector<1x128xf32> to vector<1x1x128xf32>
    %889 = vector.broadcast %888 : vector<1x1x128xf32> to vector<1x16x128xf32>
    %890 = arith.mulf %698, %889 : vector<1x16x128xf32>
    %891 = vector.shape_cast %708 : vector<1x16x16xf32> to vector<16x16xf32>
    %892 = vector.shape_cast %891 : vector<16x16xf32> to vector<16x16x1xf32>
    %893 = vector.shape_cast %885 : vector<16x1x16x128xf32> to vector<16x16x128xf32>
    %894 = vector.broadcast %892 : vector<16x16x1xf32> to vector<16x16x128xf32>
    %895 = arith.mulf %894, %893 : vector<16x16x128xf32>
    %cst_442 = arith.constant dense<0.000000e+00> : vector<16x128xf32>
    %896 = vector.multi_reduction <add>, %895, %cst_442 [1] : vector<16x16x128xf32> to vector<16x128xf32>
    %897 = vector.shape_cast %896 : vector<16x128xf32> to vector<1x16x128xf32>
    %898 = arith.addf %890, %897 : vector<1x16x128xf32>
    %899 = vector.shape_cast %898 : vector<1x16x128xf32> to vector<16x128xf32>
    %cst_443 = arith.constant 0.000000e+00 : f32
    %900 = vector.broadcast %cst_443 : f32 to vector<16x128xf32>
    %901 = arith.subf %900, %656 : vector<16x128xf32>
    %902 = math.exp %901 : vector<16x128xf32>
    %cst_444 = arith.constant 1.000000e+00 : f32
    %903 = vector.broadcast %cst_444 : f32 to vector<16x128xf32>
    %904 = arith.addf %903, %902 : vector<16x128xf32>
    %cst_445 = arith.constant 1.000000e+00 : f32
    %905 = vector.broadcast %cst_445 : f32 to vector<16x128xf32>
    %906 = arith.divf %905, %904 : vector<16x128xf32>
    %907 = arith.mulf %656, %906 : vector<16x128xf32>
    %908 = arith.mulf %899, %907 : vector<16x128xf32>
    %909 = arith.truncf %908 : vector<16x128xf32> to vector<16x128xbf16>
    %c2_446 = arith.constant 2 : index
    %c0_447 = arith.constant 0 : index
    %c0_448 = arith.constant 0 : index
    %910 = vector.load %arg18[%c2_446, %c0_447, %c0_448] : memref<3x128x64xbf16, #tpu.memory_space<vmem>>, vector<1x128x64xbf16>
    %911 = vector.shape_cast %910 : vector<1x128x64xbf16> to vector<128x64xbf16>
    %cst_449 = arith.constant dense<0.000000e+00> : vector<16x64xf32>
    %912 = tpu.matmul %909, %911, %cst_449 {dimension_numbers = #tpu.dot_dimension_numbers<[1], [0], [0], [1], [0, 0, 1, 1], [], []>} : vector<16x128xbf16>, vector<128x64xbf16>, vector<16x64xf32> -> vector<16x64xf32>
    %913 = tpu.concatenate %47, %912 in 1 : vector<16x64xf32>, vector<16x64xf32> -> vector<16x128xf32>
    %914 = arith.truncf %913 : vector<16x128xf32> to vector<16x128xbf16>
    %c0_450 = arith.constant 0 : index
    %c0_451 = arith.constant 0 : index
    %915 = vector.load %arg19[%c0_450, %c0_451] : memref<128x64xbf16, #tpu.memory_space<vmem>>, vector<128x64xbf16>
    %cst_452 = arith.constant dense<0.000000e+00> : vector<16x64xf32>
    %916 = tpu.matmul %914, %915, %cst_452 {dimension_numbers = #tpu.dot_dimension_numbers<[1], [0], [0], [1], [0, 0, 1, 1], [], []>} : vector<16x128xbf16>, vector<128x64xbf16>, vector<16x64xf32> -> vector<16x64xf32>
    %c0_453 = arith.constant 0 : index
    %c0_454 = arith.constant 0 : index
    %917 = vector.load %arg20[%c0_453, %c0_454] : memref<1x64xf32, #tpu.memory_space<vmem>>, vector<1x64xf32>
    %918 = vector.broadcast %917 : vector<1x64xf32> to vector<16x64xf32>
    %919 = arith.addf %916, %918 : vector<16x64xf32>
    %cst_455 = arith.constant 0.000000e+00 : f32
    %920 = vector.broadcast %cst_455 : f32 to vector<16x64xf32>
    %921 = arith.maximumf %919, %920 : vector<16x64xf32>
    %922 = vector.shape_cast %921 : vector<16x64xf32> to vector<1x16x64xf32>
    %cst_456 = arith.constant dense<0.000000e+00> : vector<1x64xf32>
    %923 = vector.multi_reduction <add>, %922, %cst_456 [1] : vector<1x16x64xf32> to vector<1x64xf32>
    %cst_457 = arith.constant 1.600000e+01 : f32
    %924 = vector.broadcast %cst_457 : f32 to vector<1x64xf32>
    %925 = arith.divf %923, %924 : vector<1x64xf32>
    %926 = arith.truncf %925 : vector<1x64xf32> to vector<1x64xbf16>
    %c0_458 = arith.constant 0 : index
    %c0_459 = arith.constant 0 : index
    %927 = vector.load %arg21[%c0_458, %c0_459] : memref<64x128xbf16, #tpu.memory_space<vmem>>, vector<64x128xbf16>
    %cst_460 = arith.constant dense<0.000000e+00> : vector<1x128xf32>
    %928 = tpu.matmul %926, %927, %cst_460 {dimension_numbers = #tpu.dot_dimension_numbers<[1], [0], [0], [1], [0, 0, 1, 1], [], []>} : vector<1x64xbf16>, vector<64x128xbf16>, vector<1x128xf32> -> vector<1x128xf32>
    %c0_461 = arith.constant 0 : index
    %c0_462 = arith.constant 0 : index
    %929 = vector.load %arg22[%c0_461, %c0_462] : memref<1x128xf32, #tpu.memory_space<vmem>>, vector<1x128xf32>
    %930 = arith.addf %928, %929 : vector<1x128xf32>
    %931 = vector.shape_cast %930 : vector<1x128xf32> to vector<1x1x128xf32>
    %c0_463 = arith.constant 0 : index
    %c0_464 = arith.constant 0 : index
    %c0_465 = arith.constant 0 : index
    %932 = vector.load %arg23[%c0_463, %c0_464, %c0_465] : memref<1x1x128xf32, #tpu.memory_space<vmem>>, vector<1x1x128xf32>
    tpu.vector_store %arg23[%c0_463, %c0_464, %c0_465], %931 {strides = array<i32>} : memref<1x1x128xf32, #tpu.memory_space<vmem>>, vector<1x1x128xf32>,
    return
  }
  func.func @transform_0(%arg0: i32) -> (i32, i32, i32) {
    %c0_i32 = arith.constant 0 : i32
    %c0_i32_0 = arith.constant 0 : i32
    %c0_i32_1 = arith.constant 0 : i32
    return %arg0, %c0_i32, %c0_i32_0 : i32, i32, i32
  }
  func.func @transform_1(%arg0: i32) -> (i32, i32) {
    %c0_i32 = arith.constant 0 : i32
    %c0_i32_0 = arith.constant 0 : i32
    %c0_i32_1 = arith.constant 0 : i32
    return %c0_i32, %c0_i32_0 : i32, i32
  }
  func.func @transform_2(%arg0: i32) -> (i32, i32) {
    %c0_i32 = arith.constant 0 : i32
    %c0_i32_0 = arith.constant 0 : i32
    %c0_i32_1 = arith.constant 0 : i32
    return %c0_i32, %c0_i32_0 : i32, i32
  }
  func.func @transform_3(%arg0: i32) -> (i32, i32) {
    %c0_i32 = arith.constant 0 : i32
    %c0_i32_0 = arith.constant 0 : i32
    %c0_i32_1 = arith.constant 0 : i32
    return %c0_i32, %c0_i32_0 : i32, i32
  }
  func.func @transform_4(%arg0: i32) -> (i32, i32) {
    %c0_i32 = arith.constant 0 : i32
    %c0_i32_0 = arith.constant 0 : i32
    %c0_i32_1 = arith.constant 0 : i32
    return %c0_i32, %c0_i32_0 : i32, i32
  }
  func.func @transform_5(%arg0: i32) -> (i32, i32) {
    %c0_i32 = arith.constant 0 : i32
    %c0_i32_0 = arith.constant 0 : i32
    %c0_i32_1 = arith.constant 0 : i32
    return %c0_i32, %c0_i32_0 : i32, i32
  }
  func.func @transform_6(%arg0: i32) -> (i32, i32) {
    %c0_i32 = arith.constant 0 : i32
    %c0_i32_0 = arith.constant 0 : i32
    %c0_i32_1 = arith.constant 0 : i32
    return %c0_i32, %c0_i32_0 : i32, i32
  }
  func.func @transform_7(%arg0: i32) -> (i32, i32, i32) {
    %c0_i32 = arith.constant 0 : i32
    %c0_i32_0 = arith.constant 0 : i32
    %c0_i32_1 = arith.constant 0 : i32
    %c0_i32_2 = arith.constant 0 : i32
    return %c0_i32, %c0_i32_0, %c0_i32_1 : i32, i32, i32
  }
  func.func @transform_8(%arg0: i32) -> (i32, i32, i32) {
    %c0_i32 = arith.constant 0 : i32
    %c0_i32_0 = arith.constant 0 : i32
    %c0_i32_1 = arith.constant 0 : i32
    %c0_i32_2 = arith.constant 0 : i32
    return %c0_i32, %c0_i32_0, %c0_i32_1 : i32, i32, i32
  }
  func.func @transform_9(%arg0: i32) -> (i32, i32, i32) {
    %c0_i32 = arith.constant 0 : i32
    %c0_i32_0 = arith.constant 0 : i32
    %c0_i32_1 = arith.constant 0 : i32
    %c0_i32_2 = arith.constant 0 : i32
    return %c0_i32, %c0_i32_0, %c0_i32_1 : i32, i32, i32
  }
  func.func @transform_10(%arg0: i32) -> (i32, i32, i32) {
    %c0_i32 = arith.constant 0 : i32
    %c0_i32_0 = arith.constant 0 : i32
    %c0_i32_1 = arith.constant 0 : i32
    %c0_i32_2 = arith.constant 0 : i32
    return %c0_i32, %c0_i32_0, %c0_i32_1 : i32, i32, i32
  }
  func.func @transform_11(%arg0: i32) -> (i32, i32, i32) {
    %c0_i32 = arith.constant 0 : i32
    %c0_i32_0 = arith.constant 0 : i32
    %c0_i32_1 = arith.constant 0 : i32
    %c0_i32_2 = arith.constant 0 : i32
    return %c0_i32, %c0_i32_0, %c0_i32_1 : i32, i32, i32
  }
  func.func @transform_12(%arg0: i32) -> (i32, i32, i32) {
    %c0_i32 = arith.constant 0 : i32
    %c0_i32_0 = arith.constant 0 : i32
    %c0_i32_1 = arith.constant 0 : i32
    %c0_i32_2 = arith.constant 0 : i32
    return %c0_i32, %c0_i32_0, %c0_i32_1 : i32, i32, i32
  }
  func.func @transform_13(%arg0: i32) -> (i32, i32, i32) {
    %c0_i32 = arith.constant 0 : i32
    %c0_i32_0 = arith.constant 0 : i32
    %c0_i32_1 = arith.constant 0 : i32
    %c0_i32_2 = arith.constant 0 : i32
    return %c0_i32, %c0_i32_0, %c0_i32_1 : i32, i32, i32
  }
  func.func @transform_14(%arg0: i32) -> (i32, i32, i32) {
    %c0_i32 = arith.constant 0 : i32
    %c0_i32_0 = arith.constant 0 : i32
    %c0_i32_1 = arith.constant 0 : i32
    %c0_i32_2 = arith.constant 0 : i32
    return %c0_i32, %c0_i32_0, %c0_i32_1 : i32, i32, i32
  }
  func.func @transform_15(%arg0: i32) -> (i32, i32, i32) {
    %c0_i32 = arith.constant 0 : i32
    %c0_i32_0 = arith.constant 0 : i32
    %c0_i32_1 = arith.constant 0 : i32
    %c0_i32_2 = arith.constant 0 : i32
    return %c0_i32, %c0_i32_0, %c0_i32_1 : i32, i32, i32
  }
  func.func @transform_16(%arg0: i32) -> (i32, i32, i32) {
    %c0_i32 = arith.constant 0 : i32
    %c0_i32_0 = arith.constant 0 : i32
    %c0_i32_1 = arith.constant 0 : i32
    %c0_i32_2 = arith.constant 0 : i32
    return %c0_i32, %c0_i32_0, %c0_i32_1 : i32, i32, i32
  }
  func.func @transform_17(%arg0: i32) -> (i32, i32, i32) {
    %c0_i32 = arith.constant 0 : i32
    %c0_i32_0 = arith.constant 0 : i32
    %c0_i32_1 = arith.constant 0 : i32
    %c0_i32_2 = arith.constant 0 : i32
    return %c0_i32, %c0_i32_0, %c0_i32_1 : i32, i32, i32
  }
  func.func @transform_18(%arg0: i32) -> (i32, i32) {
    %c0_i32 = arith.constant 0 : i32
    %c0_i32_0 = arith.constant 0 : i32
    %c0_i32_1 = arith.constant 0 : i32
    return %c0_i32, %c0_i32_0 : i32, i32
  }
  func.func @transform_19(%arg0: i32) -> (i32, i32) {
    %c0_i32 = arith.constant 0 : i32
    %c0_i32_0 = arith.constant 0 : i32
    %c0_i32_1 = arith.constant 0 : i32
    return %c0_i32, %c0_i32_0 : i32, i32
  }
  func.func @transform_20(%arg0: i32) -> (i32, i32) {
    %c0_i32 = arith.constant 0 : i32
    %c0_i32_0 = arith.constant 0 : i32
    %c0_i32_1 = arith.constant 0 : i32
    return %c0_i32, %c0_i32_0 : i32, i32
  }
  func.func @transform_21(%arg0: i32) -> (i32, i32) {
    %c0_i32 = arith.constant 0 : i32
    %c0_i32_0 = arith.constant 0 : i32
    %c0_i32_1 = arith.constant 0 : i32
    return %c0_i32, %c0_i32_0 : i32, i32
  }
  func.func @transform_22(%arg0: i32) -> (i32, i32, i32) {
    %c0_i32 = arith.constant 0 : i32
    %c0_i32_0 = arith.constant 0 : i32
    %c0_i32_1 = arith.constant 0 : i32
    return %arg0, %c0_i32, %c0_i32_0 : i32, i32, i32
  }
}

</mosaic_0001>

<bundles_post_ra>
// kernel: mamba_model_forward.1
= control target key start
LH: loop header
LB: loop body
LE: loop exit
PB: predicated region body
PF: predicated region fallthrough
CT: control target
= control target key end

     0   :  { %s10115_s0 = inlined_call_operand.vmem [shape: f32[2,16,2], index: 0, kind: input, shape index: {}]   ;;  %s10116_s1 = inlined_call_operand.vmem [shape: f32[2,64], index: 1, kind: input, shape index: {}]   ;;  %s10117_s2 = inlined_call_operand.vmem [shape: f32[16,64], index: 2, kind: input, shape index: {}]   ;;  %s10118_s3 = inlined_call_operand.vmem [shape: bf16[448,128], index: 3, kind: input, shape index: {}]   ;;  %s10119_s4 = inlined_call_operand.vmem [shape: f32[1,128], index: 4, kind: input, shape index: {}]   ;;  %s10120_s5 = inlined_call_operand.vmem [shape: bf16[128,64], index: 5, kind: input, shape index: {}]   ;;  %s10121_s6 = inlined_call_operand.vmem [shape: f32[1,64], index: 6, kind: input, shape index: {}]   ;;  %s10122_s7 = inlined_call_operand.vmem [shape: f32[3,1,64], index: 7, kind: input, shape index: {}]   ;;  %s10123_s8 = inlined_call_operand.vmem [shape: f32[3,1,64], index: 8, kind: input, shape index: {}]   ;;  %s10124_s9 = inlined_call_operand.vmem [shape: bf16[3,64,256], index: 9, kind: input, shape index: {}]   ;;  %s10125_s10 = inlined_call_operand.vmem [shape: f32[3,4,128], index: 10, kind: input, shape index: {}]   ;;  %s10126_s11 = inlined_call_operand.vmem [shape: f32[3,1,128], index: 11, kind: input, shape index: {}]   ;;  %s10127_s12 = inlined_call_operand.vmem [shape: bf16[3,128,48], index: 12, kind: input, shape index: {}]   ;;  %s10128_s13 = inlined_call_operand.vmem [shape: bf16[3,16,128], index: 13, kind: input, shape index: {}]   ;;  %s10129_s14 = inlined_call_operand.vmem [shape: f32[3,1,128], index: 14, kind: input, shape index: {}]   ;;  %s10130_s15 = inlined_call_operand.vmem [shape: f32[3,16,128], index: 15, kind: input, shape index: {}]   ;;  %s10131_s16 = inlined_call_operand.vmem [shape: f32[3,1,128], index: 16, kind: input, shape index: {}]   ;;  %s10132_s17 = inlined_call_operand.vmem [shape: bf16[3,128,64], index: 17, kind: input, shape index: {}]   ;;  %s10133_s18 = inlined_call_operand.vmem [shape: bf16[128,64], index: 18, kind: input, shape index: {}]   ;;  %s10134_s19 = inlined_call_operand.vmem [shape: f32[1,64], index: 19, kind: input, shape index: {}]   ;;  %s10135_s20 = inlined_call_operand.vmem [shape: bf16[64,128], index: 20, kind: input, shape index: {}]   ;;  %s10136_s21 = inlined_call_operand.vmem [shape: f32[1,128], index: 21, kind: input, shape index: {}]   ;;  %s10137_s22 = inlined_call_operand.hbm [shape: f32[2,1,128], index: 22, kind: output, shape index: {}]  }
   0x1   :  { %10194 = sst [smem:[#allocation47_spill]] %s10115_s0 }
   0x2   :  { %10195 = sst [smem:[#allocation48_spill]] %s10116_s1 }
   0x3   :  { %10196 = sst [smem:[#allocation49_spill]] %s10117_s2 }
   0x4   :  { %10197 = sst [smem:[#allocation50_spill]] %s10118_s3 }
   0x5   :  { %10198 = sst [smem:[#allocation51_spill]] %s10119_s4 }
   0x6   :  { %10199 = sst [smem:[#allocation52_spill]] %s10120_s5 }
   0x7   :  { %10200 = sst [smem:[#allocation53_spill]] %s10121_s6 }
   0x8   :  { %27 = vsyncpa [#allocation6], 0 }
   0x9   :  { %29 = vsyncpa [#allocation6 + $0x1], 0  ;;  %s7813_s3 = smov 0   ;;  %s7815_s28 = smov 0  }
   0xa   :  { %s7817_s29 = smov 0   ;;  %s7819_s30 = smov 0  }
   0xb LB: > { %10201 = sst [smem:[#allocation8_spill]] %s7677_s3  ;;  %s7834_s4 = sadd.s32 4294967295, %s7689_s30   ;;  %s7689_s30 = sphi %s7819_s30, %s10400_s30   ;;  %s7685_s29 = sphi %s7817_s29, %s10402_s29   ;;  %s7681_s28 = sphi %s7815_s28, %s10404_s28   ;;  %s7677_s3 = sphi %s7813_s3, %s10403_s3  }
   0xc   : > { %10202 = sst [smem:[#allocation9_spill]] %s7685_s29  ;;  %s6591_s0 = sadd.s32 4294967294, %s7689_s30  }
   0xd   : > { %s7838_s23 = sadd.s32 1, %s7689_s30   ;;  %s509_s1 = sadd.s32 1, %s7685_s29 }
   0xe   : > { %10203 = sst [smem:[#allocation10_spill]] %s7838_s23  ;;  %s506_s5 = ssub.s32 %s7689_s30, %s7838_s23 }
   0xf   : > { %p519_p0 = scmp.ne.s32.totalorder %s7685_s29, %s7681_s28  ;;  %p507_p1 = scmp.eq.s32.totalorder %s506_s5, 0 }
  0x10   : > { %p520_p2 = scmp.eq.s32.totalorder %s7834_s4, 1  ;;  %p525_p3 = scmp.ne.s32.totalorder %s7681_s28, %s7677_s3 }
  0x11   : > { %p526_p4 = scmp.eq.s32.totalorder %s6591_s0, 1  ;;  %p6594_p7 = scmp.ge.s32.totalorder %s7689_s30, 1 }
  0x12   : > { %s7849_s24 = scalar_select %p507_p1, %s7685_s29, %s509_s1  }
  0x13   : > { %p7851_p5 = por %p520_p2, %p519_p0  ;;  %p7855_p6 = por %p526_p4, %p525_p3 }
  0x14   : > { %10204 = sst [smem:[#allocation11_spill]] %s7849_s24  ;;  %p615_p8 = scmp.lt.s32.totalorder %s7689_s30, 3 }
  0x15   : > { %s10206_s25 = scalar_select %p7855_p6, 1, 0 }
  0x16   : > { %p616_p9 = pnand %p6594_p7, %p615_p8 }
  0x17   : > { %10207 = sst [smem:[#allocation12_spill]] %s10206_s25 }
  0x18   : > { %619 = sbr.rel (%p616_p9) target bundleno = 4920 (0x1338), region = 108 }
  0x1f   : > { %p676_p10 = scmp.lt.s32.totalorder %s7834_s4, 1  ;;  %v7691_v0 = vmov 1   ;;  %v10150_v1 = vmov 0   ;;  %s10208_s1 = sld [smem:[#allocation47_spill]]  ;;  %vm722_vm0 = vcmask 517120   ;;  %vm728_vm3 = vcmask 518145  }
  0x20   : > { %7202 = vset.pattern.permute.xlu1 %v7691_v0  ;;  %7201 = vset.pattern.permute.xlu0 %v10150_v1  ;;  %vm723_vm1 = vsmask.f32 1280  ;;  %v725_v5 = vld [vmem:[#allocation2] sm:$0x3]  ;;  %vm729_vm4 = vsmask.f32 7942  ;;  %v697_v19 = vlaneseq }
  0x21   : > { %s677_s26 = scalar_select %p676_p10, %s7834_s4, 1  ;;  %1158 = vmatprep.subr.bf16.mxu1 %v10150_v1  ;;  %vm7869_vm2 = vmand %vm722_vm0, %vm723_vm1  ;;  %v731_v7 = vld [vmem:[#allocation2 + $0x8] sm:$0x6]  ;;  %vm871_vm6 = vcmask 523264   ;;  %vm763_vm7 = vcmask 519169   ;;  %vm768_vm11 = vcmask 519168  }
  0x22   : > { %v726_v6 = vsel %vm7869_vm2, 0, %v725_v5  ;;  %vm730_vm5 = vmand %vm728_vm3, %vm729_vm4  ;;  %s10211_s27 = sld [smem:[#allocation50_spill]]  ;;  %v7916_v20 = vshrl.u32 %v697_v19, 7  ;;  %s10213_s23 = sld [smem:[#allocation48_spill]]  ;;  %vm739_vm9 = vsmask.f32 5392 }
  0x23   : > { %s6858_s2 = sshll.u32 %s677_s26, 4  ;;  %727 = vst [vmem:[#allocation2] sm:$0x3] %v726_v6  ;;  %v732_v8 = vsel %vm730_vm5, 0, %v731_v7  ;;  %vm764_vm8 = vmand %vm763_vm7, %vm729_vm4  ;;  %vm867_vm12 = vcmask 1044480   ;;  %vm807_vm14 = vcmask 1046528  }
  0x24   : > { %733 = vst [vmem:[#allocation2 + $0x8] sm:$0x6] %v732_v8  ;;  %v7919_v21 = vsub.s32 0, %v7916_v20  ;;  %v7922_v22 = vsub.s32 1, %v7916_v20  ;;  %vm740_vm10 = vmor %vm723_vm1, %vm739_vm9  ;;  %vm844_vm13 = vsmask.f32 5376 }
  0x25   : > { %s680_s5 = scalar_lea.vmem %s10208_s1, %s6858_s2  ;;  %s10214_s2 = sld [smem:[#allocation49_spill]]  ;;  %vm789_vm15 = vsmask.f32 7424  ;;  %vm837_vm0 = vcmask 1045504   ;;  %vm814_vm1 = vsmask.f32 6400 }
  0x26   : > { %v682_v2 = vld [vmem:[%s680_s5] sm:$0xff]  ;;  %v683_v3 = vld [vmem:[%s680_s5 + $0x8] sm:$0xff]  ;;  %10212 = vst [vmem:[#allocation13_spill] sm:$0xff] %v7922_v22  ;;  %s10146_s26 = smov 64   ;;  %s10215_s1 = smov 64   ;;  %vm1643_vm3 = vcmask 130048  }
  0x27   : > { %706 = vperm.xlu1 %7202, %v682_v2   ;;  %689 = vperm.xlu0 %7201, %v682_v2   ;;  %s10216_s0 = sld [smem:[#allocation52_spill]]  ;;  %vm2842_vm7 = vcmask 1041409   ;;  %vm2846_vm9 = vcmask 1043459   ;;  %s10395_s25 = sld [smem:[#allocation53_spill]] }
  0x28   : > { %v7214_v9 = vld [vmem:[%s10211_s27 + $0x80] sm:$0xff]   ;;  %v7215_v10 = vld [vmem:[%s10211_s27 + $0x88] sm:$0xff]   ;;  %v7216_v11 = vld [vmem:[%s10211_s27 + $0x90] sm:$0xff]   ;;  %s6855_s3 = sshll.u32 %s7834_s4, 4  ;;  %s7697_s5 = smov [#allocation5]  }
  0x29   : > { %1159 = vmatpush1.bf16.msra.mxu1 %v7214_v9  ;;  %v7217_v12 = vld [vmem:[%s10211_s27 + $0x98] sm:$0xff]   ;;  %v7218_v13 = vld [vmem:[%s10211_s27 + $0xa0] sm:$0xff]   ;;  %v7219_v14 = vld [vmem:[%s10211_s27 + $0xa8] sm:$0xff]   ;;  %s10073_s29 = scalar_lea.hbm %s10137_s22, %s6855_s3 }
  0x2a   : > { %1160 = vmatprep.subr.bf16.mxu1 %v10150_v1  ;;  %v7220_v15 = vld [vmem:[%s10211_s27 + $0xb0] sm:$0xff]   ;;  %v7221_v16 = vld [vmem:[%s10211_s27 + $0xb8] sm:$0xff]   ;;  %v7222_v17 = vld [vmem:[%s10211_s27 + $0xc0] sm:$0xff]  }
  0x2b   : > { %710 = vperm.xlu1 %7202, %v683_v3   ;;  %694 = vperm.xlu0 %7201, %v683_v3   ;;  %v7223_v18 = vld [vmem:[%s10211_s27 + $0xc8] sm:$0xff]   ;;  %v684_v23 = vld [vmem:[%s10213_s23] sm:$0x3]  ;;  %v7224_v61 = vld [vmem:[%s10211_s27 + $0xd0] sm:$0xff]   ;;  %s10217_s23 = sld [smem:[#allocation51_spill]] }
  0x2c   : > { %v716_v24 = vrot.slane %v684_v23, %v7922_v22  ;;  %v700_v25 = vrot.slane %v684_v23, %v7919_v21  ;;  %v685_v27 = vld [vmem:[%s10214_s2] sm:$0xff]  ;;  %v686_v33 = vld [vmem:[%s10214_s2 + $0x8] sm:$0xff]  ;;  %v7225_v4 = vld [vmem:[%s10211_s27 + $0xd8] sm:$0xff]  }
  0x2d   : > { %1161 = vmatpush1.bf16.msra.mxu1 %v7215_v10  ;;  %v765_v48 = vld [vmem:[#allocation2] sm:$0xe]  ;;  %v770_v57 = vld [vmem:[#allocation2 + $0x8] sm:$0x3] }
  0x2e   : > { %1162 = vmatprep.subr.bf16.mxu1 %v10150_v1 }
  0x2f   : > { %7208 = vset.pattern.permute.xlu0 %v7691_v0 }
  0x31   : > { %1163 = vmatpush1.bf16.msra.mxu1 %v7216_v11 }
  0x32   : > { %1164 = vmatprep.subr.bf16.mxu1 %v10150_v1 }
  0x35   : > { %1165 = vmatpush1.bf16.msra.mxu1 %v7217_v12 }
  0x36   : > { %1166 = vmatprep.subr.bf16.mxu1 %v10150_v1 }
  0x39   : > { %1167 = vmatpush1.bf16.msra.mxu1 %v7218_v13 }
  0x3a   : > { %1168 = vmatprep.subr.bf16.mxu1 %v10150_v1 }
  0x3d   : > { %1169 = vmatpush1.bf16.msra.mxu1 %v7219_v14 }
  0x3e   : > { %1170 = vmatprep.subr.bf16.mxu1 %v10150_v1 }
  0x41   : > { %1171 = vmatpush1.bf16.msra.mxu1 %v7220_v15 }
  0x42   : > { %1172 = vmatprep.subr.bf16.mxu1 %v10150_v1 }
  0x45   : > { %1173 = vmatpush1.bf16.msra.mxu1 %v7221_v16 }
  0x46   : > { %1174 = vmatprep.subr.bf16.mxu1 %v10150_v1 }
  0x49   : > { %1175 = vmatpush1.bf16.msra.mxu1 %v7222_v17 }
  0x4a   : > { %1176 = vmatprep.subr.bf16.mxu1 %v10150_v1 }
  0x4d   : > { %1177 = vmatpush1.bf16.msra.mxu1 %v7223_v18 }
  0x4e   : > { %1178 = vmatprep.subr.bf16.mxu1 %v10150_v1 }
  0x51   : > { %1179 = vmatpush1.bf16.msra.mxu1 %v7224_v61 }
  0x52   : > { %1180 = vmatprep.subr.bf16.mxu1 %v10150_v1 }
  0x55   : > { %1181 = vmatpush1.bf16.msra.mxu1 %v7225_v4 }
  0xa6   : > { %v707_v26 = vpop.permute.xlu1 %706  ;;  %v690_v28 = vpop.permute.xlu0 %689 }
  0xa7   : > { %v717_v29 = vmul.f32 %v716_v24, %v707_v26  ;;  %v701_v30 = vmul.f32 %v700_v25, %v690_v28 }
  0xa9   : > { %v703_v31 = vadd.f32 %v701_v30, %v685_v27 }
  0xaa   : > { %v711_v32 = vpop.permute.xlu1 %710  ;;  %v695_v34 = vpop.permute.xlu0 %694 }
  0xab   : > { %v702_v35 = vmul.f32 %v700_v25, %v695_v34  ;;  %v7935_v36 = vadd.f32 %v717_v29, %v703_v31  ;;  %v718_v37 = vmul.f32 %v716_v24, %v711_v32 }
  0xad   : > { %v704_v38 = vadd.f32 %v702_v35, %v686_v33  ;;  %v1316_v39 = vsel %vm871_vm6, %v7935_v36, 0.0  ;;  %v6859_v40 = vpack.c.bf16 %v7935_v36, %v7935_v36 }
  0xae   : > { %1317 = vadd.xlane.f32.xlu0 %v1316_v39  ;;  %v7228_v39 = vld [vmem:[%s10211_s27 + $0x40] sm:$0xff]  }
  0xaf   : > { %v742_v41 = vshrl.u32 %v6859_v40, 16  ;;  %v745_v42 = vshll.u32 %v6859_v40, 16  ;;  %v7941_v43 = vadd.f32 %v718_v37, %v704_v38  ;;  %v7229_v40 = vld [vmem:[%s10211_s27] sm:$0xff]   ;;  %6861 = vmatprep.subr.bf16.mxu0 %v7228_v39 }
  0xb0   : > { %6862 = vmatpush3.bf16.msra.mxu0 %v7229_v40 }
  0xb1   : > { %v744_v44 = vrot.slane %v742_v41, 6  ;;  %v747_v45 = vrot.slane %v745_v42, 7  ;;  %v1319_v46 = vsel %vm871_vm6, %v7941_v43, 0.0  ;;  %v6860_v47 = vpack.c.bf16 %v7941_v43, %v7941_v43  ;;  %v7230_v41 = vld [vmem:[%s10211_s27 + $0x48] sm:$0xff]  }
  0xb2   : > { %1320 = vadd.xlane.f32.xlu1 %v1319_v46  ;;  %v7231_v42 = vld [vmem:[%s10211_s27 + $0x8] sm:$0xff]   ;;  %6863 = vmatprep.subr.bf16.mxu0 %v7230_v41  ;;  %v7234_v46 = vld [vmem:[%s10211_s27 + $0x58] sm:$0xff]   ;;  %v7256_v41 = vld [vmem:[%s10216_s0] sm:$0xff]  }
  0xb3   : > { %v748_v49 = vor.u32 %v747_v45, %v744_v44  ;;  %v751_v50 = vshrl.u32 %v6860_v47, 16  ;;  %v754_v51 = vshll.u32 %v6860_v47, 16  ;;  %v7232_v44 = vld [vmem:[%s10211_s27 + $0x50] sm:$0xff]   ;;  %v7235_v47 = vld [vmem:[%s10211_s27 + $0x18] sm:$0xff]  }
  0xb4   : > { %6864 = vmatpush3.bf16.msra.mxu0 %v7231_v42  ;;  %v7233_v45 = vld [vmem:[%s10211_s27 + $0x10] sm:$0xff]  }
  0xb5   : > { %v766_v52 = vsel %vm764_vm8, %v748_v49, %v765_v48  ;;  %v753_v53 = vrot.slane %v751_v50, 6  ;;  %v756_v54 = vrot.slane %v754_v51, 7  ;;  %v749_v55 = vrot.slane %v748_v49, 4  ;;  %6865 = vmatprep.subr.bf16.mxu0 %v7232_v44  ;;  %v7236_v48 = vld [vmem:[%s10211_s27 + $0x60] sm:$0xff]   ;;  %v7238_v50 = vld [vmem:[%s10211_s27 + $0x68] sm:$0xff]  }
  0xb6   : > { %767 = vst [vmem:[#allocation2] sm:$0xe] %v766_v52  ;;  %v7237_v49 = vld [vmem:[%s10211_s27 + $0x20] sm:$0xff]   ;;  %v7239_v51 = vld [vmem:[%s10211_s27 + $0x28] sm:$0xff]   ;;  %vm2844_vm8 = vcmask 1042434  }
  0xb7   : > { %v757_v56 = vor.u32 %v756_v54, %v753_v53 }
  0xb8   : > { %6866 = vmatpush3.bf16.msra.mxu0 %v7233_v45  ;;  %v7257_v45 = vld [vmem:[%s10216_s0 + $0x8] sm:$0xff]  }
  0xb9   : > { %v758_v58 = vsel %vm740_vm10, %v749_v55, %v757_v56  ;;  %v759_v59 = vrot.slane %v757_v56, 4  ;;  %6867 = vmatprep.subr.bf16.mxu0 %v7234_v46  ;;  %vm2848_vm10 = vcmask 1044484  }
  0xba   : > { %769 = vst.msk [vmem:[#allocation2 + $0x4] sm:$0xf] %vm768_vm11, %v758_v58  ;;  %vm2850_vm11 = vcmask 1045509  }
  0xbb   : > { %v771_v60 = vsel %vm7869_vm2, %v759_v59, %v770_v57  ;;  %vm7695_vm2 = vmmov 0  }
  0xbc   : > { %772 = vst [vmem:[#allocation2 + $0x8] sm:$0x3] %v771_v60  ;;  %6868 = vmatpush3.bf16.msra.mxu0 %v7235_v47 }
  0xbd   : > { %v780_v62 = vld [vmem:[#allocation2] sm:$0x8]  ;;  %6869 = vmatprep.subr.bf16.mxu0 %v7236_v48 }
  0xbe   : > { %v778_v0 = vld [vmem:[#allocation2] sm:$0xc] }
  0xbf   : > { %v773_v2 = vld [vmem:[#allocation2] sm:$0xf] }
  0xc0   : > { %v776_v8 = vld [vmem:[#allocation2] sm:$0xe]  ;;  %6870 = vmatpush3.bf16.msra.mxu0 %v7237_v49 }
  0xc1   : > { %v774_v63 = vld [vmem:[#allocation2 + $0x4] sm:$0xf]  ;;  %6871 = vmatprep.subr.bf16.mxu0 %v7238_v50 }
  0xc2   : > { %v6605_v3 = vcombine.low %v780_v62, %v774_v63  ;;  %v7955_v5 = vcombine.low %v778_v0, %v774_v63  ;;  %v7957_v6 = vcombine.low %v773_v2, %v774_v63  ;;  %v7965_v19 = vcombine.low %v776_v8, %v774_v63 }
  0xc3   : > { %v7209_v7 = vld [vmem:[#allocation2 + $0x8] ss:$0 sps:$4 sm:$0x77]  }
  0xc4   : > { %v868_v9 = vrot.slane %v6605_v3, 3  ;;  %v846_v10 = vshrl.u32 %v7955_v5, 16  ;;  %v849_v11 = vshll.u32 %v7955_v5, 16  ;;  %v869_v12 = vrot.slane %v7209_v7, 3  ;;  %6872 = vmatpush3.bf16.msra.mxu0 %v7239_v51  ;;  %v7259_v51 = vld [vmem:[%s10216_s0 + $0x18] sm:$0xff]  }
  0xc5   : > { %v854_v13 = vshrl.u32 %v7209_v7, 16  ;;  %v857_v14 = vshll.u32 %v7209_v7, 16  ;;  %v7213_v15 = vld [vmem:[#allocation2 + $0x8] ss:$0 sps:$4 sm:$0x11]   ;;  %v793_v18 = vshll.u32 %v7957_v6, 16 }
  0xc6   : > { %v848_v16 = vrot.slane %v846_v10, 2  ;;  %v851_v17 = vrot.slane %v849_v11, 3  ;;  %v870_v23 = vsel %vm867_vm12, %v868_v9, %v869_v12  ;;  %v798_v26 = vshll.u32 %v7213_v15, 16  ;;  %v7226_v53 = vld [vmem:[#allocation2 + $0x8] ss:$0 sps:$4 sm:$0x33]  }
  0xc7   : > { %v856_v24 = vrot.slane %v854_v13, 2  ;;  %v859_v25 = vrot.slane %v857_v14, 3  ;;  %6635 = vmatprep.mubr.msk.bf16.mxu1 %vm871_vm6, %v870_v23  ;;  %v795_v28 = vrot.slane %v793_v18, 1  ;;  %v791_v30 = vshrl.u32 %v7957_v6, 16  ;;  %v7240_v12 = vld [vmem:[%s10211_s27 + $0x70] sm:$0xff]  }
  0xc8   : > { %v852_v27 = vor.u32 %v851_v17, %v848_v16  ;;  %v800_v33 = vrot.slane %v798_v26, 1  ;;  %v808_v34 = vrot.slane %v7965_v19, 1  ;;  %v809_v35 = vrot.slane %v7213_v15, 1  ;;  %v7241_v13 = vld [vmem:[%s10211_s27 + $0x30] sm:$0xff]   ;;  %6873 = vmatprep.subr.bf16.mxu0 %v7240_v12  ;;  %v7242_v16 = vld [vmem:[%s10211_s27 + $0x78] sm:$0xff]  }
  0xc9   : > { %v860_v29 = vor.u32 %v859_v25, %v856_v24  ;;  %v796_v32 = vor.u32 %v795_v28, %v791_v30  ;;  %v838_v57 = vrot.slane %v7955_v5, 2  ;;  %v839_v58 = vrot.slane %v7226_v53, 2  ;;  %6874 = vmatpush3.bf16.msra.mxu0 %v7241_v13  ;;  %v7243_v17 = vld [vmem:[%s10211_s27 + $0x38] sm:$0xff]   ;;  %v7244_v23 = vld [vmem:[%s10124_s9] ss:$8 sps:$4 sm:$0xff]  }
  0xca   : > { %v7971_v37 = vsel %vm807_vm14, %v808_v34, %v809_v35  ;;  %v816_v5 = vshrl.u32 %v7965_v19, 16  ;;  %v824_v4 = vshrl.u32 %v7226_v53, 16  ;;  %v827_v7 = vshll.u32 %v7226_v53, 16  ;;  %6875 = vmatprep.subr.bf16.mxu0 %v7242_v16  ;;  %v7249_v24 = vld [vmem:[%s10124_s9 + $0x14] ss:$8 sps:$4 sm:$0xff]   ;;  %v7265_v16 = vld [vmem:[%s10127_s12 + $0x8] sm:$0xff]  }
  0xcb   : > { %v861_v31 = vsel %vm844_vm13, %v852_v27, %v860_v29  ;;  %v801_v38 = vsel %vm789_vm15, %v796_v32, %v800_v33  ;;  %v840_v0 = vsel %vm837_vm0, %v838_v57, %v839_v58  ;;  %v7247_v25 = vld [vmem:[%s10124_s9 + $0x10] ss:$8 sps:$4 sm:$0xff]   ;;  %v7252_v26 = vld [vmem:[%s10124_s9 + $0x24] ss:$8 sps:$4 sm:$0xff]   ;;  %v7250_v27 = vld [vmem:[%s10124_s9 + $0x20] ss:$8 sps:$4 sm:$0xff]  }
  0xcc   : > { %862 = vrot.lane.b32.xlu1 %v861_v31, %s10146_s26  ;;  %v818_v8 = vrot.slane %v816_v5, 1  ;;  %v826_v10 = vrot.slane %v824_v4, 1  ;;  %v829_v11 = vrot.slane %v827_v7, 2  ;;  %v7255_v28 = vld [vmem:[%s10124_s9 + $0x34] ss:$8 sps:$4 sm:$0xff]   ;;  %v10153_v30 = vmov 0.0  }
  0xcd   : > { %6876 = vmatpush3.bf16.msra.mxu0 %v7243_v17  ;;  %v7253_v29 = vld [vmem:[%s10124_s9 + $0x30] ss:$8 sps:$4 sm:$0xff]   ;;  %1456 = vst [vmem:[#allocation3] sm:$0x7] %v10153_v30  ;;  %vm2852_vm12 = vcmask 1046534   ;;  %vm2854_vm13 = vcmask 1047559  }
  0xce   : > { %v830_v15 = vor.u32 %v829_v11, %v826_v10  ;;  %6966 = vmatprep.subr.bf16.mxu0 %v10153_v30 }
  0xd0   : > { %802 = vrot.lane.b32.xlu1 %v801_v38, %s10146_s26 }
 0x13b   : > { %v1318_v52 = vpop.xlane.xlu0 %1317 }
 0x13c   : > { %v1323_v54 = vmul.f32 0.015625, %v1318_v52  ;;  %v6646_v52 = vld [vmem:[%s10123_s8] ss:$0 sm:$0xff] }
 0x13e   : > { %v8011_v55 = vsub.f32 %v7935_v36, %v1323_v54 }
 0x13f   : > { %v1321_v56 = vpop.xlane.xlu1 %1320 }
 0x140   : > { %v1324_v59 = vmul.f32 0.015625, %v1321_v56  ;;  %v1327_v60 = vmul.f32 %v8011_v55, %v8011_v55  ;;  %v7260_v56 = vld [vmem:[%s10216_s0 + $0x20] sm:$0xff]  }
 0x142   : > { %v8017_v61 = vsub.f32 %v7941_v43, %v1324_v59  ;;  %v1329_v62 = vsel %vm871_vm6, %v1327_v60, 0.0  ;;  %v819_v43 = vshll.u32 %v7965_v19, 16  ;;  %v7246_v19 = vld [vmem:[%s10124_s9 + $0x4] ss:$8 sps:$4 sm:$0xff]  }
 0x143   : > { %v863_v63 = vpop.permute.xlu1 %862  ;;  %1330 = vadd.xlane.f32.xlu0 %v1329_v62  ;;  %1413 = vmatprep.subr.bf16.mxu1 %v7246_v19  ;;  %v7261_v62 = vld [vmem:[%s10216_s0 + $0x28] sm:$0xff]  }
 0x144   : > { %v881_v36 = vsel %vm871_vm6, %v840_v0, %v863_v63  ;;  %v1328_v2 = vmul.f32 %v8017_v61, %v8017_v61  ;;  %v821_v9 = vrot.slane %v819_v43, 2  ;;  %v7262_v63 = vld [vmem:[%s10216_s0 + $0x30] sm:$0xff]   ;;  %v7263_v0 = vld [vmem:[%s10216_s0 + $0x38] sm:$0xff]  }
 0x145   : > { %1191 = vmatmul.mubr.bf16.vlgmr.msra.gmra.mrb[0].mxu1 %v881_v36 }
 0x146   : > { %v1332_v3 = vsel %vm871_vm6, %v1328_v2, 0.0  ;;  %1445 = vmatprep.mubr.bf16.mxu1 %v10150_v1  ;;  %v822_v14 = vor.u32 %v821_v9, %v818_v8  ;;  %1414 = vmatpush1.bf16.msra.mxu1 %v7244_v23  ;;  %v6606_v2 = vld [vmem:[%s10217_s23] ss:$0 sm:$0xff]  ;;  %v7266_v23 = vld [vmem:[%s10127_s12 + $0x10] sm:$0xff]  }
 0x147   : > { %1333 = vadd.xlane.f32.xlu0 %v1332_v3  ;;  %1415 = vmatprep.subr.bf16.mxu1 %v7249_v24  ;;  %v803_v38 = vpop.permute.xlu1 %802 }
 0x148   : > { %v831_v18 = vsel %vm814_vm1, %v822_v14, %v830_v15  ;;  %v873_v44 = vsel %vm871_vm6, %v7957_v6, %v803_v38  ;;  %v6645_v6 = vld [vmem:[%s10122_s7] ss:$0 sm:$0xff] }
 0x149   : > { %v7264_v14 = vld [vmem:[%s10127_s12] sm:$0xff]  }
 0x14a   : > { %1416 = vmatpush1.bf16.msra.mxu1 %v7247_v25  ;;  %v8137_v25 = vsub.s32 2, %v7916_v20  ;;  %v7268_v38 = vld [vmem:[%s10127_s12 + $0x20] sm:$0xff]  }
 0x14b   : > { %1417 = vmatprep.subr.bf16.mxu1 %v7252_v26  ;;  %v1459_v26 = vld [vmem:[%s10125_s10] sm:$0xf] }
 0x14c   : > { %10220 = vst [vmem:[#allocation16_spill] sm:$0xff] %v8137_v25 }
 0x14e   : > { %1418 = vmatpush1.bf16.msra.mxu1 %v7250_v27  ;;  %v1465_v27 = vrot.slane %v1459_v26, %v7919_v21 }
 0x14f   : > { %1419 = vmatprep.subr.bf16.mxu1 %v7255_v28  ;;  %v1473_v28 = vrot.slane %v1459_v26, %v7922_v22 }
 0x152   : > { %1420 = vmatpush1.bf16.msra.mxu1 %v7253_v29  ;;  %v8145_v29 = vsub.s32 3, %v7916_v20 }
 0x153   : > { %7006 = vmatprep.subr.bf16.mxu1 %v10153_v30 }
 0x154   : > { %10221 = vst [vmem:[#allocation17_spill] sm:$0xff] %v8145_v29 }
 0x15d   : > { %832 = vrot.lane.b32.xlu0 %v831_v18, %s10215_s1 }
 0x1d0   : > { %v1331_v31 = vpop.xlane.xlu0 %1330 }
 0x1d1   : > { %v1335_v32 = vmul.f32 0.015625, %v1331_v31  ;;  %v7267_v31 = vld [vmem:[%s10127_s12 + $0x18] sm:$0xff]  }
 0x1d3   : > { %v1337_v33 = vadd.f32 1e-05, %v1335_v32  ;;  %v1483_v32 = vrot.slane %v1459_v26, %v8137_v25 }
 0x1d4   : > { %v1334_v34 = vpop.xlane.xlu0 %1333 }
 0x1d5   : > { %7351 = vrsqrt.f32 %v1337_v33  ;;  %v1336_v35 = vmul.f32 0.015625, %v1334_v34 }
 0x1d7   : > { %v1338_v39 = vadd.f32 1e-05, %v1336_v35 }
 0x1d8   : > { %v833_v40 = vpop.permute.xlu0 %832 }
 0x1d9   : > { %7353 = vrsqrt.f32 %v1338_v39  ;;  %v877_v42 = vsel %vm871_vm6, %v7971_v37, %v833_v40  ;;  %v7258_v37 = vld [vmem:[%s10216_s0 + $0x10] sm:$0xff]  }
 0x1da   : > { %1149 = vmatprep.mubr.bf16.mxu0 %v877_v42 }
 0x1db   : > { %1150 = vmatmul.mubr.bf16.vlgmr.msra.gmra.mrb[0].mxu0 %v873_v44 }
 0x1dc   : > { %6967 = vmatpush3.bf16.msra.mxu0 %v7256_v41  ;;  %6982 = vmatprep.mubr.msk.bf16.mxu0 %vm7695_vm2, %v10153_v30  ;;  %v1493_v41 = vrot.slane %v1459_v26, %v8145_v29 }
 0x1dd   : > { %6968 = vmatprep.subr.bf16.mxu0 %v10153_v30 }
 0x1df   : > { %v7352_v46 = vpop.eup %7351 }
 0x1e0   : > { %v1341_v47 = vmul.f32 %v7352_v46, %v8011_v55  ;;  %6969 = vmatpush3.bf16.msra.mxu0 %v7257_v45 }
 0x1e1   : > { %6970 = vmatprep.subr.bf16.mxu0 %v10153_v30 }
 0x1e2   : > { %v1350_v49 = vmul.f32 %v6645_v6, %v1341_v47 }
 0x1e3   : > { %v7354_v48 = vpop.eup %7353 }
 0x1e4   : > { %v1342_v50 = vmul.f32 %v7354_v48, %v8017_v61  ;;  %6971 = vmatpush3.bf16.msra.mxu0 %v7258_v37  ;;  %v1359_v54 = vadd.f32 %v6646_v52, %v1350_v49 }
 0x1e5   : > { %6972 = vmatprep.subr.bf16.mxu0 %v10153_v30 }
 0x1e6   : > { %v1351_v53 = vmul.f32 %v6645_v6, %v1342_v50 }
 0x1e8   : > { %v1360_v55 = vadd.f32 %v6646_v52, %v1351_v53  ;;  %6973 = vmatpush3.bf16.msra.mxu0 %v7259_v51  ;;  %v7269_v52 = vld [vmem:[%s10127_s12 + $0x28] sm:$0xff]   ;;  %v6656_v53 = vld [vmem:[%s10126_s11] ss:$0 sm:$0xff] }
 0x1e9   : > { %6974 = vmatprep.subr.bf16.mxu0 %v10153_v30 }
 0x1ea   : > { %v1361_v57 = vpack.c.bf16 %v1360_v55, %v1359_v54 }
 0x1ec   : > { %6655 = vmatmul.mubr.msk.bf16.vlgmr.msra.gmra.mrb[4].mxu1 %vm871_vm6, %v1361_v57  ;;  %6975 = vmatpush3.bf16.msra.mxu0 %v7260_v56 }
 0x1ed   : > { %6976 = vmatprep.subr.bf16.mxu0 %v10153_v30  ;;  %7008 = vmatprep.mubr.msk.bf16.mxu1 %vm7695_vm2, %v10153_v30 }
 0x1f0   : > { %6977 = vmatpush3.bf16.msra.mxu0 %v7261_v62 }
 0x1f1   : > { %6978 = vmatprep.subr.bf16.mxu0 %v10153_v30 }
 0x1f4   : > { %6979 = vmatpush3.bf16.msra.mxu0 %v7262_v63 }
 0x1f5   : > { %6980 = vmatprep.subr.bf16.mxu0 %v10153_v30 }
 0x1f8   : > { %6981 = vmatpush3.bf16.msra.mxu0 %v7263_v0  ;;  %v7271_v0 = vld [vmem:[%s10127_s12 + $0x38] sm:$0xff]  }
 0x1f9   : > { %6986 = vmatprep.subr.bf16.mxu0 %v10153_v30 }
 0x218   : > { %v1192_v58 = vpop.f32.mrb[0].mxu1 }
 0x219   : > { %v1194_v59 = vpop.f32.mrb[1].mxu1 }
 0x21a   : > { %v1195_v60 = vpop.f32.mrb[2].mxu1  ;;  %v7270_v59 = vld [vmem:[%s10127_s12 + $0x30] sm:$0xff]  }
 0x21b   : > { %v1197_v61 = vpop.f32.mrb[3].mxu1 }
 0x2ae   : > { %v6877_v36 = vpop.f32.mrb[0].mxu0 }
 0x2af   : > { %v6878_v3 = vpop.f32.mrb[1].mxu0 }
 0x2b0   : > { %v6879_v5 = vadd.f32 %v6878_v3, %v6877_v36  ;;  %v6880_v43 = vpop.f32.mrb[2].mxu0 }
 0x2b1   : > { %v6881_v4 = vpop.f32.mrb[3].mxu0 }
 0x2b2   : > { %v1152_v7 = vadd.f32 %v6879_v5, %v6606_v2  ;;  %v6882_v8 = vadd.f32 %v6881_v4, %v6880_v43 }
 0x2b4   : > { %v1193_v9 = vadd.f32 %v1192_v58, %v1152_v7  ;;  %v1155_v10 = vadd.f32 %v6882_v8, %v6606_v2 }
 0x2b6   : > { %v1196_v11 = vadd.f32 %v1195_v60, %v1155_v10  ;;  %v1199_v12 = vmax.f32 %v1193_v9, 0.0 }
 0x2b8   : > { %v1200_v13 = vmax.f32 %v1196_v11, 0.0  ;;  %v7272_v11 = vld [vmem:[%s10128_s13] sm:$0xff]  }
 0x2b9   : > { %7007 = vmatpush3.bf16.msra.mxu1 %v7272_v11 }
 0x2ba   : > { %v1201_v15 = vpack.c.bf16 %v1200_v13, %v1199_v12  ;;  %7012 = vmatprep.subr.bf16.mxu1 %v10153_v30 }
 0x2bc   : > { %6983 = vmatmul.mubr.bf16.vlgmr.msra.gmra.mrb[4].mxu0 %v1201_v15 }
 0x2bd   : > { %6987 = vmatpush3.bf16.msra.mxu0 %v7264_v14  ;;  %7002 = vmatprep.mubr.msk.bf16.mxu0 %vm7695_vm2, %v10153_v30 }
 0x2be   : > { %6988 = vmatprep.subr.bf16.mxu0 %v10153_v30 }
 0x2bf   : > { %v1447_v17 = vpop.f32.mrb[4].mxu1 }
 0x2c0   : > { %1457 = vst [vmem:[#allocation3 + $0x3] sm:$0xff] %v1447_v17  ;;  %v8128_v18 = vpop.f32.mrb[5].mxu1  ;;  %v1494_v51 = vmul.f32 %v1493_v41, %v1447_v17 }
 0x2c1   : > { %10218 = vst [vmem:[#allocation14_spill] sm:$0xff] %v8128_v18  ;;  %v1451_v19 = vpop.f32.mrb[6].mxu1  ;;  %6989 = vmatpush3.bf16.msra.mxu0 %v7265_v16 }
 0x2c2   : > { %1458 = vst [vmem:[#allocation3 + $0xb] sm:$0xff] %v1451_v19  ;;  %v8133_v24 = vpop.f32.mrb[7].mxu1  ;;  %6990 = vmatprep.subr.bf16.mxu0 %v10153_v30  ;;  %v1495_v55 = vmul.f32 %v1493_v41, %v1451_v19  ;;  %v8211_v41 = vsub.s32 7, %v7916_v20 }
 0x2c3   : > { %10219 = vst [vmem:[#allocation15_spill] sm:$0xff] %v8133_v24 }
 0x2c4   : > { %10229 = vst [vmem:[#allocation25_spill] sm:$0xff] %v8211_v41 }
 0x2c5   : > { %6991 = vmatpush3.bf16.msra.mxu0 %v7266_v23 }
 0x2c6   : > { %6992 = vmatprep.subr.bf16.mxu0 %v10153_v30 }
 0x2c7   : > { %v1460_v33 = vld [vmem:[#allocation3] sm:$0xff] }
 0x2c8   : > { %v1468_v34 = vld [vmem:[#allocation3 + $0x1] sm:$0xff]  ;;  %v1466_v39 = vmul.f32 %v1465_v27, %v1460_v33  ;;  %v8199_v33 = vsub.s32 4, %v7916_v20 }
 0x2c9   : > { %v1478_v35 = vld [vmem:[#allocation3 + $0x2] sm:$0xff]  ;;  %v1474_v40 = vmul.f32 %v1473_v28, %v1468_v34  ;;  %6993 = vmatpush3.bf16.msra.mxu0 %v7267_v31  ;;  %v1479_v45 = vld [vmem:[#allocation3 + $0xa] sm:$0xff] }
 0x2ca   : > { %3131 = vst [vmem:[#allocation3] sm:$0x7] %v10153_v30  ;;  %v1461_v42 = vld [vmem:[#allocation3 + $0x8] sm:$0xff]  ;;  %6994 = vmatprep.subr.bf16.mxu0 %v10153_v30  ;;  %v1484_v6 = vmul.f32 %v1483_v32, %v1478_v35  ;;  %v1485_v49 = vmul.f32 %v1483_v32, %v1479_v45  ;;  %10226 = vst [vmem:[#allocation22_spill] sm:$0xff] %v8199_v33  ;;  %v8203_v35 = vsub.s32 5, %v7916_v20 }
 0x2cb   : > { %v1469_v44 = vld [vmem:[#allocation3 + $0x9] sm:$0xff]  ;;  %v1467_v46 = vmul.f32 %v1465_v27, %v1461_v42  ;;  %v1476_v37 = vadd.f32 %v1474_v40, %v1466_v39  ;;  %v8207_v39 = vsub.s32 6, %v7916_v20 }
 0x2cc   : > { %v1475_v47 = vmul.f32 %v1473_v28, %v1469_v44  ;;  %10227 = vst [vmem:[#allocation23_spill] sm:$0xff] %v8203_v35 }
 0x2cd   : > { %v1486_v50 = vadd.f32 %v1484_v6, %v1476_v37  ;;  %6995 = vmatpush3.bf16.msra.mxu0 %v7268_v38  ;;  %10228 = vst [vmem:[#allocation24_spill] sm:$0xff] %v8207_v39 }
 0x2ce   : > { %v1477_v48 = vadd.f32 %v1475_v47, %v1467_v46  ;;  %6996 = vmatprep.subr.bf16.mxu0 %v10153_v30 }
 0x2cf   : > { %v1496_v56 = vadd.f32 %v1494_v51, %v1486_v50 }
 0x2d0   : > { %v1487_v54 = vadd.f32 %v1485_v49, %v1477_v48 }
 0x2d1   : > { %v1505_v58 = vadd.f32 %v6656_v53, %v1496_v56  ;;  %6997 = vmatpush3.bf16.msra.mxu0 %v7269_v52 }
 0x2d2   : > { %v1497_v57 = vadd.f32 %v1495_v55, %v1487_v54  ;;  %6998 = vmatprep.subr.bf16.mxu0 %v10153_v30 }
 0x2d3   : > { %v1507_v61 = vsub.f32 0.0, %v1505_v58 }
 0x2d4   : > { %v1506_v60 = vadd.f32 %v6656_v53, %v1497_v57 }
 0x2d5   : > { %v1509_v63 = vmul.f32 1.442695, %v1507_v61  ;;  %6999 = vmatpush3.bf16.msra.mxu0 %v7270_v59 }
 0x2d6   : > { %v1508_v62 = vsub.f32 0.0, %v1506_v60  ;;  %7000 = vmatprep.subr.bf16.mxu0 %v10153_v30 }
 0x2d7   : > { %7355 = vpow2.f32 %v1509_v63 }
 0x2d8   : > { %v1511_v36 = vmul.f32 1.442695, %v1508_v62 }
 0x2d9   : > { %7001 = vmatpush3.bf16.msra.mxu0 %v7271_v0 }
 0x2da   : > { %7357 = vpow2.f32 %v1511_v36 }
 0x2e1   : > { %v7356_v2 = vpop.eup %7355 }
 0x2e2   : > { %v1513_v3 = vadd.f32 1.0, %v7356_v2 }
 0x2e4   : > { %v7358_v5 = vpop.eup %7357  ;;  %7359 = vrcp.f32 %v1513_v3 }
 0x2e5   : > { %v1514_v43 = vadd.f32 1.0, %v7358_v5  ;;  %v6665_v5 = vld [vmem:[%s10129_s14] ss:$0 sm:$0xff] }
 0x2e7   : > { %7361 = vrcp.f32 %v1514_v43 }
 0x2ee   : > { %v7360_v4 = vpop.eup %7359 }
 0x2ef   : > { %v8173_v8 = vmul.f32 %v7360_v4, %v1505_v58 }
 0x2f1   : > { %v7362_v7 = vpop.eup %7361  ;;  %10222 = vst [vmem:[#allocation18_spill] sm:$0xff] %v8173_v8 }
 0x2f2   : > { %v8175_v9 = vmul.f32 %v7362_v7, %v1506_v60 }
 0x2f4   : > { %10223 = vst [vmem:[#allocation19_spill] sm:$0xff] %v8175_v9  ;;  %v1521_v10 = vpack.c.bf16 %v8175_v9, %v8173_v8 }
 0x2f6   : > { %7003 = vmatmul.mubr.bf16.vlgmr.msra.gmra.mrb[8].mxu0 %v1521_v10 }
 0x2f7   : > { %3120 = vmatprep.mubr.bf16.mxu0 %v10150_v1 }
 0x38f   : > { %v8184_v12 = vpop.f32.mrb[4].mxu0 }
 0x390   : > { %10224 = vst [vmem:[#allocation20_spill] sm:$0xff] %v8184_v12  ;;  %v6984_v13 = vpop.f32.mrb[5].mxu0 }
 0x391   : > { %v8186_v14 = vpop.f32.mrb[6].mxu0 }
 0x392   : > { %10225 = vst [vmem:[#allocation21_spill] sm:$0xff] %v8186_v14  ;;  %v6985_v15 = vpop.f32.mrb[7].mxu0 }
 0x3c9   : > { %v1620_v16 = vpop.f32.mrb[8].mxu0 }
 0x3ca   : > { %v7004_v17 = vpop.f32.mrb[9].mxu0  ;;  %v2001_v19 = vrot.slane %v1620_v16, %v7919_v21  ;;  %v2013_v28 = vrot.slane %v1620_v16, %v7922_v22  ;;  %v2025_v31 = vrot.slane %v1620_v16, %v8137_v25  ;;  %v2037_v32 = vrot.slane %v1620_v16, %v8145_v29 }
 0x3cb   : > { %v8189_v23 = vpop.f32.mrb[10].mxu0  ;;  %v2049_v34 = vrot.slane %v1620_v16, %v8199_v33  ;;  %v2061_v38 = vrot.slane %v1620_v16, %v8203_v35  ;;  %v2073_v40 = vrot.slane %v1620_v16, %v8207_v39  ;;  %v2085_v42 = vrot.slane %v1620_v16, %v8211_v41 }
 0x3cc   : > { %2008 = vbcast.lane.b32.xlu0 %v2001_v19, 280  ;;  %2004 = vbcast.lane.b32.xlu1 %v2001_v19, 272  ;;  %v7005_v26 = vpop.f32.mrb[11].mxu0  ;;  %v1627_v27 = vpack.c.bf16 %v8189_v23, %v1620_v16  ;;  %v2097_v44 = vrot.slane %v8189_v23, %v7919_v21  ;;  %v2109_v45 = vrot.slane %v8189_v23, %v7922_v22 }
 0x3cd   : > { %v2121_v46 = vrot.slane %v8189_v23, %v8137_v25  ;;  %v2133_v47 = vrot.slane %v8189_v23, %v8145_v29  ;;  %v2145_v37 = vrot.slane %v8189_v23, %v8199_v33  ;;  %v2157_v6 = vrot.slane %v8189_v23, %v8203_v35 }
 0x3ce   : > { %7009 = vmatmul.mubr.msk.bf16.vlgmr.msra.gmra.mrb[8].mxu1 %vm1643_vm3, %v1627_v27  ;;  %v2169_v48 = vrot.slane %v8189_v23, %v8207_v39  ;;  %v2181_v49 = vrot.slane %v8189_v23, %v8211_v41 }
 0x3cf   : > { %7028 = vmatprep.mubr.msk.bf16.mxu1 %vm7695_vm2, %v10153_v30 }
 0x3d0   : > { %2020 = vbcast.lane.b32.xlu0 %v2013_v28, 280  ;;  %2016 = vbcast.lane.b32.xlu1 %v2013_v28, 272 }
 0x3d4   : > { %2032 = vbcast.lane.b32.xlu0 %v2025_v31, 280  ;;  %2028 = vbcast.lane.b32.xlu1 %v2025_v31, 272 }
 0x3d8   : > { %2044 = vbcast.lane.b32.xlu0 %v2037_v32, 280  ;;  %2040 = vbcast.lane.b32.xlu1 %v2037_v32, 272 }
 0x3dc   : > { %2056 = vbcast.lane.b32.xlu0 %v2049_v34, 280  ;;  %2052 = vbcast.lane.b32.xlu1 %v2049_v34, 272 }
 0x3e0   : > { %2068 = vbcast.lane.b32.xlu0 %v2061_v38, 280  ;;  %2064 = vbcast.lane.b32.xlu1 %v2061_v38, 272 }
 0x3e4   : > { %2080 = vbcast.lane.b32.xlu0 %v2073_v40, 280  ;;  %2076 = vbcast.lane.b32.xlu1 %v2073_v40, 272 }
 0x3e8   : > { %2092 = vbcast.lane.b32.xlu0 %v2085_v42, 280  ;;  %2088 = vbcast.lane.b32.xlu1 %v2085_v42, 272 }
 0x3ec   : > { %2560 = vbcast.lane.b32.xlu0 %v2001_v19, 296  ;;  %2556 = vbcast.lane.b32.xlu1 %v2001_v19, 288 }
 0x3f0   : > { %2568 = vbcast.lane.b32.xlu0 %v2013_v28, 296  ;;  %2564 = vbcast.lane.b32.xlu1 %v2013_v28, 288 }
 0x3f4   : > { %2576 = vbcast.lane.b32.xlu0 %v2025_v31, 296  ;;  %2572 = vbcast.lane.b32.xlu1 %v2025_v31, 288 }
 0x3f8   : > { %2584 = vbcast.lane.b32.xlu0 %v2037_v32, 296  ;;  %2580 = vbcast.lane.b32.xlu1 %v2037_v32, 288 }
 0x3fc   : > { %2592 = vbcast.lane.b32.xlu0 %v2049_v34, 296  ;;  %2588 = vbcast.lane.b32.xlu1 %v2049_v34, 288 }
 0x400   : > { %2600 = vbcast.lane.b32.xlu0 %v2061_v38, 296  ;;  %2596 = vbcast.lane.b32.xlu1 %v2061_v38, 288 }
 0x404   : > { %2608 = vbcast.lane.b32.xlu0 %v2073_v40, 296  ;;  %2604 = vbcast.lane.b32.xlu1 %v2073_v40, 288  ;;  %v2867_v40 = vsub.f32 0.0, %v8128_v18 }
 0x408   : > { %2616 = vbcast.lane.b32.xlu0 %v2085_v42, 296  ;;  %2612 = vbcast.lane.b32.xlu1 %v2085_v42, 288  ;;  %v2868_v42 = vsub.f32 0.0, %v8133_v24 }
 0x40c   : > { %2104 = vbcast.lane.b32.xlu0 %v2097_v44, 280  ;;  %2100 = vbcast.lane.b32.xlu1 %v2097_v44, 272 }
 0x410   : > { %2116 = vbcast.lane.b32.xlu0 %v2109_v45, 280  ;;  %2112 = vbcast.lane.b32.xlu1 %v2109_v45, 272 }
 0x414   : > { %2128 = vbcast.lane.b32.xlu0 %v2121_v46, 280  ;;  %2124 = vbcast.lane.b32.xlu1 %v2121_v46, 272 }
 0x418   : > { %2140 = vbcast.lane.b32.xlu0 %v2133_v47, 280  ;;  %2136 = vbcast.lane.b32.xlu1 %v2133_v47, 272 }
 0x41c   : > { %2152 = vbcast.lane.b32.xlu0 %v2145_v37, 280  ;;  %2148 = vbcast.lane.b32.xlu1 %v2145_v37, 272 }
 0x420   : > { %2164 = vbcast.lane.b32.xlu0 %v2157_v6, 280  ;;  %2160 = vbcast.lane.b32.xlu1 %v2157_v6, 272 }
 0x424   : > { %2176 = vbcast.lane.b32.xlu0 %v2169_v48, 280  ;;  %2172 = vbcast.lane.b32.xlu1 %v2169_v48, 272 }
 0x428   : > { %2624 = vbcast.lane.b32.xlu0 %v2097_v44, 296  ;;  %2620 = vbcast.lane.b32.xlu1 %v2097_v44, 288 }
 0x42c   : > { %2632 = vbcast.lane.b32.xlu0 %v2109_v45, 296  ;;  %2628 = vbcast.lane.b32.xlu1 %v2109_v45, 288 }
 0x430   : > { %2640 = vbcast.lane.b32.xlu0 %v2121_v46, 296  ;;  %2636 = vbcast.lane.b32.xlu1 %v2121_v46, 288  ;;  %v2869_v46 = vmul.f32 1.442695, %v2867_v40 }
 0x434   : > { %2188 = vbcast.lane.b32.xlu0 %v2181_v49, 280  ;;  %2184 = vbcast.lane.b32.xlu1 %v2181_v49, 272 }
 0x438   : > { %2648 = vbcast.lane.b32.xlu0 %v2133_v47, 296  ;;  %2644 = vbcast.lane.b32.xlu1 %v2133_v47, 288 }
 0x43c   : > { %2656 = vbcast.lane.b32.xlu0 %v2145_v37, 296  ;;  %2652 = vbcast.lane.b32.xlu1 %v2145_v37, 288 }
 0x43e   : > { %v8230_v50 = vpop.permute.xlu0 %2008  ;;  %v8232_v51 = vpop.permute.xlu1 %2004 }
 0x440   : > { %2664 = vbcast.lane.b32.xlu0 %v2157_v6, 296  ;;  %2660 = vbcast.lane.b32.xlu1 %v2157_v6, 288 }
 0x442   : > { %v8234_v52 = vpop.permute.xlu0 %2020  ;;  %v8236_v53 = vpop.permute.xlu1 %2016 }
 0x444   : > { %2672 = vbcast.lane.b32.xlu0 %v2169_v48, 296  ;;  %2668 = vbcast.lane.b32.xlu1 %v2169_v48, 288  ;;  %v2871_v48 = vmul.f32 1.442695, %v2868_v42 }
 0x446   : > { %v8238_v54 = vpop.permute.xlu0 %2032  ;;  %v8240_v55 = vpop.permute.xlu1 %2028 }
 0x448   : > { %2680 = vbcast.lane.b32.xlu0 %v2181_v49, 296  ;;  %2676 = vbcast.lane.b32.xlu1 %v2181_v49, 288 }
 0x44a   : > { %v8242_v56 = vpop.permute.xlu0 %2044  ;;  %v8244_v57 = vpop.permute.xlu1 %2040 }
 0x44e   : > { %v8246_v58 = vpop.permute.xlu0 %2056  ;;  %v8248_v59 = vpop.permute.xlu1 %2052 }
 0x452   : > { %v8250_v60 = vpop.permute.xlu0 %2068  ;;  %v8252_v61 = vpop.permute.xlu1 %2064 }
 0x456   : > { %v8254_v62 = vpop.permute.xlu0 %2080  ;;  %v8256_v63 = vpop.permute.xlu1 %2076 }
 0x45a   : > { %v8258_v0 = vpop.permute.xlu0 %2092  ;;  %v8260_v36 = vpop.permute.xlu1 %2088 }
 0x45b   : > { %10230 = vst [vmem:[#allocation26_spill] sm:$0xff] %v8260_v36 }
 0x45e   : > { %v8262_v2 = vpop.permute.xlu0 %2560  ;;  %v8264_v3 = vpop.permute.xlu1 %2556 }
 0x462   : > { %v8269_v4 = vpop.permute.xlu0 %2568  ;;  %v8273_v11 = vpop.permute.xlu1 %2564 }
 0x466   : > { %v8279_v26 = vpop.permute.xlu0 %2576  ;;  %v8281_v31 = vpop.permute.xlu1 %2572 }
 0x46a   : > { %v8283_v34 = vpop.permute.xlu0 %2584  ;;  %v8285_v38 = vpop.permute.xlu1 %2580 }
 0x46e   : > { %v8289_v45 = vpop.permute.xlu0 %2592  ;;  %v8291_v37 = vpop.permute.xlu1 %2588 }
 0x4a1   : > { %v1681_v43 = vpop.f32.mrb[8].mxu1 }
 0x4a2   : > { %v8271_v7 = vadd.f32 %v6665_v5, %v1681_v43  ;;  %v7010_v10 = vpop.f32.mrb[9].mxu1  ;;  %v8296_v43 = vpop.permute.xlu0 %2600 }
 0x4a3   : > { %v1684_v15 = vpop.f32.mrb[10].mxu1 }
 0x4a4   : > { %v1690_v13 = vand.u32 2147483647, %v8271_v7  ;;  %v8276_v16 = vadd.f32 %v6665_v5, %v1684_v15  ;;  %v7011_v17 = vpop.f32.mrb[11].mxu1  ;;  %v7273_v5 = vld [vmem:[%s10132_s17] sm:$0xff]   ;;  %v7696_v15 = vmov 1966171168  }
 0x4a5   : > { %7013 = vmatpush3.bf16.msra.mxu1 %v7273_v5  ;;  %v1726_v17 = vunpack.c.l.s4 %v7696_v15  ;;  %v1688_v1 = vmax.f32 %v8271_v7, 0.0 }
 0x4a6   : > { %v1692_v19 = vsub.f32 0.0, %v1690_v13  ;;  %v1691_v23 = vand.u32 2147483647, %v8276_v16  ;;  %v7274_v13 = vld [vmem:[%s10132_s17 + $0x8] sm:$0xff]   ;;  %7014 = vmatprep.subr.bf16.mxu1 %v10153_v30  ;;  %v8308_v42 = vpop.permute.xlu0 %2608 }
 0x4a7   : > { %10231 = vst [vmem:[#allocation27_spill] sm:$0xff] %v8308_v42 }
 0x4a8   : > { %v1694_v27 = vmul.f32 1.442695, %v1692_v19  ;;  %v1693_v28 = vsub.f32 0.0, %v1691_v23  ;;  %v8302_v19 = vpop.permute.xlu1 %2596 }
 0x4a9   : > { %7015 = vmatpush3.bf16.msra.mxu1 %v7274_v13 }
 0x4aa   : > { %7363 = vpow2.f32 %v1694_v27  ;;  %v1696_v32 = vmul.f32 1.442695, %v1693_v28  ;;  %v7275_v28 = vld [vmem:[%s10132_s17 + $0x10] sm:$0xff]   ;;  %7016 = vmatprep.subr.bf16.mxu1 %v10153_v30  ;;  %v8320_v41 = vpop.permute.xlu0 %2616 }
 0x4ab   : > { %10233 = vst [vmem:[#allocation29_spill] sm:$0xff] %v8320_v41 }
 0x4ac   : > { %7365 = vpow2.f32 %v1696_v32  ;;  %v1727_v32 = vunpack.c.0.s8 %v1726_v17 }
 0x4ad   : > { %7017 = vmatpush3.bf16.msra.mxu1 %v7275_v28 }
 0x4ae   : > { %v8316_v17 = vsub.s32 %v1727_v32, %v7916_v20  ;;  %7018 = vmatprep.subr.bf16.mxu1 %v10153_v30  ;;  %v7277_v20 = vld [vmem:[%s10132_s17 + $0x20] sm:$0xff]  }
 0x4b4   : > { %v7364_v44 = vpop.eup %7363 }
 0x4b5   : > { %v1698_v47 = vadd.f32 1.0, %v7364_v44  ;;  %v1701_v10 = vmul.f32 -0.5, %v7364_v44  ;;  %v1704_v40 = vand.u32 2147483647, %v7364_v44 }
 0x4b6   : > { %v7366_v6 = vpop.eup %7365 }
 0x4b7   : > { %7367 = vlog2.f32 %v1698_v47  ;;  %v1707_v49 = vadd.f32 1.0, %v7366_v6  ;;  %v1710_v23 = vmul.f32 -0.5, %v7366_v6  ;;  %v1702_v27 = vadd.f32 1.0, %v1701_v10  ;;  %v7276_v10 = vld [vmem:[%s10132_s17 + $0x18] sm:$0xff]  }
 0x4b8   : > { %7369 = vpow2.f32 %v2869_v46  ;;  %v1713_v15 = vand.u32 2147483647, %v7366_v6  ;;  %vm1705_vm4 = vcmp.lt.f32.partialorder %v1704_v40, 0.0004427343  ;;  %7019 = vmatpush3.bf16.msra.mxu1 %v7276_v10 }
 0x4b9   : > { %7371 = vlog2.f32 %v1707_v49  ;;  %v1711_v47 = vadd.f32 1.0, %v1710_v23  ;;  %v1703_v5 = vmul.f32 %v7364_v44, %v1702_v27  ;;  %7020 = vmatprep.subr.bf16.mxu1 %v10153_v30 }
 0x4ba   : > { %7373 = vpow2.f32 %v2871_v48  ;;  %v8310_v48 = vpop.permute.xlu1 %2604  ;;  %vm1714_vm5 = vcmp.lt.f32.partialorder %v1713_v15, 0.0004427343 }
 0x4bb   : > { %10232 = vst [vmem:[#allocation28_spill] sm:$0xff] %v8310_v48  ;;  %v1712_v27 = vmul.f32 %v7366_v6, %v1711_v47 }
 0x4bc   : > { %7021 = vmatpush3.bf16.msra.mxu1 %v7277_v20 }
 0x4bd   : > { %7022 = vmatprep.subr.bf16.mxu1 %v10153_v30 }
 0x4c1   : > { %v7368_v46 = vpop.eup %7367 }
 0x4c2   : > { %v1700_v49 = vmul.f32 0.6931472, %v7368_v46  ;;  %v7370_v13 = vpop.eup %7369 }
 0x4c3   : > { %v7372_v23 = vpop.eup %7371  ;;  %v2873_v28 = vadd.f32 1.0, %v7370_v13  ;;  %v7278_v13 = vld [vmem:[%s10132_s17 + $0x28] sm:$0xff]  }
 0x4c4   : > { %v1706_v14 = vsel %vm1705_vm4, %v1703_v5, %v1700_v49  ;;  %v7374_v12 = vpop.eup %7373  ;;  %v1709_v44 = vmul.f32 0.6931472, %v7372_v23  ;;  %v8327_v5 = vpop.permute.xlu1 %2612  ;;  %7023 = vmatpush3.bf16.msra.mxu1 %v7278_v13 }
 0x4c5   : > { %v1716_v46 = vadd.f32 %v1706_v14, %v1688_v1  ;;  %v2874_v49 = vadd.f32 1.0, %v7374_v12  ;;  %10234 = vst [vmem:[#allocation30_spill] sm:$0xff] %v8327_v5  ;;  %v1689_v14 = vmax.f32 %v8276_v16, 0.0  ;;  %7375 = vrcp.f32 %v2873_v28  ;;  %v8341_v16 = vpop.permute.xlu0 %2104 }
 0x4c6   : > { %v1715_v40 = vsel %vm1714_vm5, %v1712_v27, %v1709_v44  ;;  %10235 = vst [vmem:[#allocation31_spill] sm:$0xff] %v8341_v16  ;;  %v8346_v27 = vld [vmem:[%s10130_s15] sm:$0xff] }
 0x4c7   : > { %v1724_v32 = vcombine.high %v1716_v46, %v1716_v46  ;;  %v1731_v7 = vrot.slane %v1716_v46, %v8316_v17  ;;  %v1720_v1 = vmul.f32 %v1716_v46, %v8173_v8  ;;  %v8333_v10 = vadd.f32 %v1715_v40, %v1689_v14 }
 0x4c8   : > { %7377 = vrcp.f32 %v2874_v49 }
 0x4c9   : > { %v1738_v6 = vrot.slane %v1724_v32, %v8316_v17  ;;  %v1739_v47 = vcombine.high %v1731_v7, %v1731_v7  ;;  %v1747_v15 = vrot.slane %v1731_v7, %v8316_v17  ;;  %v2192_v20 = vcombine.high %v1720_v1, %v1720_v1  ;;  %v8352_v32 = vld [vmem:[%s10130_s15 + $0x8] sm:$0xff] }
 0x4ca   : > { %v2199_v14 = vrot.slane %v1720_v1, %v8316_v17  ;;  %v8378_v13 = vrot.slane %v8333_v10, %v8316_v17 }
 0x4cb   : > { %v1740_v12 = vcombine.high %v1738_v6, %v1738_v6  ;;  %v1754_v23 = vrot.slane %v1738_v6, %v8316_v17  ;;  %v1761_v46 = vrot.slane %v1739_v47, %v8316_v17  ;;  %v1769_v44 = vcombine.high %v1747_v15, %v1747_v15  ;;  %v8357_v6 = vpop.permute.xlu1 %2100 }
 0x4cc   : > { %v1825_v28 = vrot.slane %v1747_v15, %v7919_v21  ;;  %10236 = vst [vmem:[#allocation32_spill] sm:$0xff] %v8357_v6  ;;  %v8362_v15 = vmul.f32 %v8333_v10, %v8175_v9  ;;  %v2207_v24 = vcombine.high %v2199_v14, %v2199_v14  ;;  %v8383_v9 = vpop.permute.xlu0 %2116 }
 0x4cd   : > { %v1768_v7 = vrot.slane %v1740_v12, %v8316_v17  ;;  %v1771_v40 = vcombine.high %v1761_v46, %v1761_v46  ;;  %v1829_v49 = vrot.slane %v1761_v46, %v7919_v21  ;;  %v1770_v47 = vcombine.high %v1754_v23, %v1754_v23  ;;  %v7279_v12 = vld [vmem:[%s10132_s17 + $0x30] sm:$0xff]   ;;  %10238 = vst [vmem:[#allocation33_spill] sm:$0xff] %v8383_v9 }
 0x4ce   : > { %v1833_v30 = vrot.slane %v1769_v44, %v7919_v21  ;;  %v1841_v35 = vrot.slane %v1754_v23, %v7919_v21  ;;  %v1902_v33 = vmul.f32 %v1825_v28, %v8346_v27  ;;  %v10237_v44 = vmov 0.0  }
 0x4cf   : > { %v1772_v46 = vcombine.high %v1768_v7, %v1768_v7  ;;  %v1837_v1 = vrot.slane %v1771_v40, %v7919_v21  ;;  %7024 = vmatprep.subr.bf16.mxu1 %v10237_v44  ;;  %v1845_v29 = vrot.slane %v1768_v7, %v7919_v21  ;;  %v1903_v25 = vmul.f32 %v1825_v28, %v8352_v32 }
 0x4d0   : > { %v1904_v39 = vmul.f32 %v1829_v49, %v8346_v27  ;;  %v1905_v22 = vmul.f32 %v1829_v49, %v8352_v32  ;;  %v2206_v40 = vrot.slane %v2192_v20, %v8316_v17  ;;  %v2215_v23 = vrot.slane %v2199_v14, %v8316_v17  ;;  %7025 = vmatpush3.bf16.msra.mxu1 %v7279_v12  ;;  %v7280_v49 = vld [vmem:[%s10132_s17 + $0x38] sm:$0xff]  }
 0x4d1   : > { %v1849_v18 = vrot.slane %v1770_v47, %v7919_v21  ;;  %v1853_v7 = vrot.slane %v1772_v46, %v7919_v21  ;;  %v1906_v28 = vmul.f32 %v1833_v30, %v8346_v27  ;;  %v1907_v8 = vmul.f32 %v1833_v30, %v8352_v32  ;;  %7026 = vmatprep.subr.bf16.mxu1 %v10237_v44  ;;  %v8396_v47 = vpop.eup %7375  ;;  %v8398_v46 = vpop.permute.xlu1 %2112 }
 0x4d2   : > { %v1908_v20 = vmul.f32 %v1837_v1, %v8346_v27  ;;  %v1909_v5 = vmul.f32 %v1837_v1, %v8352_v32  ;;  %v1910_v14 = vmul.f32 %v1841_v35, %v8346_v27  ;;  %v1934_v41 = vmul.f32 1.442695, %v1902_v33  ;;  %10239 = vst [vmem:[#allocation34_spill] sm:$0xff] %v8396_v47  ;;  %10240 = vst [vmem:[#allocation35_spill] sm:$0xff] %v8398_v46  ;;  %v8403_v42 = vpop.eup %7377 }
 0x4d3   : > { %v1911_v30 = vmul.f32 %v1841_v35, %v8352_v32  ;;  %v1912_v12 = vmul.f32 %v1845_v29, %v8346_v27  ;;  %v1936_v36 = vmul.f32 1.442695, %v1903_v25  ;;  %v1938_v9 = vmul.f32 1.442695, %v1904_v39  ;;  %10241 = vst [vmem:[#allocation36_spill] sm:$0xff] %v8403_v42 }
 0x4d4   : > { %v1913_v16 = vmul.f32 %v1845_v29, %v8352_v32  ;;  %7379 = vpow2.f32 %v1934_v41  ;;  %v1940_v6 = vmul.f32 1.442695, %v1905_v22  ;;  %v2208_v1 = vcombine.high %v2206_v40, %v2206_v40  ;;  %7027 = vmatpush3.bf16.msra.mxu1 %v7280_v49  ;;  %v8410_v29 = vpop.permute.xlu0 %2128 }
 0x4d5   : > { %v1914_v33 = vmul.f32 %v1849_v18, %v8346_v27  ;;  %v1915_v48 = vmul.f32 %v1849_v18, %v8352_v32  ;;  %7381 = vpow2.f32 %v1936_v36  ;;  %v1942_v47 = vmul.f32 1.442695, %v1906_v28  ;;  %7032 = vmatprep.subr.bf16.mxu1 %v10237_v44  ;;  %10242 = vst [vmem:[#allocation37_spill] sm:$0xff] %v8410_v29  ;;  %v8415_v49 = vpop.permute.xlu1 %2124 }
 0x4d6   : > { %v1916_v35 = vmul.f32 %v1853_v7, %v8346_v27  ;;  %v1917_v46 = vmul.f32 %v1853_v7, %v8352_v32  ;;  %v1944_v25 = vmul.f32 1.442695, %v1907_v8  ;;  %v1946_v39 = vmul.f32 1.442695, %v1908_v20 }
 0x4d7   : > { %7383 = vpow2.f32 %v1938_v9  ;;  %v1948_v22 = vmul.f32 1.442695, %v1909_v5  ;;  %v1950_v41 = vmul.f32 1.442695, %v1910_v14  ;;  %v1952_v42 = vmul.f32 1.442695, %v1911_v30 }
 0x4d8   : > { %7385 = vpow2.f32 %v1940_v6  ;;  %v2222_v18 = vrot.slane %v2206_v40, %v8316_v17  ;;  %v2229_v36 = vrot.slane %v2207_v24, %v8316_v17  ;;  %v2236_v28 = vrot.slane %v2208_v1, %v8316_v17  ;;  %v8420_v1 = vpop.permute.xlu0 %2140 }
 0x4d9   : > { %7387 = vpow2.f32 %v1942_v47  ;;  %v1954_v8 = vmul.f32 1.442695, %v1912_v12  ;;  %v1956_v7 = vmul.f32 1.442695, %v1913_v16  ;;  %v2237_v20 = vcombine.high %v2215_v23, %v2215_v23 }
 0x4da   : > { %7389 = vpow2.f32 %v1944_v25  ;;  %v1958_v44 = vmul.f32 1.442695, %v1914_v33  ;;  %v2238_v29 = vcombine.high %v2222_v18, %v2222_v18  ;;  %v2239_v9 = vcombine.high %v2229_v36, %v2229_v36 }
 0x4db   : > { %7391 = vpow2.f32 %v1946_v39  ;;  %v1960_v5 = vmul.f32 1.442695, %v1915_v48  ;;  %v2240_v14 = vcombine.high %v2236_v28, %v2236_v28  ;;  %v2293_v6 = vrot.slane %v2215_v23, %v7919_v21 }
 0x4dc   : > { %7393 = vpow2.f32 %v1948_v22  ;;  %v1962_v40 = vmul.f32 1.442695, %v1916_v35  ;;  %v2297_v24 = vrot.slane %v2229_v36, %v7919_v21  ;;  %v2301_v30 = vrot.slane %v2237_v20, %v7919_v21  ;;  %v8430_v22 = vpop.permute.xlu1 %2136 }
 0x4dd   : > { %7395 = vpow2.f32 %v1950_v41  ;;  %v1964_v16 = vmul.f32 1.442695, %v1917_v46  ;;  %v2305_v47 = vrot.slane %v2239_v9, %v7919_v21  ;;  %v10243_v12 = vcombine.high %v8333_v10, %v8333_v10  ;;  %v8452_v9 = vpop.permute.xlu0 %2152 }
 0x4de   : > { %v7380_v33 = vpop.eup %7379  ;;  %7397 = vpow2.f32 %v1952_v42  ;;  %v2309_v23 = vrot.slane %v2222_v18, %v7919_v21  ;;  %v2313_v35 = vrot.slane %v2236_v28, %v7919_v21  ;;  %v2317_v25 = vrot.slane %v2238_v29, %v7919_v21 }
 0x4df   : > { %v1787_v48 = vrot.slane %v10243_v12, %v8316_v17  ;;  %v7382_v39 = vpop.eup %7381  ;;  %7399 = vpow2.f32 %v1954_v8  ;;  %v8433_v46 = vrot.slane %v2240_v14, %v7919_v21  ;;  %v2370_v41 = vmul.f32 %v2293_v6, %v8232_v51 }
 0x4e0   : > { %v2371_v10 = vmul.f32 %v2293_v6, %v8230_v50  ;;  %7401 = vpow2.f32 %v1956_v7  ;;  %v2372_v42 = vmul.f32 %v2297_v24, %v8236_v53  ;;  %v2373_v18 = vmul.f32 %v2297_v24, %v8234_v52 }
 0x4e1   : > { %v2374_v36 = vmul.f32 %v2301_v30, %v8240_v55  ;;  %v7384_v28 = vpop.eup %7383  ;;  %7403 = vpow2.f32 %v1958_v44  ;;  %v2375_v29 = vmul.f32 %v2301_v30, %v8238_v54  ;;  %v8442_v8 = vmul.f32 %v2305_v47, %v8244_v57 }
 0x4e2   : > { %v8445_v20 = vmul.f32 %v2305_v47, %v8242_v56  ;;  %v7386_v51 = vpop.eup %7385  ;;  %v8448_v50 = vmul.f32 %v2309_v23, %v8248_v59  ;;  %v2402_v7 = vmul.f32 0.0, %v7380_v33  ;;  %v2403_v53 = vmul.f32 0.0, %v7382_v39  ;;  %v8463_v47 = vpop.permute.xlu1 %2148 }
 0x4e3   : > { %v1788_v52 = vcombine.high %v8378_v13, %v8378_v13  ;;  %v7388_v55 = vpop.eup %7387  ;;  %v8455_v54 = vmul.f32 %v2309_v23, %v8246_v58  ;;  %v8458_v57 = vmul.f32 %v2313_v35, %v8252_v61  ;;  %v1789_v56 = vcombine.high %v1787_v48, %v1787_v48 }
 0x4e4   : > { %v1796_v44 = vrot.slane %v8378_v13, %v8316_v17  ;;  %v7390_v59 = vpop.eup %7389  ;;  %7405 = vpow2.f32 %v1960_v5  ;;  %v2404_v14 = vadd.f32 %v2402_v7, %v2370_v41  ;;  %v2405_v6 = vadd.f32 %v2403_v53, %v2371_v10 }
 0x4e5   : > { %v1810_v24 = vrot.slane %v1788_v52, %v8316_v17  ;;  %v7392_v30 = vpop.eup %7391  ;;  %7407 = vpow2.f32 %v1962_v40  ;;  %v8466_v58 = vmul.f32 %v2313_v35, %v8250_v60  ;;  %v1803_v61 = vrot.slane %v1787_v48, %v8316_v17 }
 0x4e6   : > { %v1817_v12 = vrot.slane %v1789_v56, %v8316_v17  ;;  %v7394_v33 = vpop.eup %7393  ;;  %v2408_v23 = vmul.f32 %v7384_v28, %v2404_v14  ;;  %v2409_v13 = vmul.f32 %v7386_v51, %v2405_v6  ;;  %v2682_v5 = vmul.f32 %v8264_v3, %v2404_v14  ;;  %v8480_v51 = vpop.permute.xlu0 %2164 }
 0x4e7   : > { %v2683_v39 = vmul.f32 %v8262_v2, %v2405_v6  ;;  %v7396_v41 = vpop.eup %7395  ;;  %7409 = vpow2.f32 %v1964_v16  ;;  %v8473_v10 = vmul.f32 %v2317_v25, %v8256_v63  ;;  %v8476_v40 = vmul.f32 %v2317_v25, %v8254_v62  ;;  %10244 = vst [vmem:[#allocation38_spill] sm:$0xff] %v8480_v51  ;;  %v8489_v6 = vpop.permute.xlu1 %2160 }
 0x4e8   : > { %v1818_v60 = vcombine.high %v1796_v44, %v1796_v44  ;;  %v7398_v35 = vpop.eup %7397  ;;  %v2410_v48 = vadd.f32 %v2408_v23, %v2372_v42  ;;  %v2411_v7 = vadd.f32 %v2409_v13, %v2373_v18  ;;  %v1820_v52 = vcombine.high %v1810_v24, %v1810_v24 }
 0x4e9   : > { %v2714_v53 = vadd.f32 %v2683_v39, %v2682_v5  ;;  %v8478_v28 = vpop.eup %7399  ;;  %v1819_v3 = vcombine.high %v1803_v61, %v1803_v61  ;;  %v1821_v2 = vcombine.high %v1817_v12, %v1817_v12  ;;  %v1857_v16 = vrot.slane %v1796_v44, %v7919_v21 }
 0x4ea   : > { %v7402_v56 = vpop.eup %7401  ;;  %v2415_v62 = vmul.f32 %v7388_v55, %v2410_v48  ;;  %v2416_v25 = vmul.f32 %v7390_v59, %v2411_v7  ;;  %v2684_v14 = vmul.f32 %v8273_v11, %v2410_v48  ;;  %v2685_v42 = vmul.f32 %v8269_v4, %v2411_v7 }
 0x4eb   : > { %v8487_v18 = vpop.eup %7403  ;;  %v2715_v23 = vrot.slane %v2714_v53, 4  ;;  %v1861_v13 = vrot.slane %v1810_v24, %v7919_v21  ;;  %v1865_v5 = vrot.slane %v1818_v60, %v7919_v21  ;;  %v1873_v44 = vrot.slane %v1803_v61, %v7919_v21 }
 0x4ec   : > { %v2417_v39 = vadd.f32 %v2415_v62, %v2374_v36  ;;  %v2418_v63 = vadd.f32 %v2416_v25, %v2375_v29  ;;  %v2721_v51 = vadd.f32 %v2685_v42, %v2684_v14  ;;  %v8495_v55 = vrot.slane %v1820_v52, %v7919_v21  ;;  %v8508_v52 = vpop.permute.xlu0 %2176 }
 0x4ed   : > { %v2716_v11 = vadd.f32 %v2715_v23, %v2714_v53  ;;  %v8498_v4 = vrot.slane %v1817_v12, %v7919_v21  ;;  %v8501_v59 = vrot.slane %v1819_v3, %v7919_v21  ;;  %v1918_v48 = vmul.f32 %v1857_v16, %v8346_v27  ;;  %10245 = vst [vmem:[#allocation39_spill] sm:$0xff] %v8508_v52 }
 0x4ee   : > { %v7406_v24 = vpop.eup %7405  ;;  %v2422_v7 = vmul.f32 %v7392_v30, %v2417_v39  ;;  %v2423_v60 = vmul.f32 %v7394_v33, %v2418_v63  ;;  %v2686_v61 = vmul.f32 %v8281_v31, %v2417_v39  ;;  %v2687_v36 = vmul.f32 %v8279_v26, %v2418_v63  ;;  %v8520_v63 = vpop.permute.xlu1 %2172 }
 0x4ef   : > { %v8506_v29 = vpop.eup %7407  ;;  %v2722_v53 = vrot.slane %v2721_v51, 4  ;;  %v8511_v12 = vrot.slane %v1821_v2, %v7919_v21  ;;  %v1919_v3 = vmul.f32 %v1857_v16, %v8352_v32  ;;  %v1920_v62 = vmul.f32 %v1861_v13, %v8346_v27  ;;  %10246 = vst [vmem:[#allocation40_spill] sm:$0xff] %v8520_v63 }
 0x4f0   : > { %v2424_v25 = vadd.f32 %v2422_v7, %v8442_v8  ;;  %v2425_v30 = vadd.f32 %v2423_v60, %v8445_v20  ;;  %v2728_v33 = vadd.f32 %v2687_v36, %v2686_v61  ;;  %v1921_v31 = vmul.f32 %v1861_v13, %v8352_v32 }
 0x4f1   : > { %v8518_v26 = vpop.eup %7409  ;;  %v2717_v14 = vrot.slane %v2716_v11, 2  ;;  %v2723_v42 = vadd.f32 %v2722_v53, %v2721_v51  ;;  %v1922_v2 = vmul.f32 %v1865_v5, %v8346_v27  ;;  %v1966_v23 = vmul.f32 1.442695, %v1918_v48  ;;  %v8531_v48 = vpop.permute.xlu0 %2624 }
 0x4f2   : > { %v2429_v39 = vmul.f32 %v7396_v41, %v2424_v25  ;;  %v2430_v16 = vmul.f32 %v7398_v35, %v2425_v30  ;;  %v2688_v52 = vmul.f32 %v8285_v38, %v2424_v25  ;;  %v2689_v8 = vmul.f32 %v8283_v34, %v2425_v30 }
 0x4f3   : > { %v2724_v7 = vrot.slane %v2723_v42, 2  ;;  %v2729_v20 = vrot.slane %v2728_v33, 4  ;;  %v1923_v60 = vmul.f32 %v1865_v5, %v8352_v32  ;;  %v1968_v13 = vmul.f32 1.442695, %v1919_v3  ;;  %v8538_v3 = vpop.permute.xlu1 %2620 }
 0x4f4   : > { %v2431_v61 = vadd.f32 %v2429_v39, %v8448_v50  ;;  %v2432_v36 = vadd.f32 %v2430_v16, %v8455_v54  ;;  %v2735_v63 = vadd.f32 %v2689_v8, %v2688_v52  ;;  %v8529_v51 = vmul.f32 %v1873_v44, %v8346_v27 }
 0x4f5   : > { %v8533_v41 = vadd.f32 %v2717_v14, %v2716_v11  ;;  %v2730_v38 = vadd.f32 %v2729_v20, %v2728_v33  ;;  %7411 = vpow2.f32 %v1966_v23  ;;  %v1970_v34 = vmul.f32 1.442695, %v1920_v62  ;;  %v8551_v23 = vpop.permute.xlu0 %2632 }
 0x4f6   : > { %v2436_v35 = vmul.f32 %v8478_v28, %v2431_v61  ;;  %v2437_v53 = vmul.f32 %v7402_v56, %v2432_v36  ;;  %v2690_v5 = vmul.f32 %v8291_v37, %v2431_v61  ;;  %v2691_v50 = vmul.f32 %v8289_v45, %v2432_v36 }
 0x4f7   : > { %v8540_v54 = vadd.f32 %v2724_v7, %v2723_v42  ;;  %v8543_v52 = vmul.f32 %v1873_v44, %v8352_v32  ;;  %7413 = vpow2.f32 %v1968_v13  ;;  %v1972_v11 = vmul.f32 1.442695, %v1921_v31 }
 0x4f8   : > { %v2438_v25 = vadd.f32 %v2436_v35, %v8458_v57  ;;  %v2439_v62 = vadd.f32 %v2437_v53, %v8466_v58  ;;  %v2731_v30 = vrot.slane %v2730_v38, 2  ;;  %v2736_v28 = vrot.slane %v2735_v63, 4 }
 0x4f9   : > { %v2719_v56 = vrot.slane %v8533_v41, 1  ;;  %v2742_v37 = vadd.f32 %v2691_v50, %v2690_v5  ;;  %7415 = vpow2.f32 %v1970_v34  ;;  %v2248_v45 = vrot.slane %v8362_v15, %v8316_v17  ;;  %v8577_v50 = vpop.permute.xlu0 %2640 }
 0x4fa   : > { %v2443_v33 = vmul.f32 %v8487_v18, %v2438_v25  ;;  %v2444_v14 = vmul.f32 %v7406_v24, %v2439_v62  ;;  %v1974_v44 = vmul.f32 1.442695, %v1922_v2  ;;  %v1976_v42 = vmul.f32 1.442695, %v1923_v60  ;;  %v8561_v18 = vpop.permute.xlu1 %2628 }
 0x4fb   : > { %v2692_v57 = vmul.f32 %v8302_v19, %v2438_v25  ;;  %v2693_v58 = vmul.f32 %v8296_v43, %v2439_v62  ;;  %v2256_v31 = vcombine.high %v2248_v45, %v2248_v45  ;;  %v2264_v39 = vrot.slane %v2248_v45, %v8316_v17  ;;  %v10249_v45 = vld [vmem:[#allocation27_spill] sm:$0xff] }
 0x4fc   : > { %v2726_v16 = vrot.slane %v8540_v54, 1  ;;  %v8557_v8 = vadd.f32 %v2731_v30, %v2730_v38  ;;  %v8559_v7 = vadd.f32 %v2736_v28, %v2735_v63  ;;  %7417 = vpow2.f32 %v1972_v11  ;;  %v10248_v30 = vld [vmem:[#allocation28_spill] sm:$0xff] }
 0x4fd   : > { %v2446_v24 = vadd.f32 %v2444_v14, %v8476_v40  ;;  %v2743_v2 = vrot.slane %v2742_v37, 4  ;;  %v10247_v19 = vcombine.high %v8362_v15, %v8362_v15  ;;  %v1925_v20 = vmul.f32 %v8495_v55, %v8352_v32 }
 0x4fe   : > { %v2445_v60 = vadd.f32 %v2443_v33, %v8473_v10  ;;  %7419 = vpow2.f32 %v1974_v44  ;;  %v2278_v63 = vrot.slane %v2256_v31, %v8316_v17  ;;  %v2286_v13 = vcombine.high %v2264_v39, %v2264_v39  ;;  %v10251_v31 = vld [vmem:[#allocation31_spill] sm:$0xff] }
 0x4ff   : > { %v2255_v43 = vrot.slane %v10247_v19, %v8316_v17  ;;  %v7412_v61 = vpop.eup %7411  ;;  %v8572_v36 = vadd.f32 %v2693_v58, %v2692_v57  ;;  %7421 = vpow2.f32 %v1976_v42  ;;  %v2325_v40 = vrot.slane %v2264_v39, %v7919_v21  ;;  %v8596_v57 = vpop.permute.xlu1 %2636  ;;  %v10250_v58 = vld [vmem:[#allocation32_spill] sm:$0xff]  ;;  %v10252_v19 = vld [vmem:[#allocation33_spill] sm:$0xff] }
 0x500   : > { %v1980_v34 = vmul.f32 1.442695, %v1925_v20  ;;  %v2288_v35 = vcombine.high %v2278_v63, %v2278_v63  ;;  %v2329_v15 = vrot.slane %v2278_v63, %v7919_v21  ;;  %v2333_v53 = vrot.slane %v2286_v13, %v7919_v21  ;;  %v10254_v13 = vld [vmem:[#allocation37_spill] sm:$0xff] }
 0x501   : > { %v2257_v38 = vcombine.high %v2255_v43, %v2255_v43  ;;  %v7414_v5 = vpop.eup %7413  ;;  %v2385_v11 = vmul.f32 %v8433_v46, %v8258_v0  ;;  %v2451_v25 = vmul.f32 %v8518_v26, %v2446_v24  ;;  %v1924_v62 = vmul.f32 %v8495_v55, %v8346_v27 }
 0x502   : > { %v8588_v28 = vmul.f32 %v10248_v30, %v2445_v60  ;;  %v8591_v33 = vmul.f32 %v10249_v45, %v2446_v24  ;;  %v8593_v14 = vadd.f32 %v2743_v2, %v2742_v37  ;;  %v2337_v44 = vrot.slane %v2288_v35, %v7919_v21  ;;  %v10253_v24 = vld [vmem:[#allocation26_spill] sm:$0xff] }
 0x503   : > { %v8580_v10 = vrot.slane %v2257_v38, %v8316_v17  ;;  %v7416_v42 = vpop.eup %7415  ;;  %v2386_v0 = vmul.f32 %v2325_v40, %v10250_v58  ;;  %v2387_v26 = vmul.f32 %v2325_v40, %v10251_v31  ;;  %v2453_v39 = vadd.f32 %v2451_v25, %v2385_v11  ;;  %v10255_v58 = vld [vmem:[#allocation35_spill] sm:$0xff]  ;;  %v2189_v25 = vpop.permute.xlu0 %2188 }
 0x504   : > { %7423 = vpow2.f32 %v1980_v34  ;;  %v2389_v20 = vmul.f32 %v2329_v15, %v10252_v19  ;;  %v2384_v37 = vmul.f32 %v8433_v46, %v10253_v24  ;;  %v2450_v2 = vmul.f32 %v8506_v29, %v2445_v60 }
 0x505   : > { %v2289_v55 = vcombine.high %v8580_v10, %v8580_v10  ;;  %v2391_v38 = vmul.f32 %v2333_v53, %v10254_v13  ;;  %v2458_v35 = vmul.f32 %v7414_v5, %v2453_v39  ;;  %v1978_v30 = vmul.f32 1.442695, %v1924_v62  ;;  %v10256_v5 = vld [vmem:[#allocation29_spill] sm:$0xff] }
 0x506   : > { %v7418_v45 = vpop.eup %7417  ;;  %v2393_v40 = vmul.f32 %v2337_v44, %v8420_v1  ;;  %v2388_v31 = vmul.f32 %v2329_v15, %v10255_v58  ;;  %v2452_v11 = vadd.f32 %v2450_v2, %v2384_v37  ;;  %v1984_v34 = vmul.f32 1.442695, %v8543_v52 }
 0x507   : > { %v2353_v63 = vrot.slane %v2289_v55, %v7919_v21  ;;  %v2460_v19 = vadd.f32 %v2458_v35, %v2387_v26  ;;  %v2390_v46 = vmul.f32 %v2333_v53, %v8415_v49  ;;  %v2271_v29 = vrot.slane %v2255_v43, %v8316_v17  ;;  %v2185_v26 = vpop.permute.xlu1 %2184  ;;  %v10257_v35 = vld [vmem:[#allocation30_spill] sm:$0xff] }
 0x508   : > { %v1929_v60 = vmul.f32 %v8498_v4, %v8352_v32  ;;  %v7420_v55 = vpop.eup %7419  ;;  %v8616_v62 = vmul.f32 %v10256_v5, %v2453_v39  ;;  %v8619_v1 = vmul.f32 %v2337_v44, %v8430_v22  ;;  %v2457_v15 = vmul.f32 %v7412_v61, %v2452_v11 }
 0x509   : > { %v1982_v24 = vmul.f32 1.442695, %v8529_v51  ;;  %v7422_v52 = vpop.eup %7421  ;;  %v8622_v37 = vmul.f32 %v2353_v63, %v2189_v25  ;;  %v2465_v49 = vmul.f32 %v7418_v45, %v2460_v19  ;;  %7425 = vpow2.f32 %v1978_v30  ;;  %v2649_v30 = vpop.permute.xlu0 %2648 }
 0x50a   : > { %v1988_v43 = vmul.f32 1.442695, %v1929_v60  ;;  %v8624_v53 = vmul.f32 %v2353_v63, %v2185_v26  ;;  %v2699_v2 = vmul.f32 %v8531_v48, %v2460_v19  ;;  %v2459_v13 = vadd.f32 %v2457_v15, %v2386_v0 }
 0x50b   : > { %7427 = vpow2.f32 %v1984_v34  ;;  %v2467_v39 = vadd.f32 %v2465_v49, %v2389_v20  ;;  %v2341_v22 = vrot.slane %v2271_v29, %v7919_v21  ;;  %v1928_v61 = vmul.f32 %v8498_v4, %v8346_v27  ;;  %v2645_v5 = vpop.permute.xlu1 %2644 }
 0x50c   : > { %v1931_v51 = vmul.f32 %v8501_v59, %v8352_v32  ;;  %v2464_v44 = vmul.f32 %v7416_v42, %v2459_v13  ;;  %v8633_v45 = vmul.f32 %v10257_v35, %v2452_v11  ;;  %v2698_v63 = vmul.f32 %v8538_v3, %v2459_v13 }
 0x50d   : > { %7429 = vpow2.f32 %v1982_v24  ;;  %v2472_v48 = vmul.f32 %v7422_v52, %v2467_v39  ;;  %v1986_v0 = vmul.f32 1.442695, %v1928_v61  ;;  %v2701_v34 = vmul.f32 %v8551_v23, %v2467_v39 }
 0x50e   : > { %7431 = vpow2.f32 %v1988_v43  ;;  %v1992_v20 = vmul.f32 1.442695, %v1931_v51  ;;  %v7424_v58 = vpop.eup %7423  ;;  %v2466_v25 = vadd.f32 %v2464_v44, %v2388_v31  ;;  %v2770_v4 = vadd.f32 %v2699_v2, %v2698_v63 }
 0x50f   : > { %v1930_v19 = vmul.f32 %v8501_v59, %v8346_v27  ;;  %v2474_v42 = vadd.f32 %v2472_v48, %v2391_v38  ;;  %v2395_v11 = vmul.f32 %v2341_v22, %v8452_v9  ;;  %v2287_v60 = vcombine.high %v2271_v29, %v2271_v29 }
 0x510   : > { %v1933_v3 = vmul.f32 %v8511_v12, %v8352_v32  ;;  %v2471_v15 = vmul.f32 %v7420_v55, %v2466_v25  ;;  %v2700_v24 = vmul.f32 %v8561_v18, %v2466_v25  ;;  %v2771_v52 = vrot.slane %v2770_v4, 4  ;;  %v2657_v32 = vpop.permute.xlu0 %2656 }
 0x511   : > { %7433 = vpow2.f32 %v1986_v0  ;;  %v2479_v26 = vmul.f32 %v7424_v58, %v2474_v42  ;;  %v1990_v23 = vmul.f32 1.442695, %v1930_v19  ;;  %v1932_v31 = vmul.f32 %v8511_v12, %v8346_v27 }
 0x512   : > { %7435 = vpow2.f32 %v1992_v20  ;;  %v2703_v59 = vmul.f32 %v8577_v50, %v2474_v42  ;;  %v2473_v38 = vadd.f32 %v2471_v15, %v2390_v46  ;;  %v2772_v9 = vadd.f32 %v2771_v52, %v2770_v4  ;;  %v10259_v15 = vld [vmem:[#allocation39_spill] sm:$0xff] }
 0x513   : > { %v2777_v29 = vadd.f32 %v2701_v34, %v2700_v24  ;;  %v7426_v49 = vpop.eup %7425  ;;  %v2481_v43 = vadd.f32 %v2479_v26, %v2393_v40  ;;  %v2345_v55 = vrot.slane %v8580_v10, %v7919_v21  ;;  %v2349_v18 = vrot.slane %v2287_v60, %v7919_v21  ;;  %v2653_v10 = vpop.permute.xlu1 %2652  ;;  %v10258_v34 = vld [vmem:[#allocation38_spill] sm:$0xff] }
 0x514   : > { %v1996_v2 = vmul.f32 1.442695, %v1933_v3  ;;  %v2478_v39 = vmul.f32 %v7426_v49, %v2473_v38  ;;  %v2702_v61 = vmul.f32 %v8596_v57, %v2473_v38  ;;  %v2773_v51 = vrot.slane %v2772_v9, 2 }
 0x515   : > { %v7428_v13 = vpop.eup %7427  ;;  %v2778_v27 = vrot.slane %v2777_v29, 4  ;;  %v2705_v12 = vmul.f32 %v2649_v30, %v2481_v43  ;;  %7437 = vpow2.f32 %v1990_v23  ;;  %v1994_v46 = vmul.f32 1.442695, %v1932_v31 }
 0x516   : > { %v2486_v50 = vmul.f32 %v7428_v13, %v2481_v43  ;;  %v2480_v40 = vadd.f32 %v2478_v39, %v8619_v1  ;;  %v2774_v35 = vadd.f32 %v2773_v51, %v2772_v9  ;;  %v2784_v48 = vadd.f32 %v2703_v59, %v2702_v61  ;;  %v2665_v1 = vpop.permute.xlu0 %2664  ;;  %v10260_v59 = vld [vmem:[#allocation40_spill] sm:$0xff] }
 0x517   : > { %v7430_v44 = vpop.eup %7429  ;;  %v2779_v63 = vadd.f32 %v2778_v27, %v2777_v29  ;;  %v2394_v58 = vmul.f32 %v2341_v22, %v8463_v47  ;;  %v2397_v57 = vmul.f32 %v2345_v55, %v10258_v34  ;;  %7439 = vpow2.f32 %v1996_v2  ;;  %v2661_v49 = vpop.permute.xlu1 %2660 }
 0x518   : > { %v7432_v0 = vpop.eup %7431  ;;  %v2488_v20 = vadd.f32 %v2486_v50, %v2395_v11  ;;  %v2704_v25 = vmul.f32 %v2645_v5, %v2480_v40  ;;  %v2785_v4 = vrot.slane %v2784_v48, 4  ;;  %v2396_v19 = vmul.f32 %v2345_v55, %v8489_v6 }
 0x519   : > { %v2780_v30 = vrot.slane %v2779_v63, 2  ;;  %v2775_v42 = vrot.slane %v2774_v35, 1  ;;  %v2485_v60 = vmul.f32 %v7430_v44, %v2480_v40  ;;  %v2399_v24 = vmul.f32 %v2349_v18, %v10259_v15 }
 0x51a   : > { %v2493_v3 = vmul.f32 %v7432_v0, %v2488_v20  ;;  %v2786_v23 = vadd.f32 %v2785_v4, %v2784_v48  ;;  %v2791_v11 = vadd.f32 %v2705_v12, %v2704_v25  ;;  %7441 = vpow2.f32 %v1994_v46  ;;  %v2673_v44 = vpop.permute.xlu0 %2672 }
 0x51b   : > { %v7434_v52 = vpop.eup %7433  ;;  %v2781_v26 = vadd.f32 %v2780_v30, %v2779_v63  ;;  %v2707_v22 = vmul.f32 %v2657_v32, %v2488_v20  ;;  %v2487_v31 = vadd.f32 %v2485_v60, %v2394_v58  ;;  %v2398_v38 = vmul.f32 %v2349_v18, %v10260_v59  ;;  %v2669_v25 = vpop.permute.xlu1 %2668 }
 0x51c   : > { %v7436_v47 = vpop.eup %7435  ;;  %v2495_v5 = vadd.f32 %v2493_v3, %v2397_v57  ;;  %v2787_v6 = vrot.slane %v2786_v23, 2  ;;  %v2792_v29 = vrot.slane %v2791_v11, 4  ;;  %v8659_v43 = vadd.f32 %v2726_v16, %v8540_v54 }
 0x51d   : > { %v2782_v9 = vrot.slane %v2781_v26, 1  ;;  %v2776_v55 = vadd.f32 %v2775_v42, %v2774_v35  ;;  %v2706_v2 = vmul.f32 %v2653_v10, %v2487_v31  ;;  %v2492_v13 = vmul.f32 %v7434_v52, %v2487_v31 }
 0x51e   : > { %v2500_v39 = vmul.f32 %v7436_v47, %v2495_v5  ;;  %v2788_v51 = vadd.f32 %v2787_v6, %v2786_v23  ;;  %v2793_v32 = vadd.f32 %v2792_v29, %v2791_v11  ;;  %v2738_v27 = vrot.slane %v8559_v7, 2 }
 0x51f   : > { %v2783_v61 = vadd.f32 %v2782_v9, %v2781_v26  ;;  %v7438_v12 = vpop.eup %7437  ;;  %v2798_v18 = vadd.f32 %v2707_v22, %v2706_v2  ;;  %v2709_v50 = vmul.f32 %v2665_v1, %v2495_v5  ;;  %v2494_v46 = vadd.f32 %v2492_v13, %v2396_v19  ;;  %v2681_v22 = vpop.permute.xlu0 %2680 }
 0x520   : > { %v2502_v40 = vadd.f32 %v2500_v39, %v2399_v24  ;;  %v2789_v63 = vrot.slane %v2788_v51, 1  ;;  %v2794_v48 = vrot.slane %v2793_v32, 2  ;;  %v2750_v16 = vrot.slane %v8572_v36, 4 }
 0x521   : > { %v2856_v54 = vsel %vm2842_vm7, %v2783_v61, %v2776_v55  ;;  %v7440_v35 = vpop.eup %7439  ;;  %v2799_v10 = vrot.slane %v2798_v18, 4  ;;  %v2708_v0 = vmul.f32 %v2661_v49, %v2494_v46  ;;  %v2499_v20 = vmul.f32 %v7438_v12, %v2494_v46 }
 0x522   : > { %v2745_v58 = vrot.slane %v8593_v14, 2  ;;  %v2790_v34 = vadd.f32 %v2789_v63, %v2788_v51  ;;  %v2795_v57 = vadd.f32 %v2794_v48, %v2793_v32  ;;  %v2507_v30 = vmul.f32 %v7440_v35, %v2502_v40 }
 0x523   : > { %v2739_v4 = vadd.f32 %v2738_v27, %v8559_v7  ;;  %v2800_v19 = vadd.f32 %v2799_v10, %v2798_v18  ;;  %v2805_v42 = vadd.f32 %v2709_v50, %v2708_v0  ;;  %v2711_v60 = vmul.f32 %v2673_v44, %v2502_v40 }
 0x524   : > { %v2501_v1 = vadd.f32 %v2499_v20, %v2398_v38  ;;  %v7442_v3 = vpop.eup %7441  ;;  %v2796_v15 = vrot.slane %v2795_v57, 1  ;;  %v2857_v24 = vsel %vm2844_vm8, %v2790_v34, %v2856_v54  ;;  %v2509_v52 = vadd.f32 %v2507_v30, %v8622_v37  ;;  %v2677_v37 = vpop.permute.xlu1 %2676 }
 0x525   : > { %v2751_v26 = vadd.f32 %v2750_v16, %v8572_v36  ;;  %v2801_v23 = vrot.slane %v2800_v19, 2  ;;  %v2806_v11 = vrot.slane %v2805_v42, 4  ;;  %v2746_v59 = vadd.f32 %v2745_v58, %v8593_v14 }
 0x526   : > { %v2710_v47 = vmul.f32 %v2669_v25, %v2501_v1  ;;  %v2506_v31 = vmul.f32 %v7442_v3, %v2501_v1  ;;  %v2797_v5 = vadd.f32 %v2796_v15, %v2795_v57  ;;  %v2713_v7 = vmul.f32 %v2681_v22, %v2509_v52 }
 0x527   : > { %v2752_v9 = vrot.slane %v2751_v26, 2  ;;  %v2802_v38 = vadd.f32 %v2801_v23, %v2800_v19  ;;  %v2807_v6 = vadd.f32 %v2806_v11, %v2805_v42  ;;  %v2756_v2 = vadd.f32 %v8591_v33, %v8588_v28 }
 0x528   : > { %v2812_v29 = vadd.f32 %v2711_v60, %v2710_v47  ;;  %v2508_v49 = vadd.f32 %v2506_v31, %v8624_v53  ;;  %v2858_v55 = vsel %vm2846_vm9, %v2797_v5, %v2857_v24  ;;  %v2763_v13 = vadd.f32 %v8616_v62, %v8633_v45  ;;  %v10261_v5 = vld [vmem:[#allocation18_spill] sm:$0xff] }
 0x529   : > { %v2753_v36 = vadd.f32 %v2752_v9, %v2751_v26  ;;  %v2803_v39 = vrot.slane %v2802_v38, 1  ;;  %v2808_v61 = vrot.slane %v2807_v6, 2  ;;  %v2733_v32 = vrot.slane %v8557_v8, 1 }
 0x52a   : > { %v2813_v14 = vrot.slane %v2812_v29, 4  ;;  %v2712_v51 = vmul.f32 %v2677_v37, %v2508_v49  ;;  %v2740_v27 = vrot.slane %v2739_v4, 1  ;;  %v2757_v12 = vrot.slane %v2756_v2, 4 }
 0x52b   : > { %v2764_v53 = vrot.slane %v2763_v13, 4  ;;  %v2804_v18 = vadd.f32 %v2803_v39, %v2802_v38  ;;  %v2809_v50 = vadd.f32 %v2808_v61, %v2807_v6  ;;  %v2747_v40 = vrot.slane %v2746_v59, 1  ;;  %v10262_v6 = vld [vmem:[#allocation14_spill] sm:$0xff]  ;;  %v10266_v39 = vld [vmem:[#allocation36_spill] sm:$0xff] }
 0x52c   : > { %v2814_v46 = vadd.f32 %v2813_v14, %v2812_v29  ;;  %v2819_v44 = vadd.f32 %v2713_v7, %v2712_v51  ;;  %v2754_v63 = vrot.slane %v2753_v36, 1  ;;  %v2758_v48 = vadd.f32 %v2757_v12, %v2756_v2  ;;  %v10263_v29 = vld [vmem:[#allocation34_spill] sm:$0xff] }
 0x52d   : > { %v2765_v28 = vadd.f32 %v2764_v53, %v2763_v13  ;;  %v2859_v33 = vsel %vm2848_vm10, %v2804_v18, %v2858_v55  ;;  %v2810_v62 = vrot.slane %v2809_v50, 1  ;;  %v2720_v16 = vadd.f32 %v2719_v56, %v8533_v41  ;;  %v10264_v55 = vld [vmem:[#allocation19_spill] sm:$0xff] }
 0x52e   : > { %v2815_v45 = vrot.slane %v2814_v46, 2  ;;  %v2820_v54 = vrot.slane %v2819_v44, 4  ;;  %v2734_v35 = vadd.f32 %v2733_v32, %v8557_v8  ;;  %v2759_v10 = vrot.slane %v2758_v48, 2  ;;  %v10265_v13 = vld [vmem:[#allocation15_spill] sm:$0xff] }
 0x52f   : > { %v2766_v0 = vrot.slane %v2765_v28, 2  ;;  %v2811_v20 = vadd.f32 %v2810_v62, %v2809_v50  ;;  %v2741_v57 = vadd.f32 %v2740_v27, %v2739_v4  ;;  %v2748_v25 = vadd.f32 %v2747_v40, %v2746_v59  ;;  %v6668_v4 = vld [vmem:[%s10131_s16] ss:$0 sm:$0xff] }
 0x530   : > { %v2816_v58 = vadd.f32 %v2815_v45, %v2814_v46  ;;  %v2821_v34 = vadd.f32 %v2820_v54, %v2819_v44  ;;  %v2760_v30 = vadd.f32 %v2759_v10, %v2758_v48  ;;  %v2843_v42 = vsel %vm2842_vm7, %v8659_v43, %v2720_v16 }
 0x531   : > { %v2767_v19 = vadd.f32 %v2766_v0, %v2765_v28  ;;  %v2860_v60 = vsel %vm2850_vm11, %v2811_v20, %v2859_v33  ;;  %v2755_v15 = vadd.f32 %v2754_v63, %v2753_v36  ;;  %v2845_v8 = vsel %vm2844_vm8, %v2734_v35, %v2843_v42  ;;  %v7281_v0 = vld [vmem:[%s10124_s9 + $0x40] ss:$8 sps:$4 sm:$0xff]   ;;  %v7283_v20 = vld [vmem:[%s10124_s9 + $0x44] ss:$8 sps:$4 sm:$0xff]  }
 0x532   : > { %v2817_v1 = vrot.slane %v2816_v58, 1  ;;  %v2822_v3 = vrot.slane %v2821_v34, 2  ;;  %v2761_v41 = vrot.slane %v2760_v30, 1  ;;  %v2847_v26 = vsel %vm2846_vm9, %v2741_v57, %v2845_v8  ;;  %3088 = vmatprep.subr.bf16.mxu0 %v7283_v20  ;;  %v7289_v57 = vld [vmem:[%s10124_s9 + $0x64] ss:$8 sps:$4 sm:$0xff]  }
 0x533   : > { %v2768_v56 = vrot.slane %v2767_v19, 1  ;;  %v2849_v11 = vsel %vm2848_vm10, %v2748_v25, %v2847_v26  ;;  %v2552_v7 = vmul.f32 %v6668_v4, %v10261_v5  ;;  %v2879_v49 = vmul.f32 %v10263_v29, %v10262_v6  ;;  %3089 = vmatpush1.bf16.msra.mxu0 %v7281_v0  ;;  %v7287_v25 = vld [vmem:[%s10124_s9 + $0x60] ss:$8 sps:$4 sm:$0xff]   ;;  %v7299_v29 = vld [vmem:[%s10127_s12 + $0x70] sm:$0xff]  }
 0x534   : > { %v2818_v24 = vadd.f32 %v2817_v1, %v2816_v58  ;;  %v2823_v52 = vadd.f32 %v2822_v3, %v2821_v34  ;;  %v2762_v23 = vadd.f32 %v2761_v41, %v2760_v30  ;;  %v2851_v31 = vsel %vm2850_vm11, %v2755_v15, %v2849_v11  ;;  %v7286_v58 = vld [vmem:[%s10124_s9 + $0x54] ss:$8 sps:$4 sm:$0xff]   ;;  %v7284_v34 = vld [vmem:[%s10124_s9 + $0x50] ss:$8 sps:$4 sm:$0xff]   ;;  %v6678_v8 = vld [vmem:[%s10122_s7 + $0x1] ss:$0 sm:$0xff] }
 0x535   : > { %v2769_v43 = vadd.f32 %v2768_v56, %v2767_v19  ;;  %v2553_v37 = vmul.f32 %v6668_v4, %v10264_v55  ;;  %v2880_v61 = vmul.f32 %v10266_v39, %v10265_v13  ;;  %v10267_v12 = vmov 0.0   ;;  %3090 = vmatprep.subr.bf16.mxu0 %v7286_v58  ;;  %v7292_v30 = vld [vmem:[%s10124_s9 + $0x74] ss:$8 sps:$4 sm:$0xff]   ;;  %v7290_v19 = vld [vmem:[%s10124_s9 + $0x70] ss:$8 sps:$4 sm:$0xff]   ;;  %v7294_v5 = vld [vmem:[%s10127_s12 + $0x48] sm:$0xff]  }
 0x536   : > { %v2861_v47 = vsel %vm2852_vm12, %v2818_v24, %v2860_v60  ;;  %v2824_v22 = vrot.slane %v2823_v52, 1  ;;  %v2853_v59 = vsel %vm2852_vm12, %v2762_v23, %v2851_v31  ;;  %v6680_v23 = vld [vmem:[%s10123_s8 + $0x1] ss:$0 sm:$0xff]  ;;  %v7301_v6 = vld [vmem:[%s10128_s13 + $0x8] sm:$0xff]   ;;  %v6698_v13 = vld [vmem:[%s10125_s10 + $0x4] sm:$0xf] }
 0x537   : > { %v2855_v38 = vsel %vm2854_vm13, %v2769_v43, %v2853_v59  ;;  %3091 = vmatpush1.bf16.msra.mxu0 %v7284_v34  ;;  %v7293_v31 = vld [vmem:[%s10127_s12 + $0x40] sm:$0xff]   ;;  %v7296_v59 = vld [vmem:[%s10127_s12 + $0x58] sm:$0xff]   ;;  %v3141_v39 = vrot.slane %v6698_v13, %v7919_v21 }
 0x538   : > { %v2825_v9 = vadd.f32 %v2824_v22, %v2823_v52  ;;  %v2865_v36 = vadd.f32 %v2855_v38, %v2552_v7  ;;  %3092 = vmatprep.subr.bf16.mxu0 %v7289_v57  ;;  %v7295_v7 = vld [vmem:[%s10127_s12 + $0x50] sm:$0xff]   ;;  %v7298_v38 = vld [vmem:[%s10127_s12 + $0x68] sm:$0xff]   ;;  %v6700_v20 = vld [vmem:[%s10126_s11 + $0x1] ss:$0 sm:$0xff] }
 0x53a   : > { %v2862_v2 = vsel %vm2854_vm13, %v2825_v9, %v2861_v47  ;;  %v2881_v51 = vmul.f32 %v2879_v49, %v2865_v36  ;;  %v7297_v9 = vld [vmem:[%s10127_s12 + $0x60] sm:$0xff]   ;;  %v7300_v49 = vld [vmem:[%s10127_s12 + $0x78] sm:$0xff]  }
 0x53b   : > { %v2866_v14 = vadd.f32 %v2862_v2, %v2553_v37  ;;  %3093 = vmatpush1.bf16.msra.mxu0 %v7287_v25 }
 0x53c   : > { %3094 = vmatprep.subr.bf16.mxu0 %v7292_v30 }
 0x53d   : > { %v2882_v32 = vmul.f32 %v2880_v61, %v2866_v14  ;;  %v10270_v61 = vld [vmem:[#allocation13_spill] sm:$0xff] }
 0x53e   : > { %v3149_v14 = vrot.slane %v6698_v13, %v10270_v61 }
 0x53f   : > { %v2883_v27 = vpack.c.bf16 %v2882_v32, %v2881_v51  ;;  %3095 = vmatpush1.bf16.msra.mxu0 %v7290_v19  ;;  %v10271_v51 = vld [vmem:[#allocation16_spill] sm:$0xff] }
 0x540   : > { %7052 = vmatprep.subr.bf16.mxu0 %v10267_v12  ;;  %v3159_v32 = vrot.slane %v6698_v13, %v10271_v51 }
 0x541   : > { %7029 = vmatmul.mubr.bf16.vlgmr.msra.gmra.mrb[12].mxu1 %v2883_v27 }
 0x542   : > { %7048 = vmatprep.mubr.msk.bf16.mxu1 %vm7695_vm2, %v10267_v12  ;;  %7033 = vmatpush3.bf16.msra.mxu1 %v7293_v31 }
 0x543   : > { %7034 = vmatprep.subr.bf16.mxu1 %v10267_v12 }
 0x546   : > { %7035 = vmatpush3.bf16.msra.mxu1 %v7294_v5 }
 0x547   : > { %7036 = vmatprep.subr.bf16.mxu1 %v10267_v12 }
 0x54a   : > { %7037 = vmatpush3.bf16.msra.mxu1 %v7295_v7 }
 0x54b   : > { %7038 = vmatprep.subr.bf16.mxu1 %v10267_v12 }
 0x54e   : > { %7039 = vmatpush3.bf16.msra.mxu1 %v7296_v59 }
 0x54f   : > { %7040 = vmatprep.subr.bf16.mxu1 %v10267_v12 }
 0x552   : > { %7041 = vmatpush3.bf16.msra.mxu1 %v7297_v9 }
 0x553   : > { %7042 = vmatprep.subr.bf16.mxu1 %v10267_v12 }
 0x556   : > { %7043 = vmatpush3.bf16.msra.mxu1 %v7298_v38 }
 0x557   : > { %7044 = vmatprep.subr.bf16.mxu1 %v10267_v12 }
 0x55a   : > { %7045 = vmatpush3.bf16.msra.mxu1 %v7299_v29 }
 0x55b   : > { %7046 = vmatprep.subr.bf16.mxu1 %v10267_v12 }
 0x55e   : > { %7047 = vmatpush3.bf16.msra.mxu1 %v7300_v49  ;;  %v10277_v49 = vld [vmem:[#allocation23_spill] sm:$0xff] }
 0x614   : > { %v2982_v53 = vpop.f32.mrb[12].mxu1 }
 0x615   : > { %v7030_v18 = vpop.f32.mrb[13].mxu1  ;;  %v2989_v50 = vsel %vm871_vm6, %v2982_v53, 0.0 }
 0x616   : > { %2990 = vadd.xlane.f32.xlu1 %v2989_v50  ;;  %v2985_v46 = vpop.f32.mrb[14].mxu1 }
 0x617   : > { %v7031_v44 = vpop.f32.mrb[15].mxu1  ;;  %v2992_v40 = vsel %vm871_vm6, %v2985_v46, 0.0 }
 0x618   : > { %2993 = vadd.xlane.f32.xlu0 %v2992_v40  ;;  %v10272_v44 = vld [vmem:[#allocation17_spill] sm:$0xff] }
 0x619   : > { %v3169_v40 = vrot.slane %v6698_v13, %v10272_v44 }
 0x6a3   : > { %v2991_v63 = vpop.xlane.xlu1 %2990 }
 0x6a4   : > { %v2995_v48 = vmul.f32 0.015625, %v2991_v63 }
 0x6a5   : > { %v2994_v28 = vpop.xlane.xlu0 %2993 }
 0x6a6   : > { %v2997_v33 = vsub.f32 %v2982_v53, %v2995_v48  ;;  %v2996_v62 = vmul.f32 0.015625, %v2994_v28 }
 0x6a8   : > { %v2998_v45 = vsub.f32 %v2985_v46, %v2996_v62  ;;  %v2999_v54 = vmul.f32 %v2997_v33, %v2997_v33 }
 0x6aa   : > { %v3001_v16 = vsel %vm871_vm6, %v2999_v54, 0.0  ;;  %v3000_v35 = vmul.f32 %v2998_v45, %v2998_v45 }
 0x6ab   : > { %3002 = vadd.xlane.f32.xlu0 %v3001_v16 }
 0x6ac   : > { %v3004_v10 = vsel %vm871_vm6, %v3000_v35, 0.0 }
 0x6ad   : > { %3005 = vadd.xlane.f32.xlu1 %v3004_v10 }
 0x738   : > { %v3003_v42 = vpop.xlane.xlu0 %3002 }
 0x739   : > { %v3007_v60 = vmul.f32 0.015625, %v3003_v42 }
 0x73a   : > { %v3006_v1 = vpop.xlane.xlu1 %3005 }
 0x73b   : > { %v3009_v3 = vadd.f32 1e-05, %v3007_v60  ;;  %v3008_v15 = vmul.f32 0.015625, %v3006_v1 }
 0x73d   : > { %7443 = vrsqrt.f32 %v3009_v3  ;;  %v3010_v41 = vadd.f32 1e-05, %v3008_v15 }
 0x73f   : > { %7445 = vrsqrt.f32 %v3010_v41 }
 0x747   : > { %v7444_v56 = vpop.eup %7443 }
 0x748   : > { %v3013_v24 = vmul.f32 %v7444_v56, %v2997_v33 }
 0x749   : > { %v7446_v52 = vpop.eup %7445 }
 0x74a   : > { %v3023_v4 = vmul.f32 %v6678_v8, %v3013_v24  ;;  %v3014_v26 = vmul.f32 %v7446_v52, %v2998_v45 }
 0x74c   : > { %v3024_v43 = vmul.f32 %v6678_v8, %v3014_v26  ;;  %v3033_v11 = vadd.f32 %v6680_v23, %v3023_v4 }
 0x74e   : > { %v3034_v47 = vadd.f32 %v6680_v23, %v3024_v43  ;;  %v10275_v43 = vmov 0  }
 0x750   : > { %v3035_v22 = vpack.c.bf16 %v3034_v47, %v3033_v11 }
 0x752   : > { %6697 = vmatmul.mubr.msk.bf16.vlgmr.msra.gmra.mrb[12].mxu0 %vm871_vm6, %v3035_v22 }
 0x753   : > { %7054 = vmatprep.mubr.msk.bf16.mxu0 %vm7695_vm2, %v10267_v12  ;;  %7053 = vmatpush3.bf16.msra.mxu0 %v7301_v6  ;;  %v10276_v6 = vld [vmem:[#allocation22_spill] sm:$0xff] }
 0x754   : > { %7058 = vmatprep.subr.bf16.mxu0 %v10267_v12 }
 0x825   : > { %v3122_v55 = vpop.f32.mrb[12].mxu0 }
 0x826   : > { %3132 = vst [vmem:[#allocation3 + $0x3] sm:$0xff] %v3122_v55  ;;  %v8777_v37 = vpop.f32.mrb[13].mxu0  ;;  %v3170_v0 = vmul.f32 %v3169_v40, %v3122_v55 }
 0x827   : > { %10268 = vst [vmem:[#allocation28_spill] sm:$0xff] %v8777_v37  ;;  %v3126_v36 = vpop.f32.mrb[14].mxu0 }
 0x828   : > { %3133 = vst [vmem:[#allocation3 + $0xb] sm:$0xff] %v3126_v36  ;;  %v8779_v2 = vpop.f32.mrb[15].mxu0  ;;  %v3171_v34 = vmul.f32 %v3169_v40, %v3126_v36  ;;  %v10278_v36 = vld [vmem:[#allocation24_spill] sm:$0xff] }
 0x829   : > { %10269 = vst [vmem:[#allocation27_spill] sm:$0xff] %v8779_v2 }
 0x82d   : > { %v3136_v27 = vld [vmem:[#allocation3] sm:$0xff] }
 0x82e   : > { %v3144_v53 = vld [vmem:[#allocation3 + $0x1] sm:$0xff]  ;;  %v3142_v50 = vmul.f32 %v3141_v39, %v3136_v27 }
 0x82f   : > { %v3154_v18 = vld [vmem:[#allocation3 + $0x2] sm:$0xff]  ;;  %v3150_v46 = vmul.f32 %v3149_v14, %v3144_v53  ;;  %v3155_v28 = vld [vmem:[#allocation3 + $0xa] sm:$0xff] }
 0x830   : > { %4791 = vst [vmem:[#allocation3] sm:$0x7] %v10267_v12  ;;  %v3137_v63 = vld [vmem:[#allocation3 + $0x8] sm:$0xff]  ;;  %v3160_v54 = vmul.f32 %v3159_v32, %v3154_v18  ;;  %v3161_v35 = vmul.f32 %v3159_v32, %v3155_v28 }
 0x831   : > { %v3145_v48 = vld [vmem:[#allocation3 + $0x9] sm:$0xff]  ;;  %v3143_v33 = vmul.f32 %v3141_v39, %v3137_v63  ;;  %v3152_v45 = vadd.f32 %v3150_v46, %v3142_v50  ;;  %v10279_v39 = vld [vmem:[#allocation25_spill] sm:$0xff] }
 0x832   : > { %v3151_v62 = vmul.f32 %v3149_v14, %v3145_v48 }
 0x833   : > { %v3162_v10 = vadd.f32 %v3160_v54, %v3152_v45 }
 0x834   : > { %v3153_v16 = vadd.f32 %v3151_v62, %v3143_v33 }
 0x835   : > { %v3172_v57 = vadd.f32 %v3170_v0, %v3162_v10 }
 0x836   : > { %v3163_v58 = vadd.f32 %v3161_v35, %v3153_v16 }
 0x837   : > { %v3182_v30 = vadd.f32 %v6700_v20, %v3172_v57 }
 0x838   : > { %v3173_v25 = vadd.f32 %v3171_v34, %v3163_v58 }
 0x839   : > { %v3184_v42 = vsub.f32 0.0, %v3182_v30 }
 0x83a   : > { %v3183_v19 = vadd.f32 %v6700_v20, %v3173_v25 }
 0x83b   : > { %v3186_v1 = vmul.f32 1.442695, %v3184_v42 }
 0x83c   : > { %v3185_v60 = vsub.f32 0.0, %v3183_v19 }
 0x83d   : > { %7447 = vpow2.f32 %v3186_v1 }
 0x83e   : > { %v3188_v3 = vmul.f32 1.442695, %v3185_v60 }
 0x840   : > { %7449 = vpow2.f32 %v3188_v3  ;;  %v6728_v3 = vld [vmem:[%s10129_s14 + $0x1] ss:$0 sm:$0xff] }
 0x847   : > { %v7448_v15 = vpop.eup %7447 }
 0x848   : > { %v3190_v41 = vadd.f32 1.0, %v7448_v15 }
 0x84a   : > { %v7450_v56 = vpop.eup %7449  ;;  %7451 = vrcp.f32 %v3190_v41 }
 0x84b   : > { %v3191_v8 = vadd.f32 1.0, %v7450_v56 }
 0x84d   : > { %7453 = vrcp.f32 %v3191_v8 }
 0x854   : > { %v7452_v24 = vpop.eup %7451 }
 0x855   : > { %v8792_v4 = vmul.f32 %v7452_v24, %v3182_v30 }
 0x857   : > { %v7454_v52 = vpop.eup %7453  ;;  %10273 = vst [vmem:[#allocation32_spill] sm:$0xff] %v8792_v4 }
 0x858   : > { %v8794_v26 = vmul.f32 %v7454_v52, %v3183_v19 }
 0x85a   : > { %10274 = vst [vmem:[#allocation31_spill] sm:$0xff] %v8794_v26  ;;  %v3198_v23 = vpack.c.bf16 %v8794_v26, %v8792_v4 }
 0x85c   : > { %7049 = vmatmul.mubr.bf16.vlgmr.msra.gmra.mrb[16].mxu1 %v3198_v23 }
 0x85d   : > { %4780 = vmatprep.mubr.bf16.mxu1 %v10275_v43 }
 0x92f   : > { %v3298_v11 = vpop.f32.mrb[16].mxu1 }
 0x930   : > { %v7050_v47 = vpop.f32.mrb[17].mxu1  ;;  %v3681_v22 = vrot.slane %v3298_v11, %v7919_v21  ;;  %v3693_v59 = vrot.slane %v3298_v11, %v10270_v61  ;;  %v3705_v9 = vrot.slane %v3298_v11, %v10271_v51  ;;  %v3717_v38 = vrot.slane %v3298_v11, %v10272_v44 }
 0x931   : > { %v8800_v31 = vpop.f32.mrb[18].mxu1  ;;  %v3729_v29 = vrot.slane %v3298_v11, %v10276_v6  ;;  %v3741_v55 = vrot.slane %v3298_v11, %v10277_v49  ;;  %v3753_v13 = vrot.slane %v3298_v11, %v10278_v36  ;;  %v3765_v14 = vrot.slane %v3298_v11, %v10279_v39 }
 0x932   : > { %3688 = vbcast.lane.b32.xlu1 %v3681_v22, 280  ;;  %3684 = vbcast.lane.b32.xlu0 %v3681_v22, 272  ;;  %v7051_v5 = vpop.f32.mrb[19].mxu1  ;;  %v3305_v7 = vpack.c.bf16 %v8800_v31, %v3298_v11  ;;  %v3777_v32 = vrot.slane %v8800_v31, %v7919_v21  ;;  %v3789_v27 = vrot.slane %v8800_v31, %v10270_v61 }
 0x933   : > { %v3801_v53 = vrot.slane %v8800_v31, %v10271_v51  ;;  %v3813_v18 = vrot.slane %v8800_v31, %v10272_v44  ;;  %v3825_v50 = vrot.slane %v8800_v31, %v10276_v6  ;;  %v3837_v46 = vrot.slane %v8800_v31, %v10277_v49 }
 0x934   : > { %7055 = vmatmul.mubr.msk.bf16.vlgmr.msra.gmra.mrb[16].mxu0 %vm1643_vm3, %v3305_v7  ;;  %v3849_v40 = vrot.slane %v8800_v31, %v10278_v36  ;;  %v3861_v63 = vrot.slane %v8800_v31, %v10279_v39 }
 0x935   : > { %7074 = vmatprep.mubr.msk.bf16.mxu0 %vm7695_vm2, %v10267_v12 }
 0x936   : > { %3696 = vbcast.lane.b32.xlu1 %v3693_v59, 272  ;;  %3700 = vbcast.lane.b32.xlu0 %v3693_v59, 280 }
 0x93a   : > { %3708 = vbcast.lane.b32.xlu1 %v3705_v9, 272  ;;  %3712 = vbcast.lane.b32.xlu0 %v3705_v9, 280 }
 0x93e   : > { %3720 = vbcast.lane.b32.xlu1 %v3717_v38, 272  ;;  %3724 = vbcast.lane.b32.xlu0 %v3717_v38, 280 }
 0x942   : > { %3732 = vbcast.lane.b32.xlu1 %v3729_v29, 272  ;;  %3736 = vbcast.lane.b32.xlu0 %v3729_v29, 280 }
 0x946   : > { %3744 = vbcast.lane.b32.xlu1 %v3741_v55, 272  ;;  %3748 = vbcast.lane.b32.xlu0 %v3741_v55, 280 }
 0x94a   : > { %3756 = vbcast.lane.b32.xlu1 %v3753_v13, 272  ;;  %3760 = vbcast.lane.b32.xlu0 %v3753_v13, 280 }
 0x94e   : > { %3768 = vbcast.lane.b32.xlu1 %v3765_v14, 272  ;;  %3772 = vbcast.lane.b32.xlu0 %v3765_v14, 280 }
 0x952   : > { %4222 = vbcast.lane.b32.xlu1 %v3681_v22, 288  ;;  %4226 = vbcast.lane.b32.xlu0 %v3681_v22, 296 }
 0x956   : > { %4230 = vbcast.lane.b32.xlu1 %v3693_v59, 288  ;;  %4234 = vbcast.lane.b32.xlu0 %v3693_v59, 296 }
 0x95a   : > { %4238 = vbcast.lane.b32.xlu1 %v3705_v9, 288  ;;  %4242 = vbcast.lane.b32.xlu0 %v3705_v9, 296 }
 0x95e   : > { %4246 = vbcast.lane.b32.xlu1 %v3717_v38, 288  ;;  %4250 = vbcast.lane.b32.xlu0 %v3717_v38, 296  ;;  %v4526_v38 = vsub.f32 0.0, %v8777_v37 }
 0x962   : > { %4254 = vbcast.lane.b32.xlu1 %v3729_v29, 288  ;;  %4258 = vbcast.lane.b32.xlu0 %v3729_v29, 296 }
 0x966   : > { %4262 = vbcast.lane.b32.xlu1 %v3741_v55, 288  ;;  %4266 = vbcast.lane.b32.xlu0 %v3741_v55, 296 }
 0x96a   : > { %4270 = vbcast.lane.b32.xlu1 %v3753_v13, 288  ;;  %4274 = vbcast.lane.b32.xlu0 %v3753_v13, 296  ;;  %v4528_v13 = vmul.f32 1.442695, %v4526_v38 }
 0x96e   : > { %4278 = vbcast.lane.b32.xlu1 %v3765_v14, 288  ;;  %4282 = vbcast.lane.b32.xlu0 %v3765_v14, 296 }
 0x972   : > { %3784 = vbcast.lane.b32.xlu0 %v3777_v32, 280  ;;  %3780 = vbcast.lane.b32.xlu1 %v3777_v32, 272 }
 0x976   : > { %3796 = vbcast.lane.b32.xlu0 %v3789_v27, 280  ;;  %3792 = vbcast.lane.b32.xlu1 %v3789_v27, 272 }
 0x97a   : > { %3808 = vbcast.lane.b32.xlu0 %v3801_v53, 280  ;;  %3804 = vbcast.lane.b32.xlu1 %v3801_v53, 272 }
 0x97e   : > { %3820 = vbcast.lane.b32.xlu0 %v3813_v18, 280  ;;  %3816 = vbcast.lane.b32.xlu1 %v3813_v18, 272 }
 0x982   : > { %3832 = vbcast.lane.b32.xlu0 %v3825_v50, 280  ;;  %3828 = vbcast.lane.b32.xlu1 %v3825_v50, 272 }
 0x986   : > { %3844 = vbcast.lane.b32.xlu0 %v3837_v46, 280  ;;  %3840 = vbcast.lane.b32.xlu1 %v3837_v46, 272 }
 0x98a   : > { %3856 = vbcast.lane.b32.xlu0 %v3849_v40, 280  ;;  %3852 = vbcast.lane.b32.xlu1 %v3849_v40, 272 }
 0x98e   : > { %4290 = vbcast.lane.b32.xlu0 %v3777_v32, 296  ;;  %4286 = vbcast.lane.b32.xlu1 %v3777_v32, 288  ;;  %v4527_v32 = vsub.f32 0.0, %v8779_v2 }
 0x992   : > { %4298 = vbcast.lane.b32.xlu0 %v3789_v27, 296  ;;  %4294 = vbcast.lane.b32.xlu1 %v3789_v27, 288 }
 0x996   : > { %4306 = vbcast.lane.b32.xlu0 %v3801_v53, 296  ;;  %4302 = vbcast.lane.b32.xlu1 %v3801_v53, 288 }
 0x99a   : > { %3868 = vbcast.lane.b32.xlu0 %v3861_v63, 280  ;;  %3864 = vbcast.lane.b32.xlu1 %v3861_v63, 272 }
 0x99e   : > { %4314 = vbcast.lane.b32.xlu0 %v3813_v18, 296  ;;  %4310 = vbcast.lane.b32.xlu1 %v3813_v18, 288 }
 0x9a2   : > { %4322 = vbcast.lane.b32.xlu0 %v3825_v50, 296  ;;  %4318 = vbcast.lane.b32.xlu1 %v3825_v50, 288 }
 0x9a4   : > { %v8829_v48 = vpop.permute.xlu1 %3688  ;;  %v8831_v28 = vpop.permute.xlu0 %3684 }
 0x9a6   : > { %4330 = vbcast.lane.b32.xlu0 %v3837_v46, 296  ;;  %4326 = vbcast.lane.b32.xlu1 %v3837_v46, 288 }
 0x9a8   : > { %v8833_v33 = vpop.permute.xlu1 %3696  ;;  %v8835_v62 = vpop.permute.xlu0 %3700 }
 0x9aa   : > { %4338 = vbcast.lane.b32.xlu0 %v3849_v40, 296  ;;  %4334 = vbcast.lane.b32.xlu1 %v3849_v40, 288  ;;  %v4530_v40 = vmul.f32 1.442695, %v4527_v32 }
 0x9ac   : > { %v8837_v45 = vpop.permute.xlu1 %3708  ;;  %v8839_v54 = vpop.permute.xlu0 %3712 }
 0x9ae   : > { %4346 = vbcast.lane.b32.xlu0 %v3861_v63, 296  ;;  %4342 = vbcast.lane.b32.xlu1 %v3861_v63, 288 }
 0x9b0   : > { %v8841_v16 = vpop.permute.xlu1 %3720  ;;  %v8843_v35 = vpop.permute.xlu0 %3724 }
 0x9b4   : > { %v8845_v10 = vpop.permute.xlu1 %3732  ;;  %v8847_v0 = vpop.permute.xlu0 %3736 }
 0x9b8   : > { %v8849_v20 = vpop.permute.xlu1 %3744  ;;  %v8851_v58 = vpop.permute.xlu0 %3748 }
 0x9bc   : > { %v8853_v34 = vpop.permute.xlu1 %3756  ;;  %v8855_v57 = vpop.permute.xlu0 %3760 }
 0x9c0   : > { %v8857_v25 = vpop.permute.xlu1 %3768  ;;  %v8859_v30 = vpop.permute.xlu0 %3772 }
 0x9c1   : > { %10280 = vst [vmem:[#allocation33_spill] sm:$0xff] %v8857_v25  ;;  %10281 = vst [vmem:[#allocation26_spill] sm:$0xff] %v8859_v30 }
 0x9c4   : > { %v8861_v19 = vpop.permute.xlu1 %4222  ;;  %v8863_v42 = vpop.permute.xlu0 %4226 }
 0x9c8   : > { %v8865_v60 = vpop.permute.xlu1 %4230  ;;  %v8867_v1 = vpop.permute.xlu0 %4234 }
 0x9cc   : > { %v8872_v41 = vpop.permute.xlu1 %4238  ;;  %v8874_v8 = vpop.permute.xlu0 %4242 }
 0x9d0   : > { %v8879_v5 = vpop.permute.xlu1 %4246  ;;  %v8881_v7 = vpop.permute.xlu0 %4250 }
 0x9d4   : > { %v8884_v29 = vpop.permute.xlu1 %4254  ;;  %v8886_v55 = vpop.permute.xlu0 %4258 }
 0x9d8   : > { %v8889_v27 = vpop.permute.xlu1 %4262  ;;  %v8891_v53 = vpop.permute.xlu0 %4266 }
 0x9d9   : > { %10282 = vst [vmem:[#allocation37_spill] sm:$0xff] %v8889_v27  ;;  %10283 = vst [vmem:[#allocation35_spill] sm:$0xff] %v8891_v53 }
 0xa07   : > { %v3360_v15 = vpop.f32.mrb[16].mxu0 }
 0xa08   : > { %v3361_v56 = vadd.f32 %v6728_v3, %v3360_v15  ;;  %v7056_v24 = vpop.f32.mrb[17].mxu0  ;;  %v8895_v15 = vpop.permute.xlu0 %4274 }
 0xa09   : > { %v3363_v23 = vpop.f32.mrb[18].mxu0  ;;  %10285 = vst [vmem:[#allocation30_spill] sm:$0xff] %v8895_v15  ;;  %v7302_v24 = vld [vmem:[%s10132_s17 + $0x40] sm:$0xff]  }
 0xa0a   : > { %v3369_v52 = vand.u32 2147483647, %v3361_v56  ;;  %v8876_v43 = vadd.f32 %v6728_v3, %v3363_v23  ;;  %v7057_v11 = vpop.f32.mrb[19].mxu0  ;;  %v8893_v3 = vpop.permute.xlu1 %4270  ;;  %7059 = vmatpush3.bf16.msra.mxu0 %v7302_v24 }
 0xa0b   : > { %10284 = vst [vmem:[#allocation29_spill] sm:$0xff] %v8893_v3  ;;  %v7303_v11 = vld [vmem:[%s10132_s17 + $0x48] sm:$0xff]   ;;  %7060 = vmatprep.subr.bf16.mxu0 %v10267_v12 }
 0xa0c   : > { %v3371_v47 = vsub.f32 0.0, %v3369_v52  ;;  %v3370_v22 = vand.u32 2147483647, %v8876_v43 }
 0xa0e   : > { %v3373_v31 = vmul.f32 1.442695, %v3371_v47  ;;  %v3372_v59 = vsub.f32 0.0, %v3370_v22  ;;  %7061 = vmatpush3.bf16.msra.mxu0 %v7303_v11 }
 0xa0f   : > { %7062 = vmatprep.subr.bf16.mxu0 %v10267_v12 }
 0xa10   : > { %7455 = vpow2.f32 %v3373_v31  ;;  %v3375_v9 = vmul.f32 1.442695, %v3372_v59  ;;  %v8904_v59 = vpop.permute.xlu1 %4278 }
 0xa11   : > { %10286 = vst [vmem:[#allocation38_spill] sm:$0xff] %v8904_v59 }
 0xa12   : > { %7457 = vpow2.f32 %v3375_v9  ;;  %v8906_v9 = vpop.permute.xlu0 %4282 }
 0xa13   : > { %7459 = vpow2.f32 %v4528_v13  ;;  %10287 = vst [vmem:[#allocation39_spill] sm:$0xff] %v8906_v9 }
 0xa16   : > { %v8916_v11 = vpop.permute.xlu0 %3784 }
 0xa17   : > { %10288 = vst [vmem:[#allocation40_spill] sm:$0xff] %v8916_v11 }
 0xa1a   : > { %v7456_v14 = vpop.eup %7455 }
 0xa1b   : > { %v3377_v18 = vadd.f32 1.0, %v7456_v14  ;;  %v3380_v63 = vmul.f32 -0.5, %v7456_v14  ;;  %v3383_v47 = vand.u32 2147483647, %v7456_v14 }
 0xa1c   : > { %v7458_v50 = vpop.eup %7457 }
 0xa1d   : > { %7461 = vlog2.f32 %v3377_v18  ;;  %v3386_v46 = vadd.f32 1.0, %v7458_v50  ;;  %v3389_v52 = vmul.f32 -0.5, %v7458_v50  ;;  %v3381_v23 = vadd.f32 1.0, %v3380_v63  ;;  %v7460_v22 = vpop.eup %7459 }
 0xa1e   : > { %v3392_v18 = vand.u32 2147483647, %v7458_v50  ;;  %vm3384_vm14 = vcmp.lt.f32.partialorder %v3383_v47, 0.0004427343  ;;  %v4532_v24 = vadd.f32 1.0, %v7460_v22 }
 0xa1f   : > { %7463 = vlog2.f32 %v3386_v46  ;;  %v3390_v38 = vadd.f32 1.0, %v3389_v52  ;;  %v3382_v32 = vmul.f32 %v7456_v14, %v3381_v23  ;;  %v7304_v46 = vld [vmem:[%s10132_s17 + $0x50] sm:$0xff]   ;;  %v3368_v52 = vmax.f32 %v8876_v43, 0.0  ;;  %v7305_v14 = vld [vmem:[%s10132_s17 + $0x58] sm:$0xff]  }
 0xa20   : > { %7465 = vpow2.f32 %v4530_v40  ;;  %v3367_v40 = vmax.f32 %v3361_v56, 0.0  ;;  %vm3393_vm15 = vcmp.lt.f32.partialorder %v3392_v18, 0.0004427343  ;;  %7063 = vmatpush3.bf16.msra.mxu0 %v7304_v46  ;;  %v8918_v56 = vpop.permute.xlu1 %3780 }
 0xa21   : > { %v3391_v6 = vmul.f32 %v7458_v50, %v3390_v38  ;;  %10289 = vst [vmem:[#allocation18_spill] sm:$0xff] %v8918_v56  ;;  %7064 = vmatprep.subr.bf16.mxu0 %v10267_v12  ;;  %7467 = vrcp.f32 %v4532_v24 }
 0xa24   : > { %7065 = vmatpush3.bf16.msra.mxu0 %v7305_v14 }
 0xa25   : > { %7066 = vmatprep.subr.bf16.mxu0 %v10267_v12 }
 0xa27   : > { %v7462_v31 = vpop.eup %7461 }
 0xa28   : > { %v3379_v13 = vmul.f32 0.6931472, %v7462_v31 }
 0xa29   : > { %v7464_v63 = vpop.eup %7463 }
 0xa2a   : > { %v3385_v39 = vsel %vm3384_vm14, %v3382_v32, %v3379_v13  ;;  %v3388_v49 = vmul.f32 0.6931472, %v7464_v63  ;;  %v7466_v23 = vpop.eup %7465 }
 0xa2b   : > { %v3395_v36 = vadd.f32 %v3385_v39, %v3367_v40  ;;  %v8927_v18 = vadd.f32 1.0, %v7466_v23  ;;  %v8944_v40 = vld [vmem:[%s10130_s15 + $0x10] sm:$0xff]  ;;  %v8992_v9 = vpop.eup %7467 }
 0xa2c   : > { %v3394_v31 = vsel %vm3393_vm15, %v3391_v6, %v3388_v49  ;;  %v7306_v49 = vld [vmem:[%s10132_s17 + $0x60] sm:$0xff]   ;;  %10293 = vst [vmem:[#allocation15_spill] sm:$0xff] %v8992_v9 }
 0xa2d   : > { %v3400_v47 = vmul.f32 %v3395_v36, %v8792_v4  ;;  %v3404_v22 = vcombine.high %v3395_v36, %v3395_v36  ;;  %v3411_v39 = vrot.slane %v3395_v36, %v8316_v17  ;;  %v8923_v43 = vadd.f32 %v3394_v31, %v3368_v52  ;;  %10290 = vst [vmem:[#allocation14_spill] sm:$0xff] %v8927_v18  ;;  %v8959_v31 = vpop.permute.xlu0 %3796 }
 0xa2e   : > { %10291 = vst [vmem:[#allocation34_spill] sm:$0xff] %v8959_v31  ;;  %7067 = vmatpush3.bf16.msra.mxu0 %v7306_v49 }
 0xa2f   : > { %v3418_v50 = vrot.slane %v3404_v22, %v8316_v17  ;;  %v3419_v38 = vcombine.high %v3411_v39, %v3411_v39  ;;  %v3427_v13 = vrot.slane %v3411_v39, %v8316_v17  ;;  %v3872_v32 = vcombine.high %v3400_v47, %v3400_v47  ;;  %7068 = vmatprep.subr.bf16.mxu0 %v10267_v12 }
 0xa30   : > { %v8930_v46 = vrot.slane %v3400_v47, %v8316_v17  ;;  %v8934_v36 = vmul.f32 %v8923_v43, %v8794_v26  ;;  %v8957_v39 = vrot.slane %v8923_v43, %v8316_v17  ;;  %v7307_v26 = vld [vmem:[%s10132_s17 + $0x68] sm:$0xff]  }
 0xa31   : > { %v3420_v63 = vcombine.high %v3418_v50, %v3418_v50  ;;  %v3434_v24 = vrot.slane %v3418_v50, %v8316_v17  ;;  %v3441_v52 = vrot.slane %v3419_v38, %v8316_v17  ;;  %v3449_v23 = vcombine.high %v3427_v13, %v3427_v13  ;;  %v8961_v50 = vpop.permute.xlu1 %3792  ;;  %v8966_v38 = vld [vmem:[%s10130_s15 + $0x18] sm:$0xff] }
 0xa32   : > { %v3505_v47 = vrot.slane %v3427_v13, %v7919_v21  ;;  %v8951_v14 = vrot.slane %v3872_v32, %v8316_v17  ;;  %10292 = vst [vmem:[#allocation19_spill] sm:$0xff] %v8961_v50  ;;  %v8975_v2 = vrot.slane %v8930_v46, %v8316_v17  ;;  %7069 = vmatpush3.bf16.msra.mxu0 %v7307_v26 }
 0xa33   : > { %v3448_v13 = vrot.slane %v3420_v63, %v8316_v17  ;;  %v3450_v32 = vcombine.high %v3434_v24, %v3434_v24  ;;  %v3451_v6 = vcombine.high %v3441_v52, %v3441_v52  ;;  %v3509_v44 = vrot.slane %v3441_v52, %v7919_v21  ;;  %7070 = vmatprep.subr.bf16.mxu0 %v10267_v12 }
 0xa34   : > { %v3513_v22 = vrot.slane %v3449_v23, %v7919_v21  ;;  %v3521_v51 = vrot.slane %v3434_v24, %v7919_v21  ;;  %v3582_v61 = vmul.f32 %v8944_v40, %v3505_v47  ;;  %v3583_v24 = vmul.f32 %v8966_v38, %v3505_v47 }
 0xa35   : > { %v3452_v63 = vcombine.high %v3448_v13, %v3448_v13  ;;  %v3517_v37 = vrot.slane %v3451_v6, %v7919_v21  ;;  %v3525_v52 = vrot.slane %v3448_v13, %v7919_v21  ;;  %v3529_v23 = vrot.slane %v3450_v32, %v7919_v21  ;;  %v9003_v56 = vpop.permute.xlu1 %3804 }
 0xa36   : > { %v3584_v4 = vmul.f32 %v8944_v40, %v3509_v44  ;;  %v3585_v18 = vmul.f32 %v8966_v38, %v3509_v44  ;;  %v3586_v49 = vmul.f32 %v8944_v40, %v3513_v22  ;;  %v3587_v3 = vmul.f32 %v8966_v38, %v3513_v22  ;;  %v9001_v22 = vpop.permute.xlu0 %3808  ;;  %10295 = vst [vmem:[#allocation41_spill] sm:$0xff] %v9003_v56 }
 0xa37   : > { %v3533_v59 = vrot.slane %v3452_v63, %v7919_v21  ;;  %v3588_v6 = vmul.f32 %v8944_v40, %v3517_v37  ;;  %v3589_v13 = vmul.f32 %v8966_v38, %v3517_v37  ;;  %v3590_v32 = vmul.f32 %v8944_v40, %v3521_v51  ;;  %v7308_v63 = vld [vmem:[%s10132_s17 + $0x70] sm:$0xff]   ;;  %10294 = vst [vmem:[#allocation36_spill] sm:$0xff] %v9001_v22 }
 0xa38   : > { %v3591_v47 = vmul.f32 %v8966_v38, %v3521_v51  ;;  %v3592_v50 = vmul.f32 %v8944_v40, %v3525_v52  ;;  %v3593_v44 = vmul.f32 %v8966_v38, %v3525_v52  ;;  %v3594_v37 = vmul.f32 %v8944_v40, %v3529_v23  ;;  %7071 = vmatpush3.bf16.msra.mxu0 %v7308_v63 }
 0xa39   : > { %v3595_v9 = vmul.f32 %v8966_v38, %v3529_v23  ;;  %v3596_v15 = vmul.f32 %v8944_v40, %v3533_v59  ;;  %v3614_v51 = vmul.f32 1.442695, %v3582_v61  ;;  %v3597_v52 = vmul.f32 %v8966_v38, %v3533_v59  ;;  %v7309_v23 = vld [vmem:[%s10132_s17 + $0x78] sm:$0xff]   ;;  %7072 = vmatprep.subr.bf16.mxu0 %v10267_v12  ;;  %v9018_v27 = vpop.permute.xlu1 %3816 }
 0xa3a   : > { %v3616_v26 = vmul.f32 1.442695, %v3583_v24  ;;  %v3618_v31 = vmul.f32 1.442695, %v3584_v4  ;;  %v3620_v25 = vmul.f32 1.442695, %v3585_v18  ;;  %v3888_v56 = vcombine.high %v8951_v14, %v8951_v14 }
 0xa3b   : > { %7469 = vpow2.f32 %v3614_v51  ;;  %v3622_v11 = vmul.f32 1.442695, %v3586_v49  ;;  %v3624_v30 = vmul.f32 1.442695, %v3587_v3  ;;  %v3626_v22 = vmul.f32 1.442695, %v3588_v6  ;;  %v9016_v51 = vpop.permute.xlu0 %3820 }
 0xa3c   : > { %7471 = vpow2.f32 %v3616_v26  ;;  %v3628_v61 = vmul.f32 1.442695, %v3589_v13  ;;  %v3630_v53 = vmul.f32 1.442695, %v3590_v32  ;;  %v3632_v59 = vmul.f32 1.442695, %v3591_v47  ;;  %7073 = vmatpush3.bf16.msra.mxu0 %v7309_v23 }
 0xa3d   : > { %7473 = vpow2.f32 %v3618_v31  ;;  %v3634_v24 = vmul.f32 1.442695, %v3592_v50  ;;  %v3636_v4 = vmul.f32 1.442695, %v3593_v44  ;;  %v3638_v3 = vmul.f32 1.442695, %v3594_v37  ;;  %7078 = vmatprep.subr.bf16.mxu0 %v10267_v12 }
 0xa3e   : > { %7475 = vpow2.f32 %v3620_v25  ;;  %v3640_v18 = vmul.f32 1.442695, %v3595_v9  ;;  %v3642_v49 = vmul.f32 1.442695, %v3596_v15  ;;  %v3902_v6 = vrot.slane %v8951_v14, %v8316_v17 }
 0xa3f   : > { %7477 = vpow2.f32 %v3622_v11  ;;  %v10296_v31 = vcombine.high %v8930_v46, %v8930_v46  ;;  %v3916_v13 = vrot.slane %v3888_v56, %v8316_v17  ;;  %v3644_v25 = vmul.f32 1.442695, %v3597_v52  ;;  %v9046_v23 = vpop.permute.xlu0 %3832 }
 0xa40   : > { %7479 = vpow2.f32 %v3624_v30  ;;  %v3917_v15 = vcombine.high %v8975_v2, %v8975_v2  ;;  %v3973_v9 = vrot.slane %v8975_v2, %v7919_v21  ;;  %v3918_v11 = vcombine.high %v3902_v6, %v3902_v6 }
 0xa41   : > { %v3909_v50 = vrot.slane %v10296_v31, %v8316_v17  ;;  %7481 = vpow2.f32 %v3626_v22  ;;  %v3920_v14 = vcombine.high %v3916_v13, %v3916_v13  ;;  %v10297_v30 = vcombine.high %v8923_v43, %v8923_v43  ;;  %v9048_v43 = vpop.permute.xlu1 %3828 }
 0xa42   : > { %7483 = vpow2.f32 %v3628_v61  ;;  %v3981_v56 = vrot.slane %v3917_v15, %v7919_v21  ;;  %v3989_v44 = vrot.slane %v3902_v6, %v7919_v21  ;;  %v3993_v63 = vrot.slane %v3916_v13, %v7919_v21 }
 0xa43   : > { %v3919_v32 = vcombine.high %v3909_v50, %v3909_v50  ;;  %v3977_v46 = vrot.slane %v3909_v50, %v7919_v21  ;;  %v3467_v47 = vrot.slane %v10297_v30, %v8316_v17  ;;  %7485 = vpow2.f32 %v3630_v53 }
 0xa44   : > { %7487 = vpow2.f32 %v3632_v59  ;;  %v3997_v22 = vrot.slane %v3918_v11, %v7919_v21  ;;  %v9043_v37 = vrot.slane %v3920_v14, %v7919_v21  ;;  %v4050_v52 = vmul.f32 %v3973_v9, %v8831_v28 }
 0xa45   : > { %v3985_v2 = vrot.slane %v3919_v32, %v7919_v21  ;;  %v7470_v26 = vpop.eup %7469  ;;  %7489 = vpow2.f32 %v3634_v24  ;;  %v4051_v53 = vmul.f32 %v3973_v9, %v8829_v48  ;;  %v4052_v61 = vmul.f32 %v3977_v46, %v8833_v33  ;;  %v9090_v11 = vpop.permute.xlu1 %3840 }
 0xa46   : > { %v4053_v6 = vmul.f32 %v3977_v46, %v8835_v62  ;;  %v7472_v59 = vpop.eup %7471  ;;  %7491 = vpow2.f32 %v3636_v4  ;;  %v9054_v31 = vmul.f32 %v3981_v56, %v8837_v45  ;;  %v9057_v50 = vmul.f32 %v3981_v56, %v8839_v54  ;;  %10298 = vst [vmem:[#allocation42_spill] sm:$0xff] %v9090_v11 }
 0xa47   : > { %v9060_v28 = vmul.f32 %v3985_v2, %v8841_v16  ;;  %v7474_v13 = vpop.eup %7473  ;;  %7493 = vpow2.f32 %v3638_v3  ;;  %v9063_v24 = vmul.f32 %v3985_v2, %v8843_v35  ;;  %v9066_v48 = vmul.f32 %v3989_v44, %v8845_v10 }
 0xa48   : > { %v9069_v33 = vmul.f32 %v3989_v44, %v8847_v0  ;;  %v7476_v62 = vpop.eup %7475  ;;  %7495 = vpow2.f32 %v3640_v18  ;;  %v9072_v45 = vmul.f32 %v3993_v63, %v8849_v20  ;;  %v9075_v54 = vmul.f32 %v3993_v63, %v8851_v58 }
 0xa49   : > { %v9078_v16 = vmul.f32 %v3997_v22, %v8853_v34  ;;  %v7478_v4 = vpop.eup %7477  ;;  %v9081_v35 = vmul.f32 %v3997_v22, %v8855_v57  ;;  %v4082_v10 = vmul.f32 0.0, %v7470_v26  ;;  %v4083_v3 = vmul.f32 0.0, %v7472_v59  ;;  %v9088_v34 = vpop.permute.xlu0 %3844 }
 0xa4a   : > { %v3468_v0 = vcombine.high %v8957_v39, %v8957_v39  ;;  %v7480_v15 = vpop.eup %7479  ;;  %7497 = vpow2.f32 %v3642_v49  ;;  %v3469_v18 = vcombine.high %v3467_v47, %v3467_v47  ;;  %v3476_v20 = vrot.slane %v8957_v39, %v8316_v17 }
 0xa4b   : > { %v3483_v58 = vrot.slane %v3467_v47, %v8316_v17  ;;  %v7482_v9 = vpop.eup %7481  ;;  %7499 = vpow2.f32 %v3644_v25  ;;  %v4084_v57 = vadd.f32 %v4082_v10, %v4050_v52  ;;  %v4085_v32 = vadd.f32 %v4083_v3, %v4051_v53 }
 0xa4c   : > { %v3490_v14 = vrot.slane %v3468_v0, %v8316_v17  ;;  %v7484_v46 = vpop.eup %7483  ;;  %v9094_v56 = vrot.slane %v3469_v18, %v8316_v17  ;;  %v3498_v49 = vcombine.high %v3476_v20, %v3476_v20  ;;  %v3537_v30 = vrot.slane %v3476_v20, %v7919_v21 }
 0xa4d   : > { %v7486_v47 = vpop.eup %7485  ;;  %v4088_v2 = vmul.f32 %v7474_v13, %v4084_v57  ;;  %v4089_v44 = vmul.f32 %v7476_v62, %v4085_v32  ;;  %v4348_v63 = vmul.f32 %v8861_v19, %v4084_v57  ;;  %v4349_v25 = vmul.f32 %v8863_v42, %v4085_v32 }
 0xa4e   : > { %10299 = vst [vmem:[#allocation43_spill] sm:$0xff] %v9094_v56  ;;  %v7488_v22 = vpop.eup %7487  ;;  %v3499_v52 = vcombine.high %v3483_v58, %v3483_v58  ;;  %v3500_v26 = vcombine.high %v3490_v14, %v3490_v14  ;;  %v3541_v59 = vrot.slane %v3490_v14, %v7919_v21  ;;  %v3545_v13 = vrot.slane %v3498_v49, %v7919_v21 }
 0xa4f   : > { %v9104_v10 = vpop.eup %7489  ;;  %v4090_v3 = vadd.f32 %v4088_v2, %v4052_v61  ;;  %v4091_v0 = vadd.f32 %v4089_v44, %v4053_v6  ;;  %v4380_v18 = vadd.f32 %v4349_v25, %v4348_v63  ;;  %v9113_v42 = vrot.slane %v3483_v58, %v7919_v21  ;;  %v9122_v61 = vpop.permute.xlu0 %3856 }
 0xa50   : > { %v9107_v62 = vpop.eup %7491  ;;  %v9110_v19 = vrot.slane %v3500_v26, %v7919_v21  ;;  %v9117_v20 = vrot.slane %v9094_v56, %v7919_v21  ;;  %v3598_v57 = vmul.f32 %v8944_v40, %v3537_v30  ;;  %10300 = vst [vmem:[#allocation44_spill] sm:$0xff] %v9122_v61  ;;  %v9124_v6 = vpop.permute.xlu1 %3852  ;;  %v9131_v25 = vrot.slane %v3499_v52, %v7919_v21 }
 0xa51   : > { %v9120_v32 = vpop.eup %7493  ;;  %10301 = vst [vmem:[#allocation45_spill] sm:$0xff] %v9124_v6  ;;  %v4094_v14 = vmul.f32 %v7478_v4, %v4090_v3  ;;  %v4095_v49 = vmul.f32 %v7480_v15, %v4091_v0  ;;  %v4350_v2 = vmul.f32 %v8865_v60, %v4090_v3  ;;  %v4351_v44 = vmul.f32 %v8867_v1, %v4091_v0 }
 0xa52   : > { %v9128_v58 = vpop.eup %7495  ;;  %v4381_v63 = vrot.slane %v4380_v18, 4  ;;  %v3599_v26 = vmul.f32 %v8966_v38, %v3537_v30  ;;  %v3600_v53 = vmul.f32 %v8944_v40, %v3541_v59  ;;  %v3601_v15 = vmul.f32 %v8966_v38, %v3541_v59 }
 0xa53   : > { %v4096_v39 = vadd.f32 %v4094_v14, %v9054_v31  ;;  %v4097_v12 = vadd.f32 %v4095_v49, %v9057_v50  ;;  %v4387_v4 = vadd.f32 %v4351_v44, %v4350_v2  ;;  %v3602_v3 = vmul.f32 %v8944_v40, %v3545_v13  ;;  %v9146_v2 = vpop.permute.xlu0 %4290 }
 0xa54   : > { %v9138_v60 = vpop.eup %7497  ;;  %v4382_v1 = vadd.f32 %v4381_v63, %v4380_v18  ;;  %v3646_v0 = vmul.f32 1.442695, %v3598_v57  ;;  %v3648_v6 = vmul.f32 1.442695, %v3599_v26  ;;  %v3603_v49 = vmul.f32 %v8966_v38, %v3545_v13  ;;  %v9148_v18 = vpop.permute.xlu1 %4286 }
 0xa55   : > { %v9141_v52 = vpop.eup %7499  ;;  %v4100_v61 = vmul.f32 %v7482_v9, %v4096_v39  ;;  %v4101_v30 = vmul.f32 %v7484_v46, %v4097_v12  ;;  %v4352_v56 = vmul.f32 %v8872_v41, %v4096_v39  ;;  %v4353_v31 = vmul.f32 %v8874_v8, %v4097_v12 }
 0xa56   : > { %v4383_v14 = vrot.slane %v4382_v1, 2  ;;  %v4388_v50 = vrot.slane %v4387_v4, 4  ;;  %v3650_v59 = vmul.f32 1.442695, %v3600_v53  ;;  %7501 = vpow2.f32 %v3646_v0 }
 0xa57   : > { %v4102_v57 = vadd.f32 %v4100_v61, %v9060_v28  ;;  %v4103_v44 = vadd.f32 %v4101_v30, %v9063_v24  ;;  %v4394_v63 = vadd.f32 %v4353_v31, %v4352_v56  ;;  %7503 = vpow2.f32 %v3648_v6 }
 0xa58   : > { %v4384_v9 = vadd.f32 %v4383_v14, %v4382_v1  ;;  %v4389_v46 = vadd.f32 %v4388_v50, %v4387_v4  ;;  %v3652_v41 = vmul.f32 1.442695, %v3601_v15  ;;  %7505 = vpow2.f32 %v3650_v59 }
 0xa59   : > { %v4106_v12 = vmul.f32 %v7486_v47, %v4102_v57  ;;  %v4107_v8 = vmul.f32 %v7488_v22, %v4103_v44  ;;  %v4354_v39 = vmul.f32 %v8879_v5, %v4102_v57  ;;  %v4355_v53 = vmul.f32 %v8881_v7, %v4103_v44  ;;  %v9158_v22 = vpop.permute.xlu0 %4298  ;;  %v9160_v5 = vpop.permute.xlu1 %4294 }
 0xa5a   : > { %v4385_v13 = vrot.slane %v4384_v9, 1  ;;  %v4390_v26 = vrot.slane %v4389_v46, 2  ;;  %v4395_v11 = vrot.slane %v4394_v63, 4  ;;  %v3654_v61 = vmul.f32 1.442695, %v3602_v3  ;;  %v10315_v3 = vld [vmem:[#allocation41_spill] sm:$0xff] }
 0xa5b   : > { %v4108_v28 = vadd.f32 %v4106_v12, %v9066_v48  ;;  %v4109_v24 = vadd.f32 %v4107_v8, %v9069_v33  ;;  %v4401_v56 = vadd.f32 %v4355_v53, %v4354_v39  ;;  %7507 = vpow2.f32 %v3652_v41 }
 0xa5c   : > { %v9156_v1 = vadd.f32 %v4390_v26, %v4389_v46  ;;  %v4396_v6 = vadd.f32 %v4395_v11, %v4394_v63  ;;  %v3656_v47 = vmul.f32 1.442695, %v3603_v49  ;;  %v9166_v33 = vadd.f32 %v4385_v13, %v4384_v9  ;;  %v10304_v49 = vld [vmem:[#allocation37_spill] sm:$0xff]  ;;  %v10306_v13 = vld [vmem:[#allocation26_spill] sm:$0xff] }
 0xa5d   : > { %v4112_v7 = vmul.f32 %v9104_v10, %v4108_v28  ;;  %v4113_v4 = vmul.f32 %v9107_v62, %v4109_v24  ;;  %v4356_v15 = vmul.f32 %v8884_v29, %v4108_v28  ;;  %v4357_v48 = vmul.f32 %v8886_v55, %v4109_v24  ;;  %v9192_v39 = vpop.permute.xlu1 %4302 }
 0xa5e   : > { %10302 = vst [vmem:[#allocation46_spill] sm:$0xff] %v9166_v33  ;;  %v4397_v0 = vrot.slane %v4396_v6, 2  ;;  %v4402_v11 = vrot.slane %v4401_v56, 4  ;;  %7509 = vpow2.f32 %v3654_v61  ;;  %v3928_v29 = vrot.slane %v8934_v36, %v8316_v17 }
 0xa5f   : > { %v4114_v30 = vadd.f32 %v4112_v7, %v9072_v45  ;;  %v4115_v31 = vadd.f32 %v4113_v4, %v9075_v54  ;;  %v4408_v14 = vadd.f32 %v4357_v48, %v4356_v15  ;;  %7511 = vpow2.f32 %v3656_v47  ;;  %v10305_v45 = vld [vmem:[#allocation35_spill] sm:$0xff] }
 0xa60   : > { %v9171_v50 = vadd.f32 %v4397_v0, %v4396_v6  ;;  %v10303_v55 = vcombine.high %v8934_v36, %v8934_v36  ;;  %v9179_v62 = vpop.eup %7501  ;;  %v3605_v44 = vmul.f32 %v8966_v38, %v9110_v19  ;;  %v9185_v9 = vadd.f32 %v4402_v11, %v4401_v56  ;;  %v9190_v36 = vpop.permute.xlu0 %4306 }
 0xa61   : > { %v4358_v59 = vmul.f32 %v10304_v49, %v4114_v30  ;;  %v4359_v57 = vmul.f32 %v10305_v45, %v4115_v31  ;;  %v4409_v54 = vrot.slane %v4408_v14, 4  ;;  %v7504_v63 = vpop.eup %7503  ;;  %v3944_v46 = vrot.slane %v3928_v29, %v8316_v17 }
 0xa62   : > { %v3935_v10 = vrot.slane %v10303_v55, %v8316_v17  ;;  %v3936_v12 = vcombine.high %v3928_v29, %v3928_v29  ;;  %v3660_v53 = vmul.f32 1.442695, %v3605_v44  ;;  %v4065_v26 = vmul.f32 %v9043_v37, %v10306_v13  ;;  %v9197_v24 = vpop.eup %7505  ;;  %v10310_v44 = vld [vmem:[#allocation30_spill] sm:$0xff]  ;;  %v10311_v13 = vld [vmem:[#allocation36_spill] sm:$0xff] }
 0xa63   : > { %v9188_v8 = vadd.f32 %v4409_v54, %v4408_v14  ;;  %v4119_v28 = vmul.f32 %v9128_v58, %v4115_v31  ;;  %v4005_v56 = vrot.slane %v3944_v46, %v7919_v21  ;;  %v3966_v47 = vcombine.high %v3944_v46, %v3944_v46  ;;  %v10307_v14 = vld [vmem:[#allocation40_spill] sm:$0xff] }
 0xa64   : > { %v3937_v41 = vcombine.high %v3935_v10, %v3935_v10  ;;  %v3958_v6 = vrot.slane %v3936_v12, %v8316_v17  ;;  %v9202_v7 = vadd.f32 %v4359_v57, %v4358_v59  ;;  %7513 = vpow2.f32 %v3660_v53  ;;  %v10308_v59 = vld [vmem:[#allocation33_spill] sm:$0xff]  ;;  %v3869_v12 = vpop.permute.xlu0 %3868  ;;  %v3865_v53 = vpop.permute.xlu1 %3864 }
 0xa65   : > { %v4121_v4 = vadd.f32 %v4119_v28, %v9081_v35  ;;  %v3604_v15 = vmul.f32 %v8944_v40, %v9110_v19  ;;  %v7508_v48 = vpop.eup %7507  ;;  %v4013_v31 = vrot.slane %v3966_v47, %v7919_v21  ;;  %v4067_v29 = vmul.f32 %v4005_v56, %v10307_v14  ;;  %v10309_v19 = vld [vmem:[#allocation34_spill] sm:$0xff]  ;;  %v10313_v14 = vld [vmem:[#allocation19_spill] sm:$0xff] }
 0xa66   : > { %v3965_v61 = vrot.slane %v3937_v41, %v8316_v17  ;;  %v3968_v58 = vcombine.high %v3958_v6, %v3958_v6  ;;  %v4009_v11 = vrot.slane %v3958_v6, %v7919_v21  ;;  %v4064_v45 = vmul.f32 %v9043_v37, %v10308_v59  ;;  %v10312_v6 = vld [vmem:[#allocation18_spill] sm:$0xff] }
 0xa67   : > { %v4125_v55 = vmul.f32 %v9141_v52, %v4121_v4  ;;  %v3658_v49 = vmul.f32 1.442695, %v3604_v15  ;;  %v9217_v46 = vmul.f32 %v10310_v44, %v4121_v4  ;;  %v4071_v28 = vmul.f32 %v4013_v31, %v10311_v13 }
 0xa68   : > { %v3969_v0 = vcombine.high %v3965_v61, %v3965_v61  ;;  %v4017_v57 = vrot.slane %v3968_v58, %v7919_v21  ;;  %v4069_v54 = vmul.f32 %v4009_v11, %v10309_v19  ;;  %v9219_v41 = vpop.eup %7509  ;;  %v4066_v47 = vmul.f32 %v4005_v56, %v10312_v6  ;;  %v10314_v19 = vld [vmem:[#allocation39_spill] sm:$0xff] }
 0xa69   : > { %v4127_v52 = vadd.f32 %v4125_v55, %v4065_v26  ;;  %7515 = vpow2.f32 %v3658_v49  ;;  %v7512_v37 = vpop.eup %7511  ;;  %v4068_v4 = vmul.f32 %v4009_v11, %v10313_v14  ;;  %v9231_v33 = vmul.f32 %v4013_v31, %v10315_v3 }
 0xa6a   : > { %v4033_v35 = vrot.slane %v3969_v0, %v7919_v21  ;;  %v4073_v58 = vmul.f32 %v4017_v57, %v9016_v51  ;;  %v4118_v26 = vmul.f32 %v9120_v32, %v4114_v30  ;;  %v3607_v56 = vmul.f32 %v8966_v38, %v9113_v42 }
 0xa6b   : > { %v4131_v59 = vmul.f32 %v7504_v63, %v4127_v52  ;;  %v4363_v44 = vmul.f32 %v10314_v19, %v4127_v52  ;;  %v3951_v55 = vrot.slane %v3935_v10, %v8316_v17  ;;  %v3606_v49 = vmul.f32 %v8944_v40, %v9113_v42 }
 0xa6c   : > { %v9223_v15 = vmul.f32 %v4033_v35, %v3869_v12  ;;  %v9225_v0 = vmul.f32 %v4033_v35, %v3865_v53  ;;  %v3609_v51 = vmul.f32 %v8966_v38, %v9117_v20  ;;  %v4120_v63 = vadd.f32 %v4118_v26, %v9078_v16  ;;  %v10316_v16 = vld [vmem:[#allocation29_spill] sm:$0xff]  ;;  %v10317_v26 = vld [vmem:[#allocation38_spill] sm:$0xff] }
 0xa6d   : > { %v4133_v11 = vadd.f32 %v4131_v59, %v4067_v29  ;;  %v4025_v35 = vrot.slane %v3965_v61, %v7919_v21  ;;  %v3608_v3 = vmul.f32 %v8944_v40, %v9117_v20  ;;  %v3664_v32 = vmul.f32 1.442695, %v3607_v56  ;;  %v4315_v59 = vpop.permute.xlu0 %4314  ;;  %v10318_v56 = vld [vmem:[#allocation42_spill] sm:$0xff] }
 0xa6e   : > { %v4021_v30 = vrot.slane %v3951_v55, %v7919_v21  ;;  %v3662_v31 = vmul.f32 1.442695, %v3606_v49  ;;  %v3668_v12 = vmul.f32 1.442695, %v3609_v51  ;;  %v7514_v10 = vpop.eup %7513  ;;  %v9248_v13 = vmul.f32 %v4017_v57, %v9018_v27 }
 0xa6f   : > { %v4137_v53 = vmul.f32 %v7508_v48, %v4133_v11  ;;  %v4365_v42 = vmul.f32 %v9146_v2, %v4133_v11  ;;  %v4124_v29 = vmul.f32 %v9138_v60, %v4120_v63  ;;  %v9252_v52 = vmul.f32 %v10316_v16, %v4120_v63 }
 0xa70   : > { %7517 = vpow2.f32 %v3664_v32  ;;  %v4075_v20 = vmul.f32 %v4021_v30, %v9046_v23  ;;  %v9256_v61 = vmul.f32 %v4021_v30, %v9048_v43  ;;  %v3666_v48 = vmul.f32 1.442695, %v3608_v3 }
 0xa71   : > { %v4139_v6 = vadd.f32 %v4137_v53, %v4069_v54  ;;  %v4126_v14 = vadd.f32 %v4124_v29, %v4064_v45  ;;  %7519 = vpow2.f32 %v3662_v31  ;;  %v9259_v2 = vmul.f32 %v4025_v35, %v9088_v34 }
 0xa72   : > { %7521 = vpow2.f32 %v3668_v12  ;;  %v3611_v27 = vmul.f32 %v8966_v38, %v9131_v25  ;;  %v3967_v60 = vcombine.high %v3951_v55, %v3951_v55  ;;  %v9266_v54 = vmul.f32 %v4025_v35, %v10318_v56  ;;  %v10321_v35 = vld [vmem:[#allocation44_spill] sm:$0xff] }
 0xa73   : > { %v7516_v57 = vpop.eup %7515  ;;  %v4143_v19 = vmul.f32 %v7512_v37, %v4139_v6  ;;  %v4130_v23 = vmul.f32 %v9179_v62, %v4126_v14  ;;  %v4362_v43 = vmul.f32 %v10317_v26, %v4126_v14  ;;  %v4367_v45 = vmul.f32 %v9158_v22, %v4139_v6  ;;  %v10319_v37 = vld [vmem:[#allocation43_spill] sm:$0xff]  ;;  %v4323_v14 = vpop.permute.xlu0 %4322 }
 0xa74   : > { %v3672_v49 = vmul.f32 1.442695, %v3611_v27  ;;  %v4029_v34 = vrot.slane %v3967_v60, %v7919_v21  ;;  %v3610_v51 = vmul.f32 %v8944_v40, %v9131_v25  ;;  %7523 = vpow2.f32 %v3666_v48 }
 0xa75   : > { %v4145_v11 = vadd.f32 %v4143_v19, %v4071_v28  ;;  %v4132_v55 = vadd.f32 %v4130_v23, %v4066_v47  ;;  %v10320_v62 = vcombine.high %v10319_v37, %v10319_v37  ;;  %v9276_v3 = vadd.f32 %v4363_v44, %v4362_v43  ;;  %v10322_v28 = vld [vmem:[#allocation45_spill] sm:$0xff]  ;;  %v4311_v19 = vpop.permute.xlu1 %4310 }
 0xa76   : > { %7525 = vpow2.f32 %v3672_v49  ;;  %v9279_v32 = vmul.f32 %v4029_v34, %v10321_v35  ;;  %v3670_v22 = vmul.f32 1.442695, %v3610_v51  ;;  %v9284_v47 = vmul.f32 %v4029_v34, %v10322_v28 }
 0xa77   : > { %v3565_v63 = vrot.slane %v10320_v62, %v7919_v21  ;;  %v4149_v30 = vmul.f32 %v7514_v10, %v4145_v11  ;;  %v4136_v31 = vmul.f32 %v9197_v24, %v4132_v55  ;;  %v4364_v25 = vmul.f32 %v9148_v18, %v4132_v55 }
 0xa78   : > { %v4369_v12 = vmul.f32 %v9190_v36, %v4145_v11  ;;  %7527 = vpow2.f32 %v3670_v22  ;;  %v4399_v10 = vrot.slane %v9171_v50, 1  ;;  %v10323_v18 = vrot.slane %v9156_v1, 1 }
 0xa79   : > { %v3613_v53 = vmul.f32 %v8966_v38, %v3565_v63  ;;  %v3612_v44 = vmul.f32 %v8944_v40, %v3565_v63  ;;  %v4151_v29 = vadd.f32 %v4149_v30, %v4073_v58  ;;  %v4138_v16 = vadd.f32 %v4136_v31, %v4068_v4 }
 0xa7a   : > { %v4436_v6 = vadd.f32 %v4365_v42, %v4364_v25  ;;  %v7518_v48 = vpop.eup %7517  ;;  %v9293_v27 = vadd.f32 %v10323_v18, %v9156_v1  ;;  %v4404_v36 = vrot.slane %v9185_v9, 2  ;;  %v4411_v60 = vrot.slane %v9188_v8, 2 }
 0xa7b   : > { %v3676_v24 = vmul.f32 1.442695, %v3613_v53  ;;  %v7520_v38 = vpop.eup %7519  ;;  %v4142_v40 = vmul.f32 %v9219_v41, %v4138_v16  ;;  %v4366_v58 = vmul.f32 %v9160_v5, %v4138_v16  ;;  %v3674_v42 = vmul.f32 1.442695, %v3612_v44 }
 0xa7c   : > { %v4437_v4 = vrot.slane %v4436_v6, 4  ;;  %v7522_v23 = vpop.eup %7521  ;;  %v4371_v26 = vmul.f32 %v4315_v59, %v4151_v29  ;;  %v4155_v43 = vmul.f32 %v7518_v48, %v4151_v29  ;;  %v4405_v56 = vadd.f32 %v4404_v36, %v9185_v9  ;;  %v4331_v9 = vpop.permute.xlu0 %4330 }
 0xa7d   : > { %7529 = vpow2.f32 %v3676_v24  ;;  %v4144_v1 = vadd.f32 %v4142_v40, %v9231_v33  ;;  %v4443_v34 = vadd.f32 %v4367_v45, %v4366_v58  ;;  %v9302_v51 = vadd.f32 %v4399_v10, %v9171_v50 }
 0xa7e   : > { %v4438_v49 = vadd.f32 %v4437_v4, %v4436_v6  ;;  %v4157_v11 = vadd.f32 %v4155_v43, %v4075_v20  ;;  %v4406_v55 = vrot.slane %v4405_v56, 1  ;;  %v4412_v41 = vadd.f32 %v4411_v60, %v9188_v8  ;;  %v7524_v37 = vpop.eup %7523  ;;  %v4319_v8 = vpop.permute.xlu1 %4318 }
 0xa7f   : > { %v4416_v5 = vrot.slane %v9202_v7, 4  ;;  %v4148_v62 = vmul.f32 %v7516_v57, %v4144_v1  ;;  %v4368_v59 = vmul.f32 %v9192_v39, %v4144_v1  ;;  %v4444_v35 = vrot.slane %v4443_v34, 4 }
 0xa80   : > { %v4439_v63 = vrot.slane %v4438_v49, 2  ;;  %v7526_v22 = vpop.eup %7525  ;;  %v4373_v33 = vmul.f32 %v4323_v14, %v4157_v11  ;;  %v4161_v30 = vmul.f32 %v7522_v23, %v4157_v11  ;;  %7531 = vpow2.f32 %v3674_v42  ;;  %v4339_v60 = vpop.permute.xlu0 %4338 }
 0xa81   : > { %v4413_v45 = vrot.slane %v4412_v41, 1  ;;  %v4150_v50 = vadd.f32 %v4148_v62, %v9248_v13  ;;  %v4445_v31 = vadd.f32 %v4444_v35, %v4443_v34  ;;  %v4450_v25 = vadd.f32 %v4369_v12, %v4368_v59 }
 0xa82   : > { %v4440_v20 = vadd.f32 %v4439_v63, %v4438_v49  ;;  %v7528_v28 = vpop.eup %7527  ;;  %v4163_v53 = vadd.f32 %v4161_v30, %v9259_v2  ;;  %v9309_v57 = vadd.f32 %v4406_v55, %v4405_v56  ;;  %v4417_v39 = vadd.f32 %v4416_v5, %v9202_v7 }
 0xa83   : > { %v4422_v44 = vadd.f32 %v9217_v46, %v9252_v52  ;;  %v4370_v29 = vmul.f32 %v4311_v19, %v4150_v50  ;;  %v4446_v6 = vrot.slane %v4445_v31, 2  ;;  %v4451_v14 = vrot.slane %v4450_v25, 4 }
 0xa84   : > { %v4441_v16 = vrot.slane %v4440_v20, 1  ;;  %v4154_v10 = vmul.f32 %v7520_v38, %v4150_v50  ;;  %v4167_v13 = vmul.f32 %v7526_v22, %v4163_v53  ;;  %v9314_v48 = vadd.f32 %v4413_v45, %v4412_v41  ;;  %v4327_v38 = vpop.permute.xlu1 %4326 }
 0xa85   : > { %v4418_v12 = vrot.slane %v4417_v39, 2  ;;  %v4447_v24 = vadd.f32 %v4446_v6, %v4445_v31  ;;  %v4452_v18 = vadd.f32 %v4451_v14, %v4450_v25  ;;  %v4457_v36 = vadd.f32 %v4371_v26, %v4370_v29 }
 0xa86   : > { %v4375_v2 = vmul.f32 %v4331_v9, %v4163_v53  ;;  %v4442_v58 = vadd.f32 %v4441_v16, %v4440_v20  ;;  %v4156_v7 = vadd.f32 %v4154_v10, %v9256_v61  ;;  %v4169_v46 = vadd.f32 %v4167_v13, %v9279_v32  ;;  %v4347_v9 = vpop.permute.xlu0 %4346 }
 0xa87   : > { %v7530_v40 = vpop.eup %7529  ;;  %v4423_v52 = vrot.slane %v4422_v44, 4  ;;  %v4448_v19 = vrot.slane %v4447_v24, 1  ;;  %v4453_v4 = vrot.slane %v4452_v18, 2  ;;  %v4458_v42 = vrot.slane %v4457_v36, 4 }
 0xa88   : > { %v4419_v23 = vadd.f32 %v4418_v12, %v4417_v39  ;;  %v4372_v43 = vmul.f32 %v4319_v8, %v4156_v7  ;;  %v4160_v56 = vmul.f32 %v7524_v37, %v4156_v7  ;;  %v4173_v1 = vmul.f32 %v7530_v40, %v4169_v46  ;;  %v4335_v25 = vpop.permute.xlu1 %4334  ;;  %v10324_v39 = vld [vmem:[#allocation46_spill] sm:$0xff] }
 0xa89   : > { %v4430_v49 = vrot.slane %v9276_v3, 4  ;;  %v4449_v26 = vadd.f32 %v4448_v19, %v4447_v24  ;;  %v4454_v34 = vadd.f32 %v4453_v4, %v4452_v18  ;;  %v4459_v11 = vadd.f32 %v4458_v42, %v4457_v36 }
 0xa8a   : > { %v4377_v55 = vmul.f32 %v4339_v60, %v4169_v46  ;;  %v7532_v41 = vpop.eup %7531  ;;  %v4464_v5 = vadd.f32 %v4373_v33, %v4372_v43  ;;  %v4162_v61 = vadd.f32 %v4160_v56, %v9266_v54  ;;  %v4175_v32 = vadd.f32 %v4173_v1, %v9223_v15 }
 0xa8b   : > { %v4424_v62 = vadd.f32 %v4423_v52, %v4422_v44  ;;  %v4455_v59 = vrot.slane %v4454_v34, 1  ;;  %v4460_v63 = vrot.slane %v4459_v11, 2  ;;  %v4515_v35 = vsel %vm2842_vm7, %v4449_v26, %v4442_v58 }
 0xa8c   : > { %v4420_v37 = vrot.slane %v4419_v23, 1  ;;  %v4465_v22 = vrot.slane %v4464_v5, 4  ;;  %v4374_v30 = vmul.f32 %v4327_v38, %v4162_v61  ;;  %v4166_v45 = vmul.f32 %v7528_v28, %v4162_v61  ;;  %v4343_v58 = vpop.permute.xlu1 %4342  ;;  %v10326_v61 = vld [vmem:[#allocation32_spill] sm:$0xff] }
 0xa8d   : > { %v4379_v50 = vmul.f32 %v4347_v9, %v4175_v32  ;;  %v4456_v20 = vadd.f32 %v4455_v59, %v4454_v34  ;;  %v4461_v31 = vadd.f32 %v4460_v63, %v4459_v11  ;;  %v4425_v8 = vrot.slane %v4424_v62, 2  ;;  %v10325_v34 = vld [vmem:[#allocation14_spill] sm:$0xff]  ;;  %v10327_v9 = vld [vmem:[#allocation28_spill] sm:$0xff] }
 0xa8e   : > { %v4431_v33 = vadd.f32 %v4430_v49, %v9276_v3  ;;  %v4466_v54 = vadd.f32 %v4465_v22, %v4464_v5  ;;  %v4471_v53 = vadd.f32 %v4375_v2, %v4374_v30  ;;  %v4168_v15 = vadd.f32 %v4166_v45, %v9284_v47 }
 0xa8f   : > { %v4508_v44 = vsel %vm2842_vm7, %v9293_v27, %v10324_v39  ;;  %v4462_v29 = vrot.slane %v4461_v31, 1  ;;  %v4516_v16 = vsel %vm2844_vm8, %v4456_v20, %v4515_v35  ;;  %v4426_v6 = vadd.f32 %v4425_v8, %v4424_v62  ;;  %v10329_v39 = vld [vmem:[#allocation31_spill] sm:$0xff] }
 0xa90   : > { %v4432_v28 = vrot.slane %v4431_v33, 2  ;;  %v4467_v14 = vrot.slane %v4466_v54, 2  ;;  %v4472_v10 = vrot.slane %v4471_v53, 4  ;;  %v4376_v13 = vmul.f32 %v4335_v25, %v4168_v15 }
 0xa91   : > { %v4172_v12 = vmul.f32 %v7532_v41, %v4168_v15  ;;  %v4463_v24 = vadd.f32 %v4462_v29, %v4461_v31  ;;  %v4427_v18 = vrot.slane %v4426_v6, 1  ;;  %v4509_v36 = vsel %vm2844_vm8, %v9302_v51, %v4508_v44 }
 0xa92   : > { %v4433_v3 = vadd.f32 %v4432_v28, %v4431_v33  ;;  %v4468_v47 = vadd.f32 %v4467_v14, %v4466_v54  ;;  %v4473_v2 = vadd.f32 %v4472_v10, %v4471_v53  ;;  %v4478_v60 = vadd.f32 %v4377_v55, %v4376_v13 }
 0xa93   : > { %v4174_v27 = vadd.f32 %v4172_v12, %v9225_v0  ;;  %v4517_v40 = vsel %vm2846_vm9, %v4463_v24, %v4516_v16  ;;  %v4421_v7 = vadd.f32 %v4420_v37, %v4419_v23  ;;  %v4510_v52 = vsel %vm2846_vm9, %v9309_v57, %v4509_v36  ;;  %v6734_v23 = vld [vmem:[%s10131_s16 + $0x1] ss:$0 sm:$0xff]  ;;  %v10328_v37 = vld [vmem:[#allocation15_spill] sm:$0xff] }
 0xa94   : > { %v4434_v46 = vrot.slane %v4433_v3, 1  ;;  %v4469_v19 = vrot.slane %v4468_v47, 1  ;;  %v4474_v4 = vrot.slane %v4473_v2, 2  ;;  %v4479_v42 = vrot.slane %v4478_v60, 4  ;;  %v10330_v16 = vld [vmem:[#allocation27_spill] sm:$0xff] }
 0xa95   : > { %v4378_v38 = vmul.f32 %v4343_v58, %v4174_v27  ;;  %v4428_v43 = vadd.f32 %v4427_v18, %v4426_v6  ;;  %v4511_v51 = vsel %vm2848_vm10, %v9314_v48, %v4510_v52  ;;  %7533 = vrcp.f32 %v10325_v34 }
 0xa96   : > { %v4435_v56 = vadd.f32 %v4434_v46, %v4433_v3  ;;  %v4470_v1 = vadd.f32 %v4469_v19, %v4468_v47  ;;  %v4475_v49 = vadd.f32 %v4474_v4, %v4473_v2  ;;  %v4480_v0 = vadd.f32 %v4479_v42, %v4478_v60  ;;  %v7310_v42 = vld [vmem:[%s10124_s9 + $0x80] ss:$8 sps:$4 sm:$0xff]  }
 0xa97   : > { %v4485_v26 = vadd.f32 %v4379_v50, %v4378_v38  ;;  %v4512_v57 = vsel %vm2850_vm11, %v4421_v7, %v4511_v51  ;;  %v4218_v32 = vmul.f32 %v6734_v23, %v10326_v61  ;;  %v4538_v22 = vmul.f32 %v10328_v37, %v10327_v9  ;;  %v7312_v38 = vld [vmem:[%s10124_s9 + $0x84] ss:$8 sps:$4 sm:$0xff]  }
 0xa98   : > { %v4518_v11 = vsel %vm2848_vm10, %v4470_v1, %v4517_v40  ;;  %v4476_v55 = vrot.slane %v4475_v49, 1  ;;  %v4481_v41 = vrot.slane %v4480_v0, 2  ;;  %v4513_v48 = vsel %vm2852_vm12, %v4428_v43, %v4512_v57  ;;  %v7315_v43 = vld [vmem:[%s10124_s9 + $0x94] ss:$8 sps:$4 sm:$0xff]   ;;  %4748 = vmatprep.subr.bf16.mxu1 %v7312_v38  ;;  %v7318_v51 = vld [vmem:[%s10124_s9 + $0xa4] ss:$8 sps:$4 sm:$0xff]  }
 0xa99   : > { %v4486_v5 = vrot.slane %v4485_v26, 4  ;;  %v4514_v35 = vsel %vm2854_vm13, %v4435_v56, %v4513_v48  ;;  %v4219_v44 = vmul.f32 %v6734_v23, %v10329_v39  ;;  %v10331_v13 = vmov 0.0   ;;  %4749 = vmatpush1.bf16.msra.mxu1 %v7310_v42  ;;  %v7313_v56 = vld [vmem:[%s10124_s9 + $0x90] ss:$8 sps:$4 sm:$0xff]   ;;  %v7316_v1 = vld [vmem:[%s10124_s9 + $0xa0] ss:$8 sps:$4 sm:$0xff]  }
 0xa9a   : > { %v4477_v62 = vadd.f32 %v4476_v55, %v4475_v49  ;;  %v4482_v59 = vadd.f32 %v4481_v41, %v4480_v0  ;;  %v4524_v30 = vadd.f32 %v4514_v35, %v4218_v32  ;;  %4750 = vmatprep.subr.bf16.mxu1 %v7315_v43  ;;  %v7321_v49 = vld [vmem:[%s10124_s9 + $0xb4] ss:$8 sps:$4 sm:$0xff]   ;;  %v7319_v0 = vld [vmem:[%s10124_s9 + $0xb0] ss:$8 sps:$4 sm:$0xff]   ;;  %v6782_v38 = vld [vmem:[%s10126_s11 + $0x2] ss:$0 sm:$0xff] }
 0xa9b   : > { %v4487_v63 = vadd.f32 %v4486_v5, %v4485_v26  ;;  %v6760_v5 = vld [vmem:[%s10122_s7 + $0x2] ss:$0 sm:$0xff] }
 0xa9c   : > { %v4519_v45 = vsel %vm2850_vm11, %v4477_v62, %v4518_v11  ;;  %v4483_v50 = vrot.slane %v4482_v59, 1  ;;  %v4540_v31 = vmul.f32 %v4538_v22, %v4524_v30  ;;  %v7322_v22 = vld [vmem:[%s10127_s12 + $0x80] sm:$0xff]   ;;  %v7323_v30 = vld [vmem:[%s10127_s12 + $0x88] sm:$0xff]  }
 0xa9d   : > { %v4488_v20 = vrot.slane %v4487_v63, 2  ;;  %4751 = vmatpush1.bf16.msra.mxu1 %v7313_v56 }
 0xa9e   : > { %v4484_v25 = vadd.f32 %v4483_v50, %v4482_v59  ;;  %4752 = vmatprep.subr.bf16.mxu1 %v7318_v51  ;;  %v6762_v59 = vld [vmem:[%s10123_s8 + $0x2] ss:$0 sm:$0xff]  ;;  %v7325_v50 = vld [vmem:[%s10127_s12 + $0x98] sm:$0xff]  }
 0xa9f   : > { %v4489_v8 = vadd.f32 %v4488_v20, %v4487_v63  ;;  %v7534_v53 = vpop.eup %7533  ;;  %v7326_v20 = vld [vmem:[%s10127_s12 + $0xa0] sm:$0xff]  }
 0xaa0   : > { %v4520_v33 = vsel %vm2852_vm12, %v4484_v25, %v4519_v45  ;;  %v4539_v6 = vmul.f32 %v7534_v53, %v10330_v16  ;;  %v7324_v45 = vld [vmem:[%s10127_s12 + $0x90] sm:$0xff]   ;;  %v10334_v16 = vld [vmem:[#allocation13_spill] sm:$0xff] }
 0xaa1   : > { %v4490_v54 = vrot.slane %v4489_v8, 1  ;;  %4753 = vmatpush1.bf16.msra.mxu1 %v7316_v1  ;;  %v7330_v25 = vld [vmem:[%s10128_s13 + $0x10] sm:$0xff]  }
 0xaa2   : > { %4754 = vmatprep.subr.bf16.mxu1 %v7321_v49 }
 0xaa3   : > { %v4491_v15 = vadd.f32 %v4490_v54, %v4489_v8  ;;  %v7328_v8 = vld [vmem:[%s10127_s12 + $0xb0] sm:$0xff]  }
 0xaa5   : > { %v4521_v29 = vsel %vm2854_vm13, %v4491_v15, %v4520_v33  ;;  %4755 = vmatpush1.bf16.msra.mxu1 %v7319_v0  ;;  %v7329_v33 = vld [vmem:[%s10127_s12 + $0xb8] sm:$0xff]  }
 0xaa6   : > { %v4525_v28 = vadd.f32 %v4521_v29, %v4219_v44  ;;  %7098 = vmatprep.subr.bf16.mxu1 %v10331_v13  ;;  %v6780_v44 = vld [vmem:[%s10125_s10 + $0x8] sm:$0xf] }
 0xaa7   : > { %v4801_v29 = vrot.slane %v6780_v44, %v7919_v21 }
 0xaa8   : > { %v4541_v14 = vmul.f32 %v4539_v6, %v4525_v28  ;;  %v4809_v6 = vrot.slane %v6780_v44, %v10334_v16  ;;  %v10335_v28 = vld [vmem:[#allocation16_spill] sm:$0xff] }
 0xaaa   : > { %v4542_v10 = vpack.c.bf16 %v4541_v14, %v4540_v31  ;;  %v7327_v31 = vld [vmem:[%s10127_s12 + $0xa8] sm:$0xff]   ;;  %v4819_v14 = vrot.slane %v6780_v44, %v10335_v28 }
 0xaac   : > { %7075 = vmatmul.mubr.bf16.vlgmr.msra.gmra.mrb[20].mxu0 %v4542_v10 }
 0xaad   : > { %7094 = vmatprep.mubr.msk.bf16.mxu0 %vm7695_vm2, %v10331_v13  ;;  %7079 = vmatpush3.bf16.msra.mxu0 %v7322_v22 }
 0xaae   : > { %7080 = vmatprep.subr.bf16.mxu0 %v10331_v13 }
 0xab1   : > { %7081 = vmatpush3.bf16.msra.mxu0 %v7323_v30 }
 0xab2   : > { %7082 = vmatprep.subr.bf16.mxu0 %v10331_v13 }
 0xab5   : > { %7083 = vmatpush3.bf16.msra.mxu0 %v7324_v45 }
 0xab6   : > { %7084 = vmatprep.subr.bf16.mxu0 %v10331_v13 }
 0xab9   : > { %7085 = vmatpush3.bf16.msra.mxu0 %v7325_v50 }
 0xaba   : > { %7086 = vmatprep.subr.bf16.mxu0 %v10331_v13 }
 0xabd   : > { %7087 = vmatpush3.bf16.msra.mxu0 %v7326_v20 }
 0xabe   : > { %7088 = vmatprep.subr.bf16.mxu0 %v10331_v13 }
 0xac1   : > { %7089 = vmatpush3.bf16.msra.mxu0 %v7327_v31  ;;  %v10339_v31 = vld [vmem:[#allocation22_spill] sm:$0xff] }
 0xac2   : > { %7090 = vmatprep.subr.bf16.mxu0 %v10331_v13 }
 0xac5   : > { %7091 = vmatpush3.bf16.msra.mxu0 %v7328_v8  ;;  %v10340_v8 = vld [vmem:[#allocation23_spill] sm:$0xff] }
 0xac6   : > { %7092 = vmatprep.subr.bf16.mxu0 %v10331_v13 }
 0xac9   : > { %7093 = vmatpush3.bf16.msra.mxu0 %v7329_v33 }
 0xaca   : > { %7124 = vmatprep.subr.bf16.mxu0 %v10331_v13 }
 0xb7f   : > { %v4642_v12 = vpop.f32.mrb[20].mxu0 }
 0xb80   : > { %v7076_v24 = vpop.f32.mrb[21].mxu0  ;;  %v4649_v18 = vsel %vm871_vm6, %v4642_v12, 0.0 }
 0xb81   : > { %4650 = vadd.xlane.f32.xlu1 %v4649_v18  ;;  %v4645_v3 = vpop.f32.mrb[22].mxu0 }
 0xb82   : > { %v7077_v36 = vpop.f32.mrb[23].mxu0  ;;  %v4652_v47 = vsel %vm871_vm6, %v4645_v3, 0.0 }
 0xb83   : > { %4653 = vadd.xlane.f32.xlu0 %v4652_v47  ;;  %v10336_v36 = vld [vmem:[#allocation17_spill] sm:$0xff] }
 0xb84   : > { %v4829_v47 = vrot.slane %v6780_v44, %v10336_v36  ;;  %v10342_v44 = vld [vmem:[#allocation25_spill] sm:$0xff] }
 0xc0e   : > { %v4651_v2 = vpop.xlane.xlu1 %4650 }
 0xc0f   : > { %v4655_v60 = vmul.f32 0.015625, %v4651_v2 }
 0xc10   : > { %v4654_v27 = vpop.xlane.xlu0 %4653 }
 0xc11   : > { %v4657_v40 = vsub.f32 %v4642_v12, %v4655_v60  ;;  %v4656_v58 = vmul.f32 0.015625, %v4654_v27 }
 0xc13   : > { %v4658_v7 = vsub.f32 %v4645_v3, %v4656_v58  ;;  %v4659_v46 = vmul.f32 %v4657_v40, %v4657_v40 }
 0xc15   : > { %v4661_v52 = vsel %vm871_vm6, %v4659_v46, 0.0  ;;  %v4660_v19 = vmul.f32 %v4658_v7, %v4658_v7 }
 0xc16   : > { %4662 = vadd.xlane.f32.xlu0 %v4661_v52 }
 0xc17   : > { %v4664_v4 = vsel %vm871_vm6, %v4660_v19, 0.0 }
 0xc18   : > { %4665 = vadd.xlane.f32.xlu1 %v4664_v4 }
 0xca3   : > { %v4663_v26 = vpop.xlane.xlu0 %4662 }
 0xca4   : > { %v4667_v23 = vmul.f32 0.015625, %v4663_v26 }
 0xca5   : > { %v4666_v34 = vpop.xlane.xlu1 %4665 }
 0xca6   : > { %v4669_v57 = vadd.f32 1e-05, %v4667_v23  ;;  %v4668_v11 = vmul.f32 0.015625, %v4666_v34 }
 0xca8   : > { %7535 = vrsqrt.f32 %v4669_v57  ;;  %v4670_v55 = vadd.f32 1e-05, %v4668_v11 }
 0xcaa   : > { %7537 = vrsqrt.f32 %v4670_v55 }
 0xcb2   : > { %v7536_v41 = vpop.eup %7535 }
 0xcb3   : > { %v4673_v61 = vmul.f32 %v7536_v41, %v4657_v40 }
 0xcb4   : > { %v7538_v32 = vpop.eup %7537 }
 0xcb5   : > { %v4683_v48 = vmul.f32 %v6760_v5, %v4673_v61  ;;  %v4674_v62 = vmul.f32 %v7538_v32, %v4658_v7 }
 0xcb7   : > { %v4684_v63 = vmul.f32 %v6760_v5, %v4674_v62  ;;  %v4693_v35 = vadd.f32 %v6762_v59, %v4683_v48 }
 0xcb9   : > { %v4694_v9 = vadd.f32 %v6762_v59, %v4684_v63 }
 0xcbb   : > { %v4695_v37 = vpack.c.bf16 %v4694_v9, %v4693_v35 }
 0xcbd   : > { %6779 = vmatmul.mubr.msk.bf16.vlgmr.msra.gmra.mrb[20].mxu1 %vm871_vm6, %v4695_v37 }
 0xcbe   : > { %7100 = vmatprep.mubr.msk.bf16.mxu1 %vm7695_vm2, %v10331_v13  ;;  %7099 = vmatpush3.bf16.msra.mxu1 %v7330_v25 }
 0xcbf   : > { %7104 = vmatprep.subr.bf16.mxu1 %v10331_v13 }
 0xd90   : > { %v4782_v54 = vpop.f32.mrb[20].mxu1 }
 0xd91   : > { %4792 = vst [vmem:[#allocation3 + $0x3] sm:$0xff] %v4782_v54  ;;  %v9428_v53 = vpop.f32.mrb[21].mxu1  ;;  %v4830_v42 = vmul.f32 %v4829_v47, %v4782_v54  ;;  %v10341_v54 = vld [vmem:[#allocation24_spill] sm:$0xff] }
 0xd92   : > { %10332 = vst [vmem:[#allocation37_spill] sm:$0xff] %v9428_v53  ;;  %v4786_v15 = vpop.f32.mrb[22].mxu1 }
 0xd93   : > { %4793 = vst [vmem:[#allocation3 + $0xb] sm:$0xff] %v4786_v15  ;;  %v9430_v39 = vpop.f32.mrb[23].mxu1  ;;  %v4831_v56 = vmul.f32 %v4829_v47, %v4786_v15 }
 0xd94   : > { %10333 = vst [vmem:[#allocation35_spill] sm:$0xff] %v9430_v39 }
 0xd98   : > { %v4796_v10 = vld [vmem:[#allocation3] sm:$0xff] }
 0xd99   : > { %v4804_v12 = vld [vmem:[#allocation3 + $0x1] sm:$0xff]  ;;  %v4802_v18 = vmul.f32 %v4801_v29, %v4796_v10 }
 0xd9a   : > { %v4814_v24 = vld [vmem:[#allocation3 + $0x2] sm:$0xff]  ;;  %v4810_v3 = vmul.f32 %v4809_v6, %v4804_v12  ;;  %v4815_v27 = vld [vmem:[#allocation3 + $0xa] sm:$0xff] }
 0xd9b   : > { %v4797_v2 = vld [vmem:[#allocation3 + $0x8] sm:$0xff]  ;;  %v4820_v46 = vmul.f32 %v4819_v14, %v4814_v24  ;;  %v4821_v19 = vmul.f32 %v4819_v14, %v4815_v27 }
 0xd9c   : > { %v4805_v60 = vld [vmem:[#allocation3 + $0x9] sm:$0xff]  ;;  %v4803_v40 = vmul.f32 %v4801_v29, %v4797_v2  ;;  %v4812_v7 = vadd.f32 %v4810_v3, %v4802_v18 }
 0xd9d   : > { %v4811_v58 = vmul.f32 %v4809_v6, %v4805_v60 }
 0xd9e   : > { %v4822_v4 = vadd.f32 %v4820_v46, %v4812_v7 }
 0xd9f   : > { %v4813_v52 = vadd.f32 %v4811_v58, %v4803_v40 }
 0xda0   : > { %v4832_v51 = vadd.f32 %v4830_v42, %v4822_v4 }
 0xda1   : > { %v4823_v43 = vadd.f32 %v4821_v19, %v4813_v52 }
 0xda2   : > { %v4842_v49 = vadd.f32 %v6782_v38, %v4832_v51 }
 0xda3   : > { %v4833_v1 = vadd.f32 %v4831_v56, %v4823_v43 }
 0xda4   : > { %v4844_v26 = vsub.f32 0.0, %v4842_v49 }
 0xda5   : > { %v4843_v0 = vadd.f32 %v6782_v38, %v4833_v1 }
 0xda6   : > { %v4846_v34 = vmul.f32 1.442695, %v4844_v26 }
 0xda7   : > { %v4845_v23 = vsub.f32 0.0, %v4843_v0 }
 0xda8   : > { %7539 = vpow2.f32 %v4846_v34 }
 0xda9   : > { %v4848_v57 = vmul.f32 1.442695, %v4845_v23 }
 0xdab   : > { %7541 = vpow2.f32 %v4848_v57 }
 0xdb2   : > { %v7540_v11 = vpop.eup %7539 }
 0xdb3   : > { %v4850_v55 = vadd.f32 1.0, %v7540_v11 }
 0xdb5   : > { %v7542_v41 = vpop.eup %7541  ;;  %7543 = vrcp.f32 %v4850_v55 }
 0xdb6   : > { %v4851_v5 = vadd.f32 1.0, %v7542_v41 }
 0xdb8   : > { %7545 = vrcp.f32 %v4851_v5 }
 0xdbf   : > { %v7544_v61 = vpop.eup %7543 }
 0xdc0   : > { %v9442_v48 = vmul.f32 %v7544_v61, %v4842_v49 }
 0xdc2   : > { %v7546_v32 = vpop.eup %7545  ;;  %10337 = vst [vmem:[#allocation26_spill] sm:$0xff] %v9442_v48 }
 0xdc3   : > { %v9444_v62 = vmul.f32 %v7546_v32, %v4843_v0  ;;  %v6810_v0 = vld [vmem:[%s10129_s14 + $0x2] ss:$0 sm:$0xff] }
 0xdc5   : > { %10338 = vst [vmem:[#allocation40_spill] sm:$0xff] %v9444_v62  ;;  %v4858_v59 = vpack.c.bf16 %v9444_v62, %v9442_v48 }
 0xdc7   : > { %7095 = vmatmul.mubr.bf16.vlgmr.msra.gmra.mrb[24].mxu0 %v4858_v59 }
 0xdc8   : > { %7140 = vmatprep.mubr.msk.bf16.mxu0 %vm7695_vm2, %v10331_v13 }
 0xe9a   : > { %v4958_v63 = vpop.f32.mrb[24].mxu0 }
 0xe9b   : > { %v7096_v35 = vpop.f32.mrb[25].mxu0  ;;  %v5341_v9 = vrot.slane %v4958_v63, %v7919_v21  ;;  %v5353_v45 = vrot.slane %v4958_v63, %v10334_v16  ;;  %v5365_v50 = vrot.slane %v4958_v63, %v10335_v28  ;;  %v5377_v20 = vrot.slane %v4958_v63, %v10336_v36 }
 0xe9c   : > { %v9451_v37 = vpop.f32.mrb[26].mxu0  ;;  %v5389_v25 = vrot.slane %v4958_v63, %v10339_v31  ;;  %v5401_v33 = vrot.slane %v4958_v63, %v10340_v8  ;;  %v5413_v15 = vrot.slane %v4958_v63, %v10341_v54  ;;  %v5425_v29 = vrot.slane %v4958_v63, %v10342_v44 }
 0xe9d   : > { %5348 = vbcast.lane.b32.xlu1 %v5341_v9, 280  ;;  %5344 = vbcast.lane.b32.xlu0 %v5341_v9, 272  ;;  %v7097_v22 = vpop.f32.mrb[27].mxu0  ;;  %v4965_v30 = vpack.c.bf16 %v9451_v37, %v4958_v63  ;;  %v5437_v6 = vrot.slane %v9451_v37, %v7919_v21  ;;  %v5449_v14 = vrot.slane %v9451_v37, %v10334_v16 }
 0xe9e   : > { %v5461_v10 = vrot.slane %v9451_v37, %v10335_v28  ;;  %v5473_v12 = vrot.slane %v9451_v37, %v10336_v36  ;;  %v5485_v24 = vrot.slane %v9451_v37, %v10339_v31  ;;  %v5497_v16 = vrot.slane %v9451_v37, %v10340_v8 }
 0xe9f   : > { %7101 = vmatmul.mubr.msk.bf16.vlgmr.msra.gmra.mrb[24].mxu1 %vm1643_vm3, %v4965_v30  ;;  %v5509_v28 = vrot.slane %v9451_v37, %v10341_v54  ;;  %v5521_v18 = vrot.slane %v9451_v37, %v10342_v44  ;;  %v6186_v30 = vsub.f32 0.0, %v9428_v53 }
 0xea0   : > { %7120 = vmatprep.mubr.msk.bf16.mxu1 %vm7695_vm2, %v10331_v13 }
 0xea1   : > { %5356 = vbcast.lane.b32.xlu1 %v5353_v45, 272  ;;  %5360 = vbcast.lane.b32.xlu0 %v5353_v45, 280 }
 0xea5   : > { %5368 = vbcast.lane.b32.xlu1 %v5365_v50, 272  ;;  %5372 = vbcast.lane.b32.xlu0 %v5365_v50, 280 }
 0xea9   : > { %5380 = vbcast.lane.b32.xlu1 %v5377_v20, 272  ;;  %5384 = vbcast.lane.b32.xlu0 %v5377_v20, 280 }
 0xead   : > { %5392 = vbcast.lane.b32.xlu1 %v5389_v25, 272  ;;  %5396 = vbcast.lane.b32.xlu0 %v5389_v25, 280 }
 0xeb1   : > { %5404 = vbcast.lane.b32.xlu1 %v5401_v33, 272  ;;  %5408 = vbcast.lane.b32.xlu0 %v5401_v33, 280 }
 0xeb5   : > { %5416 = vbcast.lane.b32.xlu1 %v5413_v15, 272  ;;  %5420 = vbcast.lane.b32.xlu0 %v5413_v15, 280 }
 0xeb9   : > { %5428 = vbcast.lane.b32.xlu1 %v5425_v29, 272  ;;  %5432 = vbcast.lane.b32.xlu0 %v5425_v29, 280 }
 0xebd   : > { %5882 = vbcast.lane.b32.xlu1 %v5341_v9, 288  ;;  %5886 = vbcast.lane.b32.xlu0 %v5341_v9, 296 }
 0xec1   : > { %5890 = vbcast.lane.b32.xlu1 %v5353_v45, 288  ;;  %5894 = vbcast.lane.b32.xlu0 %v5353_v45, 296 }
 0xec5   : > { %5898 = vbcast.lane.b32.xlu1 %v5365_v50, 288  ;;  %5902 = vbcast.lane.b32.xlu0 %v5365_v50, 296 }
 0xec9   : > { %5906 = vbcast.lane.b32.xlu1 %v5377_v20, 288  ;;  %5910 = vbcast.lane.b32.xlu0 %v5377_v20, 296  ;;  %v6188_v20 = vmul.f32 1.442695, %v6186_v30 }
 0xecd   : > { %5914 = vbcast.lane.b32.xlu1 %v5389_v25, 288  ;;  %5918 = vbcast.lane.b32.xlu0 %v5389_v25, 296  ;;  %v6187_v25 = vsub.f32 0.0, %v9430_v39 }
 0xed1   : > { %5922 = vbcast.lane.b32.xlu1 %v5401_v33, 288  ;;  %5926 = vbcast.lane.b32.xlu0 %v5401_v33, 296 }
 0xed5   : > { %5930 = vbcast.lane.b32.xlu1 %v5413_v15, 288  ;;  %5934 = vbcast.lane.b32.xlu0 %v5413_v15, 296 }
 0xed9   : > { %5938 = vbcast.lane.b32.xlu1 %v5425_v29, 288  ;;  %5942 = vbcast.lane.b32.xlu0 %v5425_v29, 296  ;;  %v6190_v29 = vmul.f32 1.442695, %v6187_v25 }
 0xedd   : > { %5444 = vbcast.lane.b32.xlu0 %v5437_v6, 280  ;;  %5440 = vbcast.lane.b32.xlu1 %v5437_v6, 272 }
 0xee1   : > { %5456 = vbcast.lane.b32.xlu0 %v5449_v14, 280  ;;  %5452 = vbcast.lane.b32.xlu1 %v5449_v14, 272 }
 0xee5   : > { %5468 = vbcast.lane.b32.xlu0 %v5461_v10, 280  ;;  %5464 = vbcast.lane.b32.xlu1 %v5461_v10, 272 }
 0xee9   : > { %5480 = vbcast.lane.b32.xlu0 %v5473_v12, 280  ;;  %5476 = vbcast.lane.b32.xlu1 %v5473_v12, 272 }
 0xeed   : > { %5492 = vbcast.lane.b32.xlu0 %v5485_v24, 280  ;;  %5488 = vbcast.lane.b32.xlu1 %v5485_v24, 272 }
 0xef1   : > { %5504 = vbcast.lane.b32.xlu0 %v5497_v16, 280  ;;  %5500 = vbcast.lane.b32.xlu1 %v5497_v16, 272 }
 0xef5   : > { %5516 = vbcast.lane.b32.xlu0 %v5509_v28, 280  ;;  %5512 = vbcast.lane.b32.xlu1 %v5509_v28, 272 }
 0xef9   : > { %5950 = vbcast.lane.b32.xlu0 %v5437_v6, 296  ;;  %5946 = vbcast.lane.b32.xlu1 %v5437_v6, 288 }
 0xefd   : > { %5958 = vbcast.lane.b32.xlu0 %v5449_v14, 296  ;;  %5954 = vbcast.lane.b32.xlu1 %v5449_v14, 288 }
 0xf01   : > { %5966 = vbcast.lane.b32.xlu0 %v5461_v10, 296  ;;  %5962 = vbcast.lane.b32.xlu1 %v5461_v10, 288 }
 0xf05   : > { %5528 = vbcast.lane.b32.xlu0 %v5521_v18, 280  ;;  %5524 = vbcast.lane.b32.xlu1 %v5521_v18, 272 }
 0xf09   : > { %5974 = vbcast.lane.b32.xlu0 %v5473_v12, 296  ;;  %5970 = vbcast.lane.b32.xlu1 %v5473_v12, 288  ;;  %v7331_v12 = vld [vmem:[%s10132_s17 + $0x80] sm:$0xff]  }
 0xf0a   : > { %7105 = vmatpush3.bf16.msra.mxu1 %v7331_v12 }
 0xf0b   : > { %7106 = vmatprep.subr.bf16.mxu1 %v10331_v13 }
 0xf0d   : > { %5982 = vbcast.lane.b32.xlu0 %v5485_v24, 296  ;;  %5978 = vbcast.lane.b32.xlu1 %v5485_v24, 288 }
 0xf0f   : > { %v9480_v3 = vpop.permute.xlu1 %5348  ;;  %v9482_v36 = vpop.permute.xlu0 %5344 }
 0xf11   : > { %5990 = vbcast.lane.b32.xlu0 %v5497_v16, 296  ;;  %5986 = vbcast.lane.b32.xlu1 %v5497_v16, 288 }
 0xf13   : > { %v9484_v47 = vpop.permute.xlu1 %5356  ;;  %v9486_v2 = vpop.permute.xlu0 %5360 }
 0xf15   : > { %5998 = vbcast.lane.b32.xlu0 %v5509_v28, 296  ;;  %5994 = vbcast.lane.b32.xlu1 %v5509_v28, 288  ;;  %v7332_v28 = vld [vmem:[%s10132_s17 + $0x88] sm:$0xff]  }
 0xf16   : > { %7107 = vmatpush3.bf16.msra.mxu1 %v7332_v28 }
 0xf17   : > { %v9488_v60 = vpop.permute.xlu1 %5368  ;;  %v9490_v27 = vpop.permute.xlu0 %5372  ;;  %7108 = vmatprep.subr.bf16.mxu1 %v10331_v13 }
 0xf19   : > { %6006 = vbcast.lane.b32.xlu0 %v5521_v18, 296  ;;  %6002 = vbcast.lane.b32.xlu1 %v5521_v18, 288 }
 0xf1b   : > { %v9492_v40 = vpop.permute.xlu1 %5380  ;;  %v9494_v58 = vpop.permute.xlu0 %5384 }
 0xf1f   : > { %v9496_v7 = vpop.permute.xlu1 %5392  ;;  %v9498_v46 = vpop.permute.xlu0 %5396 }
 0xf23   : > { %v9500_v52 = vpop.permute.xlu1 %5404  ;;  %v9502_v19 = vpop.permute.xlu0 %5408 }
 0xf27   : > { %v9504_v4 = vpop.permute.xlu1 %5416  ;;  %v9506_v42 = vpop.permute.xlu0 %5420 }
 0xf2b   : > { %v9508_v38 = vpop.permute.xlu1 %5428  ;;  %v9510_v43 = vpop.permute.xlu0 %5432 }
 0xf2c   : > { %10343 = vst [vmem:[#allocation33_spill] sm:$0xff] %v9508_v38  ;;  %10344 = vst [vmem:[#allocation34_spill] sm:$0xff] %v9510_v43 }
 0xf2f   : > { %v9512_v56 = vpop.permute.xlu1 %5882  ;;  %v9514_v51 = vpop.permute.xlu0 %5886 }
 0xf33   : > { %v9516_v1 = vpop.permute.xlu1 %5890  ;;  %v9518_v49 = vpop.permute.xlu0 %5894 }
 0xf37   : > { %v9523_v23 = vpop.permute.xlu1 %5898  ;;  %v9525_v57 = vpop.permute.xlu0 %5902 }
 0xf3b   : > { %v9530_v35 = vpop.permute.xlu1 %5906  ;;  %v9532_v9 = vpop.permute.xlu0 %5910 }
 0xf3f   : > { %v9535_v45 = vpop.permute.xlu1 %5914  ;;  %v9537_v50 = vpop.permute.xlu0 %5918 }
 0xf43   : > { %v9540_v8 = vpop.permute.xlu1 %5922  ;;  %v9542_v33 = vpop.permute.xlu0 %5926 }
 0xf44   : > { %10345 = vst [vmem:[#allocation30_spill] sm:$0xff] %v9540_v8  ;;  %10346 = vst [vmem:[#allocation36_spill] sm:$0xff] %v9542_v33 }
 0xf47   : > { %v9544_v14 = vpop.permute.xlu1 %5930  ;;  %v9546_v10 = vpop.permute.xlu0 %5934 }
 0xf48   : > { %10347 = vst [vmem:[#allocation18_spill] sm:$0xff] %v9544_v14  ;;  %10348 = vst [vmem:[#allocation19_spill] sm:$0xff] %v9546_v10 }
 0xf72   : > { %v5020_v26 = vpop.f32.mrb[24].mxu1 }
 0xf73   : > { %v5021_v34 = vadd.f32 %v6810_v0, %v5020_v26  ;;  %v7102_v11 = vpop.f32.mrb[25].mxu1 }
 0xf74   : > { %v5023_v41 = vpop.f32.mrb[26].mxu1  ;;  %v9555_v11 = vpop.permute.xlu1 %5938 }
 0xf75   : > { %v5029_v55 = vand.u32 2147483647, %v5021_v34  ;;  %v9527_v5 = vadd.f32 %v6810_v0, %v5023_v41  ;;  %v7103_v61 = vpop.f32.mrb[27].mxu1  ;;  %10349 = vst [vmem:[#allocation39_spill] sm:$0xff] %v9555_v11 }
 0xf77   : > { %v5031_v32 = vsub.f32 0.0, %v5029_v55  ;;  %v5030_v59 = vand.u32 2147483647, %v9527_v5  ;;  %v9557_v55 = vpop.permute.xlu0 %5942 }
 0xf78   : > { %10350 = vst [vmem:[#allocation41_spill] sm:$0xff] %v9557_v55 }
 0xf79   : > { %v5033_v63 = vmul.f32 1.442695, %v5031_v32  ;;  %v5032_v37 = vsub.f32 0.0, %v5030_v59 }
 0xf7b   : > { %7547 = vpow2.f32 %v5033_v63  ;;  %v5035_v22 = vmul.f32 1.442695, %v5032_v37  ;;  %v7333_v63 = vld [vmem:[%s10132_s17 + $0x90] sm:$0xff]   ;;  %v5027_v37 = vmax.f32 %v5021_v34, 0.0  ;;  %v9567_v12 = vpop.permute.xlu0 %5444  ;;  %v9569_v34 = vpop.permute.xlu1 %5440 }
 0xf7c   : > { %7109 = vmatpush3.bf16.msra.mxu1 %v7333_v63  ;;  %10351 = vst [vmem:[#allocation29_spill] sm:$0xff] %v9567_v12  ;;  %10352 = vst [vmem:[#allocation38_spill] sm:$0xff] %v9569_v34 }
 0xf7d   : > { %7549 = vpow2.f32 %v5035_v22  ;;  %7110 = vmatprep.subr.bf16.mxu1 %v10331_v13 }
 0xf7e   : > { %7551 = vpow2.f32 %v6188_v20 }
 0xf85   : > { %v7548_v31 = vpop.eup %7547 }
 0xf86   : > { %v5037_v54 = vadd.f32 1.0, %v7548_v31  ;;  %v5040_v6 = vmul.f32 -0.5, %v7548_v31  ;;  %v5043_v18 = vand.u32 2147483647, %v7548_v31 }
 0xf87   : > { %v7550_v15 = vpop.eup %7549 }
 0xf88   : > { %7553 = vlog2.f32 %v5037_v54  ;;  %v5046_v44 = vadd.f32 1.0, %v7550_v15  ;;  %v5049_v24 = vmul.f32 -0.5, %v7550_v15  ;;  %v5041_v16 = vadd.f32 1.0, %v5040_v6  ;;  %v7552_v0 = vpop.eup %7551 }
 0xf89   : > { %v5052_v59 = vand.u32 2147483647, %v7550_v15  ;;  %vm5044_vm0 = vcmp.lt.f32.partialorder %v5043_v18, 0.0004427343  ;;  %v6192_v30 = vadd.f32 1.0, %v7552_v0 }
 0xf8a   : > { %7555 = vlog2.f32 %v5046_v44  ;;  %v5050_v41 = vadd.f32 1.0, %v5049_v24  ;;  %v5042_v32 = vmul.f32 %v7548_v31, %v5041_v16  ;;  %v7334_v31 = vld [vmem:[%s10132_s17 + $0x98] sm:$0xff]  }
 0xf8b   : > { %7557 = vpow2.f32 %v6190_v29  ;;  %v5028_v29 = vmax.f32 %v9527_v5, 0.0  ;;  %vm5053_vm1 = vcmp.lt.f32.partialorder %v5052_v59, 0.0004427343  ;;  %7111 = vmatpush3.bf16.msra.mxu1 %v7334_v31 }
 0xf8c   : > { %v5051_v44 = vmul.f32 %v7550_v15, %v5050_v41  ;;  %7559 = vrcp.f32 %v6192_v30  ;;  %7112 = vmatprep.subr.bf16.mxu1 %v10331_v13 }
 0xf92   : > { %v7554_v26 = vpop.eup %7553 }
 0xf93   : > { %v5039_v61 = vmul.f32 0.6931472, %v7554_v26 }
 0xf94   : > { %v7556_v22 = vpop.eup %7555 }
 0xf95   : > { %v5045_v20 = vsel %vm5044_vm0, %v5042_v32, %v5039_v61  ;;  %v5048_v54 = vmul.f32 0.6931472, %v7556_v22  ;;  %v7558_v6 = vpop.eup %7557  ;;  %v9595_v22 = vld [vmem:[%s10130_s15 + $0x20] sm:$0xff] }
 0xf96   : > { %v5055_v25 = vadd.f32 %v5045_v20, %v5027_v37  ;;  %v9578_v61 = vadd.f32 1.0, %v7558_v6  ;;  %v7335_v37 = vld [vmem:[%s10132_s17 + $0xa0] sm:$0xff]   ;;  %v9643_v55 = vpop.eup %7559 }
 0xf97   : > { %v5054_v18 = vsel %vm5053_vm1, %v5051_v44, %v5048_v54  ;;  %7113 = vmatpush3.bf16.msra.mxu1 %v7335_v37  ;;  %10356 = vst [vmem:[#allocation45_spill] sm:$0xff] %v9643_v55 }
 0xf98   : > { %v5060_v24 = vmul.f32 %v5055_v25, %v9442_v48  ;;  %v5064_v16 = vcombine.high %v5055_v25, %v5055_v25  ;;  %v5071_v28 = vrot.slane %v5055_v25, %v8316_v17  ;;  %v9574_v5 = vadd.f32 %v5054_v18, %v5028_v29  ;;  %10353 = vst [vmem:[#allocation42_spill] sm:$0xff] %v9578_v61 }
 0xf99   : > { %7114 = vmatprep.subr.bf16.mxu1 %v10331_v13 }
 0xf9a   : > { %v5078_v15 = vrot.slane %v5064_v16, %v8316_v17  ;;  %v5079_v0 = vcombine.high %v5071_v28, %v5071_v28  ;;  %v5087_v26 = vrot.slane %v5071_v28, %v8316_v17  ;;  %v5532_v41 = vcombine.high %v5060_v24, %v5060_v24  ;;  %v9612_v16 = vpop.permute.xlu1 %5452  ;;  %v9617_v28 = vld [vmem:[%s10130_s15 + $0x28] sm:$0xff] }
 0xf9b   : > { %v9581_v32 = vrot.slane %v5060_v24, %v8316_v17  ;;  %v9585_v59 = vmul.f32 %v9574_v5, %v9444_v62  ;;  %v9608_v6 = vrot.slane %v9574_v5, %v8316_v17  ;;  %v9610_v24 = vpop.permute.xlu0 %5456  ;;  %10355 = vst [vmem:[#allocation44_spill] sm:$0xff] %v9612_v16  ;;  %v7336_v62 = vld [vmem:[%s10132_s17 + $0xa8] sm:$0xff]  }
 0xf9c   : > { %v5080_v30 = vcombine.high %v5078_v15, %v5078_v15  ;;  %v5094_v20 = vrot.slane %v5078_v15, %v8316_v17  ;;  %v5101_v25 = vrot.slane %v5079_v0, %v8316_v17  ;;  %v5109_v54 = vcombine.high %v5087_v26, %v5087_v26  ;;  %10354 = vst [vmem:[#allocation43_spill] sm:$0xff] %v9610_v24 }
 0xf9d   : > { %v5165_v44 = vrot.slane %v5087_v26, %v7919_v21  ;;  %v9602_v29 = vrot.slane %v5532_v41, %v8316_v17  ;;  %v9626_v39 = vrot.slane %v9581_v32, %v8316_v17  ;;  %7115 = vmatpush3.bf16.msra.mxu1 %v7336_v62 }
 0xf9e   : > { %v5108_v18 = vrot.slane %v5080_v30, %v8316_v17  ;;  %v5110_v15 = vcombine.high %v5094_v20, %v5094_v20  ;;  %v5111_v0 = vcombine.high %v5101_v25, %v5101_v25  ;;  %v5169_v26 = vrot.slane %v5101_v25, %v7919_v21  ;;  %v9654_v34 = vpop.permute.xlu1 %5464  ;;  %7116 = vmatprep.subr.bf16.mxu1 %v10331_v13 }
 0xf9f   : > { %v5173_v41 = vrot.slane %v5109_v54, %v7919_v21  ;;  %v5181_v63 = vrot.slane %v5094_v20, %v7919_v21  ;;  %v5242_v31 = vmul.f32 %v9595_v22, %v5165_v44  ;;  %v5243_v20 = vmul.f32 %v9617_v28, %v5165_v44  ;;  %10358 = vst [vmem:[#allocation14_spill] sm:$0xff] %v9654_v34 }
 0xfa0   : > { %v5112_v30 = vcombine.high %v5108_v18, %v5108_v18  ;;  %v5177_v53 = vrot.slane %v5111_v0, %v7919_v21  ;;  %v5185_v25 = vrot.slane %v5108_v18, %v7919_v21  ;;  %v5189_v54 = vrot.slane %v5110_v15, %v7919_v21 }
 0xfa1   : > { %v5244_v48 = vmul.f32 %v9595_v22, %v5169_v26  ;;  %v5245_v61 = vmul.f32 %v9617_v28, %v5169_v26  ;;  %v5246_v37 = vmul.f32 %v9595_v22, %v5173_v41  ;;  %v5247_v14 = vmul.f32 %v9617_v28, %v5173_v41  ;;  %v9652_v41 = vpop.permute.xlu0 %5468 }
 0xfa2   : > { %v5193_v11 = vrot.slane %v5112_v30, %v7919_v21  ;;  %v5248_v0 = vmul.f32 %v9595_v22, %v5177_v53  ;;  %v5249_v18 = vmul.f32 %v9617_v28, %v5177_v53  ;;  %v5250_v15 = vmul.f32 %v9595_v22, %v5181_v63  ;;  %v7337_v30 = vld [vmem:[%s10132_s17 + $0xb0] sm:$0xff]   ;;  %10357 = vst [vmem:[#allocation46_spill] sm:$0xff] %v9652_v41  ;;  %v9669_v8 = vpop.permute.xlu1 %5476 }
 0xfa3   : > { %v5251_v44 = vmul.f32 %v9617_v28, %v5181_v63  ;;  %v5252_v16 = vmul.f32 %v9595_v22, %v5185_v25  ;;  %v5253_v26 = vmul.f32 %v9617_v28, %v5185_v25  ;;  %v5254_v53 = vmul.f32 %v9595_v22, %v5189_v54  ;;  %7117 = vmatpush3.bf16.msra.mxu1 %v7337_v30 }
 0xfa4   : > { %v5255_v55 = vmul.f32 %v9617_v28, %v5189_v54  ;;  %v5256_v24 = vmul.f32 %v9595_v22, %v5193_v11  ;;  %v5274_v63 = vmul.f32 1.442695, %v5242_v31  ;;  %v5257_v25 = vmul.f32 %v9617_v28, %v5193_v11  ;;  %v7338_v54 = vld [vmem:[%s10132_s17 + $0xb8] sm:$0xff]   ;;  %7118 = vmatprep.subr.bf16.mxu1 %v10331_v13 }
 0xfa5   : > { %v5276_v62 = vmul.f32 1.442695, %v5243_v20  ;;  %v5278_v12 = vmul.f32 1.442695, %v5244_v48  ;;  %v5280_v38 = vmul.f32 1.442695, %v5245_v61  ;;  %v5548_v34 = vcombine.high %v9602_v29, %v9602_v29 }
 0xfa6   : > { %7561 = vpow2.f32 %v5274_v63  ;;  %v5282_v10 = vmul.f32 1.442695, %v5246_v37  ;;  %v5284_v43 = vmul.f32 1.442695, %v5247_v14  ;;  %v5286_v41 = vmul.f32 1.442695, %v5248_v0  ;;  %v9667_v63 = vpop.permute.xlu0 %5480 }
 0xfa7   : > { %7563 = vpow2.f32 %v5276_v62  ;;  %v5288_v31 = vmul.f32 1.442695, %v5249_v18  ;;  %v5290_v33 = vmul.f32 1.442695, %v5250_v15  ;;  %v5292_v11 = vmul.f32 1.442695, %v5251_v44  ;;  %7119 = vmatpush3.bf16.msra.mxu1 %v7338_v54 }
 0xfa8   : > { %7565 = vpow2.f32 %v5278_v12  ;;  %v5294_v20 = vmul.f32 1.442695, %v5252_v16  ;;  %v5296_v48 = vmul.f32 1.442695, %v5253_v26  ;;  %v5298_v14 = vmul.f32 1.442695, %v5254_v53  ;;  %7144 = vmatprep.subr.bf16.mxu1 %v10331_v13 }
 0xfa9   : > { %7567 = vpow2.f32 %v5280_v38  ;;  %v5300_v61 = vmul.f32 1.442695, %v5255_v55  ;;  %v5302_v37 = vmul.f32 1.442695, %v5256_v24  ;;  %v5562_v0 = vrot.slane %v9602_v29, %v8316_v17 }
 0xfaa   : > { %7569 = vpow2.f32 %v5282_v10  ;;  %v10359_v12 = vcombine.high %v9581_v32, %v9581_v32  ;;  %v5576_v18 = vrot.slane %v5548_v34, %v8316_v17  ;;  %v5304_v38 = vmul.f32 1.442695, %v5257_v25  ;;  %v9697_v54 = vpop.permute.xlu0 %5492 }
 0xfab   : > { %7571 = vpow2.f32 %v5284_v43  ;;  %v5577_v55 = vcombine.high %v9626_v39, %v9626_v39  ;;  %v5633_v24 = vrot.slane %v9626_v39, %v7919_v21  ;;  %v5578_v10 = vcombine.high %v5562_v0, %v5562_v0 }
 0xfac   : > { %v5569_v16 = vrot.slane %v10359_v12, %v8316_v17  ;;  %7573 = vpow2.f32 %v5286_v41  ;;  %v5580_v29 = vcombine.high %v5576_v18, %v5576_v18  ;;  %v10360_v43 = vcombine.high %v9574_v5, %v9574_v5  ;;  %v9699_v5 = vpop.permute.xlu1 %5488 }
 0xfad   : > { %7575 = vpow2.f32 %v5288_v31  ;;  %v5641_v34 = vrot.slane %v5577_v55, %v7919_v21  ;;  %v5649_v26 = vrot.slane %v5562_v0, %v7919_v21  ;;  %v5653_v30 = vrot.slane %v5576_v18, %v7919_v21 }
 0xfae   : > { %v5579_v15 = vcombine.high %v5569_v16, %v5569_v16  ;;  %v5637_v32 = vrot.slane %v5569_v16, %v7919_v21  ;;  %v5127_v44 = vrot.slane %v10360_v43, %v8316_v17  ;;  %7577 = vpow2.f32 %v5290_v33 }
 0xfaf   : > { %7579 = vpow2.f32 %v5292_v11  ;;  %v5657_v41 = vrot.slane %v5578_v10, %v7919_v21  ;;  %v9694_v53 = vrot.slane %v5580_v29, %v7919_v21  ;;  %v5710_v25 = vmul.f32 %v5633_v24, %v9482_v36 }
 0xfb0   : > { %v5645_v39 = vrot.slane %v5579_v15, %v7919_v21  ;;  %v7562_v62 = vpop.eup %7561  ;;  %7581 = vpow2.f32 %v5294_v20  ;;  %v5711_v33 = vmul.f32 %v5633_v24, %v9480_v3  ;;  %v5712_v31 = vmul.f32 %v5637_v32, %v9484_v47  ;;  %v9741_v10 = vpop.permute.xlu1 %5500 }
 0xfb1   : > { %v5713_v0 = vmul.f32 %v5637_v32, %v9486_v2  ;;  %v7564_v11 = vpop.eup %7563  ;;  %7583 = vpow2.f32 %v5296_v48  ;;  %v9705_v12 = vmul.f32 %v5641_v34, %v9488_v60  ;;  %v9708_v16 = vmul.f32 %v5641_v34, %v9490_v27  ;;  %10361 = vst [vmem:[#allocation32_spill] sm:$0xff] %v9741_v10 }
 0xfb2   : > { %v9711_v36 = vmul.f32 %v5645_v39, %v9492_v40  ;;  %v7566_v18 = vpop.eup %7565  ;;  %7585 = vpow2.f32 %v5298_v14  ;;  %v9714_v20 = vmul.f32 %v5645_v39, %v9494_v58  ;;  %v9717_v3 = vmul.f32 %v5649_v26, %v9496_v7 }
 0xfb3   : > { %v9720_v47 = vmul.f32 %v5649_v26, %v9498_v46  ;;  %v7568_v2 = vpop.eup %7567  ;;  %7587 = vpow2.f32 %v5300_v61  ;;  %v9723_v60 = vmul.f32 %v5653_v30, %v9500_v52  ;;  %v9726_v27 = vmul.f32 %v5653_v30, %v9502_v19 }
 0xfb4   : > { %v9729_v40 = vmul.f32 %v5657_v41, %v9504_v4  ;;  %v7570_v48 = vpop.eup %7569  ;;  %v9732_v58 = vmul.f32 %v5657_v41, %v9506_v42  ;;  %v5742_v7 = vmul.f32 0.0, %v7562_v62  ;;  %v5743_v14 = vmul.f32 0.0, %v7564_v11  ;;  %v9739_v4 = vpop.permute.xlu0 %5504 }
 0xfb5   : > { %v5128_v46 = vcombine.high %v9608_v6, %v9608_v6  ;;  %v7572_v55 = vpop.eup %7571  ;;  %7589 = vpow2.f32 %v5302_v37  ;;  %v5129_v61 = vcombine.high %v5127_v44, %v5127_v44  ;;  %v5136_v52 = vrot.slane %v9608_v6, %v8316_v17 }
 0xfb6   : > { %v5143_v19 = vrot.slane %v5127_v44, %v8316_v17  ;;  %v7574_v24 = vpop.eup %7573  ;;  %7591 = vpow2.f32 %v5304_v38  ;;  %v5744_v42 = vadd.f32 %v5742_v7, %v5710_v25  ;;  %v5745_v15 = vadd.f32 %v5743_v14, %v5711_v33 }
 0xfb7   : > { %v5150_v29 = vrot.slane %v5128_v46, %v8316_v17  ;;  %v7576_v32 = vpop.eup %7575  ;;  %v9745_v34 = vrot.slane %v5129_v61, %v8316_v17  ;;  %v5158_v37 = vcombine.high %v5136_v52, %v5136_v52  ;;  %v5197_v43 = vrot.slane %v5136_v52, %v7919_v21 }
 0xfb8   : > { %v7578_v44 = vpop.eup %7577  ;;  %v5748_v39 = vmul.f32 %v7566_v18, %v5744_v42  ;;  %v5749_v26 = vmul.f32 %v7568_v2, %v5745_v15  ;;  %v6008_v30 = vmul.f32 %v9512_v56, %v5744_v42  ;;  %v6009_v38 = vmul.f32 %v9514_v51, %v5745_v15 }
 0xfb9   : > { %10362 = vst [vmem:[#allocation28_spill] sm:$0xff] %v9745_v34  ;;  %v7580_v41 = vpop.eup %7579  ;;  %v5159_v25 = vcombine.high %v5143_v19, %v5143_v19  ;;  %v5160_v62 = vcombine.high %v5150_v29, %v5150_v29  ;;  %v5201_v11 = vrot.slane %v5150_v29, %v7919_v21  ;;  %v5205_v18 = vrot.slane %v5158_v37, %v7919_v21 }
 0xfba   : > { %v9755_v7 = vpop.eup %7581  ;;  %v5750_v14 = vadd.f32 %v5748_v39, %v5712_v31  ;;  %v5751_v46 = vadd.f32 %v5749_v26, %v5713_v0  ;;  %v6040_v61 = vadd.f32 %v6009_v38, %v6008_v30  ;;  %v9764_v51 = vrot.slane %v5143_v19, %v7919_v21  ;;  %v9773_v31 = vpop.permute.xlu0 %5516 }
 0xfbb   : > { %v9758_v2 = vpop.eup %7583  ;;  %v9761_v56 = vrot.slane %v5160_v62, %v7919_v21  ;;  %v9768_v52 = vrot.slane %v9745_v34, %v7919_v21  ;;  %v5258_v42 = vmul.f32 %v9595_v22, %v5197_v43  ;;  %10363 = vst [vmem:[#allocation15_spill] sm:$0xff] %v9773_v31  ;;  %v9775_v0 = vpop.permute.xlu1 %5512  ;;  %v9782_v38 = vrot.slane %v5159_v25, %v7919_v21 }
 0xfbc   : > { %v9771_v15 = vpop.eup %7585  ;;  %10364 = vst [vmem:[#allocation31_spill] sm:$0xff] %v9775_v0  ;;  %v5754_v29 = vmul.f32 %v7570_v48, %v5750_v14  ;;  %v5755_v37 = vmul.f32 %v7572_v55, %v5751_v46  ;;  %v6010_v39 = vmul.f32 %v9516_v1, %v5750_v14  ;;  %v6011_v26 = vmul.f32 %v9518_v49, %v5751_v46 }
 0xfbd   : > { %v9779_v19 = vpop.eup %7587  ;;  %v6041_v30 = vrot.slane %v6040_v61, 4  ;;  %v5259_v62 = vmul.f32 %v9617_v28, %v5197_v43  ;;  %v5260_v33 = vmul.f32 %v9595_v22, %v5201_v11  ;;  %v5261_v55 = vmul.f32 %v9617_v28, %v5201_v11 }
 0xfbe   : > { %v5756_v6 = vadd.f32 %v5754_v29, %v9705_v12  ;;  %v5757_v13 = vadd.f32 %v5755_v37, %v9708_v16  ;;  %v6047_v48 = vadd.f32 %v6011_v26, %v6010_v39  ;;  %v5262_v14 = vmul.f32 %v9595_v22, %v5205_v18  ;;  %v9797_v39 = vpop.permute.xlu0 %5950 }
 0xfbf   : > { %v9789_v1 = vpop.eup %7589  ;;  %v6042_v49 = vadd.f32 %v6041_v30, %v6040_v61  ;;  %v5306_v46 = vmul.f32 1.442695, %v5258_v42  ;;  %v5308_v0 = vmul.f32 1.442695, %v5259_v62  ;;  %v5263_v37 = vmul.f32 %v9617_v28, %v5205_v18  ;;  %v9799_v61 = vpop.permute.xlu1 %5946 }
 0xfc0   : > { %v9792_v25 = vpop.eup %7591  ;;  %v5760_v31 = vmul.f32 %v7574_v24, %v5756_v6  ;;  %v5761_v43 = vmul.f32 %v7576_v32, %v5757_v13  ;;  %v6012_v34 = vmul.f32 %v9523_v23, %v5756_v6  ;;  %v6013_v12 = vmul.f32 %v9525_v57, %v5757_v13 }
 0xfc1   : > { %v6043_v29 = vrot.slane %v6042_v49, 2  ;;  %v6048_v16 = vrot.slane %v6047_v48, 4  ;;  %v5310_v11 = vmul.f32 1.442695, %v5260_v33  ;;  %7593 = vpow2.f32 %v5306_v46 }
 0xfc2   : > { %v5762_v42 = vadd.f32 %v5760_v31, %v9711_v36  ;;  %v5763_v26 = vadd.f32 %v5761_v43, %v9714_v20  ;;  %v6054_v30 = vadd.f32 %v6013_v12, %v6012_v34  ;;  %7595 = vpow2.f32 %v5308_v0 }
 0xfc3   : > { %v6044_v24 = vadd.f32 %v6043_v29, %v6042_v49  ;;  %v6049_v32 = vadd.f32 %v6048_v16, %v6047_v48  ;;  %v5312_v23 = vmul.f32 1.442695, %v5261_v55  ;;  %7597 = vpow2.f32 %v5310_v11 }
 0xfc4   : > { %v5766_v13 = vmul.f32 %v7578_v44, %v5762_v42  ;;  %v5767_v57 = vmul.f32 %v7580_v41, %v5763_v26  ;;  %v6014_v6 = vmul.f32 %v9530_v35, %v5762_v42  ;;  %v6015_v33 = vmul.f32 %v9532_v9, %v5763_v26  ;;  %v9809_v41 = vpop.permute.xlu0 %5958  ;;  %v9811_v35 = vpop.permute.xlu1 %5954 }
 0xfc5   : > { %v6045_v18 = vrot.slane %v6044_v24, 1  ;;  %v6050_v62 = vrot.slane %v6049_v32, 2  ;;  %v6055_v10 = vrot.slane %v6054_v30, 4  ;;  %v5314_v31 = vmul.f32 1.442695, %v5262_v14  ;;  %v10378_v14 = vld [vmem:[#allocation14_spill] sm:$0xff] }
 0xfc6   : > { %v5768_v36 = vadd.f32 %v5766_v13, %v9717_v3  ;;  %v5769_v20 = vadd.f32 %v5767_v57, %v9720_v47  ;;  %v6061_v34 = vadd.f32 %v6015_v33, %v6014_v6  ;;  %7599 = vpow2.f32 %v5312_v23 }
 0xfc7   : > { %v9807_v49 = vadd.f32 %v6050_v62, %v6049_v32  ;;  %v6056_v0 = vadd.f32 %v6055_v10, %v6054_v30  ;;  %v5316_v44 = vmul.f32 1.442695, %v5263_v37  ;;  %v9817_v47 = vadd.f32 %v6045_v18, %v6044_v24  ;;  %v10367_v37 = vld [vmem:[#allocation30_spill] sm:$0xff] }
 0xfc8   : > { %v5772_v9 = vmul.f32 %v9755_v7, %v5768_v36  ;;  %v5773_v48 = vmul.f32 %v9758_v2, %v5769_v20  ;;  %v6016_v55 = vmul.f32 %v9535_v45, %v5768_v36  ;;  %v6017_v3 = vmul.f32 %v9537_v50, %v5769_v20  ;;  %v9843_v6 = vpop.permute.xlu1 %5962  ;;  %v10369_v18 = vld [vmem:[#allocation34_spill] sm:$0xff] }
 0xfc9   : > { %10365 = vst [vmem:[#allocation27_spill] sm:$0xff] %v9817_v47  ;;  %v6057_v46 = vrot.slane %v6056_v0, 2  ;;  %v6062_v10 = vrot.slane %v6061_v34, 4  ;;  %7601 = vpow2.f32 %v5314_v31  ;;  %v5588_v45 = vrot.slane %v9585_v59, %v8316_v17 }
 0xfca   : > { %v5774_v43 = vadd.f32 %v5772_v9, %v9723_v60  ;;  %v5775_v12 = vadd.f32 %v5773_v48, %v9726_v27  ;;  %v6068_v29 = vadd.f32 %v6017_v3, %v6016_v55  ;;  %7603 = vpow2.f32 %v5316_v44  ;;  %v10368_v60 = vld [vmem:[#allocation36_spill] sm:$0xff] }
 0xfcb   : > { %v9822_v16 = vadd.f32 %v6057_v46, %v6056_v0  ;;  %v10366_v50 = vcombine.high %v9585_v59, %v9585_v59  ;;  %v9830_v2 = vpop.eup %7593  ;;  %v5265_v26 = vmul.f32 %v9617_v28, %v9761_v56  ;;  %v9836_v24 = vadd.f32 %v6062_v10, %v6061_v34  ;;  %v9841_v59 = vpop.permute.xlu0 %5966 }
 0xfcc   : > { %v6018_v11 = vmul.f32 %v10367_v37, %v5774_v43  ;;  %v6019_v42 = vmul.f32 %v10368_v60, %v5775_v12  ;;  %v6069_v27 = vrot.slane %v6068_v29, 4  ;;  %v7596_v30 = vpop.eup %7595  ;;  %v5604_v32 = vrot.slane %v5588_v45, %v8316_v17 }
 0xfcd   : > { %v5595_v7 = vrot.slane %v10366_v50, %v8316_v17  ;;  %v5596_v13 = vcombine.high %v5588_v45, %v5588_v45  ;;  %v5320_v33 = vmul.f32 1.442695, %v5265_v26  ;;  %v5725_v62 = vmul.f32 %v9694_v53, %v10369_v18  ;;  %v9848_v20 = vpop.eup %7597  ;;  %v10370_v45 = vld [vmem:[#allocation19_spill] sm:$0xff] }
 0xfce   : > { %v9839_v57 = vadd.f32 %v6069_v27, %v6068_v29  ;;  %v5779_v36 = vmul.f32 %v9779_v19, %v5775_v12  ;;  %v5665_v34 = vrot.slane %v5604_v32, %v7919_v21  ;;  %v5626_v44 = vcombine.high %v5604_v32, %v5604_v32  ;;  %v10373_v26 = vld [vmem:[#allocation43_spill] sm:$0xff] }
 0xfcf   : > { %v5597_v23 = vcombine.high %v5595_v7, %v5595_v7  ;;  %v5618_v0 = vrot.slane %v5596_v13, %v8316_v17  ;;  %v9853_v9 = vadd.f32 %v6019_v42, %v6018_v11  ;;  %7605 = vpow2.f32 %v5320_v33  ;;  %v10371_v11 = vld [vmem:[#allocation33_spill] sm:$0xff]  ;;  %v5529_v13 = vpop.permute.xlu0 %5528  ;;  %v5525_v33 = vpop.permute.xlu1 %5524 }
 0xfd0   : > { %v5781_v48 = vadd.f32 %v5779_v36, %v9732_v58  ;;  %v5264_v55 = vmul.f32 %v9595_v22, %v9761_v56  ;;  %v7600_v3 = vpop.eup %7599  ;;  %v5673_v12 = vrot.slane %v5626_v44, %v7919_v21  ;;  %v5724_v60 = vmul.f32 %v9694_v53, %v10371_v11  ;;  %v10372_v42 = vld [vmem:[#allocation29_spill] sm:$0xff] }
 0xfd1   : > { %v5625_v31 = vrot.slane %v5597_v23, %v8316_v17  ;;  %v5628_v19 = vcombine.high %v5618_v0, %v5618_v0  ;;  %v5669_v10 = vrot.slane %v5618_v0, %v7919_v21  ;;  %v5727_v27 = vmul.f32 %v5665_v34, %v10372_v42  ;;  %v10375_v0 = vld [vmem:[#allocation38_spill] sm:$0xff]  ;;  %v10377_v42 = vld [vmem:[#allocation41_spill] sm:$0xff] }
 0xfd2   : > { %v5785_v29 = vmul.f32 %v9792_v25, %v5781_v48  ;;  %v9862_v50 = vmul.f32 %v10370_v45, %v5781_v48  ;;  %v5318_v37 = vmul.f32 1.442695, %v5264_v55  ;;  %v10374_v25 = vld [vmem:[#allocation46_spill] sm:$0xff]  ;;  %v5726_v44 = vmul.f32 %v5665_v34, %v10375_v0 }
 0xfd3   : > { %v5629_v46 = vcombine.high %v5625_v31, %v5625_v31  ;;  %v5677_v56 = vrot.slane %v5628_v19, %v7919_v21  ;;  %v5729_v32 = vmul.f32 %v5669_v10, %v10373_v26  ;;  %v9870_v23 = vpop.eup %7601  ;;  %v5731_v18 = vmul.f32 %v5673_v12, %v10374_v25  ;;  %v10376_v19 = vld [vmem:[#allocation44_spill] sm:$0xff] }
 0xfd4   : > { %v5787_v36 = vadd.f32 %v5785_v29, %v5725_v62  ;;  %7607 = vpow2.f32 %v5318_v37  ;;  %v7604_v48 = vpop.eup %7603  ;;  %v5728_v45 = vmul.f32 %v5669_v10, %v10376_v19  ;;  %v9882_v47 = vmul.f32 %v5673_v12, %v10378_v14 }
 0xfd5   : > { %v5693_v58 = vrot.slane %v5629_v46, %v7919_v21  ;;  %v5733_v46 = vmul.f32 %v5677_v56, %v9667_v63  ;;  %v5778_v62 = vmul.f32 %v9771_v15, %v5774_v43  ;;  %v5267_v34 = vmul.f32 %v9617_v28, %v9764_v51 }
 0xfd6   : > { %v5791_v11 = vmul.f32 %v7596_v30, %v5787_v36  ;;  %v6023_v26 = vmul.f32 %v10377_v42, %v5787_v36  ;;  %v5611_v29 = vrot.slane %v5595_v7, %v8316_v17  ;;  %v5266_v37 = vmul.f32 %v9595_v22, %v9764_v51  ;;  %v10380_v42 = vld [vmem:[#allocation39_spill] sm:$0xff] }
 0xfd7   : > { %v9874_v53 = vmul.f32 %v5693_v58, %v5529_v13  ;;  %v9876_v55 = vmul.f32 %v5693_v58, %v5525_v33  ;;  %v5269_v63 = vmul.f32 %v9617_v28, %v9768_v52  ;;  %v5780_v30 = vadd.f32 %v5778_v62, %v9729_v40  ;;  %v10381_v62 = vld [vmem:[#allocation32_spill] sm:$0xff] }
 0xfd8   : > { %v5793_v10 = vadd.f32 %v5791_v11, %v5727_v27  ;;  %v5685_v58 = vrot.slane %v5625_v31, %v7919_v21  ;;  %v5268_v14 = vmul.f32 %v9595_v22, %v9768_v52  ;;  %v5324_v15 = vmul.f32 1.442695, %v5267_v34  ;;  %v10379_v27 = vld [vmem:[#allocation18_spill] sm:$0xff] }
 0xfd9   : > { %v5681_v43 = vrot.slane %v5611_v29, %v7919_v21  ;;  %v5322_v12 = vmul.f32 1.442695, %v5266_v37  ;;  %v5328_v13 = vmul.f32 1.442695, %v5269_v63  ;;  %v7606_v17 = vpop.eup %7605  ;;  %v9898_v51 = vmul.f32 %v5677_v56, %v9669_v8 }
 0xfda   : > { %v5797_v7 = vmul.f32 %v7600_v3, %v5793_v10  ;;  %v5784_v33 = vmul.f32 %v9789_v1, %v5780_v30  ;;  %v9902_v25 = vmul.f32 %v10379_v27, %v5780_v30  ;;  %v6025_v40 = vmul.f32 %v9797_v39, %v5793_v10  ;;  %v5975_v39 = vpop.permute.xlu0 %5974 }
 0xfdb   : > { %7609 = vpow2.f32 %v5324_v15  ;;  %v5735_v52 = vmul.f32 %v5681_v43, %v9697_v54  ;;  %v9907_v31 = vmul.f32 %v5681_v43, %v9699_v5  ;;  %v5326_v3 = vmul.f32 1.442695, %v5268_v14 }
 0xfdc   : > { %v5799_v36 = vadd.f32 %v5797_v7, %v5729_v32  ;;  %v5786_v0 = vadd.f32 %v5784_v33, %v5724_v60  ;;  %7611 = vpow2.f32 %v5322_v12  ;;  %v9910_v8 = vmul.f32 %v5685_v58, %v9739_v4 }
 0xfdd   : > { %7613 = vpow2.f32 %v5328_v13  ;;  %v5271_v1 = vmul.f32 %v9617_v28, %v9782_v38  ;;  %v5627_v56 = vcombine.high %v5611_v29, %v5611_v29  ;;  %v9917_v32 = vmul.f32 %v5685_v58, %v10381_v62  ;;  %v10384_v58 = vld [vmem:[#allocation15_spill] sm:$0xff] }
 0xfde   : > { %v7608_v19 = vpop.eup %7607  ;;  %v5803_v11 = vmul.f32 %v7604_v48, %v5799_v36  ;;  %v5790_v54 = vmul.f32 %v9830_v2, %v5786_v0  ;;  %v6022_v5 = vmul.f32 %v10380_v42, %v5786_v0  ;;  %7615 = vpow2.f32 %v5326_v3  ;;  %v10382_v48 = vld [vmem:[#allocation28_spill] sm:$0xff]  ;;  %v5983_v27 = vpop.permute.xlu0 %5982 }
 0xfdf   : > { %v5332_v60 = vmul.f32 1.442695, %v5271_v1  ;;  %v5689_v34 = vrot.slane %v5627_v56, %v7919_v21  ;;  %v5270_v4 = vmul.f32 %v9595_v22, %v9782_v38  ;;  %v10383_v2 = vcombine.high %v10382_v48, %v10382_v48  ;;  %v5971_v1 = vpop.permute.xlu1 %5970 }
 0xfe0   : > { %v5805_v37 = vadd.f32 %v5803_v11, %v5731_v18  ;;  %v5792_v63 = vadd.f32 %v5790_v54, %v5726_v44  ;;  %v9922_v29 = vadd.f32 %v6023_v26, %v6022_v5  ;;  %v6027_v30 = vmul.f32 %v9809_v41, %v5799_v36  ;;  %v10385_v18 = vld [vmem:[#allocation31_spill] sm:$0xff] }
 0xfe1   : > { %v5225_v10 = vrot.slane %v10383_v2, %v7919_v21  ;;  %7617 = vpow2.f32 %v5332_v60  ;;  %v9930_v14 = vmul.f32 %v5689_v34, %v10384_v58  ;;  %v5330_v15 = vmul.f32 1.442695, %v5270_v4 }
 0xfe2   : > { %v5809_v43 = vmul.f32 %v7606_v17, %v5805_v37  ;;  %v5796_v12 = vmul.f32 %v9848_v20, %v5792_v63  ;;  %v6024_v38 = vmul.f32 %v9799_v61, %v5792_v63  ;;  %v9935_v44 = vmul.f32 %v5689_v34, %v10385_v18 }
 0xfe3   : > { %v6029_v26 = vmul.f32 %v9841_v59, %v5805_v37  ;;  %7619 = vpow2.f32 %v5330_v15  ;;  %v5273_v21 = vmul.f32 %v9617_v28, %v5225_v10  ;;  %v5272_v41 = vmul.f32 %v9595_v22, %v5225_v10 }
 0xfe4   : > { %v5811_v13 = vadd.f32 %v5809_v43, %v5733_v46  ;;  %v5798_v7 = vadd.f32 %v5796_v12, %v5728_v45  ;;  %v6096_v33 = vadd.f32 %v6025_v40, %v6024_v38  ;;  %v6059_v17 = vrot.slane %v9822_v16, 1  ;;  %v5979_v12 = vpop.permute.xlu1 %5978 }
 0xfe5   : > { %v7610_v36 = vpop.eup %7609  ;;  %v5336_v20 = vmul.f32 1.442695, %v5273_v21  ;;  %v10386_v61 = vrot.slane %v9807_v49, 1  ;;  %v6064_v59 = vrot.slane %v9836_v24, 2  ;;  %v6071_v3 = vrot.slane %v9839_v57, 2 }
 0xfe6   : > { %v7612_v28 = vpop.eup %7611  ;;  %v5802_v22 = vmul.f32 %v9870_v23, %v5798_v7  ;;  %v6026_v46 = vmul.f32 %v9811_v35, %v5798_v7  ;;  %v6097_v45 = vrot.slane %v6096_v33, 4  ;;  %v5334_v40 = vmul.f32 1.442695, %v5272_v41 }
 0xfe7   : > { %v9944_v0 = vadd.f32 %v10386_v61, %v9807_v49  ;;  %v7614_v56 = vpop.eup %7613  ;;  %v6031_v11 = vmul.f32 %v5975_v39, %v5811_v13  ;;  %v5815_v54 = vmul.f32 %v7610_v36, %v5811_v13  ;;  %7621 = vpow2.f32 %v5336_v20 }
 0xfe8   : > { %v6065_v42 = vadd.f32 %v6064_v59, %v9836_v24  ;;  %v5804_v49 = vadd.f32 %v5802_v22, %v9882_v47  ;;  %v6098_v5 = vadd.f32 %v6097_v45, %v6096_v33  ;;  %v6103_v62 = vadd.f32 %v6027_v30, %v6026_v46  ;;  %v7616_v34 = vpop.eup %7615  ;;  %v5991_v24 = vpop.permute.xlu0 %5990 }
 0xfe9   : > { %v9953_v60 = vadd.f32 %v6059_v17, %v9822_v16  ;;  %v5817_v4 = vadd.f32 %v5815_v54, %v5735_v52  ;;  %v6072_v35 = vadd.f32 %v6071_v3, %v9839_v57  ;;  %v6076_v37 = vrot.slane %v9853_v9, 4 }
 0xfea   : > { %v6066_v23 = vrot.slane %v6065_v42, 1  ;;  %v5808_v63 = vmul.f32 %v7608_v19, %v5804_v49  ;;  %v6028_v39 = vmul.f32 %v9843_v6, %v5804_v49  ;;  %v6099_v48 = vrot.slane %v6098_v5, 2 }
 0xfeb   : > { %v6104_v2 = vrot.slane %v6103_v62, 4  ;;  %v7618_v10 = vpop.eup %7617  ;;  %v6033_v47 = vmul.f32 %v5983_v27, %v5817_v4  ;;  %v5821_v58 = vmul.f32 %v7614_v56, %v5817_v4  ;;  %7623 = vpow2.f32 %v5334_v40 }
 0xfec   : > { %v6073_v30 = vrot.slane %v6072_v35, 1  ;;  %v5810_v16 = vadd.f32 %v5808_v63, %v9898_v51  ;;  %v6100_v15 = vadd.f32 %v6099_v48, %v6098_v5  ;;  %v6110_v43 = vadd.f32 %v6029_v26, %v6028_v39  ;;  %v5999_v61 = vpop.permute.xlu0 %5998 }
 0xfed   : > { %v6105_v52 = vadd.f32 %v6104_v2, %v6103_v62  ;;  %v7620_v57 = vpop.eup %7619  ;;  %v5823_v38 = vadd.f32 %v5821_v58, %v9910_v8  ;;  %v9960_v19 = vadd.f32 %v6066_v23, %v6065_v42  ;;  %v6077_v6 = vadd.f32 %v6076_v37, %v9853_v9 }
 0xfee   : > { %v6082_v18 = vadd.f32 %v9862_v50, %v9902_v25  ;;  %v6030_v21 = vmul.f32 %v5971_v1, %v5810_v16  ;;  %v6101_v41 = vrot.slane %v6100_v15, 1  ;;  %v6111_v7 = vrot.slane %v6110_v43, 4 }
 0xfef   : > { %v6106_v13 = vrot.slane %v6105_v52, 2  ;;  %v5814_v33 = vmul.f32 %v7612_v28, %v5810_v16  ;;  %v5827_v51 = vmul.f32 %v7618_v10, %v5823_v38  ;;  %v9965_v27 = vadd.f32 %v6073_v30, %v6072_v35  ;;  %v5987_v28 = vpop.permute.xlu1 %5986 }
 0xff0   : > { %v6078_v26 = vrot.slane %v6077_v6, 2  ;;  %v6112_v36 = vadd.f32 %v6111_v7, %v6110_v43  ;;  %v6117_v20 = vadd.f32 %v6031_v11, %v6030_v21  ;;  %v6035_v8 = vmul.f32 %v5991_v24, %v5823_v38  ;;  %v6007_v48 = vpop.permute.xlu0 %6006 }
 0xff1   : > { %v6107_v17 = vadd.f32 %v6106_v13, %v6105_v52  ;;  %v7622_v59 = vpop.eup %7621  ;;  %v6102_v3 = vadd.f32 %v6101_v41, %v6100_v15  ;;  %v5816_v9 = vadd.f32 %v5814_v33, %v9907_v31  ;;  %v5829_v50 = vadd.f32 %v5827_v51, %v9930_v14 }
 0xff2   : > { %v6083_v25 = vrot.slane %v6082_v18, 4  ;;  %v6113_v22 = vrot.slane %v6112_v36, 2  ;;  %v6118_v46 = vrot.slane %v6117_v20, 4  ;;  %v6079_v45 = vadd.f32 %v6078_v26, %v6077_v6 }
 0xff3   : > { %v6108_v1 = vrot.slane %v6107_v17, 1  ;;  %v6032_v40 = vmul.f32 %v5979_v12, %v5816_v9  ;;  %v5820_v56 = vmul.f32 %v7616_v34, %v5816_v9  ;;  %v5833_v54 = vmul.f32 %v7622_v59, %v5829_v50  ;;  %v5995_v15 = vpop.permute.xlu1 %5994  ;;  %v10387_v12 = vld [vmem:[#allocation27_spill] sm:$0xff] }
 0xff4   : > { %v6090_v42 = vrot.slane %v9922_v29, 4  ;;  %v6114_v49 = vadd.f32 %v6113_v22, %v6112_v36  ;;  %v6119_v5 = vadd.f32 %v6118_v46, %v6117_v20  ;;  %v6037_v62 = vmul.f32 %v5999_v61, %v5829_v50 }
 0xff5   : > { %v6109_v11 = vadd.f32 %v6108_v1, %v6107_v17  ;;  %v7624_v4 = vpop.eup %7623  ;;  %v6124_v23 = vadd.f32 %v6033_v47, %v6032_v40  ;;  %v5822_v31 = vadd.f32 %v5820_v56, %v9917_v32  ;;  %v5835_v14 = vadd.f32 %v5833_v54, %v9874_v53 }
 0xff6   : > { %v6084_v35 = vadd.f32 %v6083_v25, %v6082_v18  ;;  %v6115_v37 = vrot.slane %v6114_v49, 1  ;;  %v6120_v63 = vrot.slane %v6119_v5, 2  ;;  %v6080_v34 = vrot.slane %v6079_v45, 1 }
 0xff7   : > { %v6175_v39 = vsel %vm2842_vm7, %v6109_v11, %v6102_v3  ;;  %v6125_v2 = vrot.slane %v6124_v23, 4  ;;  %v6034_v24 = vmul.f32 %v5987_v28, %v5822_v31  ;;  %v5826_v10 = vmul.f32 %v7620_v57, %v5822_v31  ;;  %v6003_v61 = vpop.permute.xlu1 %6002 }
 0xff8   : > { %v6039_v58 = vmul.f32 %v6007_v48, %v5835_v14  ;;  %v6116_v30 = vadd.f32 %v6115_v37, %v6114_v49  ;;  %v6121_v16 = vadd.f32 %v6120_v63, %v6119_v5  ;;  %v6085_v52 = vrot.slane %v6084_v35, 2  ;;  %v10390_v63 = vld [vmem:[#allocation37_spill] sm:$0xff] }
 0xff9   : > { %v6091_v47 = vadd.f32 %v6090_v42, %v9922_v29  ;;  %v6126_v32 = vadd.f32 %v6125_v2, %v6124_v23  ;;  %v6131_v43 = vadd.f32 %v6035_v8, %v6034_v24  ;;  %v5828_v53 = vadd.f32 %v5826_v10, %v9935_v44  ;;  %v10388_v42 = vld [vmem:[#allocation42_spill] sm:$0xff] }
 0xffa   : > { %v6168_v38 = vsel %vm2842_vm7, %v9944_v0, %v10387_v12  ;;  %v6122_v6 = vrot.slane %v6121_v16, 1  ;;  %v6176_v18 = vsel %vm2844_vm8, %v6116_v30, %v6175_v39  ;;  %v6086_v21 = vadd.f32 %v6085_v52, %v6084_v35  ;;  %v10391_v39 = vld [vmem:[#allocation45_spill] sm:$0xff] }
 0xffb   : > { %v6092_v57 = vrot.slane %v6091_v47, 2  ;;  %v6127_v41 = vrot.slane %v6126_v32, 2  ;;  %v6132_v13 = vrot.slane %v6131_v43, 4  ;;  %v6036_v7 = vmul.f32 %v5995_v15, %v5828_v53 }
 0xffc   : > { %v5832_v33 = vmul.f32 %v7624_v4, %v5828_v53  ;;  %v6123_v51 = vadd.f32 %v6122_v6, %v6121_v16  ;;  %v6087_v26 = vrot.slane %v6086_v21, 1  ;;  %v6169_v17 = vsel %vm2844_vm8, %v9953_v60, %v6168_v38  ;;  %v10389_v4 = vld [vmem:[#allocation26_spill] sm:$0xff]  ;;  %v10393_v38 = vld [vmem:[#allocation35_spill] sm:$0xff] }
 0xffd   : > { %v6093_v29 = vadd.f32 %v6092_v57, %v6091_v47  ;;  %v6128_v44 = vadd.f32 %v6127_v41, %v6126_v32  ;;  %v6133_v36 = vadd.f32 %v6132_v13, %v6131_v43  ;;  %v6138_v20 = vadd.f32 %v6037_v62, %v6036_v7  ;;  %v10392_v43 = vld [vmem:[#allocation40_spill] sm:$0xff]  ;;  %v7340_v7 = vld [vmem:[%s10133_s18 + $0x8] sm:$0xff]  }
 0xffe   : > { %v5834_v0 = vadd.f32 %v5832_v33, %v9876_v55  ;;  %v6177_v8 = vsel %vm2846_vm9, %v6123_v51, %v6176_v18  ;;  %v6081_v59 = vadd.f32 %v6080_v34, %v6079_v45  ;;  %v6170_v9 = vsel %vm2846_vm9, %v9960_v19, %v6169_v17  ;;  %v6816_v45 = vld [vmem:[%s10131_s16 + $0x2] ss:$0 sm:$0xff]  ;;  %v7341_v33 = vld [vmem:[%s10133_s18 + $0x10] sm:$0xff]   ;;  %v7342_v51 = vld [vmem:[%s10133_s18 + $0x18] sm:$0xff]  }
 0xfff   : > { %v6094_v3 = vrot.slane %v6093_v29, 1  ;;  %v6129_v50 = vrot.slane %v6128_v44, 1  ;;  %v6134_v25 = vrot.slane %v6133_v36, 2  ;;  %v6139_v1 = vrot.slane %v6138_v20, 4  ;;  %v7339_v13 = vld [vmem:[%s10133_s18] sm:$0xff]   ;;  %v7345_v17 = vld [vmem:[%s10133_s18 + $0x30] sm:$0xff]  }
0x1000   : > { %v6038_v22 = vmul.f32 %v6003_v61, %v5834_v0  ;;  %v6088_v46 = vadd.f32 %v6087_v26, %v6086_v21  ;;  %v6171_v60 = vsel %vm2848_vm10, %v9965_v27, %v6170_v9  ;;  %7625 = vrcp.f32 %v10388_v42  ;;  %7125 = vmatpush3.bf16.msra.mxu0 %v7339_v13  ;;  %v7343_v26 = vld [vmem:[%s10133_s18 + $0x20] sm:$0xff]   ;;  %v7349_v42 = vld [vmem:[%s10135_s20 + $0x10] sm:$0xff]  }
0x1001   : > { %v6095_v28 = vadd.f32 %v6094_v3, %v6093_v29  ;;  %v6130_v40 = vadd.f32 %v6129_v50, %v6128_v44  ;;  %v6135_v56 = vadd.f32 %v6134_v25, %v6133_v36  ;;  %v6140_v55 = vadd.f32 %v6139_v1, %v6138_v20  ;;  %v7344_v29 = vld [vmem:[%s10133_s18 + $0x28] sm:$0xff]   ;;  %v7346_v44 = vld [vmem:[%s10133_s18 + $0x38] sm:$0xff]  }
0x1002   : > { %v6145_v54 = vadd.f32 %v6039_v58, %v6038_v22  ;;  %v6172_v19 = vsel %vm2850_vm11, %v6081_v59, %v6171_v60  ;;  %v5878_v23 = vmul.f32 %v6816_v45, %v10389_v4  ;;  %v6198_v48 = vmul.f32 %v10391_v39, %v10390_v63  ;;  %v6636_v59 = vld [vmem:[%s10395_s25] ss:$0 sm:$0xff]  ;;  %v10397_v50 = vld [vmem:[#allocation21_spill] sm:$0xff]  ;;  %s674_s25 = sand.u32 1, %s7681_s28  }
0x1003   : > { %v6178_v11 = vsel %vm2848_vm10, %v6130_v40, %v6177_v8  ;;  %v6136_v49 = vrot.slane %v6135_v56, 1  ;;  %v6141_v5 = vrot.slane %v6140_v55, 2  ;;  %v6173_v27 = vsel %vm2852_vm12, %v6088_v46, %v6172_v19  ;;  %v10396_v3 = vld [vmem:[#allocation20_spill] sm:$0xff]  ;;  %s675_s27 = scalar_lea.vmem [#allocation5], %s674_s25  ;;  %s6524_s23 = scalar_lea.sflag [#allocation6], %s674_s25 }
0x1004   : > { %v6146_v62 = vrot.slane %v6145_v54, 4  ;;  %v6174_v37 = vsel %vm2854_vm13, %v6095_v28, %v6173_v27  ;;  %v5879_v53 = vmul.f32 %v6816_v45, %v10392_v43  ;;  %v10394_v41 = vmov 0.0   ;;  %v7348_v45 = vld [vmem:[%s10135_s20 + $0x8] sm:$0xff]   ;;  %v7350_v19 = vld [vmem:[%s10135_s20 + $0x18] sm:$0xff]   ;;  %s6536_s26 = sshll.u32 %s675_s27, 4  ;;  %s10075_s26 = int_to_ptr.vmem [resolvable:$true] %s6536_s26 }
0x1005   : > { %v6137_v31 = vadd.f32 %v6136_v49, %v6135_v56  ;;  %v6142_v14 = vadd.f32 %v6141_v5, %v6140_v55  ;;  %v6184_v34 = vadd.f32 %v6174_v37, %v5878_v23  ;;  %7126 = vmatprep.subr.bf16.mxu0 %v10394_v41  ;;  %v1308_v9 = vadd.f32 %v6636_v59, %v10396_v3  ;;  %s7627_s4 = scalar_lea.vmem %s10075_s26, 16 }
0x1006   : > { %v6147_v35 = vadd.f32 %v6146_v62, %v6145_v54  ;;  %7127 = vmatpush3.bf16.msra.mxu0 %v7340_v7  ;;  %v1311_v25 = vadd.f32 %v6636_v59, %v10397_v50  ;;  %v7347_v54 = vld [vmem:[%s10135_s20] sm:$0xff]   ;;  %p7628_p11 = scmp.ne.s32.totalorder %s10075_s26, %s7627_s4 }
0x1007   : > { %v6179_v2 = vsel %vm2850_vm11, %v6137_v31, %v6178_v11  ;;  %v6143_v24 = vrot.slane %v6142_v14, 1  ;;  %v6200_v58 = vmul.f32 %v6198_v48, %v6184_v34  ;;  %7128 = vmatprep.subr.bf16.mxu0 %v10394_v41  ;;  %v1314_v22 = vmax.f32 %v1308_v9, 0.0  ;;  %v6841_v11 = vld [vmem:[%s10134_s19] ss:$0 sm:$0xff] }
0x1008   : > { %v6148_v10 = vrot.slane %v6147_v35, 2  ;;  %v1315_v46 = vmax.f32 %v1311_v25, 0.0  ;;  %p7629_p12 = pnand %p7628_p11, %p7851_p5 }
0x1009   : > { %v6144_v30 = vadd.f32 %v6143_v24, %v6142_v14 }
0x100a   : > { %v6149_v16 = vadd.f32 %v6148_v10, %v6147_v35  ;;  %v7626_v47 = vpop.eup %7625  ;;  %7129 = vmatpush3.bf16.msra.mxu0 %v7341_v33  ;;  %p7630_p13 = pneg %p7629_p12 }
0x100b   : > { %v6180_v15 = vsel %vm2852_vm12, %v6144_v30, %v6179_v2  ;;  %v6199_v6 = vmul.f32 %v7626_v47, %v10393_v38  ;;  %7130 = vmatprep.subr.bf16.mxu0 %v10394_v41 }
0x100c   : > { %v6150_v52 = vrot.slane %v6149_v16, 1 }
0x100e   : > { %v6151_v32 = vadd.f32 %v6150_v52, %v6149_v16  ;;  %7131 = vmatpush3.bf16.msra.mxu0 %v7342_v51  ;;  %v6454_v16 = vld [vmem:[%s10136_s21] sm:$0x1] }
0x100f   : > { %7132 = vmatprep.subr.bf16.mxu0 %v10394_v41 }
0x1010   : > { %v6181_v12 = vsel %vm2854_vm13, %v6151_v32, %v6180_v15 }
0x1011   : > { %v6185_v18 = vadd.f32 %v6181_v12, %v5879_v53 }
0x1012   : > { %7133 = vmatpush3.bf16.msra.mxu0 %v7343_v26 }
0x1013   : > { %v6201_v21 = vmul.f32 %v6199_v6, %v6185_v18  ;;  %7134 = vmatprep.subr.bf16.mxu0 %v10394_v41 }
0x1015   : > { %v6202_v57 = vpack.c.bf16 %v6201_v21, %v6200_v58 }
0x1016   : > { %7135 = vmatpush3.bf16.msra.mxu0 %v7344_v29 }
0x1017   : > { %7121 = vmatmul.mubr.bf16.vlgmr.msra.gmra.mrb[28].mxu1 %v6202_v57  ;;  %7136 = vmatprep.subr.bf16.mxu0 %v10394_v41 }
0x1018   : > { %7152 = vmatprep.mubr.msk.bf16.mxu1 %vm7695_vm2, %v10394_v41  ;;  %7145 = vmatpush3.bf16.msra.mxu1 %v7347_v54 }
0x1019   : > { %7146 = vmatprep.subr.bf16.mxu1 %v10394_v41 }
0x101a   : > { %7137 = vmatpush3.bf16.msra.mxu0 %v7345_v17 }
0x101b   : > { %7138 = vmatprep.subr.bf16.mxu0 %v10394_v41 }
0x101c   : > { %7147 = vmatpush3.bf16.msra.mxu1 %v7348_v45 }
0x101d   : > { %7148 = vmatprep.subr.bf16.mxu1 %v10394_v41 }
0x101e   : > { %7139 = vmatpush3.bf16.msra.mxu0 %v7346_v44 }
0x1020   : > { %7149 = vmatpush3.bf16.msra.mxu1 %v7349_v42 }
0x1021   : > { %7150 = vmatprep.subr.bf16.mxu1 %v10394_v41 }
0x1024   : > { %7151 = vmatpush3.bf16.msra.mxu1 %v7350_v19 }
0x10ea   : > { %v6302_v36 = vpop.f32.mrb[28].mxu1 }
0x10eb   : > { %v7122_v20 = vpop.f32.mrb[29].mxu1 }
0x10ec   : > { %v6305_v0 = vpop.f32.mrb[30].mxu1 }
0x10ed   : > { %v7203_v8 = vpack.i.bf16 %v6305_v0, %v6302_v36  ;;  %v7123_v61 = vpop.f32.mrb[31].mxu1 }
0x10ef   : > { %7204 = vrot.lane.b32.xlu1 %v7203_v8, %s10215_s1  ;;  %s7631_s1 = sshll.u32 %s7697_s5, 4  ;;  %s7632_s1 = int_to_ptr.vmem [resolvable:$false] %s7631_s1 }
0x10f0   : > { %s7633_s2 = scalar_lea.vmem %s7632_s1, 32  ;;  %p7634_p0 = scmp.lt.s32.totalorder %s10075_s26, %s7632_s1 }
0x10f1   : > { %p7635_p1 = scmp.lt.s32.totalorder %s7633_s2, %s7627_s4 }
0x10f3   : > { %p7636_p2 = por %p7635_p1, %p7634_p0 }
0x10f5   : > { %p7637_p3 = pnand %p7636_p2, %p7630_p13 }
0x1161   : > { %v7205_v1 = vpop.permute.xlu1 %7204 }
0x1162   : > { %v7207_v28 = vunpack.i.h.bf16 %v7205_v1  ;;  %v7206_v60 = vunpack.i.l.bf16 %v7205_v1 }
0x1164   : > { %v6318_v40 = vsel %vm871_vm6, %v1315_v46, %v7207_v28  ;;  %v6317_v56 = vsel %vm871_vm6, %v1314_v22, %v7206_v60 }
0x1165   : > { %v6319_v55 = vpack.c.bf16 %v6318_v40, %v6317_v56 }
0x1167   : > { %7141 = vmatmul.mubr.bf16.vlgmr.msra.gmra.mrb[28].mxu0 %v6319_v55 }
0x123a   : > { %v6425_v49 = vpop.f32.mrb[28].mxu0 }
0x123b   : > { %v6426_v5 = vadd.f32 %v6841_v11, %v6425_v49  ;;  %v7142_v62 = vpop.f32.mrb[29].mxu0 }
0x123c   : > { %v6428_v4 = vpop.f32.mrb[30].mxu0 }
0x123d   : > { %v6432_v23 = vmax.f32 %v6426_v5, 0.0  ;;  %v6429_v27 = vadd.f32 %v6841_v11, %v6428_v4  ;;  %v7143_v31 = vpop.f32.mrb[31].mxu0 }
0x123f   : > { %v6433_v14 = vmax.f32 %v6429_v27, 0.0  ;;  %v6434_v35 = vsel %vm871_vm6, %v6432_v23, 0.0 }
0x1241   : > { %v6435_v37 = vsel %vm871_vm6, %v6433_v14, 0.0 }
0x1242   : > { %v6436_v63 = vadd.f32 %v6435_v37, %v6434_v35 }
0x1244   : > { %v6437_v39 = vrot.slane %v6436_v63, 4 }
0x1246   : > { %v6438_v48 = vadd.f32 %v6437_v39, %v6436_v63 }
0x1248   : > { %v6439_v34 = vrot.slane %v6438_v48, 2 }
0x124a   : > { %v6440_v2 = vadd.f32 %v6439_v34, %v6438_v48 }
0x124c   : > { %v6441_v24 = vrot.slane %v6440_v2, 1 }
0x124e   : > { %v6442_v10 = vadd.f32 %v6441_v24, %v6440_v2 }
0x1250   : > { %v6444_v58 = vmul.f32 0.0625, %v6442_v10 }
0x1252   : > { %v6445_v30 = vpack.c.bf16 %v6444_v58, %v6444_v58 }
0x1254   : > { %7153 = vmatmul.mubr.msk.bf16.vlgmr.msra.gmra.mrb[32].mxu1 %vm871_vm6, %v6445_v30 }
0x1327   : > { %v6516_v15 = vpop.f32.mrb[32].mxu1 }
0x1328   : > { %v6517_v52 = vadd.f32 %v6516_v15, %v6454_v16  ;;  %v7154_v47 = vpop.f32.mrb[33].mxu1 }
0x1329   : > { %v6519_v32 = vpop.f32.mrb[34].mxu1 }
0x132a   : > { %6522 = vst [vmem:[%s675_s27] sm:$0x1] %v6517_v52  ;;  %v7155_v43 = vpop.f32.mrb[35].mxu1 }
0x132b   : > { %7640 = shalt.err (!%p7637_p3)
}
0x132c   : > { %s7641_s25 = scalar_lea.hbm %s10073_s29, 16  ;;  %s7645_s24 = scalar_lea.hbm %s10137_s22, 32 }
0x132d   : > { %p7642_p4 = scmp.ne.s32.totalorder %s10073_s29, %s7641_s25  ;;  %p7646_p9 = scmp.lt.u32.totalorder %s10073_s29, %s10137_s22 }
0x132e   : > { %p7647_p10 = scmp.lt.u32.totalorder %s7645_s24, %s7641_s25  ;;  %p7649_p12 = scmp.lt.u32.totalorder %s7641_s25, %s10073_s29 }
0x132f   : > { %p7643_p7 = pnand %p7642_p4, %p7851_p5 }
0x1330   : > { %p7648_p11 = por %p7647_p10, %p7646_p9 }
0x1331   : > { %p7644_p8 = pneg %p7643_p7 }
0x1332   : > { %p7650_p13 = por %p7649_p12, %p7648_p11 }
0x1334   : > { %p7651_p0 = pnand %p7650_p13, %p7644_p8 }
0x1336   : > { %7654 = shalt.err (!%p7651_p0)
}
0x1337   : > { %7156 = dma.vmem_to_hbm [thread:$0]  (%p7851_p5), %s10075_s26, 16, %s10073_s29, %s6524_s23  }
0x1338 PF: > { %s10398_s4 = sld [smem:[#allocation8_spill]]  ;;  %p7162_p1 = scmp.ge.s32.totalorder %s7689_s30, 2 }
0x133a   : > { %p7159_p2 = pnand %p7162_p1, %p7855_p6 }
0x133e   : > { %s6548_s2 = sand.u32 1, %s10398_s4  }
0x133f   : > { %s6549_s3 = scalar_lea.sflag [#allocation6], %s6548_s2 }
0x1340   : > { %7672 = dma.done.wait (!%p7159_p2), %s6549_s3, 16  }
0x1341   : > { %7674 = vsyncadd (!%p7159_p2), %s6549_s3, 4294967280  ;;  %s10400_s30 = sld [smem:[#allocation10_spill]]  ;;  %s10401_s25 = sld [smem:[#allocation9_spill]] }
0x1342   : > { %s10402_s29 = sld [smem:[#allocation11_spill]]  ;;  %s10403_s3 = smov %s7681_s28 }
0x1347   : > { %p32_p3 = scmp.ge.s32.totalorder %s10400_s30, 4   ;;  %s10404_s28 = smov %s10401_s25 }
0x1349   :  { %34 = sbr.rel (!%p32_p3) target bundleno = 11 (0xb), region = 180 }
0x1350   :  { %6553 = vsyncpa [#allocation6], 1 }
0x1351   :  { %6555 = vsyncpa [#allocation6 + $0x1], 1 }

</bundles_post_ra>
